<compile_context>
chip_gen: v5e
topology: v5e:2x2
jax: 0.10.0
libtpu: 0.0.40
codegen_flags: <defaults>
</compile_context>

<pallas_src>
import functools

import jax
import jax.numpy as jnp
from jax.experimental import pallas as pl
from jax.experimental.pallas import tpu as pltpu

BN_EPS = 1e-5


def _basic_block_kernel(x_ref, w1_ref, b1_ref, w2_ref, b2_ref, *rest,
                        H, W, Cin, Cout, stride, projection, compute_dtype):
    """One batch image per grid step.

    x_ref  : (1, H, W, Cin)       un-padded NHWC input tile (compute dtype)
    w1_ref : (9*Cin, Cout)        conv1 weights (BN1 folded), im2col layout
    b1_ref : (1, Cout)            f32
    w2_ref : (9*Cout, Cout)       conv2 weights (BN2 folded), im2col layout
    b2_ref : (1, Cout)            f32
    [ws_ref: (Cin, Cout), bs_ref: (1, Cout)]   only when projection shortcut
    out_ref: (1, H1, W1, Cout)    f32
    scratch: xpad (H+2,W+2,Cin), mid (H1+2,W1+2,Cout),
             col1 (H1*W1, 9*Cin), col2 (H1*W1, 9*Cout)   -- compute dtype
    """
    if projection:
        ws_ref, bs_ref, out_ref, xpad_ref, mid_ref, col1_ref, col2_ref = rest
    else:
        out_ref, xpad_ref, mid_ref, col1_ref, col2_ref = rest

    s = stride
    H1 = (H + 2 - 3) // s + 1
    W1 = (W + 2 - 3) // s + 1
    cdt = compute_dtype

    # ---- build the zero-padded input in VMEM (no host-side jnp.pad) --------
    # Only the 1-wide border needs zeroing; the interior is fully overwritten.
    # Zeroed every step (cheap, thin) so the kernel stays correct when the
    # batch grid axis is sharded across TensorCores (per-core scratch).
    xpad_ref[0:1, :, :] = jnp.zeros((1, W + 2, Cin), cdt)
    xpad_ref[H + 1:H + 2, :, :] = jnp.zeros((1, W + 2, Cin), cdt)
    xpad_ref[:, 0:1, :] = jnp.zeros((H + 2, 1, Cin), cdt)
    xpad_ref[:, W + 1:W + 2, :] = jnp.zeros((H + 2, 1, Cin), cdt)
    xpad_ref[1:H + 1, 1:W + 1, :] = x_ref[0].astype(cdt)

    mid_ref[0:1, :, :] = jnp.zeros((1, W1 + 2, Cout), cdt)
    mid_ref[H1 + 1:H1 + 2, :, :] = jnp.zeros((1, W1 + 2, Cout), cdt)
    mid_ref[:, 0:1, :] = jnp.zeros((H1 + 2, 1, Cout), cdt)
    mid_ref[:, W1 + 1:W1 + 2, :] = jnp.zeros((H1 + 2, 1, Cout), cdt)

    # ---- conv1 (3x3, stride s) + folded BN1 + ReLU -------------------------
    # im2col into VMEM once, then a single big-K matmul (K = 9*Cin) on the MXU.
    for kh in range(3):
        for kw in range(3):
            if s == 1:
                patch = xpad_ref[kh:kh + H1, kw:kw + W1, :]
            else:
                patch = xpad_ref[pl.ds(kh, H1, s), pl.ds(kw, W1, s), :]
            c0 = (kh * 3 + kw) * Cin
            col1_ref[:, c0:c0 + Cin] = patch.reshape(H1 * W1, Cin)
    acc1 = jnp.dot(col1_ref[...], w1_ref[...],
                   preferred_element_type=jnp.float32)
    y1 = jnp.maximum(acc1 + b1_ref[...], 0.0)
    mid_ref[1:H1 + 1, 1:W1 + 1, :] = y1.reshape(H1, W1, Cout).astype(cdt)

    # ---- conv2 (3x3, stride 1) + folded BN2 --------------------------------
    for kh in range(3):
        for kw in range(3):
            c0 = (kh * 3 + kw) * Cout
            col2_ref[:, c0:c0 + Cout] = (
                mid_ref[kh:kh + H1, kw:kw + W1, :].reshape(H1 * W1, Cout))
    acc2 = jnp.dot(col2_ref[...], w2_ref[...],
                   preferred_element_type=jnp.float32) + b2_ref[...]

    # ---- shortcut -----------------------------------------------------------
    if projection:
        if s == 1:
            xs = xpad_ref[1:1 + H1, 1:1 + W1, :]
        else:
            xs = xpad_ref[pl.ds(1, H1, s), pl.ds(1, W1, s), :]
        sc = jnp.dot(xs.reshape(H1 * W1, Cin), ws_ref[...],
                     preferred_element_type=jnp.float32) + bs_ref[...]
    else:
        # identity shortcut (stride == 1 and Cin == Cout)
        sc = xpad_ref[1:1 + H1, 1:1 + W1, :].reshape(H1 * W1, Cout).astype(
            jnp.float32)

    # ---- residual add + final ReLU ------------------------------------------
    out = jnp.maximum(acc2 + sc, 0.0)
    out_ref[0] = out.reshape(H1, W1, Cout).astype(out_ref.dtype)


def fold_bn(w_hwio, b, gamma, beta, mean, var, eps=BN_EPS):
    """Fold eval-mode BatchNorm into a conv's weights/bias (exact algebra)."""
    scale = gamma / jnp.sqrt(var + eps)
    w_f = w_hwio * scale[None, None, None, :]
    b_f = (b - mean) * scale + beta
    return w_f.astype(jnp.float32), b_f.astype(jnp.float32)


def basic_block_forward(x_nchw, params, stride=1, counter=0, L=0, t=0,
                        compute_dtype=jnp.bfloat16):
    """Mirrors BasicBlock.forward(x, counter, L, t) for the plain ReLU path."""
    # TODO(synk): early-return spike checkpoints (counter == L with L > 0) are not
    # supported — they would require exposing intermediate activations.
    del t
    N, Cin, H, W = x_nchw.shape
    Cout = params["w1"].shape[-1]
    projection = (stride != 1) or (Cin != Cout)
    H1 = (H + 2 - 3) // stride + 1
    W1 = (W + 2 - 3) // stride + 1

    # NCHW -> NHWC; activations and folded weights go in the MXU compute dtype
    # (bf16 by default: native MXU passes + half the DMA bytes).  Biases stay
    # f32 and are added to the f32 accumulator.
    x = jnp.transpose(x_nchw, (0, 2, 3, 1)).astype(compute_dtype)
    w1 = params["w1"].reshape(9 * Cin, Cout).astype(compute_dtype)
    b1 = params["b1"].reshape(1, Cout).astype(jnp.float32)
    w2 = params["w2"].reshape(9 * Cout, Cout).astype(compute_dtype)
    b2 = params["b2"].reshape(1, Cout).astype(jnp.float32)

    args = [x, w1, b1, w2, b2]
    in_specs = [
        pl.BlockSpec((1, H, W, Cin), lambda n: (n, 0, 0, 0)),
        pl.BlockSpec((9 * Cin, Cout), lambda n: (0, 0)),
        pl.BlockSpec((1, Cout), lambda n: (0, 0)),
        pl.BlockSpec((9 * Cout, Cout), lambda n: (0, 0)),
        pl.BlockSpec((1, Cout), lambda n: (0, 0)),
    ]
    if projection:
        ws = params["ws"].reshape(Cin, Cout).astype(compute_dtype)
        bs = params["bs"].reshape(1, Cout).astype(jnp.float32)
        args += [ws, bs]
        in_specs += [pl.BlockSpec((Cin, Cout), lambda n: (0, 0)),
                     pl.BlockSpec((1, Cout), lambda n: (0, 0))]

    kernel = functools.partial(
        _basic_block_kernel, H=H, W=W, Cin=Cin, Cout=Cout, stride=stride,
        projection=projection, compute_dtype=compute_dtype)

    out_nhwc = pl.pallas_call(
        kernel,
        out_shape=jax.ShapeDtypeStruct((N, H1, W1, Cout), jnp.float32),
        grid=(N,),
        in_specs=in_specs,
        out_specs=pl.BlockSpec((1, H1, W1, Cout), lambda n: (n, 0, 0, 0)),
        scratch_shapes=[
            pltpu.VMEM((H + 2, W + 2, Cin), compute_dtype),      # padded input
            pltpu.VMEM((H1 + 2, W1 + 2, Cout), compute_dtype),   # padded mid act
            pltpu.VMEM((H1 * W1, 9 * Cin), compute_dtype),       # im2col conv1
            pltpu.VMEM((H1 * W1, 9 * Cout), compute_dtype),      # im2col conv2
        ],
        compiler_params=pltpu.CompilerParams(
            dimension_semantics=("parallel",),
            vmem_limit_bytes=64 * 1024 * 1024,
        ),
    )(*args)

    out = jnp.transpose(out_nhwc, (0, 3, 1, 2))      # NHWC -> NCHW
    counter += 1                                      # ReLU inside residual_function
    counter += 1                                      # final ReLU
    return out, counter, False


def reference_forward(x_nchw, raw, stride=1):
    """Pure-JAX reference with explicit eval-mode BatchNorm (NCHW in/out)."""
    dn = ("NHWC", "HWIO", "NHWC")
    prec = jax.lax.Precision.HIGHEST
    x = jnp.transpose(x_nchw, (0, 2, 3, 1)).astype(jnp.float32)

    def bn(y, g, b, m, v):
        return (y - m) / jnp.sqrt(v + BN_EPS) * g + b

    y = jax.lax.conv_general_dilated(x, raw["w1"], (stride, stride),
                                     [(1, 1), (1, 1)], dimension_numbers=dn,
                                     precision=prec) + raw["b1"]
    y = jnp.maximum(bn(y, raw["g1"], raw["be1"], raw["m1"], raw["v1"]), 0.0)
    y = jax.lax.conv_general_dilated(y, raw["w2"], (1, 1),
                                     [(1, 1), (1, 1)], dimension_numbers=dn,
                                     precision=prec) + raw["b2"]
    y = bn(y, raw["g2"], raw["be2"], raw["m2"], raw["v2"])

    Cin, Cout = x.shape[-1], raw["w1"].shape[-1]
    if stride != 1 or Cin != Cout:
        s = jax.lax.conv_general_dilated(x, raw["ws"], (stride, stride),
                                         [(0, 0), (0, 0)], dimension_numbers=dn,
                                         precision=prec) + raw["bs"]
        s = bn(s, raw["gs"], raw["bes"], raw["ms"], raw["vs"])
    else:
        s = x
    out = jnp.maximum(y + s, 0.0)
    return jnp.transpose(out, (0, 3, 1, 2))


def _make_raw(key, Cin, Cout):
    ks = jax.random.split(key, 18)

    def n(k, shape, s=0.1):
        return s * jax.random.normal(k, shape, jnp.float32)

    def u(k, shape):
        return 0.5 + jax.random.uniform(k, shape, jnp.float32)

    return {
        "w1": n(ks[0], (3, 3, Cin, Cout)), "b1": n(ks[1], (Cout,)),
        "g1": u(ks[2], (Cout,)), "be1": n(ks[3], (Cout,)),
        "m1": n(ks[4], (Cout,)), "v1": u(ks[5], (Cout,)),
        "w2": n(ks[6], (3, 3, Cout, Cout)), "b2": n(ks[7], (Cout,)),
        "g2": u(ks[8], (Cout,)), "be2": n(ks[9], (Cout,)),
        "m2": n(ks[10], (Cout,)), "v2": u(ks[11], (Cout,)),
        "ws": n(ks[12], (1, 1, Cin, Cout)), "bs": n(ks[13], (Cout,)),
        "gs": u(ks[14], (Cout,)), "bes": n(ks[15], (Cout,)),
        "ms": n(ks[16], (Cout,)), "vs": u(ks[17], (Cout,)),
    }


def _fold_all(raw):
    w1, b1 = fold_bn(raw["w1"], raw["b1"], raw["g1"], raw["be1"], raw["m1"], raw["v1"])
    w2, b2 = fold_bn(raw["w2"], raw["b2"], raw["g2"], raw["be2"], raw["m2"], raw["v2"])
    ws, bs = fold_bn(raw["ws"], raw["bs"], raw["gs"], raw["bes"], raw["ms"], raw["vs"])
    return {"w1": w1, "b1": b1, "w2": w2, "b2": b2, "ws": ws, "bs": bs}


if __name__ == "__main__":
    key = jax.random.PRNGKey(0)
    configs = [
        # (N, Cin, Cout, H, W, stride)
        (2, 4, 8, 16, 16, 1),   # projection shortcut (Cin != Cout)
        (2, 8, 8, 16, 16, 1),   # identity shortcut (no projection args at all)
        (2, 4, 8, 16, 16, 2),   # strided projection shortcut
    ]
    for idx, (N, Cin, Cout, H, W, stride) in enumerate(configs):
        kx, kp = jax.random.split(jax.random.fold_in(key, idx))
        x = jax.random.normal(kx, (N, Cin, H, W), jnp.float32)
        raw = _make_raw(kp, Cin, Cout)
        params = _fold_all(raw)
        ref = reference_forward(x, raw, stride=stride)

        # bf16 MXU path (default) with a bf16-appropriate tolerance, plus the
        # f32 path validated against the HIGHEST-precision reference at 1e-3.
        for cdt, tol in ((jnp.bfloat16, 5e-2), (jnp.float32, 1e-3)):
            out, counter, early = basic_block_forward(
                x, params, stride=stride, compute_dtype=cdt)
            out = jax.block_until_ready(out)
            assert out.shape == ref.shape == (N, Cout, H // stride, W // stride)
            max_err = float(jnp.max(jnp.abs(out - ref)))
            assert max_err < tol, (
                f"cfg={idx} dtype={jnp.dtype(cdt).name} "
                f"max abs error {max_err} >= {tol}")
            assert counter == 2 and early is False

    print("KERNEL_OK")
</pallas_src>

<mosaic_0001>
module attributes {stable_mosaic.version = 11 : i64} {
  func.func @_basic_block_kernel(%arg0: i32, %arg1: memref<1x16x16x4xbf16, #tpu.memory_space<vmem>>, %arg2: memref<36x8xbf16, #tpu.memory_space<vmem>>, %arg3: memref<1x8xf32, #tpu.memory_space<vmem>>, %arg4: memref<72x8xbf16, #tpu.memory_space<vmem>>, %arg5: memref<1x8xf32, #tpu.memory_space<vmem>>, %arg6: memref<4x8xbf16, #tpu.memory_space<vmem>>, %arg7: memref<1x8xf32, #tpu.memory_space<vmem>>, %arg8: memref<1x16x16x8xf32, #tpu.memory_space<vmem>>, %arg9: memref<18x18x4xbf16, #tpu.memory_space<vmem>>, %arg10: memref<18x18x8xbf16, #tpu.memory_space<vmem>>, %arg11: memref<256x36xbf16, #tpu.memory_space<vmem>>, %arg12: memref<256x72xbf16, #tpu.memory_space<vmem>>) attributes {dimension_semantics = [#tpu.dimension_semantics<parallel>], iteration_bounds = array<i64: 2>, scalar_prefetch = 0 : i64, scratch_operands = 4 : i64, tpu.core_type = #tpu.core_type<tc>, window_params = [{transform_indices = @transform_0, window_bounds = array<i64: 1, 16, 16, 4>}, {pipeline_mode = #tpu.pipeline_mode<synchronous>, transform_indices = @transform_1, window_bounds = array<i64: 36, 8>}, {pipeline_mode = #tpu.pipeline_mode<synchronous>, transform_indices = @transform_2, window_bounds = array<i64: 1, 8>}, {pipeline_mode = #tpu.pipeline_mode<synchronous>, transform_indices = @transform_3, window_bounds = array<i64: 72, 8>}, {pipeline_mode = #tpu.pipeline_mode<synchronous>, transform_indices = @transform_4, window_bounds = array<i64: 1, 8>}, {pipeline_mode = #tpu.pipeline_mode<synchronous>, transform_indices = @transform_5, window_bounds = array<i64: 4, 8>}, {pipeline_mode = #tpu.pipeline_mode<synchronous>, transform_indices = @transform_6, window_bounds = array<i64: 1, 8>}, {transform_indices = @transform_7, window_bounds = array<i64: 1, 16, 16, 8>}]} {
    %cst = arith.constant 0.000000e+00 : bf16
    %0 = vector.broadcast %cst : bf16 to vector<1x18x4xbf16>
    %c0 = arith.constant 0 : index
    %c0_0 = arith.constant 0 : index
    %c0_1 = arith.constant 0 : index
    %1 = vector.load %arg9[%c0, %c0_0, %c0_1] : memref<18x18x4xbf16, #tpu.memory_space<vmem>>, vector<1x18x4xbf16>
    tpu.vector_store %arg9[%c0, %c0_0, %c0_1], %0 {strides = array<i32>} : memref<18x18x4xbf16, #tpu.memory_space<vmem>>, vector<1x18x4xbf16>,
    %cst_2 = arith.constant 0.000000e+00 : bf16
    %2 = vector.broadcast %cst_2 : bf16 to vector<1x18x4xbf16>
    %c17 = arith.constant 17 : index
    %c0_3 = arith.constant 0 : index
    %c0_4 = arith.constant 0 : index
    %3 = vector.load %arg9[%c17, %c0_3, %c0_4] : memref<18x18x4xbf16, #tpu.memory_space<vmem>>, vector<1x18x4xbf16>
    tpu.vector_store %arg9[%c17, %c0_3, %c0_4], %2 {strides = array<i32>} : memref<18x18x4xbf16, #tpu.memory_space<vmem>>, vector<1x18x4xbf16>,
    %cst_5 = arith.constant 0.000000e+00 : bf16
    %4 = vector.broadcast %cst_5 : bf16 to vector<18x1x4xbf16>
    %c0_6 = arith.constant 0 : index
    %c0_7 = arith.constant 0 : index
    %c0_8 = arith.constant 0 : index
    %5 = vector.load %arg9[%c0_6, %c0_7, %c0_8] : memref<18x18x4xbf16, #tpu.memory_space<vmem>>, vector<18x1x4xbf16>
    tpu.vector_store %arg9[%c0_6, %c0_7, %c0_8], %4 {strides = array<i32>} : memref<18x18x4xbf16, #tpu.memory_space<vmem>>, vector<18x1x4xbf16>,
    %cst_9 = arith.constant 0.000000e+00 : bf16
    %6 = vector.broadcast %cst_9 : bf16 to vector<18x1x4xbf16>
    %c0_10 = arith.constant 0 : index
    %c17_11 = arith.constant 17 : index
    %c0_12 = arith.constant 0 : index
    %7 = vector.load %arg9[%c0_10, %c17_11, %c0_12] : memref<18x18x4xbf16, #tpu.memory_space<vmem>>, vector<18x1x4xbf16>
    tpu.vector_store %arg9[%c0_10, %c17_11, %c0_12], %6 {strides = array<i32>} : memref<18x18x4xbf16, #tpu.memory_space<vmem>>, vector<18x1x4xbf16>,
    %c0_13 = arith.constant 0 : index
    %c0_14 = arith.constant 0 : index
    %c0_15 = arith.constant 0 : index
    %c0_16 = arith.constant 0 : index
    %8 = vector.load %arg1[%c0_13, %c0_14, %c0_15, %c0_16] : memref<1x16x16x4xbf16, #tpu.memory_space<vmem>>, vector<1x16x16x4xbf16>
    %9 = vector.shape_cast %8 : vector<1x16x16x4xbf16> to vector<16x16x4xbf16>
    %c1 = arith.constant 1 : index
    %c1_17 = arith.constant 1 : index
    %c0_18 = arith.constant 0 : index
    %10 = vector.load %arg9[%c1, %c1_17, %c0_18] : memref<18x18x4xbf16, #tpu.memory_space<vmem>>, vector<16x16x4xbf16>
    tpu.vector_store %arg9[%c1, %c1_17, %c0_18], %9 {strides = array<i32>} : memref<18x18x4xbf16, #tpu.memory_space<vmem>>, vector<16x16x4xbf16>,
    %cst_19 = arith.constant 0.000000e+00 : bf16
    %11 = vector.broadcast %cst_19 : bf16 to vector<1x18x8xbf16>
    %c0_20 = arith.constant 0 : index
    %c0_21 = arith.constant 0 : index
    %c0_22 = arith.constant 0 : index
    %12 = vector.load %arg10[%c0_20, %c0_21, %c0_22] : memref<18x18x8xbf16, #tpu.memory_space<vmem>>, vector<1x18x8xbf16>
    tpu.vector_store %arg10[%c0_20, %c0_21, %c0_22], %11 {strides = array<i32>} : memref<18x18x8xbf16, #tpu.memory_space<vmem>>, vector<1x18x8xbf16>,
    %cst_23 = arith.constant 0.000000e+00 : bf16
    %13 = vector.broadcast %cst_23 : bf16 to vector<1x18x8xbf16>
    %c17_24 = arith.constant 17 : index
    %c0_25 = arith.constant 0 : index
    %c0_26 = arith.constant 0 : index
    %14 = vector.load %arg10[%c17_24, %c0_25, %c0_26] : memref<18x18x8xbf16, #tpu.memory_space<vmem>>, vector<1x18x8xbf16>
    tpu.vector_store %arg10[%c17_24, %c0_25, %c0_26], %13 {strides = array<i32>} : memref<18x18x8xbf16, #tpu.memory_space<vmem>>, vector<1x18x8xbf16>,
    %cst_27 = arith.constant 0.000000e+00 : bf16
    %15 = vector.broadcast %cst_27 : bf16 to vector<18x1x8xbf16>
    %c0_28 = arith.constant 0 : index
    %c0_29 = arith.constant 0 : index
    %c0_30 = arith.constant 0 : index
    %16 = vector.load %arg10[%c0_28, %c0_29, %c0_30] : memref<18x18x8xbf16, #tpu.memory_space<vmem>>, vector<18x1x8xbf16>
    tpu.vector_store %arg10[%c0_28, %c0_29, %c0_30], %15 {strides = array<i32>} : memref<18x18x8xbf16, #tpu.memory_space<vmem>>, vector<18x1x8xbf16>,
    %cst_31 = arith.constant 0.000000e+00 : bf16
    %17 = vector.broadcast %cst_31 : bf16 to vector<18x1x8xbf16>
    %c0_32 = arith.constant 0 : index
    %c17_33 = arith.constant 17 : index
    %c0_34 = arith.constant 0 : index
    %18 = vector.load %arg10[%c0_32, %c17_33, %c0_34] : memref<18x18x8xbf16, #tpu.memory_space<vmem>>, vector<18x1x8xbf16>
    tpu.vector_store %arg10[%c0_32, %c17_33, %c0_34], %17 {strides = array<i32>} : memref<18x18x8xbf16, #tpu.memory_space<vmem>>, vector<18x1x8xbf16>,
    %c0_35 = arith.constant 0 : index
    %c0_36 = arith.constant 0 : index
    %c0_37 = arith.constant 0 : index
    %19 = vector.load %arg9[%c0_35, %c0_36, %c0_37] : memref<18x18x4xbf16, #tpu.memory_space<vmem>>, vector<16x16x4xbf16>
    %20 = vector.shape_cast %19 : vector<16x16x4xbf16> to vector<256x4xbf16>
    %c0_38 = arith.constant 0 : index
    %c0_39 = arith.constant 0 : index
    %21 = vector.load %arg11[%c0_38, %c0_39] : memref<256x36xbf16, #tpu.memory_space<vmem>>, vector<256x4xbf16>
    tpu.vector_store %arg11[%c0_38, %c0_39], %20 {strides = array<i32>} : memref<256x36xbf16, #tpu.memory_space<vmem>>, vector<256x4xbf16>,
    %c0_40 = arith.constant 0 : index
    %c1_41 = arith.constant 1 : index
    %c0_42 = arith.constant 0 : index
    %22 = vector.load %arg9[%c0_40, %c1_41, %c0_42] : memref<18x18x4xbf16, #tpu.memory_space<vmem>>, vector<16x16x4xbf16>
    %23 = vector.shape_cast %22 : vector<16x16x4xbf16> to vector<256x4xbf16>
    %c0_43 = arith.constant 0 : index
    %c4 = arith.constant 4 : index
    %24 = vector.load %arg11[%c0_43, %c4] : memref<256x36xbf16, #tpu.memory_space<vmem>>, vector<256x4xbf16>
    tpu.vector_store %arg11[%c0_43, %c4], %23 {strides = array<i32>} : memref<256x36xbf16, #tpu.memory_space<vmem>>, vector<256x4xbf16>,
    %c0_44 = arith.constant 0 : index
    %c2 = arith.constant 2 : index
    %c0_45 = arith.constant 0 : index
    %25 = vector.load %arg9[%c0_44, %c2, %c0_45] : memref<18x18x4xbf16, #tpu.memory_space<vmem>>, vector<16x16x4xbf16>
    %26 = vector.shape_cast %25 : vector<16x16x4xbf16> to vector<256x4xbf16>
    %c0_46 = arith.constant 0 : index
    %c8 = arith.constant 8 : index
    %27 = vector.load %arg11[%c0_46, %c8] : memref<256x36xbf16, #tpu.memory_space<vmem>>, vector<256x4xbf16>
    tpu.vector_store %arg11[%c0_46, %c8], %26 {strides = array<i32>} : memref<256x36xbf16, #tpu.memory_space<vmem>>, vector<256x4xbf16>,
    %c1_47 = arith.constant 1 : index
    %c0_48 = arith.constant 0 : index
    %c0_49 = arith.constant 0 : index
    %28 = vector.load %arg9[%c1_47, %c0_48, %c0_49] : memref<18x18x4xbf16, #tpu.memory_space<vmem>>, vector<16x16x4xbf16>
    %29 = vector.shape_cast %28 : vector<16x16x4xbf16> to vector<256x4xbf16>
    %c0_50 = arith.constant 0 : index
    %c12 = arith.constant 12 : index
    %30 = vector.load %arg11[%c0_50, %c12] : memref<256x36xbf16, #tpu.memory_space<vmem>>, vector<256x4xbf16>
    tpu.vector_store %arg11[%c0_50, %c12], %29 {strides = array<i32>} : memref<256x36xbf16, #tpu.memory_space<vmem>>, vector<256x4xbf16>,
    %c1_51 = arith.constant 1 : index
    %c1_52 = arith.constant 1 : index
    %c0_53 = arith.constant 0 : index
    %31 = vector.load %arg9[%c1_51, %c1_52, %c0_53] : memref<18x18x4xbf16, #tpu.memory_space<vmem>>, vector<16x16x4xbf16>
    %32 = vector.shape_cast %31 : vector<16x16x4xbf16> to vector<256x4xbf16>
    %c0_54 = arith.constant 0 : index
    %c16 = arith.constant 16 : index
    %33 = vector.load %arg11[%c0_54, %c16] : memref<256x36xbf16, #tpu.memory_space<vmem>>, vector<256x4xbf16>
    tpu.vector_store %arg11[%c0_54, %c16], %32 {strides = array<i32>} : memref<256x36xbf16, #tpu.memory_space<vmem>>, vector<256x4xbf16>,
    %c1_55 = arith.constant 1 : index
    %c2_56 = arith.constant 2 : index
    %c0_57 = arith.constant 0 : index
    %34 = vector.load %arg9[%c1_55, %c2_56, %c0_57] : memref<18x18x4xbf16, #tpu.memory_space<vmem>>, vector<16x16x4xbf16>
    %35 = vector.shape_cast %34 : vector<16x16x4xbf16> to vector<256x4xbf16>
    %c0_58 = arith.constant 0 : index
    %c20 = arith.constant 20 : index
    %36 = vector.load %arg11[%c0_58, %c20] : memref<256x36xbf16, #tpu.memory_space<vmem>>, vector<256x4xbf16>
    tpu.vector_store %arg11[%c0_58, %c20], %35 {strides = array<i32>} : memref<256x36xbf16, #tpu.memory_space<vmem>>, vector<256x4xbf16>,
    %c2_59 = arith.constant 2 : index
    %c0_60 = arith.constant 0 : index
    %c0_61 = arith.constant 0 : index
    %37 = vector.load %arg9[%c2_59, %c0_60, %c0_61] : memref<18x18x4xbf16, #tpu.memory_space<vmem>>, vector<16x16x4xbf16>
    %38 = vector.shape_cast %37 : vector<16x16x4xbf16> to vector<256x4xbf16>
    %c0_62 = arith.constant 0 : index
    %c24 = arith.constant 24 : index
    %39 = vector.load %arg11[%c0_62, %c24] : memref<256x36xbf16, #tpu.memory_space<vmem>>, vector<256x4xbf16>
    tpu.vector_store %arg11[%c0_62, %c24], %38 {strides = array<i32>} : memref<256x36xbf16, #tpu.memory_space<vmem>>, vector<256x4xbf16>,
    %c2_63 = arith.constant 2 : index
    %c1_64 = arith.constant 1 : index
    %c0_65 = arith.constant 0 : index
    %40 = vector.load %arg9[%c2_63, %c1_64, %c0_65] : memref<18x18x4xbf16, #tpu.memory_space<vmem>>, vector<16x16x4xbf16>
    %41 = vector.shape_cast %40 : vector<16x16x4xbf16> to vector<256x4xbf16>
    %c0_66 = arith.constant 0 : index
    %c28 = arith.constant 28 : index
    %42 = vector.load %arg11[%c0_66, %c28] : memref<256x36xbf16, #tpu.memory_space<vmem>>, vector<256x4xbf16>
    tpu.vector_store %arg11[%c0_66, %c28], %41 {strides = array<i32>} : memref<256x36xbf16, #tpu.memory_space<vmem>>, vector<256x4xbf16>,
    %c2_67 = arith.constant 2 : index
    %c2_68 = arith.constant 2 : index
    %c0_69 = arith.constant 0 : index
    %43 = vector.load %arg9[%c2_67, %c2_68, %c0_69] : memref<18x18x4xbf16, #tpu.memory_space<vmem>>, vector<16x16x4xbf16>
    %44 = vector.shape_cast %43 : vector<16x16x4xbf16> to vector<256x4xbf16>
    %c0_70 = arith.constant 0 : index
    %c32 = arith.constant 32 : index
    %45 = vector.load %arg11[%c0_70, %c32] : memref<256x36xbf16, #tpu.memory_space<vmem>>, vector<256x4xbf16>
    tpu.vector_store %arg11[%c0_70, %c32], %44 {strides = array<i32>} : memref<256x36xbf16, #tpu.memory_space<vmem>>, vector<256x4xbf16>,
    %c0_71 = arith.constant 0 : index
    %c0_72 = arith.constant 0 : index
    %46 = vector.load %arg11[%c0_71, %c0_72] : memref<256x36xbf16, #tpu.memory_space<vmem>>, vector<256x36xbf16>
    %c0_73 = arith.constant 0 : index
    %c0_74 = arith.constant 0 : index
    %47 = vector.load %arg2[%c0_73, %c0_74] : memref<36x8xbf16, #tpu.memory_space<vmem>>, vector<36x8xbf16>
    %cst_75 = arith.constant dense<0.000000e+00> : vector<256x8xf32>
    %48 = tpu.matmul %46, %47, %cst_75 {dimension_numbers = #tpu.dot_dimension_numbers<[1], [0], [0], [1], [0, 0, 1, 1], [], []>} : vector<256x36xbf16>, vector<36x8xbf16>, vector<256x8xf32> -> vector<256x8xf32>
    %c0_76 = arith.constant 0 : index
    %c0_77 = arith.constant 0 : index
    %49 = vector.load %arg3[%c0_76, %c0_77] : memref<1x8xf32, #tpu.memory_space<vmem>>, vector<1x8xf32>
    %50 = vector.broadcast %49 : vector<1x8xf32> to vector<256x8xf32>
    %51 = arith.addf %48, %50 : vector<256x8xf32>
    %cst_78 = arith.constant 0.000000e+00 : f32
    %52 = vector.broadcast %cst_78 : f32 to vector<256x8xf32>
    %53 = arith.maximumf %51, %52 : vector<256x8xf32>
    %54 = vector.shape_cast %53 : vector<256x8xf32> to vector<16x16x8xf32>
    %55 = arith.truncf %54 : vector<16x16x8xf32> to vector<16x16x8xbf16>
    %c1_79 = arith.constant 1 : index
    %c1_80 = arith.constant 1 : index
    %c0_81 = arith.constant 0 : index
    %56 = vector.load %arg10[%c1_79, %c1_80, %c0_81] : memref<18x18x8xbf16, #tpu.memory_space<vmem>>, vector<16x16x8xbf16>
    tpu.vector_store %arg10[%c1_79, %c1_80, %c0_81], %55 {strides = array<i32>} : memref<18x18x8xbf16, #tpu.memory_space<vmem>>, vector<16x16x8xbf16>,
    %c0_82 = arith.constant 0 : index
    %c0_83 = arith.constant 0 : index
    %c0_84 = arith.constant 0 : index
    %57 = vector.load %arg10[%c0_82, %c0_83, %c0_84] : memref<18x18x8xbf16, #tpu.memory_space<vmem>>, vector<16x16x8xbf16>
    %58 = vector.shape_cast %57 : vector<16x16x8xbf16> to vector<256x8xbf16>
    %c0_85 = arith.constant 0 : index
    %c0_86 = arith.constant 0 : index
    %59 = vector.load %arg12[%c0_85, %c0_86] : memref<256x72xbf16, #tpu.memory_space<vmem>>, vector<256x8xbf16>
    tpu.vector_store %arg12[%c0_85, %c0_86], %58 {strides = array<i32>} : memref<256x72xbf16, #tpu.memory_space<vmem>>, vector<256x8xbf16>,
    %c0_87 = arith.constant 0 : index
    %c1_88 = arith.constant 1 : index
    %c0_89 = arith.constant 0 : index
    %60 = vector.load %arg10[%c0_87, %c1_88, %c0_89] : memref<18x18x8xbf16, #tpu.memory_space<vmem>>, vector<16x16x8xbf16>
    %61 = vector.shape_cast %60 : vector<16x16x8xbf16> to vector<256x8xbf16>
    %c0_90 = arith.constant 0 : index
    %c8_91 = arith.constant 8 : index
    %62 = vector.load %arg12[%c0_90, %c8_91] : memref<256x72xbf16, #tpu.memory_space<vmem>>, vector<256x8xbf16>
    tpu.vector_store %arg12[%c0_90, %c8_91], %61 {strides = array<i32>} : memref<256x72xbf16, #tpu.memory_space<vmem>>, vector<256x8xbf16>,
    %c0_92 = arith.constant 0 : index
    %c2_93 = arith.constant 2 : index
    %c0_94 = arith.constant 0 : index
    %63 = vector.load %arg10[%c0_92, %c2_93, %c0_94] : memref<18x18x8xbf16, #tpu.memory_space<vmem>>, vector<16x16x8xbf16>
    %64 = vector.shape_cast %63 : vector<16x16x8xbf16> to vector<256x8xbf16>
    %c0_95 = arith.constant 0 : index
    %c16_96 = arith.constant 16 : index
    %65 = vector.load %arg12[%c0_95, %c16_96] : memref<256x72xbf16, #tpu.memory_space<vmem>>, vector<256x8xbf16>
    tpu.vector_store %arg12[%c0_95, %c16_96], %64 {strides = array<i32>} : memref<256x72xbf16, #tpu.memory_space<vmem>>, vector<256x8xbf16>,
    %c1_97 = arith.constant 1 : index
    %c0_98 = arith.constant 0 : index
    %c0_99 = arith.constant 0 : index
    %66 = vector.load %arg10[%c1_97, %c0_98, %c0_99] : memref<18x18x8xbf16, #tpu.memory_space<vmem>>, vector<16x16x8xbf16>
    %67 = vector.shape_cast %66 : vector<16x16x8xbf16> to vector<256x8xbf16>
    %c0_100 = arith.constant 0 : index
    %c24_101 = arith.constant 24 : index
    %68 = vector.load %arg12[%c0_100, %c24_101] : memref<256x72xbf16, #tpu.memory_space<vmem>>, vector<256x8xbf16>
    tpu.vector_store %arg12[%c0_100, %c24_101], %67 {strides = array<i32>} : memref<256x72xbf16, #tpu.memory_space<vmem>>, vector<256x8xbf16>,
    %c1_102 = arith.constant 1 : index
    %c1_103 = arith.constant 1 : index
    %c0_104 = arith.constant 0 : index
    %69 = vector.load %arg10[%c1_102, %c1_103, %c0_104] : memref<18x18x8xbf16, #tpu.memory_space<vmem>>, vector<16x16x8xbf16>
    %70 = vector.shape_cast %69 : vector<16x16x8xbf16> to vector<256x8xbf16>
    %c0_105 = arith.constant 0 : index
    %c32_106 = arith.constant 32 : index
    %71 = vector.load %arg12[%c0_105, %c32_106] : memref<256x72xbf16, #tpu.memory_space<vmem>>, vector<256x8xbf16>
    tpu.vector_store %arg12[%c0_105, %c32_106], %70 {strides = array<i32>} : memref<256x72xbf16, #tpu.memory_space<vmem>>, vector<256x8xbf16>,
    %c1_107 = arith.constant 1 : index
    %c2_108 = arith.constant 2 : index
    %c0_109 = arith.constant 0 : index
    %72 = vector.load %arg10[%c1_107, %c2_108, %c0_109] : memref<18x18x8xbf16, #tpu.memory_space<vmem>>, vector<16x16x8xbf16>
    %73 = vector.shape_cast %72 : vector<16x16x8xbf16> to vector<256x8xbf16>
    %c0_110 = arith.constant 0 : index
    %c40 = arith.constant 40 : index
    %74 = vector.load %arg12[%c0_110, %c40] : memref<256x72xbf16, #tpu.memory_space<vmem>>, vector<256x8xbf16>
    tpu.vector_store %arg12[%c0_110, %c40], %73 {strides = array<i32>} : memref<256x72xbf16, #tpu.memory_space<vmem>>, vector<256x8xbf16>,
    %c2_111 = arith.constant 2 : index
    %c0_112 = arith.constant 0 : index
    %c0_113 = arith.constant 0 : index
    %75 = vector.load %arg10[%c2_111, %c0_112, %c0_113] : memref<18x18x8xbf16, #tpu.memory_space<vmem>>, vector<16x16x8xbf16>
    %76 = vector.shape_cast %75 : vector<16x16x8xbf16> to vector<256x8xbf16>
    %c0_114 = arith.constant 0 : index
    %c48 = arith.constant 48 : index
    %77 = vector.load %arg12[%c0_114, %c48] : memref<256x72xbf16, #tpu.memory_space<vmem>>, vector<256x8xbf16>
    tpu.vector_store %arg12[%c0_114, %c48], %76 {strides = array<i32>} : memref<256x72xbf16, #tpu.memory_space<vmem>>, vector<256x8xbf16>,
    %c2_115 = arith.constant 2 : index
    %c1_116 = arith.constant 1 : index
    %c0_117 = arith.constant 0 : index
    %78 = vector.load %arg10[%c2_115, %c1_116, %c0_117] : memref<18x18x8xbf16, #tpu.memory_space<vmem>>, vector<16x16x8xbf16>
    %79 = vector.shape_cast %78 : vector<16x16x8xbf16> to vector<256x8xbf16>
    %c0_118 = arith.constant 0 : index
    %c56 = arith.constant 56 : index
    %80 = vector.load %arg12[%c0_118, %c56] : memref<256x72xbf16, #tpu.memory_space<vmem>>, vector<256x8xbf16>
    tpu.vector_store %arg12[%c0_118, %c56], %79 {strides = array<i32>} : memref<256x72xbf16, #tpu.memory_space<vmem>>, vector<256x8xbf16>,
    %c2_119 = arith.constant 2 : index
    %c2_120 = arith.constant 2 : index
    %c0_121 = arith.constant 0 : index
    %81 = vector.load %arg10[%c2_119, %c2_120, %c0_121] : memref<18x18x8xbf16, #tpu.memory_space<vmem>>, vector<16x16x8xbf16>
    %82 = vector.shape_cast %81 : vector<16x16x8xbf16> to vector<256x8xbf16>
    %c0_122 = arith.constant 0 : index
    %c64 = arith.constant 64 : index
    %83 = vector.load %arg12[%c0_122, %c64] : memref<256x72xbf16, #tpu.memory_space<vmem>>, vector<256x8xbf16>
    tpu.vector_store %arg12[%c0_122, %c64], %82 {strides = array<i32>} : memref<256x72xbf16, #tpu.memory_space<vmem>>, vector<256x8xbf16>,
    %c0_123 = arith.constant 0 : index
    %c0_124 = arith.constant 0 : index
    %84 = vector.load %arg12[%c0_123, %c0_124] : memref<256x72xbf16, #tpu.memory_space<vmem>>, vector<256x72xbf16>
    %c0_125 = arith.constant 0 : index
    %c0_126 = arith.constant 0 : index
    %85 = vector.load %arg4[%c0_125, %c0_126] : memref<72x8xbf16, #tpu.memory_space<vmem>>, vector<72x8xbf16>
    %cst_127 = arith.constant dense<0.000000e+00> : vector<256x8xf32>
    %86 = tpu.matmul %84, %85, %cst_127 {dimension_numbers = #tpu.dot_dimension_numbers<[1], [0], [0], [1], [0, 0, 1, 1], [], []>} : vector<256x72xbf16>, vector<72x8xbf16>, vector<256x8xf32> -> vector<256x8xf32>
    %c0_128 = arith.constant 0 : index
    %c0_129 = arith.constant 0 : index
    %87 = vector.load %arg5[%c0_128, %c0_129] : memref<1x8xf32, #tpu.memory_space<vmem>>, vector<1x8xf32>
    %88 = vector.broadcast %87 : vector<1x8xf32> to vector<256x8xf32>
    %89 = arith.addf %86, %88 : vector<256x8xf32>
    %c1_130 = arith.constant 1 : index
    %c1_131 = arith.constant 1 : index
    %c0_132 = arith.constant 0 : index
    %90 = vector.load %arg9[%c1_130, %c1_131, %c0_132] : memref<18x18x4xbf16, #tpu.memory_space<vmem>>, vector<16x16x4xbf16>
    %91 = vector.shape_cast %90 : vector<16x16x4xbf16> to vector<256x4xbf16>
    %c0_133 = arith.constant 0 : index
    %c0_134 = arith.constant 0 : index
    %92 = vector.load %arg6[%c0_133, %c0_134] : memref<4x8xbf16, #tpu.memory_space<vmem>>, vector<4x8xbf16>
    %cst_135 = arith.constant dense<0.000000e+00> : vector<256x8xf32>
    %93 = tpu.matmul %91, %92, %cst_135 {dimension_numbers = #tpu.dot_dimension_numbers<[1], [0], [0], [1], [0, 0, 1, 1], [], []>} : vector<256x4xbf16>, vector<4x8xbf16>, vector<256x8xf32> -> vector<256x8xf32>
    %c0_136 = arith.constant 0 : index
    %c0_137 = arith.constant 0 : index
    %94 = vector.load %arg7[%c0_136, %c0_137] : memref<1x8xf32, #tpu.memory_space<vmem>>, vector<1x8xf32>
    %95 = vector.broadcast %94 : vector<1x8xf32> to vector<256x8xf32>
    %96 = arith.addf %93, %95 : vector<256x8xf32>
    %97 = arith.addf %89, %96 : vector<256x8xf32>
    %cst_138 = arith.constant 0.000000e+00 : f32
    %98 = vector.broadcast %cst_138 : f32 to vector<256x8xf32>
    %99 = arith.maximumf %97, %98 : vector<256x8xf32>
    %100 = vector.shape_cast %99 : vector<256x8xf32> to vector<16x16x8xf32>
    %c0_139 = arith.constant 0 : index
    %c0_140 = arith.constant 0 : index
    %c0_141 = arith.constant 0 : index
    %c0_142 = arith.constant 0 : index
    %101 = vector.load %arg8[%c0_139, %c0_140, %c0_141, %c0_142] : memref<1x16x16x8xf32, #tpu.memory_space<vmem>>, vector<1x16x16x8xf32>
    %102 = vector.shape_cast %101 : vector<1x16x16x8xf32> to vector<16x16x8xf32>
    %103 = vector.shape_cast %100 : vector<16x16x8xf32> to vector<1x16x16x8xf32>
    tpu.vector_store %arg8[%c0_139, %c0_140, %c0_141, %c0_142], %103 {strides = array<i32>} : memref<1x16x16x8xf32, #tpu.memory_space<vmem>>, vector<1x16x16x8xf32>,
    return
  }
  func.func @transform_0(%arg0: i32) -> (i32, i32, i32, i32) {
    %c0_i32 = arith.constant 0 : i32
    %c0_i32_0 = arith.constant 0 : i32
    %c0_i32_1 = arith.constant 0 : i32
    %c0_i32_2 = arith.constant 0 : i32
    return %arg0, %c0_i32, %c0_i32_0, %c0_i32_1 : i32, i32, i32, i32
  }
  func.func @transform_1(%arg0: i32) -> (i32, i32) {
    %c0_i32 = arith.constant 0 : i32
    %c0_i32_0 = arith.constant 0 : i32
    %c0_i32_1 = arith.constant 0 : i32
    return %c0_i32, %c0_i32_0 : i32, i32
  }
  func.func @transform_2(%arg0: i32) -> (i32, i32) {
    %c0_i32 = arith.constant 0 : i32
    %c0_i32_0 = arith.constant 0 : i32
    %c0_i32_1 = arith.constant 0 : i32
    return %c0_i32, %c0_i32_0 : i32, i32
  }
  func.func @transform_3(%arg0: i32) -> (i32, i32) {
    %c0_i32 = arith.constant 0 : i32
    %c0_i32_0 = arith.constant 0 : i32
    %c0_i32_1 = arith.constant 0 : i32
    return %c0_i32, %c0_i32_0 : i32, i32
  }
  func.func @transform_4(%arg0: i32) -> (i32, i32) {
    %c0_i32 = arith.constant 0 : i32
    %c0_i32_0 = arith.constant 0 : i32
    %c0_i32_1 = arith.constant 0 : i32
    return %c0_i32, %c0_i32_0 : i32, i32
  }
  func.func @transform_5(%arg0: i32) -> (i32, i32) {
    %c0_i32 = arith.constant 0 : i32
    %c0_i32_0 = arith.constant 0 : i32
    %c0_i32_1 = arith.constant 0 : i32
    return %c0_i32, %c0_i32_0 : i32, i32
  }
  func.func @transform_6(%arg0: i32) -> (i32, i32) {
    %c0_i32 = arith.constant 0 : i32
    %c0_i32_0 = arith.constant 0 : i32
    %c0_i32_1 = arith.constant 0 : i32
    return %c0_i32, %c0_i32_0 : i32, i32
  }
  func.func @transform_7(%arg0: i32) -> (i32, i32, i32, i32) {
    %c0_i32 = arith.constant 0 : i32
    %c0_i32_0 = arith.constant 0 : i32
    %c0_i32_1 = arith.constant 0 : i32
    %c0_i32_2 = arith.constant 0 : i32
    return %arg0, %c0_i32, %c0_i32_0, %c0_i32_1 : i32, i32, i32, i32
  }
}

</mosaic_0001>

<bundles_post_ra>
// kernel: tpu_custom_call.1
= control target key start
LH: loop header
LB: loop body
LE: loop exit
PB: predicated region body
PF: predicated region fallthrough
CT: control target
= control target key end

     0   :  { %s9581_s24 = smov 0   ;;  %s13018_s0 = inlined_call_operand.vmem [shape: bf16[2,16,16,4], index: 0, kind: input, shape index: {}]   ;;  %s13019_s1 = inlined_call_operand.vmem [shape: bf16[36,8], index: 1, kind: input, shape index: {}]   ;;  %s13020_s2 = inlined_call_operand.vmem [shape: f32[1,8], index: 2, kind: input, shape index: {}]   ;;  %s13021_s3 = inlined_call_operand.vmem [shape: bf16[72,8], index: 3, kind: input, shape index: {}]   ;;  %s13022_s4 = inlined_call_operand.vmem [shape: f32[1,8], index: 4, kind: input, shape index: {}]   ;;  %s13023_s5 = inlined_call_operand.vmem [shape: bf16[4,8], index: 5, kind: input, shape index: {}]   ;;  %s13024_s6 = inlined_call_operand.vmem [shape: f32[1,8], index: 6, kind: input, shape index: {}]   ;;  %s13025_s7 = inlined_call_operand.vmem [shape: f32[2,16,16,8], index: 7, kind: output, shape index: {}]  }
   0x1 LB: > { %s9136_s25 = sadd.s32 4294967295, %s9526_s24   ;;  %p9140_p0 = scmp.ge.s32.totalorder %s9526_s24, 1  ;;  %s9526_s24 = sphi %s9581_s24, %s17_s24  }
   0x2   : > { %p237_p1 = scmp.lt.s32.totalorder %s9526_s24, 3 }
   0x4   : > { %p238_p2 = pnand %p9140_p0, %p237_p1 }
   0x5   : > { %p269_p3 = scmp.lt.s32.totalorder (!%p238_p2), %s9136_s25, 1  ;;  %s9529_s30 = smov (!%p238_p2), 4  }
   0x6   : > { %241 = sbr.rel (%p238_p2) target bundleno = 2012 (0x7dc), region = 48  ;;  %s9530_s8 = smov (!%p238_p2), 8  }
   0x7   : > { %s9531_s9 = smov (!%p238_p2), 12   ;;  %s9532_s10 = smov (!%p238_p2), 16  }
   0x8   : > { %s9533_s11 = smov (!%p238_p2), 20   ;;  %s9534_s12 = smov (!%p238_p2), 24  }
   0x9   : > { %s9535_s13 = smov (!%p238_p2), 28   ;;  %s9536_s14 = smov (!%p238_p2), 32  }
   0xb   : > { %vm280_vm0 = vcmask 27648   ;;  %vm283_vm1 = vcmask 24576   ;;  %v9528_v0 = vmov 0   ;;  %vm290_vm2 = vsmask.f32 256  ;;  %s13045_s25 = smov (!%p269_p3, %s9136_s25), 1 }
   0xc   : > { %282 = vst.msk [vmem:[#allocation2 + $0x4] sm:$0xf] %vm280_vm0, %v9528_v0  ;;  %vm346_vm3 = vsmask.f32 7938  ;;  %vm871_vm4 = vcmask 60416   ;;  %vm9598_vm5 = vmand %vm283_vm1, %vm290_vm2  ;;  %vm874_vm8 = vcmask 57344  }
   0xd   : > { %284 = vst.msk [vmem:[#allocation2 + $0x8] sm:$0x1] %vm283_vm1, %v9528_v0  ;;  %v301_v2 = vld [vmem:[#allocation2 + $0x24] sm:$0x1]  ;;  %vm434_vm6 = vsmask.f32 4368  ;;  %vm9605_vm7 = vmand %vm283_vm1, %vm346_vm3 }
   0xe   : > { %281 = vst.msk [vmem:[#allocation2] sm:$0xf] %vm280_vm0, %v9528_v0  ;;  %s9443_s26 = sshll.u32 %s13045_s25, 7  ;;  %v295_v4 = vld [vmem:[#allocation2 + $0xc] sm:$0x1]  ;;  %v302_v13 = vsel %vm9598_vm5, 0, %v301_v2  ;;  %vm9643_vm11 = vmor %vm290_vm2, %vm434_vm6 }
   0xf   : > { %286 = vst.msk [vmem:[#allocation2 + $0xcc] sm:$0xf] %vm280_vm0, %v9528_v0  ;;  %v360_v6 = vld [vmem:[#allocation2 + $0x38] sm:$0x1]  ;;  %vm1103_vm9 = vsmask.f32 3328  ;;  %s9616_s29 = scalar_lea.vmem %s13018_s0, %s9443_s26  ;;  %vm9655_vm12 = vmand %vm280_vm0, %vm346_vm3 }
  0x10   : > { %287 = vst.msk [vmem:[#allocation2 + $0xd0] sm:$0xf] %vm280_vm0, %v9528_v0  ;;  %vm1104_vm10 = vsmask.f32 7440  ;;  %v351_v10 = vld [vmem:[#allocation2 + $0x14] sm:$0x1] }
  0x11   : > { %288 = vst.msk [vmem:[#allocation2 + $0xd4] sm:$0x1] %vm283_vm1, %v9528_v0  ;;  %v296_v17 = vsel %vm9598_vm5, 0, %v295_v4  ;;  %v406_v18 = vld [vmem:[%s9616_s29 + $0x10] sm:$0xf]  ;;  %v361_v23 = vsel %vm9605_vm7, 0, %v360_v6  ;;  %vm9663_vm13 = vmor %vm1103_vm9, %vm1104_vm10 }
  0x12   : > { %872 = vst.msk [vmem:[#allocation3] sm:$0xf] %vm871_vm4, %v9528_v0  ;;  %v407_v19 = vld [vmem:[%s9616_s29 + $0x14] sm:$0xf]  ;;  %v471_v21 = vshrl.u32 %v406_v18, 16  ;;  %v352_v26 = vsel %vm9605_vm7, 0, %v351_v10 }
  0x13   : > { %v1056_v5 = vld [vmem:[#allocation2 + $0x4] sm:$0xf]  ;;  %873 = vst.msk [vmem:[#allocation3 + $0x4] sm:$0xf] %vm871_vm4, %v9528_v0  ;;  %v479_v22 = vshrl.u32 %v407_v19, 16  ;;  %v482_v24 = vshll.u32 %v407_v19, 16 }
  0x14   : > { %v348_v7 = vld [vmem:[#allocation2 + $0x8] sm:$0x1]  ;;  %v1116_v8 = vshll.u32 %v1056_v5, 16  ;;  %v1120_v9 = vshrl.u32 %v1056_v5, 16  ;;  %875 = vst.msk [vmem:[#allocation3 + $0x8] sm:$0x1] %vm874_vm8, %v9528_v0 }
  0x15   : > { %v349_v11 = vsel %vm9605_vm7, 0, %v348_v7  ;;  %877 = vst.msk [vmem:[#allocation3 + $0xcc] sm:$0xf] %vm871_vm4, %v9528_v0  ;;  %v292_v12 = vld [vmem:[#allocation2] sm:$0x1]  ;;  %v473_v27 = vrot.slane %v471_v21, 7 }
  0x16   : > { %350 = vst [vmem:[#allocation2 + $0x8] sm:$0x1] %v349_v11  ;;  %v9623_v14 = vrot.slane %v1116_v8, 5  ;;  %v1122_v15 = vrot.slane %v1120_v9, 4  ;;  %v293_v16 = vsel %vm9598_vm5, 0, %v292_v12  ;;  %v474_v28 = vshll.u32 %v406_v18, 16 }
  0x17   : > { %878 = vst.msk [vmem:[#allocation3 + $0xd0] sm:$0xf] %vm871_vm4, %v9528_v0  ;;  %v402_v25 = vld [vmem:[%s9616_s29] sm:$0xf]  ;;  %v9639_v29 = vrot.slane %v479_v22, 7  ;;  %v477_v35 = vrot.slane %v473_v27, 4 }
  0x18   : > { %v1123_v20 = vor.u32 %v1122_v15, %v9623_v14  ;;  %879 = vst.msk [vmem:[#allocation3 + $0xd4] sm:$0x1] %vm874_vm8, %v9528_v0  ;;  %v437_v30 = vshrl.u32 %v402_v25, 16  ;;  %v403_v33 = vld [vmem:[%s9616_s29 + $0x4] sm:$0xf]  ;;  %v440_v34 = vshll.u32 %v402_v25, 16  ;;  %v476_v45 = vor.u32 %v474_v28, %v473_v27 }
  0x19   : > { %294 = vst [vmem:[#allocation2] sm:$0x1] %v293_v16  ;;  %v484_v36 = vor.u32 %v482_v24, %v9639_v29  ;;  %v9650_v38 = vld [vmem:[%s9616_s29 + $0x18] sm:$0xf]  ;;  %v445_v40 = vshrl.u32 %v403_v33, 16  ;;  %v448_v41 = vshll.u32 %v403_v33, 16 }
  0x1a   : > { %303 = vst [vmem:[#allocation2 + $0x24] sm:$0x1] %v302_v13  ;;  %v1124_v31 = vrot.slane %v1123_v20, 4  ;;  %v439_v37 = vrot.slane %v437_v30, 7  ;;  %v409_v42 = vld [vmem:[%s9616_s29 + $0x1c] sm:$0xf] }
  0x1b   : > { %297 = vst [vmem:[#allocation2 + $0xc] sm:$0x1] %v296_v17  ;;  %v485_v46 = vsel %vm9643_vm11, %v477_v35, %v484_v36  ;;  %v310_v48 = vld [vmem:[#allocation2 + $0x48] sm:$0x1]  ;;  %v447_v51 = vrot.slane %v445_v40, 7  ;;  %v488_v52 = vshrl.u32 %v9650_v38, 16 }
  0x1c   : > { %362 = vst [vmem:[#allocation2 + $0x38] sm:$0x1] %v361_v23  ;;  %v442_v47 = vor.u32 %v440_v34, %v439_v37  ;;  %v443_v50 = vrot.slane %v439_v37, 4  ;;  %v496_v53 = vshrl.u32 %v409_v42, 16  ;;  %v499_v56 = vshll.u32 %v409_v42, 16  ;;  %s9444_s28 = sshll.u32 %s13045_s25, 8 }
  0x1d   : > { %v1057_v39 = vld [vmem:[#allocation2 + $0x8] sm:$0x1]  ;;  %353 = vst [vmem:[#allocation2 + $0x14] sm:$0x1] %v352_v26  ;;  %v311_v57 = vsel %vm9598_vm5, 0, %v310_v48  ;;  %v450_v61 = vor.u32 %v448_v41, %v447_v51  ;;  %v9671_v62 = vrot.slane %v488_v52, 7  ;;  %s12707_s25 = scalar_lea.vmem %s13025_s7, %s9444_s28 }
  0x1e   : > { %v1126_v44 = vshll.u32 %v1057_v39, 16  ;;  %776 = vst.msk [vmem:[#allocation2 + $0x28] sm:$0xf] %vm280_vm0, %v485_v46  ;;  %v498_v4 = vrot.slane %v496_v53, 7  ;;  %v452_v5 = vrot.slane %v447_v51, 4  ;;  %vm1715_vm14 = vcmask 1042432  }
  0x1f   : > { %312 = vst [vmem:[#allocation2 + $0x48] sm:$0x1] %v311_v57  ;;  %v451_v8 = vsel %vm9643_vm11, %v443_v50, %v450_v61  ;;  %v494_v11 = vrot.slane %v9671_v62, 4  ;;  %v412_v15 = vld [vmem:[%s9616_s29 + $0x28] sm:$0xf]  ;;  %vm1716_vm15 = vcmask 1046532  }
  0x20   : > { %v1128_v54 = vrot.slane %v1126_v44, 5  ;;  %v1055_v55 = vld [vmem:[#allocation2] sm:$0xf]  ;;  %v501_v12 = vor.u32 %v499_v56, %v498_v4  ;;  %v503_v13 = vrot.slane %v498_v4, 4  ;;  %762 = vst.msk [vmem:[#allocation2 + $0x10] sm:$0xf] %vm280_vm0, %v451_v8  ;;  %vm10065_vm1 = vmor %vm1715_vm14, %vm1716_vm15 }
  0x21   : > { %v1107_v58 = vshrl.u32 %v1055_v55, 16  ;;  %v1110_v59 = vshll.u32 %v1055_v55, 16  ;;  %v773_v60 = vld [vmem:[#allocation2 + $0x24] sm:$0xf]  ;;  %v413_v18 = vld [vmem:[%s9616_s29 + $0x2c] sm:$0xf] }
  0x22   : > { %v1129_v63 = vsel %vm9663_vm13, %v1124_v31, %v1128_v54  ;;  %v774_v0 = vsel %vm9655_vm12, %v476_v45, %v773_v60  ;;  %v759_v2 = vld [vmem:[#allocation2 + $0xc] sm:$0xf]  ;;  %v502_v20 = vsel %vm9643_vm11, %v494_v11, %v501_v12  ;;  %v522_v23 = vshrl.u32 %v412_v15, 16  ;;  %v298_v24 = vld [vmem:[#allocation2 + $0x18] sm:$0x1] }
  0x23   : > { %1492 = vrot.lane.b32.xlu0 %v1129_v63, %s9529_s30  ;;  %v1109_v6 = vrot.slane %v1107_v58, 4  ;;  %v1112_v7 = vrot.slane %v1110_v59, 5  ;;  %775 = vst [vmem:[#allocation2 + $0x24] sm:$0xf] %v774_v0  ;;  %v760_v9 = vsel %vm9655_vm12, %v442_v47, %v759_v2  ;;  %v784_v10 = vld [vmem:[#allocation2 + $0x38] sm:$0x1] }
  0x24   : > { %761 = vst [vmem:[#allocation2 + $0xc] sm:$0xf] %v760_v9  ;;  %v763_v17 = vld [vmem:[#allocation2 + $0x14] sm:$0x1]  ;;  %v785_v21 = vsel %vm9598_vm5, %v503_v13, %v784_v10  ;;  %v525_v27 = vshll.u32 %v412_v15, 16  ;;  %v524_v28 = vrot.slane %v522_v23, 7 }
  0x25   : > { %v1113_v16 = vor.u32 %v1112_v7, %v1109_v6  ;;  %v9686_v19 = vld [vmem:[#allocation2 + $0x28] sm:$0xf]  ;;  %v764_v22 = vsel %vm9598_vm5, %v452_v5, %v763_v17  ;;  %783 = vst.msk [vmem:[#allocation2 + $0x34] sm:$0xf] %vm280_vm0, %v502_v20  ;;  %v530_v30 = vshrl.u32 %v413_v18, 16  ;;  %v533_v31 = vshll.u32 %v413_v18, 16 }
  0x26   : > { %v1188_v26 = vshll.u32 %v9686_v19, 16  ;;  %786 = vst [vmem:[#allocation2 + $0x38] sm:$0x1] %v785_v21  ;;  %v299_v33 = vsel %vm9598_vm5, 0, %v298_v24  ;;  %v794_v36 = vld [vmem:[#allocation2 + $0x48] sm:$0xf]  ;;  %v527_v39 = vor.u32 %v525_v27, %v524_v28 }
  0x27   : > { %v1114_v25 = vrot.slane %v1113_v16, 4  ;;  %765 = vst [vmem:[#allocation2 + $0x14] sm:$0x1] %v764_v22  ;;  %v528_v40 = vrot.slane %v524_v28, 4  ;;  %v9703_v41 = vrot.slane %v530_v30, 7  ;;  %v491_v16 = vshll.u32 %v9650_v38, 16 }
  0x28   : > { %v9701_v35 = vrot.slane %v1188_v26, 5  ;;  %300 = vst [vmem:[#allocation2 + $0x18] sm:$0x1] %v299_v33  ;;  %v404_v46 = vld [vmem:[%s9616_s29 + $0x8] sm:$0xf]  ;;  %v795_v51 = vsel %vm9655_vm12, %v527_v39, %v794_v36  ;;  %vm1586_vm6 = vcmask 60448  }
  0x29   : > { %v1119_v34 = vsel %vm9663_vm13, %v1114_v25, %v9623_v14  ;;  %v1059_v47 = vld [vmem:[#allocation2 + $0x10] sm:$0xf]  ;;  %v535_v14 = vor.u32 %v533_v31, %v9703_v41  ;;  %796 = vst [vmem:[#allocation2 + $0x48] sm:$0xf] %v795_v51  ;;  %v454_v60 = vshrl.u32 %v404_v46, 16  ;;  %v457_v24 = vshll.u32 %v404_v46, 16 }
  0x2a   : > { %v1064_v37 = vld [vmem:[#allocation2 + $0x24] sm:$0xf]  ;;  %v1140_v54 = vshll.u32 %v1059_v47, 16  ;;  %v1144_v55 = vshrl.u32 %v1059_v47, 16  ;;  %v405_v13 = vld [vmem:[%s9616_s29 + $0xc] sm:$0xf] }
  0x2b   : > { %1490 = vrot.lane.b32.xlu0 %v1119_v34, %s9529_s30  ;;  %v1179_v42 = vshrl.u32 %v1064_v37, 16  ;;  %v1182_v44 = vshll.u32 %v1064_v37, 16  ;;  %v1058_v45 = vld [vmem:[#allocation2 + $0xc] sm:$0xf]  ;;  %v536_v59 = vsel %vm9643_vm11, %v528_v40, %v535_v14  ;;  %v456_v18 = vrot.slane %v454_v60, 7 }
  0x2c   : > { %v1131_v48 = vshrl.u32 %v1058_v45, 16  ;;  %v1134_v50 = vshll.u32 %v1058_v45, 16  ;;  %v1068_v58 = vld [vmem:[#allocation2 + $0x34] sm:$0xf]  ;;  %v1142_v63 = vrot.slane %v1140_v54, 5  ;;  %v1146_v0 = vrot.slane %v1144_v55, 4 }
  0x2d   : > { %v1181_v52 = vrot.slane %v1179_v42, 4  ;;  %v1184_v53 = vrot.slane %v1182_v44, 5  ;;  %v1069_v2 = vld [vmem:[#allocation2 + $0x38] sm:$0x1]  ;;  %v1212_v4 = vshll.u32 %v1068_v58, 16  ;;  %v1216_v6 = vshrl.u32 %v1068_v58, 16 }
  0x2e   : > { %v1133_v56 = vrot.slane %v1131_v48, 4  ;;  %v1136_v57 = vrot.slane %v1134_v50, 5  ;;  %v1222_v7 = vshll.u32 %v1069_v2, 16  ;;  %v1060_v8 = vld [vmem:[#allocation2 + $0x14] sm:$0x1]  ;;  %v1147_v11 = vor.u32 %v1146_v0, %v1142_v63 }
  0x2f   : > { %v1185_v61 = vor.u32 %v1184_v53, %v1181_v52  ;;  %797 = vst.msk [vmem:[#allocation2 + $0x4c] sm:$0xf] %vm280_vm0, %v536_v59  ;;  %v9713_v10 = vrot.slane %v1212_v4, 5  ;;  %v1150_v12 = vshll.u32 %v1060_v8, 16  ;;  %v1218_v17 = vrot.slane %v1216_v6, 4 }
  0x30   : > { %v1137_v5 = vor.u32 %v1136_v57, %v1133_v56  ;;  %v766_v20 = vld [vmem:[#allocation2 + $0x18] sm:$0xf]  ;;  %v1224_v22 = vrot.slane %v1222_v7, 5  ;;  %v1148_v23 = vrot.slane %v1147_v11, 4  ;;  %v357_v25 = vld [vmem:[#allocation2 + $0x2c] sm:$0x1]  ;;  %v459_v37 = vor.u32 %v457_v24, %v456_v18 }
  0x31   : > { %v1186_v9 = vrot.slane %v1185_v61, 4  ;;  %v1219_v27 = vor.u32 %v1218_v17, %v9713_v10  ;;  %v1152_v28 = vrot.slane %v1150_v12, 5  ;;  %v1073_v30 = vld [vmem:[#allocation2 + $0x48] sm:$0xf]  ;;  %v462_v31 = vshrl.u32 %v405_v13, 16 }
  0x32   : > { %v1138_v15 = vrot.slane %v1137_v5, 4  ;;  %v369_v33 = vld [vmem:[#allocation2 + $0x5c] sm:$0x1]  ;;  %v1251_v34 = vshrl.u32 %v1073_v30, 16  ;;  %v1254_v36 = vshll.u32 %v1073_v30, 16  ;;  %v460_v39 = vrot.slane %v456_v18, 4 }
  0x33   : > { %v1191_v21 = vsel %vm9663_vm13, %v1186_v9, %v9701_v35  ;;  %v9726_v40 = vld [vmem:[%s9616_s29 + $0x30] sm:$0xf]  ;;  %v1220_v42 = vrot.slane %v1219_v27, 4  ;;  %v9728_v44 = vrot.slane %v462_v31, 7  ;;  %v465_v45 = vshll.u32 %v405_v13, 16 }
  0x34   : > { %1502 = vrot.lane.b32.xlu0 %v1191_v21, %s9529_s30  ;;  %v1143_v26 = vsel %vm9663_vm13, %v1138_v15, %v1142_v63  ;;  %v358_v46 = vsel %vm9605_vm7, 0, %v357_v25  ;;  %v415_v47 = vld [vmem:[%s9616_s29 + $0x34] sm:$0xf]  ;;  %v1253_v50 = vrot.slane %v1251_v34, 4  ;;  %v1256_v14 = vrot.slane %v1254_v36, 5 }
  0x35   : > { %1494 = vrot.lane.b32.xlu1 %v1143_v26, %s9529_s30  ;;  %v767_v51 = vsel %vm9655_vm12, %v459_v37, %v766_v20  ;;  %359 = vst [vmem:[#allocation2 + $0x2c] sm:$0x1] %v358_v46  ;;  %v1192_v52 = vshrl.u32 %v9686_v19, 16  ;;  %v467_v54 = vor.u32 %v465_v45, %v9728_v44  ;;  %v354_v55 = vld [vmem:[#allocation2 + $0x20] sm:$0x1]  ;;  %v1225_v56 = vsel %vm9663_vm13, %v1220_v42, %v1224_v22 }
  0x36   : > { %v9733_v48 = vld [vmem:[#allocation2 + $0x4c] sm:$0xf]  ;;  %768 = vst [vmem:[#allocation2 + $0x18] sm:$0xf] %v767_v51  ;;  %v1257_v57 = vor.u32 %v1256_v14, %v1253_v50  ;;  %v370_v58 = vsel %vm9605_vm7, 0, %v369_v33  ;;  %v539_v59 = vshrl.u32 %v9726_v40, 16  ;;  %v1153_v19 = vsel %vm9663_vm13, %v1148_v23, %v1152_v28 }
  0x37   : > { %v1260_v53 = vshll.u32 %v9733_v48, 16  ;;  %v307_v60 = vld [vmem:[#allocation2 + $0x3c] sm:$0x1]  ;;  %v410_v61 = vld [vmem:[%s9616_s29 + $0x20] sm:$0xf]  ;;  %v468_v63 = vsel %vm9643_vm11, %v460_v39, %v467_v54  ;;  %v486_v0 = vrot.slane %v9639_v29, 4 }
  0x38   : > { %371 = vst [vmem:[#allocation2 + $0x5c] sm:$0x1] %v370_v58  ;;  %v547_v2 = vshrl.u32 %v415_v47, 16  ;;  %v411_v4 = vld [vmem:[%s9616_s29 + $0x24] sm:$0xf]  ;;  %v9755_v6 = vrot.slane %v539_v59, 7 }
  0x39   : > { %v9752_v5 = vrot.slane %v1260_v53, 5  ;;  %769 = vst.msk [vmem:[#allocation2 + $0x1c] sm:$0xf] %vm280_vm0, %v468_v63  ;;  %v550_v7 = vshll.u32 %v415_v47, 16  ;;  %v355_v8 = vsel %vm9605_vm7, 0, %v354_v55  ;;  %v1258_v9 = vrot.slane %v1257_v57, 4 }
  0x3a   : > { %v549_v11 = vrot.slane %v547_v2, 7  ;;  %356 = vst [vmem:[#allocation2 + $0x20] sm:$0x1] %v355_v8  ;;  %v308_v29 = vsel %vm9598_vm5, 0, %v307_v60  ;;  %v505_v12 = vshrl.u32 %v410_v61, 16  ;;  %v1194_v13 = vrot.slane %v1192_v52, 4 }
  0x3b   : > { %v545_v15 = vrot.slane %v9755_v6, 4  ;;  %309 = vst [vmem:[#allocation2 + $0x3c] sm:$0x1] %v308_v29  ;;  %v508_v17 = vshll.u32 %v410_v61, 16  ;;  %v513_v18 = vshrl.u32 %v411_v4, 16  ;;  %v516_v24 = vshll.u32 %v411_v4, 16 }
  0x3c   : > { %1508 = vrot.lane.b32.xlu0 %v1225_v56, %s9529_s30  ;;  %v777_v20 = vld [vmem:[#allocation2 + $0x2c] sm:$0x1]  ;;  %v552_v21 = vor.u32 %v550_v7, %v549_v11  ;;  %v554_v22 = vrot.slane %v549_v11, 4  ;;  %v507_v23 = vrot.slane %v505_v12, 7  ;;  %v469_v27 = vrot.slane %v9728_v44, 4 }
  0x3d   : > { %1496 = vrot.lane.b32.xlu1 %v1153_v19, %s9529_s30  ;;  %v1061_v25 = vld [vmem:[#allocation2 + $0x18] sm:$0xf]  ;;  %v778_v26 = vsel %vm9598_vm5, %v486_v0, %v777_v20  ;;  %v9767_v28 = vrot.slane %v513_v18, 7  ;;  %v319_v30 = vld [vmem:[#allocation2 + $0x6c] sm:$0x1]  ;;  %v1263_v31 = vsel %vm9663_vm13, %v1258_v9, %v9752_v5  ;;  %v1195_v54 = vor.u32 %v1194_v13, %v9701_v35 }
  0x3e   : > { %v1155_v33 = vshrl.u32 %v1061_v25, 16  ;;  %v1158_v34 = vshll.u32 %v1061_v25, 16  ;;  %779 = vst [vmem:[#allocation2 + $0x2c] sm:$0x1] %v778_v26  ;;  %v553_v36 = vsel %vm9643_vm11, %v545_v15, %v552_v21  ;;  %v418_v37 = vld [vmem:[%s9616_s29 + $0x40] sm:$0xf]  ;;  %v510_v42 = vor.u32 %v508_v17, %v507_v23 }
  0x3f   : > { %804 = vst.msk [vmem:[#allocation2 + $0x58] sm:$0xf] %vm280_vm0, %v553_v36  ;;  %v805_v39 = vld [vmem:[#allocation2 + $0x5c] sm:$0x1]  ;;  %v511_v45 = vrot.slane %v507_v23, 4  ;;  %v518_v44 = vor.u32 %v516_v24, %v9767_v28  ;;  %v320_v46 = vsel %vm9598_vm5, 0, %v319_v30 }
  0x40   : > { %v1062_v47 = vld [vmem:[#allocation2 + $0x1c] sm:$0xf]  ;;  %v1157_v50 = vrot.slane %v1155_v33, 4  ;;  %v1160_v14 = vrot.slane %v1158_v34, 5  ;;  %v806_v51 = vsel %vm9598_vm5, %v554_v22, %v805_v39  ;;  %321 = vst [vmem:[#allocation2 + $0x6c] sm:$0x1] %v320_v46 }
  0x41   : > { %v1164_v52 = vshll.u32 %v1062_v47, 16  ;;  %v1168_v53 = vshrl.u32 %v1062_v47, 16  ;;  %807 = vst [vmem:[#allocation2 + $0x5c] sm:$0x1] %v806_v51  ;;  %v770_v55 = vld [vmem:[#allocation2 + $0x20] sm:$0x1]  ;;  %v519_v56 = vsel %vm9643_vm11, %v511_v45, %v518_v44  ;;  %v493_v51 = vor.u32 %v491_v16, %v9671_v62 }
  0x42   : > { %v1161_v57 = vor.u32 %v1160_v14, %v1157_v50  ;;  %v771_v58 = vsel %vm9598_vm5, %v469_v27, %v770_v55  ;;  %v787_v59 = vld [vmem:[#allocation2 + $0x3c] sm:$0xf]  ;;  %790 = vst.msk [vmem:[#allocation2 + $0x40] sm:$0xf] %vm280_vm0, %v519_v56  ;;  %v419_v60 = vld [vmem:[%s9616_s29 + $0x44] sm:$0xf] }
  0x43   : > { %v1166_v61 = vrot.slane %v1164_v52, 5  ;;  %v1170_v19 = vrot.slane %v1168_v53, 4  ;;  %772 = vst [vmem:[#allocation2 + $0x20] sm:$0x1] %v771_v58  ;;  %v788_v35 = vsel %vm9655_vm12, %v510_v42, %v787_v59  ;;  %v573_v63 = vshrl.u32 %v418_v37, 16 }
  0x44   : > { %1514 = vrot.lane.b32.xlu0 %v1263_v31, %s9529_s30  ;;  %v1162_v0 = vrot.slane %v1161_v57, 4  ;;  %789 = vst [vmem:[#allocation2 + $0x3c] sm:$0xf] %v788_v35  ;;  %v576_v2 = vshll.u32 %v418_v37, 16  ;;  %v581_v4 = vshrl.u32 %v419_v60, 16  ;;  %v584_v7 = vshll.u32 %v419_v60, 16 }
  0x45   : > { %v1066_v8 = vld [vmem:[#allocation2 + $0x2c] sm:$0x1]  ;;  %v1196_v9 = vrot.slane %v1195_v54, 4  ;;  %v1171_v11 = vor.u32 %v1170_v19, %v1166_v61  ;;  %v575_v29 = vrot.slane %v573_v63, 7  ;;  %v304_v12 = vld [vmem:[#allocation2 + $0x30] sm:$0x1] }
  0x46   : > { %v1167_v13 = vsel %vm9663_vm13, %v1162_v0, %v1166_v61  ;;  %v1198_v15 = vshll.u32 %v1066_v8, 16  ;;  %v1077_v17 = vld [vmem:[#allocation2 + $0x58] sm:$0xf]  ;;  %v9793_v18 = vrot.slane %v581_v4, 7  ;;  %v305_v20 = vsel %vm9598_vm5, 0, %v304_v12 }
  0x47   : > { %v1264_v21 = vshrl.u32 %v9733_v48, 16  ;;  %1498 = vrot.lane.b32.xlu2 %v1167_v13, %s9529_s30  ;;  %v1284_v22 = vshll.u32 %v1077_v17, 16  ;;  %v1288_v23 = vshrl.u32 %v1077_v17, 16  ;;  %v578_v24 = vor.u32 %v576_v2, %v575_v29  ;;  %v815_v25 = vld [vmem:[#allocation2 + $0x6c] sm:$0xf] }
  0x48   : > { %v1200_v26 = vrot.slane %v1198_v15, 5  ;;  %v1078_v27 = vld [vmem:[#allocation2 + $0x5c] sm:$0x1]  ;;  %v579_v30 = vrot.slane %v575_v29, 4  ;;  %v586_v31 = vor.u32 %v584_v7, %v9793_v18  ;;  %306 = vst [vmem:[#allocation2 + $0x30] sm:$0x1] %v305_v20 }
  0x49   : > { %v9800_v33 = vrot.slane %v1284_v22, 5  ;;  %v1290_v34 = vrot.slane %v1288_v23, 4  ;;  %v1294_v36 = vshll.u32 %v1078_v27, 16  ;;  %v1071_v37 = vld [vmem:[#allocation2 + $0x40] sm:$0xf]  ;;  %v816_v48 = vsel %vm9655_vm12, %v578_v24, %v815_v25 }
  0x4a   : > { %v1201_v39 = vsel %vm9663_vm13, %v1196_v9, %v1200_v26  ;;  %v1063_v42 = vld [vmem:[#allocation2 + $0x20] sm:$0x1]  ;;  %v1172_v45 = vrot.slane %v1171_v11, 4  ;;  %v587_v44 = vsel %vm9643_vm11, %v579_v30, %v586_v31  ;;  %817 = vst [vmem:[#allocation2 + $0x6c] sm:$0xf] %v816_v48  ;;  %v1236_v54 = vshll.u32 %v1071_v37, 16 }
  0x4b   : > { %1504 = vrot.lane.b32.xlu1 %v1201_v39, %s9529_s30  ;;  %v1291_v46 = vor.u32 %v1290_v34, %v9800_v33  ;;  %v1296_v47 = vrot.slane %v1294_v36, 5  ;;  %v1174_v50 = vshll.u32 %v1063_v42, 16  ;;  %v1070_v14 = vld [vmem:[#allocation2 + $0x3c] sm:$0xf]  ;;  %818 = vst.msk [vmem:[#allocation2 + $0x70] sm:$0xf] %vm280_vm0, %v587_v44 }
  0x4c   : > { %v1227_v52 = vshrl.u32 %v1070_v14, 16  ;;  %v1230_v53 = vshll.u32 %v1070_v14, 16  ;;  %v366_v55 = vld [vmem:[#allocation2 + $0x50] sm:$0x1]  ;;  %v537_v56 = vrot.slane %v9703_v41, 4  ;;  %v9817_v60 = vrot.slane %v1264_v21, 4 }
  0x4d   : > { %v1292_v57 = vrot.slane %v1291_v46, 4  ;;  %v1176_v58 = vrot.slane %v1174_v50, 5  ;;  %v367_v59 = vsel %vm9605_vm7, 0, %v366_v55  ;;  %v378_v61 = vld [vmem:[#allocation2 + $0x80] sm:$0x1]  ;;  %v1240_v38 = vshrl.u32 %v1071_v37, 16 }
  0x4e   : > { %v1229_v19 = vrot.slane %v1227_v52, 4  ;;  %v1232_v35 = vrot.slane %v1230_v53, 5  ;;  %368 = vst [vmem:[#allocation2 + $0x50] sm:$0x1] %v367_v59  ;;  %v379_v62 = vsel %vm9605_vm7, 0, %v378_v61  ;;  %v9830_v4 = vrot.slane %v1236_v54, 5 }
  0x4f   : > { %v1297_v16 = vsel %vm9663_vm13, %v1292_v57, %v1296_v47  ;;  %v1177_v41 = vsel %vm9663_vm13, %v1172_v45, %v1176_v58  ;;  %v780_v63 = vld [vmem:[#allocation2 + $0x30] sm:$0xf]  ;;  %380 = vst [vmem:[#allocation2 + $0x80] sm:$0x1] %v379_v62  ;;  %v9826_v0 = vld [vmem:[%s9616_s29 + $0x48] sm:$0xf]  ;;  %v1267_v39 = vor.u32 %v9817_v60, %v9752_v5 }
  0x50   : > { %1520 = vrot.lane.b32.xlu0 %v1297_v16, %s9529_s30  ;;  %1500 = vrot.lane.b32.xlu2 %v1177_v41, %s9529_s30  ;;  %v1233_v2 = vor.u32 %v1232_v35, %v1229_v19  ;;  %v781_v7 = vsel %vm9655_vm12, %v493_v51, %v780_v63  ;;  %v421_v8 = vld [vmem:[%s9616_s29 + $0x4c] sm:$0xf]  ;;  %v590_v9 = vshrl.u32 %v9826_v0, 16  ;;  %v363_v11 = vld [vmem:[#allocation2 + $0x44] sm:$0x1]  ;;  %v1242_v26 = vrot.slane %v1240_v38, 4 }
  0x51   : > { %v1082_v29 = vld [vmem:[#allocation2 + $0x6c] sm:$0xf]  ;;  %782 = vst [vmem:[#allocation2 + $0x30] sm:$0xf] %v781_v7  ;;  %v598_v12 = vshrl.u32 %v421_v8, 16  ;;  %v601_v13 = vshll.u32 %v421_v8, 16 }
  0x52   : > { %v1234_v15 = vrot.slane %v1233_v2, 4  ;;  %v9836_v17 = vld [vmem:[#allocation2 + $0x70] sm:$0xf]  ;;  %v1323_v20 = vshrl.u32 %v1082_v29, 16  ;;  %v1326_v21 = vshll.u32 %v1082_v29, 16  ;;  %v9838_v22 = vrot.slane %v590_v9, 7 }
  0x53   : > { %v1332_v23 = vshll.u32 %v9836_v17, 16  ;;  %v600_v24 = vrot.slane %v598_v12, 7  ;;  %v364_v25 = vsel %vm9605_vm7, 0, %v363_v11  ;;  %v316_v27 = vld [vmem:[#allocation2 + $0x60] sm:$0x1]  ;;  %v542_v37 = vshll.u32 %v9726_v40, 16 }
  0x54   : > { %v1239_v30 = vsel %vm9663_vm13, %v1234_v15, %v9830_v4  ;;  %v1325_v31 = vrot.slane %v1323_v20, 4  ;;  %v1328_v34 = vrot.slane %v1326_v21, 5  ;;  %v596_v36 = vrot.slane %v9838_v22, 4  ;;  %365 = vst [vmem:[#allocation2 + $0x44] sm:$0x1] %v364_v25 }
  0x55   : > { %1510 = vrot.lane.b32.xlu1 %v1239_v30, %s9529_s30  ;;  %v798_v48 = vld [vmem:[#allocation2 + $0x50] sm:$0x1]  ;;  %v603_v42 = vor.u32 %v601_v13, %v600_v24  ;;  %v605_v45 = vrot.slane %v600_v24, 4  ;;  %v9851_v46 = vrot.slane %v1332_v23, 5  ;;  %v520_v14 = vrot.slane %v9767_v28, 4 }
  0x56   : > { %v1329_v44 = vor.u32 %v1328_v34, %v1325_v31  ;;  %v799_v47 = vsel %vm9598_vm5, %v537_v56, %v798_v48  ;;  %v826_v50 = vld [vmem:[#allocation2 + $0x80] sm:$0x1]  ;;  %v416_v51 = vld [vmem:[%s9616_s29 + $0x38] sm:$0xf]  ;;  %v317_v5 = vsel %vm9598_vm5, 0, %v316_v27  ;;  %v1243_v56 = vor.u32 %v1242_v26, %v9830_v4 }
  0x57   : > { %800 = vst [vmem:[#allocation2 + $0x50] sm:$0x1] %v799_v47  ;;  %v604_v52 = vsel %vm9643_vm11, %v596_v36, %v603_v42  ;;  %v827_v53 = vsel %vm9598_vm5, %v605_v45, %v826_v50  ;;  %v417_v54 = vld [vmem:[%s9616_s29 + $0x3c] sm:$0xf]  ;;  %v556_v55 = vshrl.u32 %v416_v51, 16  ;;  %v559_v38 = vshll.u32 %v416_v51, 16 }
  0x58   : > { %v1330_v57 = vrot.slane %v1329_v44, 4  ;;  %v1067_v58 = vld [vmem:[#allocation2 + $0x30] sm:$0xf]  ;;  %825 = vst.msk [vmem:[#allocation2 + $0x7c] sm:$0xf] %vm280_vm0, %v604_v52  ;;  %v564_v28 = vshrl.u32 %v417_v54, 16 }
  0x59   : > { %v1203_v59 = vshrl.u32 %v1067_v58, 16  ;;  %v1206_v60 = vshll.u32 %v1067_v58, 16  ;;  %828 = vst [vmem:[#allocation2 + $0x80] sm:$0x1] %v827_v53  ;;  %v558_v61 = vrot.slane %v556_v55, 7  ;;  %v567_v19 = vshll.u32 %v417_v54, 16 }
  0x5a   : > { %v1335_v35 = vsel %vm9663_vm13, %v1330_v57, %v9851_v46  ;;  %318 = vst [vmem:[#allocation2 + $0x60] sm:$0x1] %v317_v5  ;;  %v9869_v62 = vrot.slane %v564_v28, 7  ;;  %v328_v16 = vld [vmem:[#allocation2 + $0x90] sm:$0x1]  ;;  %v1268_v2 = vrot.slane %v1267_v39, 4 }
  0x5b   : > { %1526 = vrot.lane.b32.xlu0 %v1335_v35, %s9529_s30  ;;  %v1205_v41 = vrot.slane %v1203_v59, 4  ;;  %v1208_v63 = vrot.slane %v1206_v60, 5  ;;  %v791_v4 = vld [vmem:[#allocation2 + $0x44] sm:$0x1]  ;;  %v562_v7 = vrot.slane %v558_v61, 4  ;;  %v1336_v8 = vshrl.u32 %v9836_v17, 16 }
  0x5c   : > { %v792_v9 = vsel %vm9598_vm5, %v520_v14, %v791_v4  ;;  %v569_v11 = vor.u32 %v567_v19, %v9869_v62  ;;  %v329_v29 = vsel %vm9598_vm5, 0, %v328_v16  ;;  %v424_v12 = vld [vmem:[%s9616_s29 + $0x58] sm:$0xf]  ;;  %v425_v13 = vld [vmem:[%s9616_s29 + $0x5c] sm:$0xf]  ;;  %v9880_v20 = vrot.slane %v1243_v56, 4 }
  0x5d   : > { %v1209_v15 = vor.u32 %v1208_v63, %v1205_v41  ;;  %793 = vst [vmem:[#allocation2 + $0x44] sm:$0x1] %v792_v9  ;;  %v624_v21 = vshrl.u32 %v424_v12, 16  ;;  %v632_v23 = vshrl.u32 %v425_v13, 16  ;;  %v561_v25 = vor.u32 %v559_v38, %v558_v61  ;;  %v313_v51 = vld [vmem:[#allocation2 + $0x54] sm:$0x1] }
  0x5e   : > { %v1075_v24 = vld [vmem:[#allocation2 + $0x50] sm:$0x1]  ;;  %v570_v17 = vsel %vm9643_vm11, %v562_v7, %v569_v11  ;;  %330 = vst [vmem:[#allocation2 + $0x90] sm:$0x1] %v329_v29  ;;  %v627_v26 = vshll.u32 %v424_v12, 16  ;;  %v635_v27 = vshll.u32 %v425_v13, 16 }
  0x5f   : > { %v1210_v30 = vrot.slane %v1209_v15, 4  ;;  %v1270_v31 = vshll.u32 %v1075_v24, 16  ;;  %v1086_v34 = vld [vmem:[#allocation2 + $0x7c] sm:$0xf]  ;;  %811 = vst.msk [vmem:[#allocation2 + $0x64] sm:$0xf] %vm280_vm0, %v570_v17 }
  0x60   : > { %v1087_v36 = vld [vmem:[#allocation2 + $0x80] sm:$0x1]  ;;  %v1356_v48 = vshll.u32 %v1086_v34, 16  ;;  %v1360_v39 = vshrl.u32 %v1086_v34, 16  ;;  %v626_v42 = vrot.slane %v624_v21, 7  ;;  %v9885_v45 = vrot.slane %v632_v23, 7 }
  0x61   : > { %v1215_v44 = vsel %vm9663_vm13, %v1210_v30, %v9713_v10  ;;  %v1272_v47 = vrot.slane %v1270_v31, 5  ;;  %v1366_v50 = vshll.u32 %v1087_v36, 16  ;;  %v808_v14 = vld [vmem:[#allocation2 + $0x60] sm:$0xf]  ;;  %v375_v55 = vld [vmem:[#allocation2 + $0x74] sm:$0x1] }
  0x62   : > { %1506 = vrot.lane.b32.xlu2 %v1215_v44, %s9529_s30  ;;  %v9891_v52 = vrot.slane %v1356_v48, 5  ;;  %v1362_v53 = vrot.slane %v1360_v39, 4  ;;  %v809_v5 = vsel %vm9655_vm12, %v561_v25, %v808_v14  ;;  %v629_v54 = vor.u32 %v627_v26, %v626_v42  ;;  %v387_v57 = vld [vmem:[#allocation2 + $0xa4] sm:$0x1]  ;;  %v9899_v59 = vld [vmem:[%s9616_s29 + $0x60] sm:$0xf] }
  0x63   : > { %v1273_v58 = vsel %vm9663_vm13, %v1268_v2, %v1272_v47  ;;  %810 = vst [vmem:[#allocation2 + $0x60] sm:$0xf] %v809_v5  ;;  %v630_v10 = vrot.slane %v626_v42, 4  ;;  %v637_v56 = vor.u32 %v635_v27, %v9885_v45  ;;  %v1338_v28 = vrot.slane %v1336_v8, 4  ;;  %v427_v21 = vld [vmem:[%s9616_s29 + $0x64] sm:$0xf] }
  0x64   : > { %1516 = vrot.lane.b32.xlu1 %v1273_v58, %s9529_s30  ;;  %v1363_v60 = vor.u32 %v1362_v53, %v9891_v52  ;;  %v1368_v61 = vrot.slane %v1366_v50, 5  ;;  %v1072_v19 = vld [vmem:[#allocation2 + $0x44] sm:$0x1]  ;;  %v314_v35 = vsel %vm9598_vm5, 0, %v313_v51  ;;  %v376_v38 = vsel %vm9605_vm7, 0, %v375_v55 }
  0x65   : > { %v1246_v16 = vshll.u32 %v1072_v19, 16  ;;  %v638_v41 = vsel %vm9643_vm11, %v630_v10, %v637_v56  ;;  %v836_v63 = vld [vmem:[#allocation2 + $0x90] sm:$0xf]  ;;  %315 = vst [vmem:[#allocation2 + $0x54] sm:$0x1] %v314_v35  ;;  %v641_v2 = vshrl.u32 %v9899_v59, 16  ;;  %v1339_v15 = vor.u32 %v1338_v28, %v9851_v46 }
  0x66   : > { %v1364_v4 = vrot.slane %v1363_v60, 4  ;;  %v1080_v7 = vld [vmem:[#allocation2 + $0x64] sm:$0xf]  ;;  %v837_v8 = vsel %vm9655_vm12, %v629_v54, %v836_v63  ;;  %839 = vst.msk [vmem:[#allocation2 + $0x94] sm:$0xf] %vm280_vm0, %v638_v41  ;;  %v388_v9 = vsel %vm9605_vm7, 0, %v387_v57  ;;  %v544_v25 = vor.u32 %v542_v37, %v9755_v6 }
  0x67   : > { %v1248_v11 = vrot.slane %v1246_v16, 5  ;;  %v1308_v29 = vshll.u32 %v1080_v7, 16  ;;  %838 = vst [vmem:[#allocation2 + $0x90] sm:$0xf] %v837_v8  ;;  %v9915_v12 = vrot.slane %v641_v2, 7  ;;  %v649_v17 = vshrl.u32 %v427_v21, 16 }
  0x68   : > { %v1369_v13 = vsel %vm9663_vm13, %v1364_v4, %v1368_v61  ;;  %377 = vst [vmem:[#allocation2 + $0x74] sm:$0x1] %v376_v38  ;;  %v372_v23 = vld [vmem:[#allocation2 + $0x68] sm:$0x1]  ;;  %v593_v26 = vshll.u32 %v9826_v0, 16  ;;  %v652_v46 = vshll.u32 %v427_v21, 16 }
  0x69   : > { %1532 = vrot.lane.b32.xlu0 %v1369_v13, %s9529_s30  ;;  %v1249_v24 = vsel %vm9663_vm13, %v9880_v20, %v1248_v11  ;;  %389 = vst [vmem:[#allocation2 + $0xa4] sm:$0x1] %v388_v9  ;;  %v373_v30 = vsel %vm9605_vm7, 0, %v372_v23  ;;  %v647_v20 = vrot.slane %v9915_v12, 4  ;;  %v651_v36 = vrot.slane %v649_v17, 7 }
  0x6a   : > { %1512 = vrot.lane.b32.xlu2 %v1249_v24, %s9529_s30  ;;  %v1079_v27 = vld [vmem:[#allocation2 + $0x60] sm:$0xf]  ;;  %374 = vst [vmem:[#allocation2 + $0x68] sm:$0x1] %v373_v30  ;;  %v9933_v40 = vrot.slane %v1308_v29, 5  ;;  %v1312_v6 = vshrl.u32 %v1080_v7, 16 }
  0x6b   : > { %v1299_v31 = vshrl.u32 %v1079_v27, 16  ;;  %v1302_v34 = vshll.u32 %v1079_v27, 16  ;;  %v588_v48 = vrot.slane %v9793_v18, 4  ;;  %v9936_v39 = vrot.slane %v1339_v15, 4  ;;  %v325_v51 = vld [vmem:[#allocation2 + $0x84] sm:$0x1] }
  0x6c   : > { %v801_v37 = vld [vmem:[#allocation2 + $0x54] sm:$0xf]  ;;  %v654_v14 = vor.u32 %v652_v46, %v651_v36  ;;  %v422_v53 = vld [vmem:[%s9616_s29 + $0x50] sm:$0xf]  ;;  %v571_v55 = vrot.slane %v9869_v62, 4  ;;  %v656_v19 = vrot.slane %v651_v36, 4 }
  0x6d   : > { %v1301_v42 = vrot.slane %v1299_v31, 4  ;;  %v1304_v44 = vrot.slane %v1302_v34, 5  ;;  %v9938_v47 = vld [vmem:[#allocation2 + $0x94] sm:$0xf]  ;;  %v802_v50 = vsel %vm9655_vm12, %v544_v25, %v801_v37  ;;  %v9951_v38 = vrot.slane %v1312_v6, 4 }
  0x6e   : > { %v1091_v5 = vld [vmem:[#allocation2 + $0x90] sm:$0xf]  ;;  %v1404_v54 = vshll.u32 %v9938_v47, 16  ;;  %803 = vst [vmem:[#allocation2 + $0x54] sm:$0xf] %v802_v50  ;;  %v655_v28 = vsel %vm9643_vm11, %v647_v20, %v654_v14  ;;  %v326_v7 = vsel %vm9598_vm5, 0, %v325_v51 }
  0x6f   : > { %v423_v57 = vld [vmem:[%s9616_s29 + $0x54] sm:$0xf]  ;;  %v1305_v18 = vor.u32 %v1304_v44, %v1301_v42  ;;  %v1395_v58 = vshrl.u32 %v1091_v5, 16  ;;  %v1398_v10 = vshll.u32 %v1091_v5, 16  ;;  %846 = vst.msk [vmem:[#allocation2 + $0xa0] sm:$0xf] %vm280_vm0, %v655_v28  ;;  %v1315_v20 = vor.u32 %v9951_v38, %v9933_v40 }
  0x70   : > { %v819_v56 = vld [vmem:[#allocation2 + $0x74] sm:$0x1]  ;;  %v847_v35 = vld [vmem:[#allocation2 + $0xa4] sm:$0x1]  ;;  %v9953_v63 = vrot.slane %v1404_v54, 5  ;;  %v607_v8 = vshrl.u32 %v422_v53, 16 }
  0x71   : > { %v337_v60 = vld [vmem:[#allocation2 + $0xb4] sm:$0x1]  ;;  %v820_v61 = vsel %vm9598_vm5, %v588_v48, %v819_v56  ;;  %v1306_v62 = vrot.slane %v1305_v18, 4  ;;  %v1397_v16 = vrot.slane %v1395_v58, 4  ;;  %v1400_v41 = vrot.slane %v1398_v10, 5 }
  0x72   : > { %821 = vst [vmem:[#allocation2 + $0x74] sm:$0x1] %v820_v61  ;;  %v848_v2 = vsel %vm9598_vm5, %v656_v19, %v847_v35  ;;  %v812_v4 = vld [vmem:[#allocation2 + $0x68] sm:$0x1]  ;;  %v610_v9 = vshll.u32 %v422_v53, 16  ;;  %v615_v15 = vshrl.u32 %v423_v57, 16 }
  0x73   : > { %v1311_v11 = vsel %vm9663_vm13, %v1306_v62, %v9933_v40  ;;  %v1401_v29 = vor.u32 %v1400_v41, %v1397_v16  ;;  %849 = vst [vmem:[#allocation2 + $0xa4] sm:$0x1] %v848_v2  ;;  %v813_v13 = vsel %vm9598_vm5, %v571_v55, %v812_v4  ;;  %v430_v21 = vld [vmem:[%s9616_s29 + $0x70] sm:$0xf]  ;;  %v609_v23 = vrot.slane %v607_v8, 7 }
  0x74   : > { %1522 = vrot.lane.b32.xlu1 %v1311_v11, %s9529_s30  ;;  %814 = vst [vmem:[#allocation2 + $0x68] sm:$0x1] %v813_v13  ;;  %v618_v24 = vshll.u32 %v423_v57, 16  ;;  %v338_v25 = vsel %vm9598_vm5, 0, %v337_v60  ;;  %v675_v17 = vshrl.u32 %v430_v21, 16  ;;  %v9968_v30 = vrot.slane %v615_v15, 7 }
  0x75   : > { %v1402_v27 = vrot.slane %v1401_v29, 4  ;;  %v1076_v46 = vld [vmem:[#allocation2 + $0x54] sm:$0xf]  ;;  %327 = vst [vmem:[#allocation2 + $0x84] sm:$0x1] %v326_v7  ;;  %v613_v36 = vrot.slane %v609_v23, 4  ;;  %v612_v55 = vor.u32 %v610_v9, %v609_v23 }
  0x76   : > { %v1275_v31 = vshrl.u32 %v1076_v46, 16  ;;  %v1278_v34 = vshll.u32 %v1076_v46, 16  ;;  %339 = vst [vmem:[#allocation2 + $0xb4] sm:$0x1] %v338_v25  ;;  %v1095_v37 = vld [vmem:[#allocation2 + $0xa0] sm:$0xf]  ;;  %v620_v48 = vor.u32 %v618_v24, %v9968_v30 }
  0x77   : > { %v1407_v6 = vsel %vm9663_vm13, %v1402_v27, %v9953_v63  ;;  %v431_v42 = vld [vmem:[%s9616_s29 + $0x74] sm:$0xf]  ;;  %v677_v44 = vrot.slane %v675_v17, 7  ;;  %v678_v50 = vshll.u32 %v430_v21, 16  ;;  %v1428_v5 = vshll.u32 %v1095_v37, 16 }
  0x78   : > { %1538 = vrot.lane.b32.xlu0 %v1407_v6, %s9529_s30  ;;  %v1277_v14 = vrot.slane %v1275_v31, 4  ;;  %v1280_v51 = vrot.slane %v1278_v34, 5  ;;  %v1432_v54 = vshrl.u32 %v1095_v37, 16  ;;  %v621_v57 = vsel %vm9643_vm11, %v613_v36, %v620_v48  ;;  %v322_v58 = vld [vmem:[#allocation2 + $0x78] sm:$0x1] }
  0x79   : > { %v1084_v53 = vld [vmem:[#allocation2 + $0x74] sm:$0x1]  ;;  %v681_v18 = vrot.slane %v677_v44, 4  ;;  %v9980_v28 = vrot.slane %v1428_v5, 5  ;;  %832 = vst.msk [vmem:[#allocation2 + $0x88] sm:$0xf] %vm280_vm0, %v621_v57  ;;  %v680_v61 = vor.u32 %v678_v50, %v677_v44  ;;  %v595_v36 = vor.u32 %v593_v26, %v9838_v22 }
  0x7a   : > { %v1342_v40 = vshll.u32 %v1084_v53, 16  ;;  %v1281_v10 = vor.u32 %v1280_v51, %v1277_v14  ;;  %v1096_v56 = vld [vmem:[#allocation2 + $0xa4] sm:$0x1]  ;;  %v1434_v60 = vrot.slane %v1432_v54, 4  ;;  %v384_v19 = vld [vmem:[#allocation2 + $0x98] sm:$0x1] }
  0x7b   : > { %v1438_v38 = vshll.u32 %v1096_v56, 16  ;;  %v1081_v62 = vld [vmem:[#allocation2 + $0x68] sm:$0x1]  ;;  %v683_v16 = vshrl.u32 %v431_v42, 16  ;;  %v686_v41 = vshll.u32 %v431_v42, 16  ;;  %v323_v9 = vsel %vm9598_vm5, 0, %v322_v58 }
  0x7c   : > { %v1344_v35 = vrot.slane %v1342_v40, 5  ;;  %v1282_v2 = vrot.slane %v1281_v10, 4  ;;  %v1435_v4 = vor.u32 %v1434_v60, %v9980_v28  ;;  %v1318_v7 = vshll.u32 %v1081_v62, 16  ;;  %v829_v8 = vld [vmem:[#allocation2 + $0x84] sm:$0xf] }
  0x7d   : > { %v1440_v29 = vrot.slane %v1438_v38, 5  ;;  %v830_v13 = vsel %vm9655_vm12, %v612_v55, %v829_v8  ;;  %v9991_v15 = vrot.slane %v683_v16, 7  ;;  %v857_v21 = vld [vmem:[#allocation2 + $0xb4] sm:$0xf]  ;;  %324 = vst [vmem:[#allocation2 + $0x78] sm:$0x1] %v323_v9 }
  0x7e   : > { %v1345_v11 = vsel %vm9663_vm13, %v9936_v39, %v1344_v35  ;;  %v1287_v23 = vsel %vm9663_vm13, %v1282_v2, %v9800_v33  ;;  %v1436_v24 = vrot.slane %v1435_v4, 4  ;;  %831 = vst [vmem:[#allocation2 + $0x84] sm:$0xf] %v830_v13  ;;  %v858_v25 = vsel %vm9655_vm12, %v680_v61, %v857_v21  ;;  %v381_v34 = vld [vmem:[#allocation2 + $0x8c] sm:$0x1] }
  0x7f   : > { %1528 = vrot.lane.b32.xlu1 %v1345_v11, %s9529_s30  ;;  %v1408_v39 = vshrl.u32 %v9938_v47, 16  ;;  %1518 = vrot.lane.b32.xlu2 %v1287_v23, %s9529_s30  ;;  %v688_v17 = vor.u32 %v686_v41, %v9991_v15  ;;  %859 = vst [vmem:[#allocation2 + $0xb4] sm:$0xf] %v858_v25  ;;  %v385_v27 = vsel %vm9605_vm7, 0, %v384_v19  ;;  %v1316_v46 = vrot.slane %v1315_v20, 4 }
  0x80   : > { %v1441_v33 = vsel %vm9663_vm13, %v1436_v24, %v1440_v29  ;;  %v1320_v31 = vrot.slane %v1318_v7, 5  ;;  %386 = vst [vmem:[#allocation2 + $0x98] sm:$0x1] %v385_v27  ;;  %v10012_v6 = vld [vmem:[#allocation2 + $0x4] sm:$0xf]  ;;  %v382_v20 = vsel %vm9605_vm7, 0, %v381_v34 }
  0x81   : > { %1544 = vrot.lane.b32.xlu0 %v1441_v33, %s9529_s30  ;;  %v689_v47 = vsel %vm9643_vm11, %v681_v18, %v688_v17  ;;  %v334_v37 = vld [vmem:[#allocation2 + $0xa8] sm:$0x1]  ;;  %v644_v42 = vshll.u32 %v9899_v59, 16  ;;  %v639_v44 = vrot.slane %v9885_v45, 4  ;;  %383 = vst [vmem:[#allocation2 + $0x8c] sm:$0x1] %v382_v20 }
  0x82   : > { %v1089_v48 = vld [vmem:[#allocation2 + $0x88] sm:$0xf]  ;;  %860 = vst.msk [vmem:[#allocation2 + $0xb8] sm:$0xf] %vm280_vm0, %v689_v47  ;;  %v335_v50 = vsel %vm9598_vm5, 0, %v334_v37  ;;  %v1321_v0 = vsel %vm9663_vm13, %v1316_v46, %v1320_v31  ;;  %v1410_v26 = vrot.slane %v1408_v39, 4 }
  0x83   : > { %v1720_v14 = vrot.slane %v10012_v6, 5  ;;  %336 = vst [vmem:[#allocation2 + $0xa8] sm:$0x1] %v335_v50  ;;  %v1380_v53 = vshll.u32 %v1089_v48, 16  ;;  %v1384_v5 = vshrl.u32 %v1089_v48, 16  ;;  %v622_v60 = vrot.slane %v9968_v30, 4 }
  0x84   : > { %v822_v22 = vld [vmem:[#allocation2 + $0x78] sm:$0xf]  ;;  %v428_v40 = vld [vmem:[%s9616_s29 + $0x68] sm:$0xf]  ;;  %v429_v62 = vld [vmem:[%s9616_s29 + $0x6c] sm:$0xf]  ;;  %v1411_v7 = vor.u32 %v1410_v26, %v9953_v63 }
  0x85   : > { %v1088_v51 = vld [vmem:[#allocation2 + $0x84] sm:$0xf]  ;;  %v823_v54 = vsel %vm9655_vm12, %v595_v36, %v822_v22  ;;  %v10028_v56 = vld [vmem:[#allocation2 + $0x8] sm:$0x1]  ;;  %v658_v61 = vshrl.u32 %v428_v40, 16  ;;  %v661_v16 = vshll.u32 %v428_v40, 16 }
  0x86   : > { %v1371_v45 = vshrl.u32 %v1088_v51, 16  ;;  %v1374_v55 = vshll.u32 %v1088_v51, 16  ;;  %v1100_v57 = vld [vmem:[#allocation2 + $0xb4] sm:$0xf]  ;;  %824 = vst [vmem:[#allocation2 + $0x78] sm:$0xf] %v823_v54 }
  0x87   : > { %1524 = vrot.lane.b32.xlu2 %v1321_v0, %s9529_s30  ;;  %v1467_v18 = vshrl.u32 %v1100_v57, 16  ;;  %v1470_v58 = vshll.u32 %v1100_v57, 16  ;;  %v840_v10 = vld [vmem:[#allocation2 + $0x98] sm:$0x1]  ;;  %v1382_v9 = vrot.slane %v1380_v53, 5  ;;  %v660_v29 = vrot.slane %v658_v61, 7 }
  0x88   : > { %v1373_v19 = vrot.slane %v1371_v45, 4  ;;  %v1376_v35 = vrot.slane %v1374_v55, 5  ;;  %v841_v38 = vsel %vm9598_vm5, %v639_v44, %v840_v10  ;;  %v833_v30 = vld [vmem:[#allocation2 + $0x8c] sm:$0x1]  ;;  %v666_v23 = vshrl.u32 %v429_v62, 16 }
  0x89   : > { %v10034_v41 = vld [vmem:[#allocation2 + $0xb8] sm:$0xf]  ;;  %v1469_v2 = vrot.slane %v1467_v18, 4  ;;  %v1472_v4 = vrot.slane %v1470_v58, 5  ;;  %842 = vst [vmem:[#allocation2 + $0x98] sm:$0x1] %v841_v38  ;;  %v834_v21 = vsel %vm9598_vm5, %v622_v60, %v833_v30  ;;  %v663_v63 = vor.u32 %v661_v16, %v660_v29 }
  0x8a   : > { %v1377_v8 = vor.u32 %v1376_v35, %v1373_v19  ;;  %v1476_v11 = vshll.u32 %v10034_v41, 16  ;;  %v669_v24 = vshll.u32 %v429_v62, 16  ;;  %v850_v25 = vld [vmem:[#allocation2 + $0xa8] sm:$0xf]  ;;  %v1723_v27 = vrot.slane %v10028_v56, 5 }
  0x8b   : > { %v1473_v13 = vor.u32 %v1472_v4, %v1469_v2  ;;  %835 = vst [vmem:[#allocation2 + $0x8c] sm:$0x1] %v834_v21  ;;  %v1386_v31 = vrot.slane %v1384_v5, 4  ;;  %v664_v34 = vrot.slane %v660_v29, 4  ;;  %v10043_v47 = vrot.slane %v666_v23, 7 }
  0x8c   : > { %v1378_v39 = vrot.slane %v1377_v8, 4  ;;  %v10040_v17 = vrot.slane %v1476_v11, 5  ;;  %v851_v20 = vsel %vm9655_vm12, %v663_v63, %v850_v25  ;;  %v331_v44 = vld [vmem:[#allocation2 + $0x9c] sm:$0x1]  ;;  %v1412_v22 = vrot.slane %v1411_v7, 4 }
  0x8d   : > { %v1474_v33 = vrot.slane %v1473_v13, 4  ;;  %v1085_v46 = vld [vmem:[#allocation2 + $0x78] sm:$0xf]  ;;  %v393_v50 = vld [vmem:[#allocation2 + $0xbc] sm:$0x1]  ;;  %v671_v26 = vor.u32 %v669_v24, %v10043_v47  ;;  %v332_v51 = vsel %vm9598_vm5, 0, %v331_v44  ;;  %v1387_v10 = vor.u32 %v1386_v31, %v1382_v9 }
  0x8e   : > { %v1383_v36 = vsel %vm9663_vm13, %v1378_v39, %v1382_v9  ;;  %v1347_v37 = vshrl.u32 %v1085_v46, 16  ;;  %v1350_v48 = vshll.u32 %v1085_v46, 16  ;;  %852 = vst [vmem:[#allocation2 + $0xa8] sm:$0xf] %v851_v20  ;;  %v1722_v45 = vrot.slane %v1720_v14, 4 }
  0x8f   : > { %1534 = vrot.lane.b32.xlu1 %v1383_v36, %s9529_s30  ;;  %v1479_v0 = vsel %vm9663_vm13, %v1474_v33, %v10040_v17  ;;  %333 = vst [vmem:[#allocation2 + $0x9c] sm:$0x1] %v332_v51  ;;  %v672_v55 = vsel %vm9643_vm11, %v664_v34, %v671_v26  ;;  %v394_v57 = vsel %vm9605_vm7, 0, %v393_v50  ;;  %v390_v56 = vld [vmem:[#allocation2 + $0xb0] sm:$0x1]  ;;  %v646_v16 = vor.u32 %v644_v42, %v9915_v12 }
  0x90   : > { %1550 = vrot.lane.b32.xlu0 %v1479_v0, %s9529_s30  ;;  %v1349_v53 = vrot.slane %v1347_v37, 4  ;;  %v1352_v5 = vrot.slane %v1350_v48, 5  ;;  %v1093_v54 = vld [vmem:[#allocation2 + $0x98] sm:$0x1]  ;;  %853 = vst.msk [vmem:[#allocation2 + $0xac] sm:$0xf] %vm280_vm0, %v672_v55  ;;  %v1724_v4 = vsel %vm10065_vm1, %v1722_v45, %v1723_v27 }
  0x91   : > { %v1414_v40 = vshll.u32 %v1093_v54, 16  ;;  %395 = vst [vmem:[#allocation2 + $0xbc] sm:$0x1] %v394_v57  ;;  %v391_v19 = vsel %vm9605_vm7, 0, %v390_v56  ;;  %v1625_v62 = vld [vmem:[#allocation2 + $0x18] sm:$0xe] }
  0x92   : > { %v1353_v18 = vor.u32 %v1352_v5, %v1349_v53  ;;  %v1090_v61 = vld [vmem:[#allocation2 + $0x8c] sm:$0x1]  ;;  %392 = vst [vmem:[#allocation2 + $0xb0] sm:$0x1] %v391_v19  ;;  %v10079_v7 = vld [vmem:[#allocation2 + $0x1c] sm:$0xf] }
  0x93   : > { %v1416_v60 = vrot.slane %v1414_v40, 5  ;;  %v1390_v38 = vshll.u32 %v1090_v61, 16  ;;  %v1388_v9 = vrot.slane %v1387_v10, 4  ;;  %v690_v30 = vrot.slane %v9991_v15, 4  ;;  %v10093_v63 = vld [vmem:[#allocation2 + $0x28] sm:$0xf] }
  0x94   : > { %v1354_v35 = vrot.slane %v1353_v18, 4  ;;  %v1480_v59 = vshrl.u32 %v10034_v41, 16  ;;  %v9147_v29 = vrot.slane %v1625_v62, 9  ;;  %v673_v15 = vrot.slane %v10043_v47, 4  ;;  %v992_v36 = vld [vmem:[#allocation2 + $0x4] sm:$0xf] }
  0x95   : > { %v1417_v2 = vsel %vm9663_vm13, %v1412_v22, %v1416_v60  ;;  %v1097_v11 = vld [vmem:[#allocation2 + $0xa8] sm:$0xf]  ;;  %v1392_v21 = vrot.slane %v1390_v38, 5  ;;  %v1493_v33 = vpop.permute.xlu0 %1492  ;;  %v1741_v0 = vrot.slane %v10093_v63, 5  ;;  %v1630_v26 = vld [vmem:[#allocation2 + $0x2c] sm:$0x1] }
  0x96   : > { %v1359_v8 = vsel %vm9663_vm13, %v1354_v35, %v9891_v52  ;;  %v1443_v12 = vshrl.u32 %v1097_v11, 16  ;;  %v1446_v42 = vshll.u32 %v1097_v11, 16  ;;  %v843_v13 = vld [vmem:[#allocation2 + $0x9c] sm:$0xf]  ;;  %v1734_v52 = vrot.slane %v10079_v7, 5 }
  0x97   : > { %1530 = vrot.lane.b32.xlu2 %v1359_v8, %s9529_s30  ;;  %1540 = vrot.lane.b32.xlu1 %v1417_v2, %s9529_s30  ;;  %v844_v23 = vsel %vm9655_vm12, %v646_v16, %v843_v13  ;;  %v1098_v41 = vld [vmem:[#allocation2 + $0xac] sm:$0xf]  ;;  %v1393_v37 = vsel %vm9663_vm13, %v1388_v9, %v1392_v21  ;;  %v1482_v47 = vrot.slane %v1480_v59, 4  ;;  %1024 = vst.msk [vmem:[#allocation4 + $0x4] sm:$0xf] %vm280_vm0, %v992_v36  ;;  %v1743_v45 = vrot.slane %v1741_v0, 4 }
  0x98   : > { %1832 = vrot.lane.b32.xlu0 %v1724_v4, %s9530_s8  ;;  %v1445_v24 = vrot.slane %v1443_v12, 4  ;;  %v1448_v25 = vrot.slane %v1446_v42, 5  ;;  %845 = vst [vmem:[#allocation2 + $0x9c] sm:$0xf] %v844_v23  ;;  %v1452_v39 = vshll.u32 %v1098_v41, 16  ;;  %v1735_v50 = vsel %vm10065_vm1, %v9147_v29, %v1734_v52 }
  0x99   : > { %v861_v27 = vld [vmem:[#allocation2 + $0xbc] sm:$0x1]  ;;  %v854_v34 = vld [vmem:[#allocation2 + $0xb0] sm:$0x1]  ;;  %v1456_v22 = vshrl.u32 %v1098_v41, 16  ;;  %v1483_v5 = vor.u32 %v1482_v47, %v10040_v17  ;;  %v1744_v55 = vrot.slane %v1630_v26, 5 }
  0x9a   : > { %v1449_v46 = vor.u32 %v1448_v25, %v1445_v24  ;;  %v862_v31 = vsel %vm9598_vm5, %v690_v30, %v861_v27  ;;  %v1454_v48 = vrot.slane %v1452_v39, 5  ;;  %v855_v20 = vsel %vm9598_vm5, %v673_v15, %v854_v34  ;;  %1588 = vst.msk [vmem:[#allocation4 + $0x4] sm:$0xf] %vm1586_vm6, %v1493_v33  ;;  %v991_v10 = vld [vmem:[#allocation2] sm:$0xf] }
  0x9b   : > { %863 = vst [vmem:[#allocation2 + $0xbc] sm:$0x1] %v862_v31  ;;  %v1458_v57 = vrot.slane %v1456_v22, 4  ;;  %v995_v60 = vld [vmem:[#allocation2 + $0x18] sm:$0xf]  ;;  %v1484_v62 = vrot.slane %v1483_v5, 4  ;;  %v1745_v4 = vsel %vm10065_vm1, %v1743_v45, %v1744_v55 }
  0x9c   : > { %v1450_v44 = vrot.slane %v1449_v46, 4  ;;  %856 = vst [vmem:[#allocation2 + $0xb0] sm:$0x1] %v855_v20  ;;  %v1622_v38 = vld [vmem:[#allocation2 + $0xc] sm:$0xe]  ;;  %vm1926_vm9 = vcmask 93248  }
  0x9d   : > { %v1491_v18 = vpop.permute.xlu0 %1490  ;;  %1023 = vst.msk [vmem:[#allocation4] sm:$0xf] %vm280_vm0, %v991_v10  ;;  %v10120_v8 = vld [vmem:[#allocation2 + $0x10] sm:$0xf]  ;;  %v1634_v9 = vld [vmem:[#allocation2 + $0x3c] sm:$0xe]  ;;  %v1459_v12 = vor.u32 %v1458_v57, %v1454_v48 }
  0x9e   : > { %v1455_v51 = vsel %vm9663_vm13, %v1450_v44, %v1454_v48  ;;  %1587 = vst.msk [vmem:[#allocation4] sm:$0xf] %vm1586_vm6, %v1491_v18  ;;  %v10123_v30 = vld [vmem:[#allocation2 + $0x40] sm:$0xf]  ;;  %v9146_v13 = vrot.slane %v1622_v38, 9  ;;  %v1727_v23 = vrot.slane %v10120_v8, 5 }
  0x9f   : > { %1536 = vrot.lane.b32.xlu2 %v1393_v37, %s9529_s30  ;;  %1546 = vrot.lane.b32.xlu1 %v1455_v51, %s9529_s30  ;;  %v1094_v53 = vld [vmem:[#allocation2 + $0x9c] sm:$0xf]  ;;  %1027 = vst.msk [vmem:[#allocation4 + $0x10] sm:$0xf] %vm280_vm0, %v995_v60  ;;  %v9150_v15 = vrot.slane %v1634_v9, 9  ;;  %v1755_v41 = vrot.slane %v10123_v30, 5 }
  0xa0   : > { %1838 = vrot.lane.b32.xlu0 %v1735_v50, %s9530_s8  ;;  %v1419_v54 = vshrl.u32 %v1094_v53, 16  ;;  %v1422_v40 = vshll.u32 %v1094_v53, 16  ;;  %v10136_v24 = vld [vmem:[#allocation2 + $0x4c] sm:$0xf]  ;;  %v997_v39 = vld [vmem:[#allocation2 + $0x24] sm:$0xf]  ;;  %v1728_v48 = vsel %vm10065_vm1, %v9146_v13, %v1727_v23 }
  0xa1   : > { %v1499_v56 = vpop.permute.xlu2 %1498  ;;  %v996_v27 = vld [vmem:[#allocation2 + $0x1c] sm:$0xf]  ;;  %v1460_v33 = vrot.slane %v1459_v12, 4  ;;  %1029 = vst.msk [vmem:[#allocation4 + $0x18] sm:$0xf] %vm280_vm0, %v997_v39  ;;  %v1756_v36 = vsel %vm10065_vm1, %v9150_v15, %v1755_v41  ;;  %v1762_v37 = vrot.slane %v10136_v24, 5 }
  0xa2   : > { %v1421_v61 = vrot.slane %v1419_v54, 4  ;;  %v1424_v19 = vrot.slane %v1422_v40, 5  ;;  %v1102_v35 = vld [vmem:[#allocation2 + $0xbc] sm:$0x1]  ;;  %1591 = vst.msk [vmem:[#allocation4 + $0x10] sm:$0xf] %vm1586_vm6, %v1499_v56 }
  0xa3   : > { %v1486_v16 = vshll.u32 %v1102_v35, 16  ;;  %v1099_v17 = vld [vmem:[#allocation2 + $0xb0] sm:$0x1]  ;;  %v993_v34 = vld [vmem:[#allocation2 + $0xc] sm:$0xf]  ;;  %v1764_v22 = vrot.slane %v1762_v37, 4 }
  0xa4   : > { %v1425_v2 = vor.u32 %v1424_v19, %v1421_v61  ;;  %v1462_v42 = vshll.u32 %v1099_v17, 16  ;;  %1028 = vst.msk [vmem:[#allocation4 + $0x14] sm:$0xf] %vm280_vm0, %v996_v27  ;;  %v1639_v47 = vld [vmem:[#allocation2 + $0x50] sm:$0x1]  ;;  %v1736_v51 = vrot.slane %v1734_v52, 4 }
  0xa5   : > { %v1488_v11 = vrot.slane %v1486_v16, 5  ;;  %v1627_v44 = vld [vmem:[#allocation2 + $0x20] sm:$0x1]  ;;  %1025 = vst.msk [vmem:[#allocation4 + $0x8] sm:$0xf] %vm280_vm0, %v993_v34  ;;  %v1765_v26 = vrot.slane %v1639_v47, 5 }
  0xa6   : > { %v1426_v59 = vrot.slane %v1425_v2, 4  ;;  %v1503_v25 = vpop.permute.xlu0 %1502  ;;  %v1464_v46 = vrot.slane %v1462_v42, 5  ;;  %v1619_v50 = vld [vmem:[#allocation2] sm:$0xe]  ;;  %v1737_v53 = vrot.slane %v1627_v44, 5  ;;  %v1729_v2 = vrot.slane %v1727_v23, 4 }
  0xa7   : > { %v1489_v29 = vsel %vm9663_vm13, %v1484_v62, %v1488_v11  ;;  %1593 = vst.msk [vmem:[#allocation4 + $0x18] sm:$0xf] %vm1586_vm6, %v1503_v25  ;;  %v1000_v5 = vld [vmem:[#allocation2 + $0x34] sm:$0xf]  ;;  %v999_v40 = vld [vmem:[#allocation2 + $0x30] sm:$0xf]  ;;  %v1766_v18 = vsel %vm10065_vm1, %v1764_v22, %v1765_v26 }
  0xa8   : > { %1844 = vrot.lane.b32.xlu0 %v1745_v4, %s9530_s8  ;;  %v1431_v21 = vsel %vm9663_vm13, %v1426_v59, %v9980_v28  ;;  %1552 = vrot.lane.b32.xlu1 %v1489_v29, %s9529_s30  ;;  %v1495_v28 = vpop.permute.xlu1 %1494  ;;  %v1465_v20 = vsel %vm9663_vm13, %v1460_v33, %v1464_v46  ;;  %v9145_v45 = vrot.slane %v1619_v50, 9  ;;  %1032 = vst.msk [vmem:[#allocation4 + $0x24] sm:$0xf] %vm280_vm0, %v1000_v5  ;;  %v994_v55 = vld [vmem:[#allocation2 + $0x10] sm:$0xf]  ;;  %v1757_v27 = vrot.slane %v1755_v41, 4 }
  0xa9   : > { %1542 = vrot.lane.b32.xlu2 %v1431_v21, %s9529_s30  ;;  %1589 = vst.msk [vmem:[#allocation4 + $0x8] sm:$0xf] %vm1586_vm6, %v1495_v28  ;;  %v1738_v7 = vsel %vm10065_vm1, %v1736_v51, %v1737_v53  ;;  %v1643_v52 = vld [vmem:[#allocation2 + $0x60] sm:$0xe]  ;;  %v10167_v10 = vld [vmem:[#allocation2 + $0x64] sm:$0xf] }
  0xaa   : > { %v1501_v31 = vpop.permute.xlu2 %1500  ;;  %1031 = vst.msk [vmem:[#allocation4 + $0x20] sm:$0xf] %vm280_vm0, %v999_v40  ;;  %v1721_v56 = vsel %vm10065_vm1, %v9145_v45, %v1720_v14  ;;  %v1631_v60 = vld [vmem:[#allocation2 + $0x30] sm:$0xe]  ;;  %v10174_v61 = vld [vmem:[#allocation2 + $0x34] sm:$0xf] }
  0xab   : > { %1592 = vst.msk [vmem:[#allocation4 + $0x14] sm:$0xf] %vm1586_vm6, %v1501_v31  ;;  %v1624_v19 = vld [vmem:[#allocation2 + $0x14] sm:$0x1]  ;;  %v9153_v35 = vrot.slane %v1643_v52, 9  ;;  %v1776_v38 = vrot.slane %v10167_v10, 5 }
  0xac   : > { %1026 = vst.msk [vmem:[#allocation4 + $0xc] sm:$0xf] %vm280_vm0, %v994_v55  ;;  %v9149_v62 = vrot.slane %v1631_v60, 9  ;;  %v1748_v6 = vrot.slane %v10174_v61, 5  ;;  %v10182_v16 = vld [vmem:[#allocation2 + $0x70] sm:$0xf] }
  0xad   : > { %v1003_v14 = vld [vmem:[#allocation2 + $0x48] sm:$0xf]  ;;  %v1730_v4 = vrot.slane %v1624_v19, 5  ;;  %v1002_v8 = vld [vmem:[#allocation2 + $0x40] sm:$0xf]  ;;  %v1777_v59 = vsel %vm10065_vm1, %v9153_v35, %v1776_v38  ;;  %v1783_v12 = vrot.slane %v10182_v16, 5 }
  0xae   : > { %v1509_v54 = vpop.permute.xlu0 %1508  ;;  %1035 = vst.msk [vmem:[#allocation4 + $0x30] sm:$0xf] %vm280_vm0, %v1003_v14  ;;  %v998_v11 = vld [vmem:[#allocation2 + $0x28] sm:$0xf]  ;;  %v1749_v29 = vsel %vm10065_vm1, %v9149_v62, %v1748_v6  ;;  %v1648_v13 = vld [vmem:[#allocation2 + $0x74] sm:$0x1] }
  0xaf   : > { %1596 = vst.msk [vmem:[#allocation4 + $0x24] sm:$0xf] %vm1586_vm6, %v1509_v54  ;;  %v1731_v21 = vsel %vm10065_vm1, %v1729_v2, %v1730_v4  ;;  %v1636_v23 = vld [vmem:[#allocation2 + $0x44] sm:$0x1]  ;;  %v1628_v15 = vld [vmem:[#allocation2 + $0x24] sm:$0xe] }
  0xb0   : > { %1850 = vrot.lane.b32.xlu0 %v1756_v36, %s9530_s8  ;;  %1834 = vrot.lane.b32.xlu1 %v1728_v48, %s9530_s8  ;;  %v1497_v57 = vpop.permute.xlu1 %1496  ;;  %1034 = vst.msk [vmem:[#allocation4 + $0x2c] sm:$0xf] %vm280_vm0, %v1002_v8  ;;  %v1785_v25 = vrot.slane %v1783_v12, 4  ;;  %v1786_v39 = vrot.slane %v1648_v13, 5  ;;  %v1758_v33 = vrot.slane %v1636_v23, 5  ;;  %v9148_v28 = vrot.slane %v1628_v15, 9 }
  0xb1   : > { %1548 = vrot.lane.b32.xlu2 %v1465_v20, %s9529_s30  ;;  %1590 = vst.msk [vmem:[#allocation4 + $0xc] sm:$0xf] %vm1586_vm6, %v1497_v57  ;;  %v1006_v46 = vld [vmem:[#allocation2 + $0x58] sm:$0xf]  ;;  %v1005_v34 = vld [vmem:[#allocation2 + $0x54] sm:$0xf] }
  0xb2   : > { %1030 = vst.msk [vmem:[#allocation4 + $0x1c] sm:$0xf] %vm280_vm0, %v998_v11  ;;  %v1001_v48 = vld [vmem:[#allocation2 + $0x3c] sm:$0xf]  ;;  %v1787_v47 = vsel %vm10065_vm1, %v1785_v25, %v1786_v39  ;;  %v1640_v20 = vld [vmem:[#allocation2 + $0x54] sm:$0xe]  ;;  %v1759_v30 = vsel %vm10065_vm1, %v1757_v27, %v1758_v33  ;;  %v1742_v22 = vsel %vm10065_vm1, %v9148_v28, %v1741_v0 }
  0xb3   : > { %1038 = vst.msk [vmem:[#allocation4 + $0x3c] sm:$0xf] %vm280_vm0, %v1006_v46  ;;  %v10210_v44 = vld [vmem:[#allocation2 + $0x58] sm:$0xf]  ;;  %v1652_v41 = vld [vmem:[#allocation2 + $0x84] sm:$0xe] }
  0xb4   : > { %v10215_v50 = vld [vmem:[#allocation2 + $0x88] sm:$0xf]  ;;  %1037 = vst.msk [vmem:[#allocation4 + $0x38] sm:$0xf] %vm280_vm0, %v1005_v34  ;;  %v1633_v51 = vld [vmem:[#allocation2 + $0x38] sm:$0x1] }
  0xb5   : > { %1033 = vst.msk [vmem:[#allocation4 + $0x28] sm:$0xf] %vm280_vm0, %v1001_v48  ;;  %v9152_v53 = vrot.slane %v1640_v20, 9  ;;  %v1769_v5 = vrot.slane %v10210_v44, 5  ;;  %v9156_v54 = vrot.slane %v1652_v41, 9  ;;  %v1797_v40 = vrot.slane %v10215_v50, 5 }
  0xb6   : > { %v1515_v17 = vpop.permute.xlu0 %1514  ;;  %v10228_v63 = vld [vmem:[#allocation2 + $0x94] sm:$0xf]  ;;  %v1009_v0 = vld [vmem:[#allocation2 + $0x6c] sm:$0xf]  ;;  %v1008_v45 = vld [vmem:[#allocation2 + $0x64] sm:$0xf] }
  0xb7   : > { %1599 = vst.msk [vmem:[#allocation4 + $0x30] sm:$0xf] %vm1586_vm6, %v1515_v17  ;;  %v1004_v55 = vld [vmem:[#allocation2 + $0x4c] sm:$0xf]  ;;  %v1750_v57 = vrot.slane %v1748_v6, 4  ;;  %v1804_v52 = vrot.slane %v10228_v63, 5  ;;  %v1770_v60 = vsel %vm10065_vm1, %v9152_v53, %v1769_v5 }
  0xb8   : > { %1856 = vrot.lane.b32.xlu0 %v1766_v18, %s9530_s8  ;;  %1840 = vrot.lane.b32.xlu1 %v1738_v7, %s9530_s8  ;;  %v1751_v18 = vrot.slane %v1633_v51, 5  ;;  %1041 = vst.msk [vmem:[#allocation4 + $0x48] sm:$0xf] %vm280_vm0, %v1009_v0  ;;  %v1798_v7 = vsel %vm10065_vm1, %v9156_v54, %v1797_v40  ;;  %v1645_v61 = vld [vmem:[#allocation2 + $0x68] sm:$0x1]  ;;  %v1778_v6 = vrot.slane %v1776_v38, 4 }
  0xb9   : > { %1830 = vrot.lane.b32.xlu2 %v1721_v56, %s9530_s8  ;;  %1040 = vst.msk [vmem:[#allocation4 + $0x44] sm:$0xf] %vm280_vm0, %v1008_v45  ;;  %v1657_v19 = vld [vmem:[#allocation2 + $0x98] sm:$0x1]  ;;  %v1637_v62 = vld [vmem:[#allocation2 + $0x48] sm:$0xe] }
  0xba   : > { %1036 = vst.msk [vmem:[#allocation4 + $0x34] sm:$0xf] %vm280_vm0, %v1004_v55  ;;  %v1752_v35 = vsel %vm10065_vm1, %v1750_v57, %v1751_v18  ;;  %v1779_v14 = vrot.slane %v1645_v61, 5  ;;  %v1806_v17 = vrot.slane %v1804_v52, 4  ;;  %v1807_v2 = vrot.slane %v1657_v19, 5  ;;  %s9538_s30 = smov 48  }
  0xbb   : > { %v1012_v4 = vld [vmem:[#allocation2 + $0x7c] sm:$0xf]  ;;  %v1011_v8 = vld [vmem:[#allocation2 + $0x78] sm:$0xf]  ;;  %v9151_v11 = vrot.slane %v1637_v62, 9  ;;  %v1771_v28 = vrot.slane %v1769_v5, 4 }
  0xbc   : > { %v1507_v9 = vpop.permute.xlu2 %1506  ;;  %1044 = vst.msk [vmem:[#allocation4 + $0x54] sm:$0xf] %vm280_vm0, %v1012_v4  ;;  %v1649_v10 = vld [vmem:[#allocation2 + $0x78] sm:$0xe]  ;;  %v1780_v38 = vsel %vm10065_vm1, %v1778_v6, %v1779_v14  ;;  %v10260_v13 = vld [vmem:[#allocation2 + $0xac] sm:$0xf] }
  0xbd   : > { %1595 = vst.msk [vmem:[#allocation4 + $0x20] sm:$0xf] %vm1586_vm6, %v1507_v9  ;;  %v1505_v42 = vpop.permute.xlu1 %1504  ;;  %v1007_v9 = vld [vmem:[#allocation2 + $0x60] sm:$0xf]  ;;  %v1763_v23 = vsel %vm10065_vm1, %v9151_v11, %v1762_v37  ;;  %v1642_v15 = vld [vmem:[#allocation2 + $0x5c] sm:$0x1] }
  0xbe   : > { %1594 = vst.msk [vmem:[#allocation4 + $0x1c] sm:$0xf] %vm1586_vm6, %v1505_v42  ;;  %v10258_v42 = vld [vmem:[#allocation2 + $0x7c] sm:$0xf]  ;;  %v9155_v25 = vrot.slane %v1649_v10, 9  ;;  %v1818_v46 = vrot.slane %v10260_v13, 5 }
  0xbf   : > { %1043 = vst.msk [vmem:[#allocation4 + $0x50] sm:$0xf] %vm280_vm0, %v1011_v8  ;;  %v1790_v39 = vrot.slane %v10258_v42, 5  ;;  %v1015_v24 = vld [vmem:[#allocation2 + $0x90] sm:$0xf]  ;;  %v1772_v34 = vrot.slane %v1642_v15, 5 }
  0xc0   : > { %1862 = vrot.lane.b32.xlu0 %v1777_v59, %s9530_s8  ;;  %1846 = vrot.lane.b32.xlu1 %v1749_v29, %s9530_s8  ;;  %v1808_v59 = vsel %vm10065_vm1, %v1806_v17, %v1807_v2  ;;  %1039 = vst.msk [vmem:[#allocation4 + $0x40] sm:$0xf] %vm280_vm0, %v1007_v9  ;;  %v1661_v29 = vld [vmem:[#allocation2 + $0xa8] sm:$0xe]  ;;  %v1010_v48 = vld [vmem:[#allocation2 + $0x70] sm:$0xf] }
  0xc1   : > { %1836 = vrot.lane.b32.xlu2 %v1731_v21, %s9530_s8  ;;  %v9159_v33 = vrot.slane %v1661_v29, 9  ;;  %v1014_v37 = vld [vmem:[#allocation2 + $0x88] sm:$0xf]  ;;  %1047 = vst.msk [vmem:[#allocation4 + $0x60] sm:$0xf] %vm280_vm0, %v1015_v24  ;;  %v1791_v44 = vsel %vm10065_vm1, %v9155_v25, %v1790_v39  ;;  %v1799_v51 = vrot.slane %v1797_v40, 4 }
  0xc2   : > { %v1521_v31 = vpop.permute.xlu0 %1520  ;;  %1046 = vst.msk [vmem:[#allocation4 + $0x5c] sm:$0xf] %vm280_vm0, %v1014_v37  ;;  %v1666_v41 = vld [vmem:[#allocation2 + $0xbc] sm:$0x1]  ;;  %v1018_v45 = vld [vmem:[#allocation2 + $0xa0] sm:$0xf] }
  0xc3   : > { %1602 = vst.msk [vmem:[#allocation4 + $0x3c] sm:$0xf] %vm1586_vm6, %v1521_v31  ;;  %v10271_v31 = vld [vmem:[#allocation2 + $0xb8] sm:$0xf]  ;;  %v1828_v0 = vrot.slane %v1666_v41, 5  ;;  %v1792_v16 = vrot.slane %v1790_v39, 4 }
  0xc4   : > { %v1513_v36 = vpop.permute.xlu2 %1512  ;;  %v1825_v20 = vrot.slane %v10271_v31, 5  ;;  %1042 = vst.msk [vmem:[#allocation4 + $0x4c] sm:$0xf] %vm280_vm0, %v1010_v48  ;;  %v1017_v55 = vld [vmem:[#allocation2 + $0x9c] sm:$0xf]  ;;  %v1820_v42 = vrot.slane %v1818_v46, 4 }
  0xc5   : > { %1598 = vst.msk [vmem:[#allocation4 + $0x2c] sm:$0xf] %vm1586_vm6, %v1513_v36  ;;  %v1013_v18 = vld [vmem:[#allocation2 + $0x84] sm:$0xf]  ;;  %v1659_v61 = vld [vmem:[#allocation2 + $0xa0] sm:$0xf] }
  0xc6   : > { %v1827_v54 = vrot.slane %v1825_v20, 4  ;;  %1050 = vst.msk [vmem:[#allocation4 + $0x6c] sm:$0xf] %vm280_vm0, %v1018_v45  ;;  %v1651_v19 = vld [vmem:[#allocation2 + $0x80] sm:$0x1]  ;;  %v1811_v62 = vrot.slane %v1659_v61, 5 }
  0xc7   : > { %v1511_v26 = vpop.permute.xlu1 %1510  ;;  %1049 = vst.msk [vmem:[#allocation4 + $0x68] sm:$0xf] %vm280_vm0, %v1017_v55  ;;  %v1021_v14 = vld [vmem:[#allocation2 + $0xb4] sm:$0xf]  ;;  %v1020_v17 = vld [vmem:[#allocation2 + $0xac] sm:$0xf] }
  0xc8   : > { %1868 = vrot.lane.b32.xlu0 %v1787_v47, %s9530_s8  ;;  %1597 = vst.msk [vmem:[#allocation4 + $0x28] sm:$0xf] %vm1586_vm6, %v1511_v26  ;;  %1852 = vrot.lane.b32.xlu1 %v1759_v30, %s9530_s8  ;;  %v1819_v47 = vsel %vm10065_vm1, %v9159_v33, %v1818_v46  ;;  %v1654_v30 = vld [vmem:[#allocation2 + $0x8c] sm:$0x1]  ;;  %v1646_v26 = vld [vmem:[#allocation2 + $0x6c] sm:$0xe]  ;;  %v1829_v50 = vsel %vm10065_vm1, %v1827_v54, %v1828_v0 }
  0xc9   : > { %1842 = vrot.lane.b32.xlu2 %v1742_v22, %s9530_s8  ;;  %v1773_v22 = vsel %vm10065_vm1, %v1771_v28, %v1772_v34  ;;  %v1800_v53 = vrot.slane %v1654_v30, 5  ;;  %v9154_v57 = vrot.slane %v1646_v26, 9  ;;  %1045 = vst.msk [vmem:[#allocation4 + $0x58] sm:$0xf] %vm280_vm0, %v1013_v18  ;;  %v1793_v2 = vrot.slane %v1651_v19, 5 }
  0xca   : > { %1053 = vst.msk [vmem:[#allocation4 + $0x78] sm:$0xf] %vm280_vm0, %v1021_v14  ;;  %v1961_v4 = vld [vmem:[#allocation2 + $0x18] sm:$0xf]  ;;  %v1663_v11 = vld [vmem:[#allocation2 + $0xb0] sm:$0x1] }
  0xcb   : > { %v1801_v40 = vsel %vm10065_vm1, %v1799_v51, %v1800_v53  ;;  %1052 = vst.msk [vmem:[#allocation4 + $0x74] sm:$0xf] %vm280_vm0, %v1020_v17  ;;  %v1794_v9 = vsel %vm10065_vm1, %v1792_v16, %v1793_v2  ;;  %v1821_v29 = vrot.slane %v1663_v11, 5  ;;  %v1019_v15 = vld [vmem:[#allocation2 + $0xa8] sm:$0xf]  ;;  %v1813_v46 = vrot.slane %v1811_v62, 4 }
  0xcc   : > { %v1964_v25 = vld [vmem:[#allocation2 + $0x28] sm:$0xf]  ;;  %1051 = vst.msk [vmem:[#allocation4 + $0x70] sm:$0xf] %vm280_vm0, %v1019_v15  ;;  %v1660_v13 = vld [vmem:[#allocation2 + $0xa4] sm:$0x1] }
  0xcd   : > { %v1527_v56 = vpop.permute.xlu0 %1526  ;;  %v1822_v39 = vsel %vm10065_vm1, %v1820_v42, %v1821_v29  ;;  %v1814_v24 = vrot.slane %v1660_v13, 5  ;;  %v1022_v37 = vld [vmem:[#allocation2 + $0xb8] sm:$0xf]  ;;  %v1967_v28 = vld [vmem:[#allocation2 + $0x3c] sm:$0xf]  ;;  %vm2680_vm10 = vcmask 158848  }
  0xce   : > { %1605 = vst.msk [vmem:[#allocation4 + $0x48] sm:$0xf] %vm1586_vm6, %v1527_v56  ;;  %v1784_v56 = vsel %vm10065_vm1, %v9154_v57, %v1783_v12  ;;  %v1016_v12 = vld [vmem:[#allocation2 + $0x94] sm:$0xf]  ;;  %v1959_v63 = vld [vmem:[#allocation2 + $0xc] sm:$0xf] }
  0xcf   : > { %1048 = vst.msk [vmem:[#allocation4 + $0x64] sm:$0xf] %vm280_vm0, %v1016_v12  ;;  %v1664_v34 = vld [vmem:[#allocation2 + $0xb4] sm:$0xe]  ;;  %v1970_v30 = vld [vmem:[#allocation2 + $0x4c] sm:$0xf] }
  0xd0   : > { %1874 = vrot.lane.b32.xlu0 %v1798_v7, %s9530_s8  ;;  %1858 = vrot.lane.b32.xlu1 %v1770_v60, %s9530_s8  ;;  %v1658_v60 = vld [vmem:[#allocation2 + $0x9c] sm:$0xe]  ;;  %1054 = vst.msk [vmem:[#allocation4 + $0x7c] sm:$0xf] %vm280_vm0, %v1022_v37  ;;  %v1973_v31 = vld [vmem:[#allocation2 + $0x60] sm:$0xf] }
  0xd1   : > { %1848 = vrot.lane.b32.xlu2 %v1752_v35, %s9530_s8  ;;  %v9158_v35 = vrot.slane %v1658_v60, 9  ;;  %v1962_v41 = vld [vmem:[#allocation2 + $0x1c] sm:$0xf]  ;;  %v1960_v54 = vld [vmem:[#allocation2 + $0x10] sm:$0xf]  ;;  %vm4327_vm14 = vcmask 1041408  }
  0xd2   : > { %v1976_v55 = vld [vmem:[#allocation2 + $0x70] sm:$0xf]  ;;  %v1968_v57 = vld [vmem:[#allocation2 + $0x40] sm:$0xf]  ;;  %v1963_v18 = vld [vmem:[#allocation2 + $0x24] sm:$0xf] }
  0xd3   : > { %v1812_v8 = vsel %vm10065_vm1, %v9158_v35, %v1811_v62  ;;  %v1971_v60 = vld [vmem:[#allocation2 + $0x54] sm:$0xf]  ;;  %v340_v19 = vld [vmem:[#allocation2 + $0xc0] sm:$0x1]  ;;  %v10391_v43 = vld [vmem:[#allocation2 + $0x10] sm:$0xf] }
  0xd4   : > { %v1966_v61 = vld [vmem:[#allocation2 + $0x34] sm:$0xf]  ;;  %v341_v35 = vsel %vm9598_vm5, 0, %v340_v19  ;;  %v433_v37 = vld [vmem:[%s9616_s29 + $0x7c] sm:$0xf]  ;;  %vm4109_vm15 = vcmask 290048  }
  0xd5   : > { %342 = vst [vmem:[#allocation2 + $0xc0] sm:$0x1] %v341_v35  ;;  %v1982_v2 = vld [vmem:[#allocation2 + $0x94] sm:$0xf]  ;;  %v1983_v19 = vld [vmem:[#allocation2 + $0x9c] sm:$0xf] }
  0xd6   : > { %v1517_v21 = vpop.permute.xlu1 %1516  ;;  %v1978_v35 = vld [vmem:[#allocation2 + $0x7c] sm:$0xf] }
  0xd7   : > { %1600 = vst.msk [vmem:[#allocation4 + $0x34] sm:$0xf] %vm1586_vm6, %v1517_v21 }
  0xd8   : > { %1880 = vrot.lane.b32.xlu0 %v1808_v59, %s9530_s8  ;;  %1864 = vrot.lane.b32.xlu1 %v1780_v38, %s9530_s8  ;;  %v1655_v59 = vld [vmem:[#allocation2 + $0x90] sm:$0xe] }
  0xd9   : > { %v1519_v27 = vpop.permute.xlu2 %1518  ;;  %1854 = vrot.lane.b32.xlu2 %v1763_v23, %s9530_s8  ;;  %v9157_v21 = vrot.slane %v1655_v59, 9 }
  0xda   : > { %1601 = vst.msk [vmem:[#allocation4 + $0x38] sm:$0xf] %vm1586_vm6, %v1519_v27 }
  0xdb   : > { %v1533_v36 = vpop.permute.xlu0 %1532  ;;  %v1805_v27 = vsel %vm10065_vm1, %v9157_v21, %v1804_v52  ;;  %v1815_v52 = vsel %vm10065_vm1, %v1813_v46, %v1814_v24  ;;  %v2156_v24 = vld [vmem:[#allocation2 + $0x1c] sm:$0xf] }
  0xdc   : > { %1608 = vst.msk [vmem:[#allocation4 + $0x54] sm:$0xf] %vm1586_vm6, %v1533_v36  ;;  %v864_v59 = vld [vmem:[#allocation2 + $0xc0] sm:$0xf] }
  0xe0   : > { %1886 = vrot.lane.b32.xlu0 %v1819_v47, %s9530_s8  ;;  %1870 = vrot.lane.b32.xlu1 %v1791_v44, %s9530_s8  ;;  %v9160_v47 = vrot.slane %v1664_v34, 9 }
  0xe1   : > { %v1525_v5 = vpop.permute.xlu2 %1524  ;;  %1860 = vrot.lane.b32.xlu2 %v1773_v22, %s9530_s8 }
  0xe2   : > { %1604 = vst.msk [vmem:[#allocation4 + $0x44] sm:$0xf] %vm1586_vm6, %v1525_v5  ;;  %v1826_v22 = vsel %vm10065_vm1, %v9160_v47, %v1825_v20  ;;  %v1965_v5 = vld [vmem:[#allocation2 + $0x30] sm:$0xf]  ;;  %v2234_v47 = vshll.u32 %v2156_v24, 16 }
  0xe6   : > { %v1523_v7 = vpop.permute.xlu1 %1522 }
  0xe7   : > { %1603 = vst.msk [vmem:[#allocation4 + $0x40] sm:$0xf] %vm1586_vm6, %v1523_v7 }
  0xe8   : > { %1892 = vrot.lane.b32.xlu0 %v1829_v50, %s9530_s8  ;;  %1876 = vrot.lane.b32.xlu1 %v1801_v40, %s9530_s8 }
  0xe9   : > { %1866 = vrot.lane.b32.xlu2 %v1784_v56, %s9530_s8  ;;  %v1979_v56 = vld [vmem:[#allocation2 + $0x84] sm:$0xf] }
  0xea   : > { %v1539_v6 = vpop.permute.xlu0 %1538 }
  0xeb   : > { %1611 = vst.msk [vmem:[#allocation4 + $0x60] sm:$0xf] %vm1586_vm6, %v1539_v6  ;;  %v432_v6 = vld [vmem:[%s9616_s29 + $0x78] sm:$0xf]  ;;  %s9537_s29 = smov 40  }
  0xec   : > { %v692_v17 = vshrl.u32 %v432_v6, 16 }
  0xee   : > { %v10378_v12 = vrot.slane %v692_v17, 7 }
  0xf0   : > { %2027 = vrot.lane.b32.xlu0 %v1961_v4, %s9531_s9  ;;  %1882 = vrot.lane.b32.xlu1 %v1812_v8, %s9530_s8  ;;  %v1974_v4 = vld [vmem:[#allocation2 + $0x64] sm:$0xf]  ;;  %v695_v8 = vshll.u32 %v432_v6, 16 }
  0xf1   : > { %v1529_v10 = vpop.permute.xlu1 %1528  ;;  %v1531_v38 = vpop.permute.xlu2 %1530  ;;  %1872 = vrot.lane.b32.xlu2 %v1794_v9, %s9530_s8  ;;  %v1969_v9 = vld [vmem:[#allocation2 + $0x48] sm:$0xf] }
  0xf2   : > { %1606 = vst.msk [vmem:[#allocation4 + $0x4c] sm:$0xf] %vm1586_vm6, %v1529_v10  ;;  %v697_v11 = vor.u32 %v695_v8, %v10378_v12  ;;  %v2152_v10 = vld [vmem:[#allocation2 + $0xc] sm:$0xf] }
  0xf3   : > { %1607 = vst.msk [vmem:[#allocation4 + $0x50] sm:$0xf] %vm1586_vm6, %v1531_v38  ;;  %v1545_v23 = vpop.permute.xlu0 %1544  ;;  %v2204_v15 = vshll.u32 %v2152_v10, 16 }
  0xf4   : > { %1614 = vst.msk [vmem:[#allocation4 + $0x6c] sm:$0xf] %vm1586_vm6, %v1545_v23  ;;  %v865_v29 = vsel %vm9655_vm12, %v697_v11, %v864_v59  ;;  %v2201_v23 = vshrl.u32 %v2152_v10, 16  ;;  %vm3017_vm12 = vcmask 191648  }
  0xf5   : > { %866 = vst [vmem:[#allocation2 + $0xc0] sm:$0xf] %v865_v29  ;;  %v1986_v29 = vld [vmem:[#allocation2 + $0xac] sm:$0xf] }
  0xf6   : > { %v2203_v13 = vrot.slane %v2201_v23, 4 }
  0xf8   : > { %2033 = vrot.lane.b32.xlu0 %v1964_v25, %s9531_s9  ;;  %1888 = vrot.lane.b32.xlu1 %v1822_v39, %s9530_s8  ;;  %v1985_v25 = vld [vmem:[#allocation2 + $0xa8] sm:$0xf]  ;;  %v1977_v39 = vld [vmem:[#allocation2 + $0x78] sm:$0xf] }
  0xf9   : > { %v1537_v33 = vpop.permute.xlu2 %1536  ;;  %1878 = vrot.lane.b32.xlu2 %v1805_v27, %s9530_s8  ;;  %v1972_v27 = vld [vmem:[#allocation2 + $0x58] sm:$0xf] }
  0xfa   : > { %1610 = vst.msk [vmem:[#allocation4 + $0x5c] sm:$0xf] %vm1586_vm6, %v1537_v33  ;;  %v2206_v33 = vrot.slane %v2204_v15, 5 }
  0xfc   : > { %v2207_v34 = vor.u32 %v2206_v33, %v2203_v13  ;;  %v2166_v13 = vld [vmem:[#allocation2 + $0x44] sm:$0x1] }
 0x100   : > { %2039 = vrot.lane.b32.xlu0 %v1967_v28, %s9531_s9  ;;  %2023 = vrot.lane.b32.xlu1 %v1959_v63, %s9531_s9  ;;  %v700_v63 = vshrl.u32 %v433_v37, 16 }
 0x101   : > { %v1535_v36 = vpop.permute.xlu1 %1534  ;;  %1884 = vrot.lane.b32.xlu2 %v1815_v52, %s9530_s8 }
 0x102   : > { %1609 = vst.msk [vmem:[#allocation4 + $0x58] sm:$0xf] %vm1586_vm6, %v1535_v36  ;;  %v1551_v48 = vpop.permute.xlu0 %1550  ;;  %v2210_v36 = vshll.u32 %v10391_v43, 16 }
 0x103   : > { %1617 = vst.msk [vmem:[#allocation4 + $0x78] sm:$0xf] %vm1586_vm6, %v1551_v48  ;;  %v1543_v44 = vpop.permute.xlu2 %1542  ;;  %v1988_v48 = vld [vmem:[#allocation2 + $0xb8] sm:$0xf] }
 0x104   : > { %1613 = vst.msk [vmem:[#allocation4 + $0x68] sm:$0xf] %vm1586_vm6, %v1543_v44  ;;  %v2238_v44 = vshrl.u32 %v2156_v24, 16  ;;  %v2170_v24 = vld [vmem:[#allocation2 + $0x54] sm:$0xf] }
 0x108   : > { %2045 = vrot.lane.b32.xlu0 %v1970_v30, %s9531_s9  ;;  %2029 = vrot.lane.b32.xlu1 %v1962_v41, %s9531_s9  ;;  %v1980_v30 = vld [vmem:[#allocation2 + $0x88] sm:$0xf]  ;;  %v10399_v41 = vrot.slane %v700_v63, 7 }
 0x109   : > { %v1541_v26 = vpop.permute.xlu1 %1540  ;;  %1890 = vrot.lane.b32.xlu2 %v1826_v22, %s9530_s8  ;;  %v703_v22 = vshll.u32 %v433_v37, 16  ;;  %v2154_v37 = vld [vmem:[#allocation2 + $0x14] sm:$0x1] }
 0x10a   : > { %1612 = vst.msk [vmem:[#allocation4 + $0x64] sm:$0xf] %vm1586_vm6, %v1541_v26  ;;  %v1833_v51 = vpop.permute.xlu0 %1832  ;;  %v1975_v26 = vld [vmem:[#allocation2 + $0x6c] sm:$0xf] }
 0x10b   : > { %1928 = vst.msk [vmem:[#allocation4 + $0x4] sm:$0xf] %vm1926_vm9, %v1833_v51  ;;  %v1549_v53 = vpop.permute.xlu2 %1548  ;;  %v698_v51 = vrot.slane %v10378_v12, 4  ;;  %v10423_v12 = vld [vmem:[#allocation2 + $0x34] sm:$0xf] }
 0x10c   : > { %1616 = vst.msk [vmem:[#allocation4 + $0x74] sm:$0xf] %vm1586_vm6, %v1549_v53  ;;  %v2208_v53 = vrot.slane %v2207_v34, 4 }
 0x110   : > { %2051 = vrot.lane.b32.xlu0 %v1973_v31, %s9531_s9  ;;  %2035 = vrot.lane.b32.xlu1 %v1965_v5, %s9531_s9  ;;  %v10403_v31 = vrot.slane %v2210_v36, 5  ;;  %v705_v5 = vor.u32 %v703_v22, %v10399_v41  ;;  %v2316_v36 = vshll.u32 %v2166_v13, 16 }
 0x111   : > { %2025 = vrot.lane.b32.xlu2 %v1960_v54, %s9531_s9  ;;  %v1547_v20 = vpop.permute.xlu1 %1546  ;;  %v10407_v54 = vrot.slane %v2234_v47, 5  ;;  %v2345_v47 = vshrl.u32 %v2170_v24, 16 }
 0x112   : > { %v1839_v0 = vpop.permute.xlu0 %1838  ;;  %1615 = vst.msk [vmem:[#allocation4 + $0x70] sm:$0xf] %vm1586_vm6, %v1547_v20  ;;  %v2240_v20 = vrot.slane %v2238_v44, 4  ;;  %v2348_v44 = vshll.u32 %v2170_v24, 16  ;;  %v2163_v24 = vld [vmem:[#allocation2 + $0x38] sm:$0x1] }
 0x113   : > { %v1831_v45 = vpop.permute.xlu2 %1830  ;;  %1931 = vst.msk [vmem:[#allocation4 + $0x10] sm:$0xf] %vm1926_vm9, %v1839_v0 }
 0x114   : > { %1927 = vst.msk [vmem:[#allocation4] sm:$0xf] %vm1926_vm9, %v1831_v45  ;;  %v2157_v45 = vld [vmem:[#allocation2 + $0x20] sm:$0x1] }
 0x118   : > { %2057 = vrot.lane.b32.xlu0 %v1976_v55, %s9531_s9  ;;  %2041 = vrot.lane.b32.xlu1 %v1968_v57, %s9531_s9  ;;  %v2161_v55 = vld [vmem:[#allocation2 + $0x30] sm:$0xf] }
 0x119   : > { %2031 = vrot.lane.b32.xlu2 %v1963_v18, %s9531_s9  ;;  %v706_v18 = vsel %vm9643_vm11, %v698_v51, %v705_v5  ;;  %v1984_v51 = vld [vmem:[#allocation2 + $0xa0] sm:$0xf] }
 0x11a   : > { %v1845_v50 = vpop.permute.xlu0 %1844  ;;  %v1553_v40 = vpop.permute.xlu1 %1552  ;;  %867 = vst.msk [vmem:[#allocation2 + $0xc4] sm:$0xf] %vm280_vm0, %v706_v18  ;;  %v2350_v18 = vrot.slane %v2348_v44, 5  ;;  %vm2119_vm0 = vcmask 126048  }
 0x11b   : > { %1934 = vst.msk [vmem:[#allocation4 + $0x1c] sm:$0xf] %vm1926_vm9, %v1845_v50  ;;  %v1837_v7 = vpop.permute.xlu2 %1836 }
 0x11c   : > { %1618 = vst.msk [vmem:[#allocation4 + $0x7c] sm:$0xf] %vm1586_vm6, %v1553_v40  ;;  %v2213_v40 = vsel %vm9663_vm13, %v2208_v53, %v10403_v31  ;;  %vm4278_vm6 = vcmask 293888  }
 0x11d   : > { %1930 = vst.msk [vmem:[#allocation4 + $0xc] sm:$0xf] %vm1926_vm9, %v1837_v7  ;;  %v2241_v7 = vor.u32 %v2240_v20, %v10407_v54 }
 0x120   : > { %2063 = vrot.lane.b32.xlu0 %v1979_v56, %s9531_s9  ;;  %2047 = vrot.lane.b32.xlu1 %v1971_v60, %s9531_s9  ;;  %v2244_v56 = vshll.u32 %v2157_v45, 16  ;;  %v2273_v60 = vshrl.u32 %v2161_v55, 16  ;;  %v10449_v45 = vld [vmem:[#allocation2 + $0x28] sm:$0xf] }
 0x121   : > { %2037 = vrot.lane.b32.xlu2 %v1966_v61, %s9531_s9  ;;  %v2276_v61 = vshll.u32 %v2161_v55, 16  ;;  %v2155_v55 = vld [vmem:[#allocation2 + $0x18] sm:$0xf] }
 0x122   : > { %v1851_v62 = vpop.permute.xlu0 %1850  ;;  %v1835_v14 = vpop.permute.xlu1 %1834  ;;  %v2246_v6 = vrot.slane %v2244_v56, 5  ;;  %v2174_v56 = vld [vmem:[#allocation2 + $0x64] sm:$0xf] }
 0x123   : > { %1937 = vst.msk [vmem:[#allocation4 + $0x28] sm:$0xf] %vm1926_vm9, %v1851_v62  ;;  %v1843_v16 = vpop.permute.xlu2 %1842  ;;  %v2242_v62 = vrot.slane %v2241_v7, 4  ;;  %v2278_v17 = vrot.slane %v2276_v61, 5  ;;  %v10452_v7 = vld [vmem:[#allocation2 + $0x58] sm:$0xf] }
 0x124   : > { %1929 = vst.msk [vmem:[#allocation4 + $0x8] sm:$0xf] %vm1926_vm9, %v1835_v14  ;;  %v2275_v14 = vrot.slane %v2273_v60, 4 }
 0x125   : > { %1933 = vst.msk [vmem:[#allocation4 + $0x18] sm:$0xf] %vm1926_vm9, %v1843_v16  ;;  %v2165_v16 = vld [vmem:[#allocation2 + $0x40] sm:$0xf]  ;;  %v2247_v59 = vsel %vm9663_vm13, %v2242_v62, %v2246_v6  ;;  %v2258_v62 = vshll.u32 %v10449_v45, 16  ;;  %v2225_v6 = vshrl.u32 %v2155_v55, 16 }
 0x126   : > { %v2310_v11 = vshrl.u32 %v2165_v16, 16  ;;  %v2279_v10 = vor.u32 %v2278_v17, %v2275_v14  ;;  %v2228_v14 = vshll.u32 %v2155_v55, 16 }
 0x128   : > { %2069 = vrot.lane.b32.xlu0 %v1982_v2, %s9531_s9  ;;  %2053 = vrot.lane.b32.xlu1 %v1974_v4, %s9531_s9  ;;  %v2312_v15 = vrot.slane %v2310_v11, 4  ;;  %v1987_v11 = vld [vmem:[#allocation2 + $0xb4] sm:$0xf] }
 0x129   : > { %2043 = vrot.lane.b32.xlu2 %v1969_v9, %s9531_s9  ;;  %v2306_v9 = vshll.u32 %v2165_v16, 16  ;;  %v2354_v16 = vshll.u32 %v10452_v7, 16 }
 0x12a   : > { %v1857_v38 = vpop.permute.xlu0 %1856  ;;  %v1841_v42 = vpop.permute.xlu1 %1840 }
 0x12b   : > { %1940 = vst.msk [vmem:[#allocation4 + $0x34] sm:$0xf] %vm1926_vm9, %v1857_v38  ;;  %v1849_v21 = vpop.permute.xlu2 %1848  ;;  %v2282_v38 = vshll.u32 %v10423_v12, 16  ;;  %v10433_v23 = vrot.slane %v2306_v9, 5 }
 0x12c   : > { %1932 = vst.msk [vmem:[#allocation4 + $0x14] sm:$0xf] %vm1926_vm9, %v1841_v42  ;;  %v2214_v42 = vshrl.u32 %v10391_v43, 16 }
 0x12d   : > { %1936 = vst.msk [vmem:[#allocation4 + $0x24] sm:$0xf] %vm1926_vm9, %v1849_v21  ;;  %v1981_v21 = vld [vmem:[#allocation2 + $0x90] sm:$0xf]  ;;  %v2313_v34 = vor.u32 %v2312_v15, %v10433_v23 }
 0x12f   : > { %v2314_v20 = vrot.slane %v2313_v34, 4 }
 0x130   : > { %2075 = vrot.lane.b32.xlu0 %v1985_v25, %s9531_s9  ;;  %2059 = vrot.lane.b32.xlu1 %v1977_v39, %s9531_s9  ;;  %v2158_v25 = vld [vmem:[#allocation2 + $0x24] sm:$0xf]  ;;  %v2280_v39 = vrot.slane %v2279_v10, 4  ;;  %v10465_v10 = vrot.slane %v2258_v62, 5  ;;  %v2168_v62 = vld [vmem:[#allocation2 + $0x4c] sm:$0xf] }
 0x131   : > { %2049 = vrot.lane.b32.xlu2 %v1972_v27, %s9531_s9  ;;  %v10436_v27 = vrot.slane %v2282_v38, 5  ;;  %v2252_v63 = vshll.u32 %v2158_v25, 16  ;;  %v2227_v38 = vrot.slane %v2225_v6, 4 }
 0x132   : > { %v1863_v46 = vpop.permute.xlu0 %1862  ;;  %v1847_v28 = vpop.permute.xlu1 %1846 }
 0x133   : > { %1943 = vst.msk [vmem:[#allocation4 + $0x40] sm:$0xf] %vm1926_vm9, %v1863_v46  ;;  %v1855_v52 = vpop.permute.xlu2 %1854  ;;  %v2216_v46 = vrot.slane %v2214_v42, 4  ;;  %v2254_v5 = vrot.slane %v2252_v63, 5  ;;  %v2230_v42 = vrot.slane %v2228_v14, 5  ;;  %v2262_v63 = vshrl.u32 %v10449_v45, 16 }
 0x134   : > { %1935 = vst.msk [vmem:[#allocation4 + $0x20] sm:$0xf] %vm1926_vm9, %v1847_v28  ;;  %v2249_v28 = vshrl.u32 %v2158_v25, 16 }
 0x135   : > { %1939 = vst.msk [vmem:[#allocation4 + $0x30] sm:$0xf] %vm1926_vm9, %v1855_v52  ;;  %v2217_v22 = vor.u32 %v2216_v46, %v10403_v31  ;;  %v2264_v55 = vrot.slane %v2262_v63, 4 }
 0x136   : > { %v2251_v53 = vrot.slane %v2249_v28, 4 }
 0x138   : > { %2081 = vrot.lane.b32.xlu0 %v1988_v48, %s9531_s9  ;;  %2065 = vrot.lane.b32.xlu1 %v1980_v30, %s9531_s9  ;;  %v2285_v48 = vsel %vm9663_vm13, %v2280_v39, %v10436_v27  ;;  %v1989_v30 = vld [vmem:[#allocation2 + $0xc0] sm:$0xf]  ;;  %v2255_v61 = vor.u32 %v2254_v5, %v2251_v53  ;;  %v1990_v53 = vld [vmem:[#allocation2 + $0xc4] sm:$0xf]  ;;  %v2164_v5 = vld [vmem:[#allocation2 + $0x3c] sm:$0xf] }
 0x139   : > { %2055 = vrot.lane.b32.xlu2 %v1975_v26, %s9531_s9  ;;  %v2220_v26 = vshll.u32 %v2154_v37, 16  ;;  %v2297_v6 = vshrl.u32 %v2164_v5, 16 }
 0x13a   : > { %v1869_v0 = vpop.permute.xlu0 %1868  ;;  %v1853_v57 = vpop.permute.xlu1 %1852 }
 0x13b   : > { %1946 = vst.msk [vmem:[#allocation4 + $0x4c] sm:$0xf] %vm1926_vm9, %v1869_v0  ;;  %v1861_v50 = vpop.permute.xlu2 %1860  ;;  %v2318_v0 = vrot.slane %v2316_v36, 5  ;;  %v2231_v36 = vor.u32 %v2230_v42, %v2227_v38  ;;  %v2330_v42 = vshll.u32 %v2168_v62, 16 }
 0x13c   : > { %1938 = vst.msk [vmem:[#allocation4 + $0x2c] sm:$0xf] %vm1926_vm9, %v1853_v57  ;;  %v2347_v57 = vrot.slane %v2345_v47, 4 }
 0x13d   : > { %1942 = vst.msk [vmem:[#allocation4 + $0x3c] sm:$0xf] %vm1926_vm9, %v1861_v50  ;;  %v2218_v50 = vrot.slane %v2217_v22, 4  ;;  %v2292_v22 = vshll.u32 %v2163_v24, 16  ;;  %v2232_v45 = vrot.slane %v2231_v36, 4 }
 0x13e   : > { %v2351_v17 = vor.u32 %v2350_v18, %v2347_v57  ;;  %v2172_v24 = vld [vmem:[#allocation2 + $0x5c] sm:$0x1] }
 0x140   : > { %2584 = vrot.lane.b32.xlu0 %v2213_v40, %s9532_s10  ;;  %2071 = vrot.lane.b32.xlu1 %v1983_v19, %s9531_s9  ;;  %v2222_v40 = vrot.slane %v2220_v26, 5 }
 0x141   : > { %2061 = vrot.lane.b32.xlu2 %v1978_v35, %s9531_s9  ;;  %v2319_v35 = vsel %vm9663_vm13, %v2314_v20, %v2318_v0 }
 0x142   : > { %v1875_v2 = vpop.permute.xlu0 %1874  ;;  %v1859_v4 = vpop.permute.xlu1 %1858  ;;  %v2223_v9 = vsel %vm9663_vm13, %v2218_v50, %v2222_v40  ;;  %v10487_v50 = vld [vmem:[#allocation2 + $0x7c] sm:$0xf]  ;;  %v2294_v40 = vrot.slane %v2292_v22, 5 }
 0x143   : > { %1949 = vst.msk [vmem:[#allocation4 + $0x58] sm:$0xf] %vm1926_vm9, %v1875_v2  ;;  %v1867_v8 = vpop.permute.xlu2 %1866  ;;  %v2378_v2 = vshll.u32 %v2174_v56, 16 }
 0x144   : > { %1941 = vst.msk [vmem:[#allocation4 + $0x38] sm:$0xf] %vm1926_vm9, %v1859_v4  ;;  %v2382_v4 = vshrl.u32 %v2174_v56, 16 }
 0x145   : > { %1945 = vst.msk [vmem:[#allocation4 + $0x48] sm:$0xf] %vm1926_vm9, %v1867_v8  ;;  %v2286_v8 = vshrl.u32 %v10423_v12, 16  ;;  %v10470_v15 = vrot.slane %v2378_v2, 5  ;;  %v2179_v12 = vld [vmem:[#allocation2 + $0x78] sm:$0xf] }
 0x146   : > { %v2384_v25 = vrot.slane %v2382_v4, 4  ;;  %v2420_v34 = vshll.u32 %v2179_v12, 16  ;;  %v2426_v4 = vshll.u32 %v10487_v50, 16 }
 0x147   : > { %v2288_v13 = vrot.slane %v2286_v8, 4  ;;  %v2265_v8 = vor.u32 %v2264_v55, %v10465_v10 }
 0x148   : > { %2590 = vrot.lane.b32.xlu0 %v2247_v59, %s9532_s10  ;;  %2077 = vrot.lane.b32.xlu1 %v1986_v29, %s9531_s9  ;;  %v2256_v59 = vrot.slane %v2255_v61, 4  ;;  %v2352_v29 = vrot.slane %v2351_v17, 4  ;;  %v2385_v47 = vor.u32 %v2384_v25, %v10470_v15  ;;  %v2422_v0 = vrot.slane %v2420_v34, 5  ;;  %v2183_v61 = vld [vmem:[#allocation2 + $0x88] sm:$0xf] }
 0x149   : > { %2067 = vrot.lane.b32.xlu2 %v1981_v21, %s9531_s9  ;;  %v10468_v21 = vrot.slane %v2354_v16, 5  ;;  %v2160_v17 = vld [vmem:[#allocation2 + $0x2c] sm:$0x1]  ;;  %v2300_v16 = vshll.u32 %v2164_v5, 16  ;;  %v2188_v34 = vld [vmem:[#allocation2 + $0x9c] sm:$0xf] }
 0x14a   : > { %v1881_v33 = vpop.permute.xlu0 %1880  ;;  %v1865_v43 = vpop.permute.xlu1 %1864  ;;  %v2261_v28 = vsel %vm9663_vm13, %v2256_v59, %v10465_v10  ;;  %v2386_v57 = vrot.slane %v2385_v47, 4  ;;  %v2268_v25 = vshll.u32 %v2160_v17, 16  ;;  %v2334_v47 = vshrl.u32 %v2168_v62, 16 }
 0x14b   : > { %1952 = vst.msk [vmem:[#allocation4 + $0x64] sm:$0xf] %vm1926_vm9, %v1881_v33  ;;  %v1873_v52 = vpop.permute.xlu2 %1872  ;;  %v2175_v33 = vld [vmem:[#allocation2 + $0x68] sm:$0x1] }
 0x14c   : > { %1944 = vst.msk [vmem:[#allocation4 + $0x44] sm:$0xf] %vm1926_vm9, %v1865_v43  ;;  %v2167_v43 = vld [vmem:[#allocation2 + $0x48] sm:$0xf]  ;;  %v2388_v44 = vshll.u32 %v2175_v33, 16 }
 0x14d   : > { %1948 = vst.msk [vmem:[#allocation4 + $0x54] sm:$0xf] %vm1926_vm9, %v1873_v52  ;;  %v2417_v52 = vshrl.u32 %v2179_v12, 16  ;;  %v2321_v26 = vshrl.u32 %v2167_v43, 16  ;;  %v2299_v12 = vrot.slane %v2297_v6, 4 }
 0x14e   : > { %v2390_v18 = vrot.slane %v2388_v44, 5  ;;  %v2176_v44 = vld [vmem:[#allocation2 + $0x6c] sm:$0xf] }
 0x14f   : > { %v2419_v20 = vrot.slane %v2417_v52, 4  ;;  %v2323_v56 = vrot.slane %v2321_v26, 4  ;;  %v2184_v52 = vld [vmem:[#allocation2 + $0x8c] sm:$0x1] }
 0x150   : > { %2596 = vrot.lane.b32.xlu0 %v2285_v48, %s9532_s10  ;;  %2083 = vrot.lane.b32.xlu1 %v1989_v30, %s9531_s9  ;;  %v2357_v48 = vsel %vm9663_vm13, %v2352_v29, %v10468_v21  ;;  %v2289_v30 = vor.u32 %v2288_v13, %v10436_v27  ;;  %v2237_v29 = vsel %vm9663_vm13, %v2232_v45, %v10407_v54  ;;  %v10504_v13 = vrot.slane %v2426_v4, 5  ;;  %v10530_v4 = vld [vmem:[#allocation2 + $0xa0] sm:$0xf] }
 0x151   : > { %2073 = vrot.lane.b32.xlu2 %v1984_v51, %s9531_s9  ;;  %v2324_v51 = vshll.u32 %v2167_v43, 16  ;;  %v2423_v2 = vor.u32 %v2422_v0, %v2419_v20  ;;  %v10510_v54 = vrot.slane %v2330_v42, 5  ;;  %v2460_v20 = vshll.u32 %v2184_v52, 16 }
 0x152   : > { %v1887_v31 = vpop.permute.xlu0 %1886  ;;  %v1871_v60 = vpop.permute.xlu1 %1870  ;;  %v2290_v27 = vrot.slane %v2289_v30, 4  ;;  %v2489_v0 = vshrl.u32 %v2188_v34, 16  ;;  %v2492_v45 = vshll.u32 %v2188_v34, 16 }
 0x153   : > { %1955 = vst.msk [vmem:[#allocation4 + $0x70] sm:$0xf] %vm1926_vm9, %v1887_v31  ;;  %v1879_v19 = vpop.permute.xlu2 %1878  ;;  %v2424_v10 = vrot.slane %v2423_v2, 4 }
 0x154   : > { %1947 = vst.msk [vmem:[#allocation4 + $0x50] sm:$0xf] %vm1926_vm9, %v1871_v60  ;;  %v2326_v60 = vrot.slane %v2324_v51, 5  ;;  %v2295_v59 = vsel %vm9663_vm13, %v2290_v27, %v2294_v40  ;;  %v2491_v62 = vrot.slane %v2489_v0, 4  ;;  %v2494_v6 = vrot.slane %v2492_v45, 5 }
 0x155   : > { %1951 = vst.msk [vmem:[#allocation4 + $0x60] sm:$0xf] %vm1926_vm9, %v1879_v19  ;;  %v2429_v26 = vsel %vm9663_vm13, %v2424_v10, %v10504_v13  ;;  %v2498_v10 = vshll.u32 %v10530_v4, 16  ;;  %v2181_v45 = vld [vmem:[#allocation2 + $0x80] sm:$0x1] }
 0x156   : > { %v2327_v38 = vor.u32 %v2326_v60, %v2323_v56  ;;  %v2336_v56 = vrot.slane %v2334_v47, 4  ;;  %v2169_v60 = vld [vmem:[#allocation2 + $0x50] sm:$0x1] }
 0x158   : > { %2602 = vrot.lane.b32.xlu0 %v2319_v35, %s9532_s10  ;;  %2586 = vrot.lane.b32.xlu1 %v2223_v9, %s9532_s10  ;;  %v2358_v35 = vshrl.u32 %v10452_v7, 16  ;;  %v2391_v9 = vsel %vm9663_vm13, %v2386_v57, %v2390_v18  ;;  %v2450_v7 = vshll.u32 %v2183_v61, 16  ;;  %v2393_v57 = vshrl.u32 %v2176_v44, 16 }
 0x159   : > { %2079 = vrot.lane.b32.xlu2 %v1987_v11, %s9531_s9  ;;  %v2454_v11 = vshrl.u32 %v2183_v61, 16  ;;  %v2396_v18 = vshll.u32 %v2176_v44, 16  ;;  %v10552_v44 = vrot.slane %v2498_v10, 5  ;;  %v2178_v10 = vld [vmem:[#allocation2 + $0x74] sm:$0x1] }
 0x15a   : > { %v1893_v39 = vpop.permute.xlu0 %1892  ;;  %v1877_v46 = vpop.permute.xlu1 %1876  ;;  %v2360_v33 = vrot.slane %v2358_v35, 4  ;;  %v10507_v43 = vrot.slane %v2450_v7, 5  ;;  %v10527_v35 = vld [vmem:[#allocation2 + $0x70] sm:$0xf]  ;;  %v2430_v7 = vshrl.u32 %v10487_v50, 16 }
 0x15b   : > { %1958 = vst.msk [vmem:[#allocation4 + $0x7c] sm:$0xf] %vm1926_vm9, %v1893_v39  ;;  %v1885_v37 = vpop.permute.xlu2 %1884  ;;  %v2302_v39 = vrot.slane %v2300_v16, 5  ;;  %v2395_v16 = vrot.slane %v2393_v57, 4  ;;  %v2398_v2 = vrot.slane %v2396_v18, 5  ;;  %v707_v18 = vrot.slane %v10399_v41, 4 }
 0x15c   : > { %1950 = vst.msk [vmem:[#allocation4 + $0x5c] sm:$0xf] %vm1926_vm9, %v1877_v46  ;;  %v2266_v46 = vrot.slane %v2265_v8, 4  ;;  %v2361_v51 = vor.u32 %v2360_v33, %v10468_v21  ;;  %v396_v8 = vld [vmem:[#allocation2 + $0xc8] sm:$0x1]  ;;  %v2340_v33 = vshll.u32 %v2169_v60, 16 }
 0x15d   : > { %1954 = vst.msk [vmem:[#allocation4 + $0x6c] sm:$0xf] %vm1926_vm9, %v1885_v37  ;;  %v2456_v37 = vrot.slane %v2454_v11, 4  ;;  %v2303_v22 = vor.u32 %v2302_v39, %v2299_v12  ;;  %v2173_v11 = vld [vmem:[#allocation2 + $0x60] sm:$0xf]  ;;  %v2337_v12 = vor.u32 %v2336_v56, %v10510_v54  ;;  %v2495_v39 = vor.u32 %v2494_v6, %v2491_v62 }
 0x15e   : > { %v2362_v21 = vrot.slane %v2361_v51, 4  ;;  %v2432_v52 = vrot.slane %v2430_v7, 4  ;;  %v2406_v41 = vshrl.u32 %v10527_v35, 16 }
 0x15f   : > { %v2457_v5 = vor.u32 %v2456_v37, %v10507_v43  ;;  %v2304_v40 = vrot.slane %v2303_v22, 4  ;;  %v2369_v37 = vshrl.u32 %v2173_v11, 16  ;;  %v2496_v47 = vrot.slane %v2495_v39, 4 }
 0x160   : > { %2608 = vrot.lane.b32.xlu0 %v2357_v48, %s9532_s10  ;;  %2592 = vrot.lane.b32.xlu1 %v2261_v28, %s9532_s10  ;;  %v2328_v28 = vrot.slane %v2327_v38, 4  ;;  %v2270_v48 = vrot.slane %v2268_v25, 5  ;;  %v2342_v22 = vrot.slane %v2340_v33, 5 }
 0x161   : > { %2085 = vrot.lane.b32.xlu2 %v1990_v53, %s9531_s9  ;;  %v2364_v53 = vshll.u32 %v2172_v24, 16  ;;  %v2458_v61 = vrot.slane %v2457_v5, 4  ;;  %v2402_v24 = vshll.u32 %v10527_v35, 16  ;;  %v2197_v5 = vld [vmem:[#allocation2 + $0xc0] sm:$0xf]  ;;  %v2501_v56 = vsel %vm9663_vm13, %v2496_v47, %v10552_v44 }
 0x162   : > { %v2028_v31 = vpop.permute.xlu0 %2027  ;;  %v1883_v19 = vpop.permute.xlu1 %1882  ;;  %v2333_v55 = vsel %vm9663_vm13, %v2328_v28, %v10510_v54  ;;  %v2271_v27 = vsel %vm9663_vm13, %v2266_v46, %v2270_v48  ;;  %v2399_v46 = vor.u32 %v2398_v2, %v2395_v16  ;;  %v2309_v28 = vsel %vm9663_vm13, %v2304_v40, %v10433_v23 }
 0x163   : > { %2122 = vst.msk [vmem:[#allocation4 + $0x8] sm:$0xf] %vm2119_vm0, %v2028_v31  ;;  %v1891_v14 = vpop.permute.xlu2 %1890  ;;  %v2366_v31 = vrot.slane %v2364_v53, 5  ;;  %v2338_v48 = vrot.slane %v2337_v12, 4  ;;  %v10555_v23 = vrot.slane %v2402_v24, 5  ;;  %v2371_v53 = vrot.slane %v2369_v37, 4 }
 0x164   : > { %1953 = vst.msk [vmem:[#allocation4 + $0x68] sm:$0xf] %vm1926_vm9, %v1883_v19  ;;  %v2462_v19 = vrot.slane %v2460_v20, 5  ;;  %v2561_v60 = vshrl.u32 %v2197_v5, 16  ;;  %v10579_v12 = vld [vmem:[#allocation2 + $0xc4] sm:$0xf] }
 0x165   : > { %1957 = vst.msk [vmem:[#allocation4 + $0x78] sm:$0xf] %vm1926_vm9, %v1891_v14  ;;  %v2192_v14 = vld [vmem:[#allocation2 + $0xac] sm:$0xf]  ;;  %v2367_v42 = vsel %vm9663_vm13, %v2362_v21, %v2366_v31  ;;  %v2343_v6 = vsel %vm9663_vm13, %v2338_v48, %v2342_v22 }
 0x166   : > { %v2526_v25 = vshrl.u32 %v2192_v14, 16  ;;  %v2463_v50 = vsel %vm9663_vm13, %v2458_v61, %v2462_v19  ;;  %v2564_v61 = vshll.u32 %v2197_v5, 16  ;;  %v2436_v19 = vshll.u32 %v2181_v45, 16 }
 0x167   : > { %v2563_v35 = vrot.slane %v2561_v60, 4 }
 0x168   : > { %2614 = vrot.lane.b32.xlu0 %v2391_v9, %s9532_s10  ;;  %2598 = vrot.lane.b32.xlu1 %v2295_v59, %s9532_s10  ;;  %v397_v59 = vsel %vm9605_vm7, 0, %v396_v8  ;;  %v2528_v34 = vrot.slane %v2526_v25, 4  ;;  %v2182_v25 = vld [vmem:[#allocation2 + $0x84] sm:$0xf] }
 0x169   : > { %2588 = vrot.lane.b32.xlu2 %v2237_v29, %s9532_s10  ;;  %v2522_v29 = vshll.u32 %v2192_v14, 16  ;;  %398 = vst [vmem:[#allocation2 + $0xc8] sm:$0x1] %v397_v59  ;;  %v2566_v59 = vrot.slane %v2564_v61, 5 }
 0x16a   : > { %v2034_v63 = vpop.permute.xlu0 %2033  ;;  %v1889_v36 = vpop.permute.xlu1 %1888 }
 0x16b   : > { %2125 = vst.msk [vmem:[#allocation4 + $0x14] sm:$0xf] %vm2119_vm0, %v2034_v63  ;;  %v2026_v30 = vpop.permute.xlu2 %2025  ;;  %v2372_v63 = vshll.u32 %v2173_v11, 16  ;;  %v10549_v54 = vrot.slane %v2522_v29, 5  ;;  %v10576_v11 = vld [vmem:[#allocation2 + $0x94] sm:$0xf] }
 0x16c   : > { %1956 = vst.msk [vmem:[#allocation4 + $0x74] sm:$0xf] %vm1926_vm9, %v1889_v36  ;;  %v2185_v36 = vld [vmem:[#allocation2 + $0x90] sm:$0xf]  ;;  %v2408_v29 = vrot.slane %v2406_v41, 4  ;;  %v2474_v37 = vshll.u32 %v10576_v11, 16  ;;  %vm11316_vm9 = vmand %vm874_vm8, %vm290_vm2 }
 0x16d   : > { %2121 = vst.msk [vmem:[#allocation4 + $0x4] sm:$0xf] %vm2119_vm0, %v2026_v30  ;;  %v2193_v30 = vld [vmem:[#allocation2 + $0xb0] sm:$0x1]  ;;  %v2374_v0 = vrot.slane %v2372_v63, 5  ;;  %v2465_v57 = vshrl.u32 %v2185_v36, 16  ;;  %v2529_v40 = vor.u32 %v2528_v34, %v10549_v54  ;;  %vm11332_vm2 = vmand %vm874_vm8, %vm346_vm3 }
 0x16e   : > { %v2532_v21 = vshll.u32 %v2193_v30, 16  ;;  %v2468_v31 = vshll.u32 %v2185_v36, 16  ;;  %v2444_v63 = vshll.u32 %v2182_v25, 16  ;;  %v2570_v34 = vshll.u32 %v10579_v12, 16  ;;  %vm11375_vm8 = vmand %vm871_vm4, %vm346_vm3 }
 0x16f   : > { %v2375_v14 = vor.u32 %v2374_v0, %v2371_v53  ;;  %v2467_v16 = vrot.slane %v2465_v57, 4  ;;  %v2530_v2 = vrot.slane %v2529_v40, 4  ;;  %v2502_v36 = vshrl.u32 %v10530_v4, 16  ;;  %v10602_v57 = vld [vmem:[#allocation2 + $0x10] sm:$0xf] }
 0x170   : > { %2620 = vrot.lane.b32.xlu0 %v2429_v26, %s9532_s10  ;;  %2604 = vrot.lane.b32.xlu1 %v2333_v55, %s9532_s10  ;;  %v2400_v26 = vrot.slane %v2399_v46, 4  ;;  %v2433_v55 = vor.u32 %v2432_v52, %v10504_v13  ;;  %v868_v62 = vld [vmem:[#allocation2 + $0xc8] sm:$0x1]  ;;  %v2534_v8 = vrot.slane %v2532_v21, 5  ;;  %v2567_v52 = vor.u32 %v2566_v59, %v2563_v35 }
 0x171   : > { %2594 = vrot.lane.b32.xlu2 %v2271_v27, %s9532_s10  ;;  %v869_v7 = vsel %vm9598_vm5, %v707_v18, %v868_v62  ;;  %v2376_v39 = vrot.slane %v2375_v14, 4  ;;  %v2409_v47 = vor.u32 %v2408_v29, %v10555_v23  ;;  %v2412_v30 = vshll.u32 %v2178_v10, 16  ;;  %v2190_v18 = vld [vmem:[#allocation2 + $0xa4] sm:$0x1] }
 0x172   : > { %v2040_v17 = vpop.permute.xlu0 %2039  ;;  %v2024_v9 = vpop.permute.xlu1 %2023  ;;  %v2405_v13 = vsel %vm9663_vm13, %v2400_v26, %v10555_v23  ;;  %870 = vst [vmem:[#allocation2 + $0xc8] sm:$0x1] %v869_v7  ;;  %v2535_v46 = vsel %vm9663_vm13, %v2530_v2, %v2534_v8  ;;  %v2446_v5 = vrot.slane %v2444_v63, 5  ;;  %v2568_v4 = vrot.slane %v2567_v52, 4  ;;  %v10632_v63 = vld [vmem:[#allocation2 + $0x28] sm:$0xf] }
 0x173   : > { %2128 = vst.msk [vmem:[#allocation4 + $0x20] sm:$0xf] %vm2119_vm0, %v2040_v17  ;;  %v2032_v38 = vpop.permute.xlu2 %2031  ;;  %v2434_v17 = vrot.slane %v2433_v55, 4  ;;  %v2381_v22 = vsel %vm9663_vm13, %v2376_v39, %v10470_v15  ;;  %v2410_v23 = vrot.slane %v2409_v47, 4  ;;  %v2414_v0 = vrot.slane %v2412_v30, 5 }
 0x174   : > { %2120 = vst.msk [vmem:[#allocation4] sm:$0xf] %vm2119_vm0, %v2024_v9  ;;  %v2470_v9 = vrot.slane %v2468_v31, 5  ;;  %v2504_v55 = vrot.slane %v2502_v36, 4  ;;  %v2478_v21 = vshrl.u32 %v10576_v11, 16  ;;  %v2811_v61 = vrot.slane %v10602_v57, 5 }
 0x175   : > { %2124 = vst.msk [vmem:[#allocation4 + $0x10] sm:$0xf] %vm2119_vm0, %v2032_v38  ;;  %v2438_v38 = vrot.slane %v2436_v19, 5  ;;  %v2508_v41 = vshll.u32 %v2190_v18, 16  ;;  %v2715_v19 = vld [vmem:[#allocation2 + $0x14] sm:$0x1]  ;;  %v2415_v14 = vsel %vm9663_vm13, %v2410_v23, %v2414_v0 }
 0x176   : > { %v2471_v24 = vor.u32 %v2470_v9, %v2467_v16  ;;  %v2480_v16 = vrot.slane %v2478_v21, 4  ;;  %v2813_v2 = vrot.slane %v2811_v61, 4  ;;  %v2814_v8 = vrot.slane %v2715_v19, 5  ;;  %v2724_v21 = vld [vmem:[#allocation2 + $0x38] sm:$0x1] }
 0x177   : > { %v2439_v48 = vsel %vm9663_vm13, %v2434_v17, %v2438_v38  ;;  %v2510_v9 = vrot.slane %v2508_v41, 5  ;;  %v2187_v38 = vld [vmem:[#allocation2 + $0x98] sm:$0x1]  ;;  %v2825_v47 = vrot.slane %v10632_v63, 5  ;;  %v2835_v41 = vrot.slane %v2724_v21, 5 }
 0x178   : > { %2626 = vrot.lane.b32.xlu0 %v2463_v50, %s9532_s10  ;;  %2610 = vrot.lane.b32.xlu1 %v2367_v42, %s9532_s10  ;;  %v2472_v26 = vrot.slane %v2471_v24, 4  ;;  %v2815_v10 = vsel %vm10065_vm1, %v2813_v2, %v2814_v8  ;;  %v2196_v2 = vld [vmem:[#allocation2 + $0xbc] sm:$0x1]  ;;  %v10705_v63 = vld [vmem:[#allocation2 + $0x70] sm:$0xf]  ;;  %vm5511_vm3 = vcmask 126016  }
 0x179   : > { %2600 = vrot.lane.b32.xlu2 %v2309_v28, %s9532_s10  ;;  %v2441_v28 = vshrl.u32 %v2182_v25, 16  ;;  %v2191_v25 = vld [vmem:[#allocation2 + $0xa8] sm:$0xf]  ;;  %v2718_v21 = vld [vmem:[#allocation2 + $0x20] sm:$0x1] }
 0x17a   : > { %v2046_v51 = vpop.permute.xlu0 %2045  ;;  %v2030_v20 = vpop.permute.xlu1 %2029  ;;  %v2199_v0 = vld [vmem:[#allocation2 + $0xc8] sm:$0x1] }
 0x17b   : > { %2131 = vst.msk [vmem:[#allocation4 + $0x2c] sm:$0xf] %vm2119_vm0, %v2046_v51  ;;  %v2038_v27 = vpop.permute.xlu2 %2037  ;;  %v10596_v51 = vrot.slane %v2474_v37, 5  ;;  %v2443_v53 = vrot.slane %v2441_v28, 4  ;;  %v2719_v28 = vld [vmem:[#allocation2 + $0x24] sm:$0xe] }
 0x17c   : > { %2123 = vst.msk [vmem:[#allocation4 + $0xc] sm:$0xf] %vm2119_vm0, %v2030_v20  ;;  %v10599_v20 = vrot.slane %v2570_v34, 5  ;;  %v2513_v34 = vshrl.u32 %v2191_v25, 16 }
 0x17d   : > { %2127 = vst.msk [vmem:[#allocation4 + $0x1c] sm:$0xf] %vm2119_vm0, %v2038_v27  ;;  %v2194_v27 = vld [vmem:[#allocation2 + $0xb4] sm:$0xf]  ;;  %v2477_v31 = vsel %vm9663_vm13, %v2472_v26, %v10596_v51  ;;  %v2481_v39 = vor.u32 %v2480_v16, %v10596_v51 }
 0x17e   : > { %v2573_v60 = vsel %vm9663_vm13, %v2568_v4, %v10599_v20  ;;  %v2537_v62 = vshrl.u32 %v2194_v27, 16  ;;  %v2515_v4 = vrot.slane %v2513_v34, 4 }
 0x17f   : > { %v2482_v36 = vrot.slane %v2481_v39, 4 }
 0x180   : > { %2632 = vrot.lane.b32.xlu0 %v2501_v56, %s9532_s10  ;;  %2616 = vrot.lane.b32.xlu1 %v2405_v13, %s9532_s10  ;;  %v2447_v56 = vor.u32 %v2446_v5, %v2443_v53  ;;  %v2505_v13 = vor.u32 %v2504_v55, %v10552_v44  ;;  %v2539_v11 = vrot.slane %v2537_v62, 4  ;;  %v10641_v5 = vld [vmem:[#allocation2 + $0x34] sm:$0xf] }
 0x181   : > { %2606 = vrot.lane.b32.xlu2 %v2343_v6, %s9532_s10  ;;  %v2540_v6 = vshll.u32 %v2194_v27, 16 }
 0x182   : > { %v2052_v42 = vpop.permute.xlu0 %2051  ;;  %v2036_v50 = vpop.permute.xlu1 %2035  ;;  %v2448_v17 = vrot.slane %v2447_v56, 4  ;;  %v2506_v44 = vrot.slane %v2505_v13, 4 }
 0x183   : > { %2134 = vst.msk [vmem:[#allocation4 + $0x38] sm:$0xf] %vm2119_vm0, %v2052_v42  ;;  %v2044_v33 = vpop.permute.xlu2 %2043  ;;  %v2542_v35 = vrot.slane %v2540_v6, 5  ;;  %v2195_v42 = vld [vmem:[#allocation2 + $0xb8] sm:$0xf] }
 0x184   : > { %2126 = vst.msk [vmem:[#allocation4 + $0x18] sm:$0xf] %vm2119_vm0, %v2036_v50  ;;  %v2574_v50 = vshrl.u32 %v10579_v12, 16  ;;  %v2546_v37 = vshll.u32 %v2195_v42, 16  ;;  %v2453_v52 = vsel %vm9663_vm13, %v2448_v17, %v10507_v43  ;;  %v2516_v12 = vshll.u32 %v2191_v25, 16 }
 0x185   : > { %2130 = vst.msk [vmem:[#allocation4 + $0x28] sm:$0xf] %vm2119_vm0, %v2044_v33  ;;  %v2511_v33 = vsel %vm9663_vm13, %v2506_v44, %v2510_v9  ;;  %v2543_v24 = vor.u32 %v2542_v35, %v2539_v11  ;;  %v2550_v56 = vshrl.u32 %v2195_v42, 16  ;;  %v2728_v9 = vld [vmem:[#allocation2 + $0x48] sm:$0xe] }
 0x186   : > { %v2548_v26 = vrot.slane %v2546_v37, 5  ;;  %v2576_v53 = vrot.slane %v2574_v50, 4  ;;  %v2518_v23 = vrot.slane %v2516_v12, 5  ;;  %v2717_v42 = vld [vmem:[#allocation2 + $0x1c] sm:$0xf] }
 0x187   : > { %v2552_v17 = vrot.slane %v2550_v56, 4  ;;  %v2818_v39 = vrot.slane %v2717_v42, 5  ;;  %v2733_v12 = vld [vmem:[#allocation2 + $0x5c] sm:$0x1]  ;;  %v2867_v56 = vrot.slane %v10705_v63, 5 }
 0x188   : > { %2638 = vrot.lane.b32.xlu0 %v2535_v46, %s9532_s10  ;;  %2622 = vrot.lane.b32.xlu1 %v2439_v48, %s9532_s10  ;;  %v2484_v46 = vshll.u32 %v2187_v38, 16  ;;  %v9163_v48 = vrot.slane %v2719_v28, 9  ;;  %v2577_v27 = vor.u32 %v2576_v53, %v10599_v20  ;;  %v2716_v38 = vld [vmem:[#allocation2 + $0x18] sm:$0xe] }
 0x189   : > { %2612 = vrot.lane.b32.xlu2 %v2381_v22, %s9532_s10  ;;  %v2544_v22 = vrot.slane %v2543_v24, 4  ;;  %v2553_v35 = vor.u32 %v2552_v17, %v2548_v26  ;;  %v9162_v50 = vrot.slane %v2716_v38, 9  ;;  %v10781_v63 = vld [vmem:[#allocation2 + $0xb8] sm:$0xf] }
 0x18a   : > { %v2058_v45 = vpop.permute.xlu0 %2057  ;;  %v2042_v15 = vpop.permute.xlu1 %2041  ;;  %v2486_v30 = vrot.slane %v2484_v46, 5  ;;  %v2826_v55 = vsel %vm10065_vm1, %v9163_v48, %v2825_v47  ;;  %v2578_v19 = vrot.slane %v2577_v27, 4  ;;  %v2721_v48 = vld [vmem:[#allocation2 + $0x2c] sm:$0x1]  ;;  %v2725_v27 = vld [vmem:[#allocation2 + $0x3c] sm:$0xe] }
 0x18b   : > { %2137 = vst.msk [vmem:[#allocation4 + $0x44] sm:$0xf] %vm2119_vm0, %v2058_v45  ;;  %v2050_v40 = vpop.permute.xlu2 %2049  ;;  %v2549_v18 = vsel %vm9663_vm13, %v2544_v22, %v2548_v26  ;;  %v2819_v34 = vsel %vm10065_vm1, %v9162_v50, %v2818_v39  ;;  %v2856_v26 = vrot.slane %v2733_v12, 5  ;;  %v2828_v53 = vrot.slane %v2721_v48, 5 }
 0x18c   : > { %2129 = vst.msk [vmem:[#allocation4 + $0x24] sm:$0xf] %vm2119_vm0, %v2042_v15  ;;  %v2832_v15 = vrot.slane %v10641_v5, 5 }
 0x18d   : > { %2133 = vst.msk [vmem:[#allocation4 + $0x34] sm:$0xf] %vm2119_vm0, %v2050_v40  ;;  %v2580_v40 = vshll.u32 %v2199_v0, 16 }
 0x18e   : > { %v2834_v13 = vrot.slane %v2832_v15, 4 }
 0x18f   : > { %v2582_v62 = vrot.slane %v2580_v40, 5  ;;  %v2726_v40 = vld [vmem:[#allocation2 + $0x40] sm:$0xf] }
 0x190   : > { %2644 = vrot.lane.b32.xlu0 %v2573_v60, %s9532_s10  ;;  %2628 = vrot.lane.b32.xlu1 %v2477_v31, %s9532_s10  ;;  %v2487_v31 = vsel %vm9663_vm13, %v2482_v36, %v2486_v30  ;;  %v2519_v60 = vor.u32 %v2518_v23, %v2515_v4  ;;  %v2836_v8 = vsel %vm10065_vm1, %v2834_v13, %v2835_v41  ;;  %v2713_v30 = vld [vmem:[#allocation2 + $0xc] sm:$0xe]  ;;  %v2839_v13 = vrot.slane %v2726_v40, 5 }
 0x191   : > { %2618 = vrot.lane.b32.xlu2 %v2415_v14, %s9532_s10  ;;  %v2583_v44 = vsel %vm9663_vm13, %v2578_v19, %v2582_v62  ;;  %v9161_v23 = vrot.slane %v2713_v30, 9  ;;  %v10715_v19 = vld [vmem:[#allocation2 + $0x7c] sm:$0xf]  ;;  %v2820_v62 = vrot.slane %v2818_v39, 4  ;;  %v10753_v30 = vld [vmem:[#allocation2 + $0xa0] sm:$0xf] }
 0x192   : > { %v2064_v7 = vpop.permute.xlu0 %2063  ;;  %v2048_v59 = vpop.permute.xlu1 %2047  ;;  %v2520_v14 = vrot.slane %v2519_v60, 4  ;;  %v9165_v60 = vrot.slane %v2725_v27, 9 }
 0x193   : > { %2140 = vst.msk [vmem:[#allocation4 + $0x50] sm:$0xf] %vm2119_vm0, %v2064_v7  ;;  %v2056_v29 = vpop.permute.xlu2 %2055  ;;  %v10668_v7 = vld [vmem:[#allocation2 + $0x4c] sm:$0xf] }
 0x194   : > { %2132 = vst.msk [vmem:[#allocation4 + $0x30] sm:$0xf] %vm2119_vm0, %v2048_v59  ;;  %v2525_v11 = vsel %vm9663_vm13, %v2520_v14, %v10549_v54  ;;  %v2556_v59 = vshll.u32 %v2196_v2, 16  ;;  %v2846_v25 = vrot.slane %v10668_v7, 5  ;;  %v2554_v54 = vrot.slane %v2553_v35, 4 }
 0x195   : > { %2136 = vst.msk [vmem:[#allocation4 + $0x40] sm:$0xf] %vm2119_vm0, %v2056_v29  ;;  %v9166_v29 = vrot.slane %v2728_v9, 9  ;;  %v2874_v14 = vrot.slane %v10715_v19, 5  ;;  %v2840_v17 = vsel %vm10065_vm1, %v9165_v60, %v2839_v13  ;;  %v10743_v7 = vld [vmem:[#allocation2 + $0x94] sm:$0xf] }
 0x196   : > { %v2558_v24 = vrot.slane %v2556_v59, 5  ;;  %v2848_v35 = vrot.slane %v2846_v25, 4 }
 0x197   : > { %v2847_v28 = vsel %vm10065_vm1, %v9166_v29, %v2846_v25  ;;  %v2876_v9 = vrot.slane %v2874_v14, 4 }
 0x198   : > { %2923 = vrot.lane.b32.xlu0 %v2815_v10, %s9533_s11  ;;  %2634 = vrot.lane.b32.xlu1 %v2511_v33, %s9532_s10  ;;  %v10677_v33 = vld [vmem:[#allocation2 + $0x58] sm:$0xf]  ;;  %v2559_v36 = vsel %vm9663_vm13, %v2554_v54, %v2558_v24  ;;  %v2734_v54 = vld [vmem:[#allocation2 + $0x60] sm:$0xe]  ;;  %v2735_v24 = vld [vmem:[#allocation2 + $0x64] sm:$0xf] }
 0x199   : > { %2624 = vrot.lane.b32.xlu2 %v2453_v52, %s9532_s10  ;;  %v2853_v52 = vrot.slane %v10677_v33, 5  ;;  %v9168_v12 = vrot.slane %v2734_v54, 9 }
 0x19a   : > { %v2070_v51 = vpop.permute.xlu0 %2069  ;;  %v2054_v43 = vpop.permute.xlu1 %2053 }
 0x19b   : > { %2143 = vst.msk [vmem:[#allocation4 + $0x5c] sm:$0xf] %vm2119_vm0, %v2070_v51  ;;  %v2062_v45 = vpop.permute.xlu2 %2061  ;;  %v2855_v22 = vrot.slane %v2853_v52, 4  ;;  %v2827_v51 = vrot.slane %v2825_v47, 4  ;;  %v2812_v47 = vsel %vm10065_vm1, %v9161_v23, %v2811_v61  ;;  %v2821_v61 = vrot.slane %v2718_v21, 5 }
 0x19c   : > { %2135 = vst.msk [vmem:[#allocation4 + $0x3c] sm:$0xf] %vm2119_vm0, %v2054_v43 }
 0x19d   : > { %2139 = vst.msk [vmem:[#allocation4 + $0x4c] sm:$0xf] %vm2119_vm0, %v2062_v45  ;;  %v2857_v45 = vsel %vm10065_vm1, %v2855_v22, %v2856_v26  ;;  %v2822_v2 = vsel %vm10065_vm1, %v2820_v62, %v2821_v61  ;;  %v2841_v22 = vrot.slane %v2839_v13, 4  ;;  %v2743_v62 = vld [vmem:[#allocation2 + $0x84] sm:$0xe] }
 0x19e   : > { %v2744_v61 = vld [vmem:[#allocation2 + $0x88] sm:$0xf] }
 0x1a0   : > { %2929 = vrot.lane.b32.xlu0 %v2826_v55, %s9533_s11  ;;  %2640 = vrot.lane.b32.xlu1 %v2549_v18, %s9532_s10  ;;  %v2829_v55 = vsel %vm10065_vm1, %v2827_v51, %v2828_v53  ;;  %v2737_v18 = vld [vmem:[#allocation2 + $0x6c] sm:$0xe]  ;;  %v2895_v53 = vrot.slane %v10753_v30, 5  ;;  %v3059_v30 = vld [vmem:[#allocation2 + $0x48] sm:$0xf] }
 0x1a1   : > { %2630 = vrot.lane.b32.xlu2 %v2487_v31, %s9532_s10  ;;  %v9169_v31 = vrot.slane %v2737_v18, 9 }
 0x1a2   : > { %v2076_v20 = vpop.permute.xlu0 %2075  ;;  %v2060_v6 = vpop.permute.xlu1 %2059 }
 0x1a3   : > { %2146 = vst.msk [vmem:[#allocation4 + $0x68] sm:$0xf] %vm2119_vm0, %v2076_v20  ;;  %v2068_v16 = vpop.permute.xlu2 %2067 }
 0x1a4   : > { %2138 = vst.msk [vmem:[#allocation4 + $0x48] sm:$0xf] %vm2119_vm0, %v2060_v6  ;;  %v2868_v6 = vsel %vm10065_vm1, %v9169_v31, %v2867_v56 }
 0x1a5   : > { %2142 = vst.msk [vmem:[#allocation4 + $0x58] sm:$0xf] %vm2119_vm0, %v2068_v16  ;;  %v2742_v16 = vld [vmem:[#allocation2 + $0x80] sm:$0x1] }
 0x1a8   : > { %2935 = vrot.lane.b32.xlu0 %v2836_v8, %s9533_s11  ;;  %2646 = vrot.lane.b32.xlu1 %v2583_v44, %s9532_s10  ;;  %v2730_v8 = vld [vmem:[#allocation2 + $0x50] sm:$0x1]  ;;  %v2722_v44 = vld [vmem:[#allocation2 + $0x30] sm:$0xe] }
 0x1a9   : > { %2636 = vrot.lane.b32.xlu2 %v2525_v11, %s9532_s10  ;;  %v2877_v11 = vrot.slane %v2742_v16, 5  ;;  %v2849_v59 = vrot.slane %v2730_v8, 5  ;;  %v9164_v29 = vrot.slane %v2722_v44, 9  ;;  %v9171_v16 = vrot.slane %v2743_v62, 9  ;;  %v10791_v44 = vld [vmem:[#allocation2 + $0xc4] sm:$0xf] }
 0x1aa   : > { %v2082_v10 = vpop.permute.xlu0 %2081  ;;  %v2066_v46 = vpop.permute.xlu1 %2065 }
 0x1ab   : > { %2149 = vst.msk [vmem:[#allocation4 + $0x74] sm:$0xf] %vm2119_vm0, %v2082_v10  ;;  %v2074_v37 = vpop.permute.xlu2 %2073  ;;  %v2878_v39 = vsel %vm10065_vm1, %v2876_v9, %v2877_v11  ;;  %v2850_v10 = vsel %vm10065_vm1, %v2848_v35, %v2849_v59  ;;  %v2833_v25 = vsel %vm10065_vm1, %v9164_v29, %v2832_v15  ;;  %v2916_v59 = vrot.slane %v10791_v44, 5  ;;  %v3065_v44 = vld [vmem:[#allocation2 + $0x6c] sm:$0xf] }
 0x1ac   : > { %2141 = vst.msk [vmem:[#allocation4 + $0x54] sm:$0xf] %vm2119_vm0, %v2066_v46  ;;  %v2746_v46 = vld [vmem:[#allocation2 + $0x90] sm:$0xe] }
 0x1ad   : > { %2145 = vst.msk [vmem:[#allocation4 + $0x64] sm:$0xf] %vm2119_vm0, %v2074_v37  ;;  %v2727_v37 = vld [vmem:[#allocation2 + $0x44] sm:$0x1] }
 0x1ae   : > { %v2842_v15 = vrot.slane %v2727_v37, 5 }
 0x1b0   : > { %2941 = vrot.lane.b32.xlu0 %v2847_v28, %s9533_s11  ;;  %2925 = vrot.lane.b32.xlu1 %v2819_v34, %s9533_s11  ;;  %v9172_v28 = vrot.slane %v2746_v46, 9  ;;  %v2888_v34 = vrot.slane %v10743_v7, 5  ;;  %v2843_v23 = vsel %vm10065_vm1, %v2841_v22, %v2842_v15  ;;  %v2745_v22 = vld [vmem:[#allocation2 + $0x8c] sm:$0x1] }
 0x1b1   : > { %2642 = vrot.lane.b32.xlu2 %v2559_v36, %s9532_s10  ;;  %v2860_v36 = vrot.slane %v2735_v24, 5 }
 0x1b2   : > { %v2585_v43 = vpop.permute.xlu0 %2584  ;;  %v2072_v4 = vpop.permute.xlu1 %2071  ;;  %v2889_v51 = vsel %vm10065_vm1, %v9172_v28, %v2888_v34 }
 0x1b3   : > { %2681 = vst.msk [vmem:[#allocation4] sm:$0xf] %vm2680_vm10, %v2585_v43  ;;  %v2080_v0 = vpop.permute.xlu2 %2079  ;;  %v2861_v43 = vsel %vm10065_vm1, %v9168_v12, %v2860_v36  ;;  %v2862_v9 = vrot.slane %v2860_v36, 4 }
 0x1b4   : > { %2144 = vst.msk [vmem:[#allocation4 + $0x60] sm:$0xf] %vm2119_vm0, %v2072_v4  ;;  %v2751_v4 = vld [vmem:[#allocation2 + $0xa4] sm:$0x1] }
 0x1b5   : > { %2148 = vst.msk [vmem:[#allocation4 + $0x70] sm:$0xf] %vm2119_vm0, %v2080_v0  ;;  %v2739_v0 = vld [vmem:[#allocation2 + $0x74] sm:$0x1]  ;;  %v2898_v18 = vrot.slane %v2751_v4, 5 }
 0x1b6   : > { %v2870_v27 = vrot.slane %v2739_v0, 5 }
 0x1b8   : > { %2947 = vrot.lane.b32.xlu0 %v2857_v45, %s9533_s11  ;;  %2931 = vrot.lane.b32.xlu1 %v2829_v55, %s9533_s11  ;;  %v2731_v45 = vld [vmem:[#allocation2 + $0x54] sm:$0xe]  ;;  %v2897_v55 = vrot.slane %v2895_v53, 4 }
 0x1b9   : > { %2921 = vrot.lane.b32.xlu2 %v2812_v47, %s9533_s11  ;;  %v2869_v47 = vrot.slane %v2867_v56, 4  ;;  %v9167_v31 = vrot.slane %v2731_v45, 9 }
 0x1ba   : > { %v2591_v41 = vpop.permute.xlu0 %2590  ;;  %v2078_v57 = vpop.permute.xlu1 %2077  ;;  %v2899_v13 = vsel %vm10065_vm1, %v2897_v55, %v2898_v18  ;;  %v2757_v55 = vld [vmem:[#allocation2 + $0xbc] sm:$0x1]  ;;  %v2749_v18 = vld [vmem:[#allocation2 + $0x9c] sm:$0xe] }
 0x1bb   : > { %2684 = vst.msk [vmem:[#allocation4 + $0xc] sm:$0xf] %vm2680_vm10, %v2591_v41  ;;  %v2086_v20 = vpop.permute.xlu2 %2085  ;;  %v2871_v41 = vsel %vm10065_vm1, %v2869_v47, %v2870_v27  ;;  %v2854_v56 = vsel %vm10065_vm1, %v9167_v31, %v2853_v52  ;;  %v2912_v27 = vrot.slane %v2757_v55, 5  ;;  %v9173_v31 = vrot.slane %v2749_v18, 9 }
 0x1bc   : > { %2147 = vst.msk [vmem:[#allocation4 + $0x6c] sm:$0xf] %vm2119_vm0, %v2078_v57  ;;  %v2755_v57 = vld [vmem:[#allocation2 + $0xb4] sm:$0xe] }
 0x1bd   : > { %2151 = vst.msk [vmem:[#allocation4 + $0x7c] sm:$0xf] %vm2119_vm0, %v2086_v20  ;;  %v2736_v20 = vld [vmem:[#allocation2 + $0x68] sm:$0x1] }
 0x1be   : > { %v2863_v52 = vrot.slane %v2736_v20, 5 }
 0x1c0   : > { %2953 = vrot.lane.b32.xlu0 %v2868_v6, %s9533_s11  ;;  %2937 = vrot.lane.b32.xlu1 %v2840_v17, %s9533_s11  ;;  %v9175_v6 = vrot.slane %v2755_v57, 9  ;;  %v2909_v17 = vrot.slane %v10781_v63, 5  ;;  %v2864_v29 = vsel %vm10065_vm1, %v2862_v9, %v2863_v52  ;;  %v2896_v57 = vsel %vm10065_vm1, %v9173_v31, %v2895_v53  ;;  %v2754_v63 = vld [vmem:[#allocation2 + $0xb0] sm:$0x1]  ;;  %v3051_v53 = vld [vmem:[#allocation2 + $0x18] sm:$0xf] }
 0x1c1   : > { %2927 = vrot.lane.b32.xlu2 %v2822_v2, %s9533_s11  ;;  %v2881_v2 = vrot.slane %v2744_v61, 5  ;;  %v2905_v20 = vrot.slane %v2754_v63, 5  ;;  %v3062_v52 = vld [vmem:[#allocation2 + $0x58] sm:$0xf]  ;;  %v10896_v31 = vld [vmem:[#allocation2 + $0x1c] sm:$0xf] }
 0x1c2   : > { %v2597_v38 = vpop.permute.xlu0 %2596  ;;  %v2084_v42 = vpop.permute.xlu1 %2083  ;;  %v2910_v35 = vsel %vm10065_vm1, %v9175_v6, %v2909_v17  ;;  %v2911_v47 = vrot.slane %v2909_v17, 4 }
 0x1c3   : > { %2687 = vst.msk [vmem:[#allocation4 + $0x18] sm:$0xf] %vm2680_vm10, %v2597_v38  ;;  %v2589_v50 = vpop.permute.xlu2 %2588  ;;  %v2882_v38 = vsel %vm10065_vm1, %v9171_v16, %v2881_v2  ;;  %v2883_v4 = vrot.slane %v2881_v2, 4  ;;  %v2758_v16 = vld [vmem:[#allocation2 + $0xc0] sm:$0xe] }
 0x1c4   : > { %2150 = vst.msk [vmem:[#allocation4 + $0x78] sm:$0xf] %vm2119_vm0, %v2084_v42  ;;  %v2760_v42 = vld [vmem:[#allocation2 + $0xc8] sm:$0x1]  ;;  %vm5848_vm0 = vcmask 191616  }
 0x1c5   : > { %2683 = vst.msk [vmem:[#allocation4 + $0x8] sm:$0xf] %vm2680_vm10, %v2589_v50  ;;  %v2748_v50 = vld [vmem:[#allocation2 + $0x98] sm:$0x1]  ;;  %v2919_v46 = vrot.slane %v2760_v42, 5 }
 0x1c6   : > { %v2891_v54 = vrot.slane %v2748_v50, 5  ;;  %v3057_v50 = vld [vmem:[#allocation2 + $0x3c] sm:$0xf] }
 0x1c8   : > { %2959 = vrot.lane.b32.xlu0 %v2878_v39, %s9533_s11  ;;  %2943 = vrot.lane.b32.xlu1 %v2850_v10, %s9533_s11  ;;  %v2740_v39 = vld [vmem:[#allocation2 + $0x78] sm:$0xe]  ;;  %v2918_v10 = vrot.slane %v2916_v59, 4 }
 0x1c9   : > { %2933 = vrot.lane.b32.xlu2 %v2833_v25, %s9533_s11  ;;  %v2890_v25 = vrot.slane %v2888_v34, 4  ;;  %v9170_v28 = vrot.slane %v2740_v39, 9  ;;  %v2752_v34 = vld [vmem:[#allocation2 + $0xa8] sm:$0xe]  ;;  %v3052_v39 = vld [vmem:[#allocation2 + $0x1c] sm:$0xf] }
 0x1ca   : > { %v2603_v48 = vpop.permute.xlu0 %2602  ;;  %v2587_v5 = vpop.permute.xlu1 %2586  ;;  %v2920_v36 = vsel %vm10065_vm1, %v2918_v10, %v2919_v46  ;;  %v9174_v15 = vrot.slane %v2752_v34, 9 }
 0x1cb   : > { %2690 = vst.msk [vmem:[#allocation4 + $0x24] sm:$0xf] %vm2680_vm10, %v2603_v48  ;;  %v2595_v26 = vpop.permute.xlu2 %2594  ;;  %v2892_v48 = vsel %vm10065_vm1, %v2890_v25, %v2891_v54  ;;  %v2875_v7 = vsel %vm10065_vm1, %v9170_v28, %v2874_v14  ;;  %v3053_v14 = vld [vmem:[#allocation2 + $0x24] sm:$0xf]  ;;  %v3068_v25 = vld [vmem:[#allocation2 + $0x7c] sm:$0xf] }
 0x1cc   : > { %2682 = vst.msk [vmem:[#allocation4 + $0x4] sm:$0xf] %vm2680_vm10, %v2587_v5  ;;  %v2753_v5 = vld [vmem:[#allocation2 + $0xac] sm:$0xf] }
 0x1cd   : > { %2686 = vst.msk [vmem:[#allocation4 + $0x14] sm:$0xf] %vm2680_vm10, %v2595_v26  ;;  %v2902_v26 = vrot.slane %v2753_v5, 5  ;;  %v3060_v54 = vld [vmem:[#allocation2 + $0x4c] sm:$0xf] }
 0x1cf   : > { %v2903_v0 = vsel %vm10065_vm1, %v9174_v15, %v2902_v26  ;;  %v2904_v61 = vrot.slane %v2902_v26, 4  ;;  %v3074_v15 = vld [vmem:[#allocation2 + $0xa0] sm:$0xf]  ;;  %v3066_v26 = vld [vmem:[#allocation2 + $0x70] sm:$0xf] }
 0x1d0   : > { %2965 = vrot.lane.b32.xlu0 %v2889_v51, %s9533_s11  ;;  %2949 = vrot.lane.b32.xlu1 %v2861_v43, %s9533_s11 }
 0x1d1   : > { %2939 = vrot.lane.b32.xlu2 %v2843_v23, %s9533_s11  ;;  %v2884_v23 = vrot.slane %v2745_v22, 5  ;;  %v2906_v17 = vsel %vm10065_vm1, %v2904_v61, %v2905_v20  ;;  %v3072_v20 = vld [vmem:[#allocation2 + $0x94] sm:$0xf] }
 0x1d2   : > { %v2609_v40 = vpop.permute.xlu0 %2608  ;;  %v2593_v21 = vpop.permute.xlu1 %2592 }
 0x1d3   : > { %2693 = vst.msk [vmem:[#allocation4 + $0x30] sm:$0xf] %vm2680_vm10, %v2609_v40  ;;  %v2601_v60 = vpop.permute.xlu2 %2600  ;;  %v2885_v45 = vsel %vm10065_vm1, %v2883_v4, %v2884_v23 }
 0x1d4   : > { %2685 = vst.msk [vmem:[#allocation4 + $0x10] sm:$0xf] %vm2680_vm10, %v2593_v21 }
 0x1d5   : > { %2689 = vst.msk [vmem:[#allocation4 + $0x20] sm:$0xf] %vm2680_vm10, %v2601_v60 }
 0x1d8   : > { %2971 = vrot.lane.b32.xlu0 %v2899_v13, %s9533_s11  ;;  %2955 = vrot.lane.b32.xlu1 %v2871_v41, %s9533_s11  ;;  %v3056_v13 = vld [vmem:[#allocation2 + $0x34] sm:$0xf]  ;;  %v2913_v41 = vsel %vm10065_vm1, %v2911_v47, %v2912_v27  ;;  %v3069_v47 = vld [vmem:[#allocation2 + $0x84] sm:$0xf] }
 0x1d9   : > { %2945 = vrot.lane.b32.xlu2 %v2854_v56, %s9533_s11  ;;  %v3064_v27 = vld [vmem:[#allocation2 + $0x64] sm:$0xf] }
 0x1da   : > { %v2615_v8 = vpop.permute.xlu0 %2614  ;;  %v2599_v33 = vpop.permute.xlu1 %2598 }
 0x1db   : > { %2696 = vst.msk [vmem:[#allocation4 + $0x3c] sm:$0xf] %vm2680_vm10, %v2615_v8  ;;  %v2607_v11 = vpop.permute.xlu2 %2606 }
 0x1dc   : > { %2688 = vst.msk [vmem:[#allocation4 + $0x1c] sm:$0xf] %vm2680_vm10, %v2599_v33  ;;  %v9176_v33 = vrot.slane %v2758_v16, 9 }
 0x1dd   : > { %2692 = vst.msk [vmem:[#allocation4 + $0x2c] sm:$0xf] %vm2680_vm10, %v2607_v11  ;;  %v3054_v11 = vld [vmem:[#allocation2 + $0x28] sm:$0xf] }
 0x1e0   : > { %2977 = vrot.lane.b32.xlu0 %v2910_v35, %s9533_s11  ;;  %2961 = vrot.lane.b32.xlu1 %v2882_v38, %s9533_s11  ;;  %v2917_v35 = vsel %vm10065_vm1, %v9176_v33, %v2916_v59  ;;  %v3249_v33 = vld [vmem:[#allocation2 + $0x2c] sm:$0x1] }
 0x1e1   : > { %2951 = vrot.lane.b32.xlu2 %v2864_v29, %s9533_s11 }
 0x1e2   : > { %v2621_v24 = vpop.permute.xlu0 %2620  ;;  %v2605_v37 = vpop.permute.xlu1 %2604 }
 0x1e3   : > { %2699 = vst.msk [vmem:[#allocation4 + $0x48] sm:$0xf] %vm2680_vm10, %v2621_v24  ;;  %v2613_v12 = vpop.permute.xlu2 %2612  ;;  %v3055_v24 = vld [vmem:[#allocation2 + $0x30] sm:$0xf] }
 0x1e4   : > { %2691 = vst.msk [vmem:[#allocation4 + $0x28] sm:$0xf] %vm2680_vm10, %v2605_v37 }
 0x1e5   : > { %2695 = vst.msk [vmem:[#allocation4 + $0x38] sm:$0xf] %vm2680_vm10, %v2613_v12 }
 0x1e8   : > { %2983 = vrot.lane.b32.xlu0 %v2920_v36, %s9533_s11  ;;  %2967 = vrot.lane.b32.xlu1 %v2892_v48, %s9533_s11  ;;  %v3071_v36 = vld [vmem:[#allocation2 + $0x90] sm:$0xf]  ;;  %v3063_v48 = vld [vmem:[#allocation2 + $0x60] sm:$0xf] }
 0x1e9   : > { %2957 = vrot.lane.b32.xlu2 %v2875_v7, %s9533_s11  ;;  %v3058_v7 = vld [vmem:[#allocation2 + $0x40] sm:$0xf] }
 0x1ea   : > { %v2627_v51 = vpop.permute.xlu0 %2626  ;;  %v2611_v43 = vpop.permute.xlu1 %2610 }
 0x1eb   : > { %2702 = vst.msk [vmem:[#allocation4 + $0x54] sm:$0xf] %vm2680_vm10, %v2627_v51  ;;  %v2619_v19 = vpop.permute.xlu2 %2618  ;;  %v3061_v51 = vld [vmem:[#allocation2 + $0x54] sm:$0xf] }
 0x1ec   : > { %2694 = vst.msk [vmem:[#allocation4 + $0x34] sm:$0xf] %vm2680_vm10, %v2611_v43  ;;  %v343_v43 = vld [vmem:[#allocation2 + $0xcc] sm:$0x1] }
 0x1ed   : > { %2698 = vst.msk [vmem:[#allocation4 + $0x44] sm:$0xf] %vm2680_vm10, %v2619_v19  ;;  %v344_v4 = vsel %vm9598_vm5, 0, %v343_v43  ;;  %v3244_v19 = vld [vmem:[#allocation2 + $0x18] sm:$0xf]  ;;  %vm3211_vm5 = vcmask 224448  }
 0x1ee   : > { %345 = vst [vmem:[#allocation2 + $0xcc] sm:$0x1] %v344_v4  ;;  %v3293_v55 = vshrl.u32 %v3244_v19, 16  ;;  %v3296_v18 = vshll.u32 %v3244_v19, 16 }
 0x1f0   : > { %3119 = vrot.lane.b32.xlu0 %v3053_v14, %s9534_s12  ;;  %2973 = vrot.lane.b32.xlu1 %v2903_v0, %s9533_s11  ;;  %v3295_v1 = vrot.slane %v3293_v55, 4  ;;  %v3246_v55 = vld [vmem:[#allocation2 + $0x20] sm:$0x1] }
 0x1f1   : > { %2963 = vrot.lane.b32.xlu2 %v2885_v45, %s9533_s11  ;;  %v3077_v45 = vld [vmem:[#allocation2 + $0xb4] sm:$0xf] }
 0x1f2   : > { %v2633_v40 = vpop.permute.xlu0 %2632  ;;  %v2617_v21 = vpop.permute.xlu1 %2616 }
 0x1f3   : > { %2705 = vst.msk [vmem:[#allocation4 + $0x60] sm:$0xf] %vm2680_vm10, %v2633_v40  ;;  %v2625_v60 = vpop.permute.xlu2 %2624  ;;  %v3298_v40 = vrot.slane %v3296_v18, 5  ;;  %v3250_v18 = vld [vmem:[#allocation2 + $0x30] sm:$0xf] }
 0x1f4   : > { %2697 = vst.msk [vmem:[#allocation4 + $0x40] sm:$0xf] %vm2680_vm10, %v2617_v21 }
 0x1f5   : > { %2701 = vst.msk [vmem:[#allocation4 + $0x50] sm:$0xf] %vm2680_vm10, %v2625_v60  ;;  %v3248_v60 = vld [vmem:[#allocation2 + $0x28] sm:$0xf]  ;;  %v3299_v63 = vor.u32 %v3298_v40, %v3295_v1 }
 0x1f6   : > { %v3330_v61 = vshrl.u32 %v3248_v60, 16 }
 0x1f8   : > { %3125 = vrot.lane.b32.xlu0 %v3056_v13, %s9534_s12  ;;  %2979 = vrot.lane.b32.xlu1 %v2913_v41, %s9533_s11  ;;  %v3332_v16 = vrot.slane %v3330_v61, 4 }
 0x1f9   : > { %2969 = vrot.lane.b32.xlu2 %v2896_v57, %s9533_s11  ;;  %v3080_v57 = vld [vmem:[#allocation2 + $0xc4] sm:$0xf] }
 0x1fa   : > { %v2639_v56 = vpop.permute.xlu0 %2638  ;;  %v2623_v62 = vpop.permute.xlu1 %2622 }
 0x1fb   : > { %2708 = vst.msk [vmem:[#allocation4 + $0x6c] sm:$0xf] %vm2680_vm10, %v2639_v56  ;;  %v2631_v6 = vpop.permute.xlu2 %2630  ;;  %v3302_v56 = vshll.u32 %v10896_v31, 16 }
 0x1fc   : > { %2700 = vst.msk [vmem:[#allocation4 + $0x4c] sm:$0xf] %vm2680_vm10, %v2623_v62  ;;  %v3326_v62 = vshll.u32 %v3248_v60, 16  ;;  %v3081_v60 = vld [vmem:[#allocation2 + $0xcc] sm:$0xf] }
 0x1fd   : > { %2704 = vst.msk [vmem:[#allocation4 + $0x5c] sm:$0xf] %vm2680_vm10, %v2631_v6  ;;  %v3067_v6 = vld [vmem:[#allocation2 + $0x78] sm:$0xf] }
 0x200   : > { %3131 = vrot.lane.b32.xlu0 %v3059_v30, %s9534_s12  ;;  %3115 = vrot.lane.b32.xlu1 %v3051_v53, %s9534_s12  ;;  %v3300_v30 = vrot.slane %v3299_v63, 4  ;;  %v10904_v53 = vrot.slane %v3302_v56, 5  ;;  %v3344_v63 = vshll.u32 %v3250_v18, 16  ;;  %v3076_v56 = vld [vmem:[#allocation2 + $0xac] sm:$0xf] }
 0x201   : > { %2975 = vrot.lane.b32.xlu2 %v2906_v17, %s9533_s11  ;;  %v10906_v17 = vrot.slane %v3326_v62, 5 }
 0x202   : > { %v2645_v2 = vpop.permute.xlu0 %2644  ;;  %v2629_v8 = vpop.permute.xlu1 %2628 }
 0x203   : > { %2711 = vst.msk [vmem:[#allocation4 + $0x78] sm:$0xf] %vm2680_vm10, %v2645_v2  ;;  %v2637_v9 = vpop.permute.xlu2 %2636  ;;  %v3253_v2 = vld [vmem:[#allocation2 + $0x3c] sm:$0xf] }
 0x204   : > { %2703 = vst.msk [vmem:[#allocation4 + $0x58] sm:$0xf] %vm2680_vm10, %v2629_v8 }
 0x205   : > { %2707 = vst.msk [vmem:[#allocation4 + $0x68] sm:$0xf] %vm2680_vm10, %v2637_v9 }
 0x208   : > { %3137 = vrot.lane.b32.xlu0 %v3062_v52, %s9534_s12  ;;  %3121 = vrot.lane.b32.xlu1 %v3054_v11, %s9534_s12  ;;  %v3365_v11 = vshrl.u32 %v3253_v2, 16 }
 0x209   : > { %2981 = vrot.lane.b32.xlu2 %v2917_v35, %s9533_s11  ;;  %v3368_v35 = vshll.u32 %v3253_v2, 16  ;;  %s9540_s11 = smov 64  }
 0x20a   : > { %v2924_v38 = vpop.permute.xlu0 %2923  ;;  %v2635_v42 = vpop.permute.xlu1 %2634 }
 0x20b   : > { %3019 = vst.msk [vmem:[#allocation4 + $0x4] sm:$0xf] %vm3017_vm12, %v2924_v38  ;;  %v2643_v29 = vpop.permute.xlu2 %2642  ;;  %v3305_v38 = vsel %vm9663_vm13, %v3300_v30, %v10904_v53  ;;  %v3266_v30 = vld [vmem:[#allocation2 + $0x70] sm:$0xf] }
 0x20c   : > { %2706 = vst.msk [vmem:[#allocation4 + $0x64] sm:$0xf] %vm2680_vm10, %v2635_v42  ;;  %v3333_v42 = vor.u32 %v3332_v16, %v10906_v17 }
 0x20d   : > { %2710 = vst.msk [vmem:[#allocation4 + $0x74] sm:$0xf] %vm2680_vm10, %v2643_v29  ;;  %v3336_v29 = vshll.u32 %v3249_v33, 16 }
 0x210   : > { %3143 = vrot.lane.b32.xlu0 %v3065_v44, %s9534_s12  ;;  %3127 = vrot.lane.b32.xlu1 %v3057_v50, %s9534_s12  ;;  %v3075_v44 = vld [vmem:[#allocation2 + $0xa8] sm:$0xf] }
 0x211   : > { %3117 = vrot.lane.b32.xlu2 %v3052_v39, %s9534_s12  ;;  %v3070_v50 = vld [vmem:[#allocation2 + $0x88] sm:$0xf]  ;;  %v3367_v39 = vrot.slane %v3365_v11, 4 }
 0x212   : > { %v2930_v59 = vpop.permute.xlu0 %2929  ;;  %v2641_v10 = vpop.permute.xlu1 %2640 }
 0x213   : > { %3022 = vst.msk [vmem:[#allocation4 + $0x10] sm:$0xf] %vm3017_vm12, %v2930_v59  ;;  %v2922_v46 = vpop.permute.xlu2 %2921  ;;  %v3370_v59 = vrot.slane %v3368_v35, 5  ;;  %v3251_v35 = vld [vmem:[#allocation2 + $0x34] sm:$0xf] }
 0x214   : > { %2709 = vst.msk [vmem:[#allocation4 + $0x70] sm:$0xf] %vm2680_vm10, %v2641_v10  ;;  %v3334_v10 = vrot.slane %v3333_v42, 4  ;;  %v3247_v42 = vld [vmem:[#allocation2 + $0x24] sm:$0xf] }
 0x215   : > { %3018 = vst.msk [vmem:[#allocation4] sm:$0xf] %vm3017_vm12, %v2922_v46  ;;  %v3338_v46 = vrot.slane %v3336_v29, 5  ;;  %v3470_v29 = vshll.u32 %v3266_v30, 16 }
 0x218   : > { %3149 = vrot.lane.b32.xlu0 %v3068_v25, %s9534_s12  ;;  %3133 = vrot.lane.b32.xlu1 %v3060_v54, %s9534_s12  ;;  %v10918_v25 = vld [vmem:[#allocation2 + $0x40] sm:$0xf] }
 0x219   : > { %3123 = vrot.lane.b32.xlu2 %v3055_v24, %s9534_s12  ;;  %v3257_v24 = vld [vmem:[#allocation2 + $0x4c] sm:$0xf]  ;;  %v3378_v11 = vshrl.u32 %v10918_v25, 16 }
 0x21a   : > { %v2936_v37 = vpop.permute.xlu0 %2935  ;;  %v2647_v28 = vpop.permute.xlu1 %2646 }
 0x21b   : > { %3025 = vst.msk [vmem:[#allocation4 + $0x1c] sm:$0xf] %vm3017_vm12, %v2936_v37  ;;  %v2928_v12 = vpop.permute.xlu2 %2927 }
 0x21c   : > { %2712 = vst.msk [vmem:[#allocation4 + $0x7c] sm:$0xf] %vm2680_vm10, %v2647_v28  ;;  %vm8843_vm10 = vcmask 31744  }
 0x21d   : > { %3021 = vst.msk [vmem:[#allocation4 + $0xc] sm:$0xf] %vm3017_vm12, %v2928_v12  ;;  %v3371_v12 = vor.u32 %v3370_v59, %v3367_v39 }
 0x220   : > { %3155 = vrot.lane.b32.xlu0 %v3071_v36, %s9534_s12  ;;  %3139 = vrot.lane.b32.xlu1 %v3063_v48, %s9534_s12  ;;  %v3374_v36 = vshll.u32 %v10918_v25, 16  ;;  %v3339_v48 = vsel %vm9663_vm13, %v3334_v10, %v3338_v46  ;;  %v3350_v25 = vshll.u32 %v3251_v35, 16 }
 0x221   : > { %3129 = vrot.lane.b32.xlu2 %v3058_v7, %s9534_s12  ;;  %v3398_v7 = vshll.u32 %v3257_v24, 16 }
 0x222   : > { %v2942_v34 = vpop.permute.xlu0 %2941  ;;  %v2926_v5 = vpop.permute.xlu1 %2925 }
 0x223   : > { %3028 = vst.msk [vmem:[#allocation4 + $0x28] sm:$0xf] %vm3017_vm12, %v2942_v34  ;;  %v2934_v22 = vpop.permute.xlu2 %2933  ;;  %v3402_v34 = vshrl.u32 %v3257_v24, 16  ;;  %v10932_v43 = vrot.slane %v3398_v7, 5  ;;  %v3317_v24 = vshrl.u32 %v3247_v42, 16 }
 0x224   : > { %3020 = vst.msk [vmem:[#allocation4 + $0x8] sm:$0xf] %vm3017_vm12, %v2926_v5  ;;  %v3306_v5 = vshrl.u32 %v10896_v31, 16 }
 0x225   : > { %3024 = vst.msk [vmem:[#allocation4 + $0x18] sm:$0xf] %vm3017_vm12, %v2934_v22  ;;  %v3078_v22 = vld [vmem:[#allocation2 + $0xb8] sm:$0xf]  ;;  %v3404_v4 = vrot.slane %v3402_v34, 4 }
 0x226   : > { %v3308_v19 = vrot.slane %v3306_v5, 4  ;;  %v3267_v34 = vld [vmem:[#allocation2 + $0x74] sm:$0x1] }
 0x227   : > { %v3405_v1 = vor.u32 %v3404_v4, %v10932_v43  ;;  %v3271_v4 = vld [vmem:[#allocation2 + $0x84] sm:$0xf] }
 0x228   : > { %3161 = vrot.lane.b32.xlu0 %v3074_v15, %s9534_s12  ;;  %3145 = vrot.lane.b32.xlu1 %v3066_v26, %s9534_s12  ;;  %v3073_v15 = vld [vmem:[#allocation2 + $0x9c] sm:$0xf]  ;;  %v3372_v26 = vrot.slane %v3371_v12, 4  ;;  %v10958_v12 = vrot.slane %v3470_v29, 5 }
 0x229   : > { %3135 = vrot.lane.b32.xlu2 %v3061_v51, %s9534_s12  ;;  %v10929_v51 = vrot.slane %v3374_v36, 5  ;;  %v3406_v62 = vrot.slane %v3405_v1, 4 }
 0x22a   : > { %v2948_v23 = vpop.permute.xlu0 %2947  ;;  %v2932_v14 = vpop.permute.xlu1 %2931 }
 0x22b   : > { %3031 = vst.msk [vmem:[#allocation4 + $0x34] sm:$0xf] %vm3017_vm12, %v2948_v23  ;;  %v2940_v0 = vpop.permute.xlu2 %2939 }
 0x22c   : > { %3023 = vst.msk [vmem:[#allocation4 + $0x14] sm:$0xf] %vm3017_vm12, %v2932_v14  ;;  %v3258_v14 = vld [vmem:[#allocation2 + $0x50] sm:$0x1] }
 0x22d   : > { %3027 = vst.msk [vmem:[#allocation4 + $0x24] sm:$0xf] %vm3017_vm12, %v2940_v0  ;;  %v3262_v0 = vld [vmem:[#allocation2 + $0x60] sm:$0xf]  ;;  %v3408_v40 = vshll.u32 %v3258_v14, 16 }
 0x22e   : > { %v3440_v31 = vshll.u32 %v3262_v0, 16 }
 0x22f   : > { %v3410_v61 = vrot.slane %v3408_v40, 5 }
 0x230   : > { %3167 = vrot.lane.b32.xlu0 %v3077_v45, %s9534_s12  ;;  %3151 = vrot.lane.b32.xlu1 %v3069_v47, %s9534_s12 }
 0x231   : > { %3141 = vrot.lane.b32.xlu2 %v3064_v27, %s9534_s12  ;;  %v3377_v27 = vsel %vm9663_vm13, %v3372_v26, %v10929_v51  ;;  %v3255_v26 = vld [vmem:[#allocation2 + $0x44] sm:$0x1] }
 0x232   : > { %v2954_v21 = vpop.permute.xlu0 %2953  ;;  %v2938_v13 = vpop.permute.xlu1 %2937  ;;  %v3384_v40 = vshll.u32 %v3255_v26, 16 }
 0x233   : > { %3034 = vst.msk [vmem:[#allocation4 + $0x40] sm:$0xf] %vm3017_vm12, %v2954_v21  ;;  %v2946_v41 = vpop.permute.xlu2 %2945  ;;  %v3437_v21 = vshrl.u32 %v3262_v0, 16  ;;  %v3259_v0 = vld [vmem:[#allocation2 + $0x54] sm:$0xf] }
 0x234   : > { %3026 = vst.msk [vmem:[#allocation4 + $0x20] sm:$0xf] %vm3017_vm12, %v2938_v13  ;;  %v3309_v13 = vor.u32 %v3308_v19, %v10904_v53  ;;  %v3346_v53 = vrot.slane %v3344_v63, 5  ;;  %v3319_v19 = vrot.slane %v3317_v24, 4 }
 0x235   : > { %3030 = vst.msk [vmem:[#allocation4 + $0x30] sm:$0xf] %vm3017_vm12, %v2946_v41  ;;  %v3312_v41 = vshll.u32 %v3246_v55, 16  ;;  %v3354_v55 = vshrl.u32 %v3251_v35, 16 }
 0x236   : > { %v3310_v16 = vrot.slane %v3309_v13, 4  ;;  %v3413_v13 = vshrl.u32 %v3259_v0, 16 }
 0x237   : > { %v3314_v2 = vrot.slane %v3312_v41, 5  ;;  %v3416_v41 = vshll.u32 %v3259_v0, 16  ;;  %v3356_v63 = vrot.slane %v3354_v55, 4  ;;  %v3276_v55 = vld [vmem:[#allocation2 + $0x98] sm:$0x1] }
 0x238   : > { %3173 = vrot.lane.b32.xlu0 %v3080_v57, %s9534_s12  ;;  %3157 = vrot.lane.b32.xlu1 %v3072_v20, %s9534_s12  ;;  %v3341_v57 = vshrl.u32 %v3250_v18, 16  ;;  %v3439_v20 = vrot.slane %v3437_v21, 4  ;;  %v3509_v21 = vshrl.u32 %v3271_v4, 16 }
 0x239   : > { %3147 = vrot.lane.b32.xlu2 %v3067_v6, %s9534_s12  ;;  %v3442_v6 = vrot.slane %v3440_v31, 5  ;;  %v3315_v10 = vsel %vm9663_vm13, %v3310_v16, %v3314_v2  ;;  %v3512_v31 = vshll.u32 %v3271_v4, 16 }
 0x23a   : > { %v2960_v8 = vpop.permute.xlu0 %2959  ;;  %v2944_v9 = vpop.permute.xlu1 %2943  ;;  %v3343_v33 = vrot.slane %v3341_v57, 4  ;;  %v3082_v57 = vld [vmem:[#allocation2 + $0xd0] sm:$0xf] }
 0x23b   : > { %3037 = vst.msk [vmem:[#allocation4 + $0x4c] sm:$0xf] %vm3017_vm12, %v2960_v8  ;;  %v2952_v52 = vpop.permute.xlu2 %2951  ;;  %v3443_v39 = vor.u32 %v3442_v6, %v3439_v20  ;;  %v3386_v20 = vrot.slane %v3384_v40, 5  ;;  %v3252_v6 = vld [vmem:[#allocation2 + $0x38] sm:$0x1]  ;;  %v3514_v16 = vrot.slane %v3512_v31, 5 }
 0x23c   : > { %3029 = vst.msk [vmem:[#allocation4 + $0x2c] sm:$0xf] %vm3017_vm12, %v2944_v9  ;;  %v10946_v9 = vld [vmem:[#allocation2 + $0x64] sm:$0xf]  ;;  %v3347_v46 = vor.u32 %v3346_v53, %v3343_v33  ;;  %v3418_v33 = vrot.slane %v3416_v41, 5 }
 0x23d   : > { %3033 = vst.msk [vmem:[#allocation4 + $0x3c] sm:$0xf] %vm3017_vm12, %v2952_v52  ;;  %v3446_v59 = vshll.u32 %v10946_v9, 16  ;;  %v10980_v53 = vld [vmem:[#allocation2 + $0x88] sm:$0xf]  ;;  %v3450_v29 = vshrl.u32 %v10946_v9, 16 }
 0x23e   : > { %v3348_v5 = vrot.slane %v3347_v46, 4  ;;  %v3518_v46 = vshll.u32 %v10980_v53, 16 }
 0x23f   : > { %v10961_v7 = vrot.slane %v3446_v59, 5  ;;  %v3256_v59 = vld [vmem:[#allocation2 + $0x48] sm:$0xf] }
 0x240   : > { %3676 = vrot.lane.b32.xlu0 %v3305_v38, %s9535_s13  ;;  %3163 = vrot.lane.b32.xlu1 %v3075_v44, %s9534_s12  ;;  %v3474_v44 = vshrl.u32 %v3266_v30, 16  ;;  %v3511_v30 = vrot.slane %v3509_v21, 4  ;;  %v10997_v26 = vrot.slane %v3518_v46, 5  ;;  %v3522_v46 = vshrl.u32 %v10980_v53, 16 }
 0x241   : > { %3153 = vrot.lane.b32.xlu2 %v3070_v50, %s9534_s12  ;;  %v3411_v50 = vsel %vm9663_vm13, %v3406_v62, %v3410_v61 }
 0x242   : > { %v2966_v54 = vpop.permute.xlu0 %2965  ;;  %v2950_v37 = vpop.permute.xlu1 %2949  ;;  %v3476_v36 = vrot.slane %v3474_v44, 4 }
 0x243   : > { %3040 = vst.msk [vmem:[#allocation4 + $0x58] sm:$0xf] %vm3017_vm12, %v2966_v54  ;;  %v2958_v28 = vpop.permute.xlu2 %2957  ;;  %v3079_v54 = vld [vmem:[#allocation2 + $0xc0] sm:$0xf] }
 0x244   : > { %3032 = vst.msk [vmem:[#allocation4 + $0x38] sm:$0xf] %vm3017_vm12, %v2950_v37  ;;  %v3320_v37 = vshll.u32 %v3247_v42, 16 }
 0x245   : > { %3036 = vst.msk [vmem:[#allocation4 + $0x48] sm:$0xf] %vm3017_vm12, %v2958_v28  ;;  %v3380_v28 = vrot.slane %v3378_v11, 4 }
 0x246   : > { %v3322_v14 = vrot.slane %v3320_v37, 5 }
 0x247   : > { %v3381_v18 = vor.u32 %v3380_v28, %v10929_v51 }
 0x248   : > { %3682 = vrot.lane.b32.xlu0 %v3339_v48, %s9535_s13  ;;  %3169 = vrot.lane.b32.xlu1 %v3078_v22, %s9534_s12  ;;  %v3444_v48 = vrot.slane %v3443_v39, 4  ;;  %v10964_v22 = vrot.slane %v3350_v25, 5  ;;  %v3323_v51 = vor.u32 %v3322_v14, %v3319_v19  ;;  %v3280_v19 = vld [vmem:[#allocation2 + $0xa8] sm:$0xf] }
 0x249   : > { %3159 = vrot.lane.b32.xlu2 %v3073_v15, %s9534_s12  ;;  %v3382_v61 = vrot.slane %v3381_v18, 4 }
 0x24a   : > { %v2972_v23 = vpop.permute.xlu0 %2971  ;;  %v2956_v45 = vpop.permute.xlu1 %2955  ;;  %v3449_v1 = vsel %vm9663_vm13, %v3444_v48, %v10961_v7  ;;  %v3324_v35 = vrot.slane %v3323_v51, 4  ;;  %v3357_v44 = vor.u32 %v3356_v63, %v10964_v22  ;;  %v3392_v48 = vshll.u32 %v3256_v59, 16 }
 0x24b   : > { %3043 = vst.msk [vmem:[#allocation4 + $0x64] sm:$0xf] %vm3017_vm12, %v2972_v23  ;;  %v2964_v47 = vpop.permute.xlu2 %2963  ;;  %v3387_v24 = vsel %vm9663_vm13, %v3382_v61, %v3386_v20  ;;  %v3552_v63 = vshll.u32 %v3276_v55, 16  ;;  %v3273_v55 = vld [vmem:[#allocation2 + $0x8c] sm:$0x1] }
 0x24c   : > { %3035 = vst.msk [vmem:[#allocation4 + $0x44] sm:$0xf] %vm3017_vm12, %v2956_v45  ;;  %v3329_v9 = vsel %vm9663_vm13, %v3324_v35, %v10906_v17 }
 0x24d   : > { %3039 = vst.msk [vmem:[#allocation4 + $0x54] sm:$0xf] %vm3017_vm12, %v2964_v47  ;;  %v3477_v47 = vor.u32 %v3476_v36, %v10958_v12  ;;  %v3389_v36 = vshrl.u32 %v3256_v59, 16  ;;  %v3269_v59 = vld [vmem:[#allocation2 + $0x7c] sm:$0xf] }
 0x250   : > { %3688 = vrot.lane.b32.xlu0 %v3377_v27, %s9535_s13  ;;  %3175 = vrot.lane.b32.xlu1 %v3081_v60, %s9534_s12  ;;  %v3480_v27 = vshll.u32 %v3267_v34, 16  ;;  %v3353_v60 = vsel %vm9663_vm13, %v3348_v5, %v10964_v22  ;;  %v3358_v34 = vrot.slane %v3357_v44, 4  ;;  %v3452_v22 = vrot.slane %v3450_v29, 4  ;;  %v3284_v44 = vld [vmem:[#allocation2 + $0xb8] sm:$0xf] }
 0x251   : > { %3165 = vrot.lane.b32.xlu2 %v3076_v56, %s9534_s12  ;;  %v3478_v56 = vrot.slane %v3477_v47, 4  ;;  %v3391_v47 = vrot.slane %v3389_v36, 4  ;;  %v3614_v36 = vshll.u32 %v3284_v44, 16 }
 0x252   : > { %v2978_v8 = vpop.permute.xlu0 %2977  ;;  %v2962_v52 = vpop.permute.xlu1 %2961  ;;  %v3482_v62 = vrot.slane %v3480_v27, 5  ;;  %v3394_v27 = vrot.slane %v3392_v48, 5  ;;  %v3453_v31 = vor.u32 %v3452_v22, %v10961_v7  ;;  %v3618_v48 = vshrl.u32 %v3284_v44, 16 }
 0x253   : > { %3046 = vst.msk [vmem:[#allocation4 + $0x70] sm:$0xf] %vm3017_vm12, %v2978_v8  ;;  %v2970_v38 = vpop.permute.xlu2 %2969  ;;  %v3415_v8 = vrot.slane %v3413_v13, 4  ;;  %v3584_v13 = vshll.u32 %v3280_v19, 16  ;;  %v3494_v22 = vshll.u32 %v3269_v59, 16 }
 0x254   : > { %3038 = vst.msk [vmem:[#allocation4 + $0x50] sm:$0xf] %vm3017_vm12, %v2962_v52  ;;  %v3275_v52 = vld [vmem:[#allocation2 + $0x94] sm:$0xf]  ;;  %v3483_v39 = vsel %vm9663_vm13, %v3478_v56, %v3482_v62  ;;  %v3395_v20 = vor.u32 %v3394_v27, %v3391_v47  ;;  %v3620_v47 = vrot.slane %v3618_v48, 4 }
 0x255   : > { %3042 = vst.msk [vmem:[#allocation4 + $0x60] sm:$0xf] %vm3017_vm12, %v2970_v38  ;;  %v3260_v38 = vld [vmem:[#allocation2 + $0x58] sm:$0xf]  ;;  %v3542_v25 = vshll.u32 %v3275_v52, 16  ;;  %v3419_v37 = vor.u32 %v3418_v33, %v3415_v8 }
 0x256   : > { %v3422_v28 = vshll.u32 %v3260_v38, 16  ;;  %v3426_v21 = vshrl.u32 %v3260_v38, 16  ;;  %v3261_v38 = vld [vmem:[#allocation2 + $0x5c] sm:$0x1]  ;;  %v3274_v48 = vld [vmem:[#allocation2 + $0x90] sm:$0xf] }
 0x257   : > { %v10999_v4 = vrot.slane %v3542_v25, 5  ;;  %v3420_v14 = vrot.slane %v3419_v37, 4 }
 0x258   : > { %3694 = vrot.lane.b32.xlu0 %v3411_v50, %s9535_s13  ;;  %3678 = vrot.lane.b32.xlu1 %v3315_v10, %s9535_s13  ;;  %v3360_v50 = vshll.u32 %v3252_v6, 16  ;;  %v3515_v10 = vor.u32 %v3514_v16, %v3511_v30  ;;  %v11002_v17 = vrot.slane %v3422_v28, 5  ;;  %v3428_v6 = vrot.slane %v3426_v21, 4  ;;  %v3289_v21 = vld [vmem:[#allocation2 + $0xcc] sm:$0xf] }
 0x259   : > { %3171 = vrot.lane.b32.xlu2 %v3079_v54, %s9534_s12  ;;  %v3546_v54 = vshrl.u32 %v3275_v52, 16  ;;  %v3586_v16 = vrot.slane %v3584_v13, 5  ;;  %v3554_v52 = vrot.slane %v3552_v63, 5  ;;  %v3432_v28 = vshll.u32 %v3261_v38, 16  ;;  %v3270_v38 = vld [vmem:[#allocation2 + $0x80] sm:$0x1] }
 0x25a   : > { %v2984_v15 = vpop.permute.xlu0 %2983  ;;  %v2968_v23 = vpop.permute.xlu1 %2967  ;;  %v3362_v5 = vrot.slane %v3360_v50, 5  ;;  %v3425_v56 = vsel %vm9663_vm13, %v3420_v14, %v11002_v17  ;;  %v3429_v25 = vor.u32 %v3428_v6, %v11002_v17  ;;  %v3524_v17 = vrot.slane %v3522_v46, 4  ;;  %v11062_v46 = vld [vmem:[#allocation2 + $0xa0] sm:$0xf] }
 0x25b   : > { %3049 = vst.msk [vmem:[#allocation4 + $0x7c] sm:$0xf] %vm3017_vm12, %v2984_v15  ;;  %v2976_v45 = vpop.permute.xlu2 %2975  ;;  %v3516_v15 = vrot.slane %v3515_v10, 4  ;;  %v3656_v6 = vshll.u32 %v3289_v21, 16 }
 0x25c   : > { %3041 = vst.msk [vmem:[#allocation4 + $0x5c] sm:$0xf] %vm3017_vm12, %v2968_v23  ;;  %v3548_v23 = vrot.slane %v3546_v54, 4  ;;  %v3363_v7 = vsel %vm9663_vm13, %v3358_v34, %v3362_v5  ;;  %v3265_v54 = vld [vmem:[#allocation2 + $0x6c] sm:$0xf] }
 0x25d   : > { %3045 = vst.msk [vmem:[#allocation4 + $0x6c] sm:$0xf] %vm3017_vm12, %v2976_v45  ;;  %v3264_v45 = vld [vmem:[#allocation2 + $0x68] sm:$0x1]  ;;  %v3521_v41 = vsel %vm9663_vm13, %v3516_v15, %v10997_v26  ;;  %v3461_v15 = vshrl.u32 %v3265_v54, 16 }
 0x25e   : > { %v3549_v51 = vor.u32 %v3548_v23, %v10999_v4  ;;  %v3464_v23 = vshll.u32 %v3265_v54, 16 }
 0x260   : > { %3700 = vrot.lane.b32.xlu0 %v3449_v1, %s9535_s13  ;;  %3684 = vrot.lane.b32.xlu1 %v3353_v60, %s9535_s13  ;;  %v3268_v1 = vld [vmem:[#allocation2 + $0x78] sm:$0xf]  ;;  %v3581_v60 = vshrl.u32 %v3280_v19, 16  ;;  %v3550_v33 = vrot.slane %v3549_v51, 4  ;;  %v3466_v13 = vrot.slane %v3464_v23, 5  ;;  %v3498_v51 = vshrl.u32 %v3269_v59, 16 }
 0x261   : > { %3177 = vrot.lane.b32.xlu2 %v3082_v57, %s9534_s12  ;;  %v3456_v57 = vshll.u32 %v3264_v45, 16  ;;  %v3485_v62 = vshrl.u32 %v3268_v1, 16  ;;  %v3488_v61 = vshll.u32 %v3268_v1, 16  ;;  %v3434_v45 = vrot.slane %v3432_v28, 5 }
 0x262   : > { %v3120_v2 = vpop.permute.xlu0 %3119  ;;  %v2974_v11 = vpop.permute.xlu1 %2973  ;;  %v3583_v30 = vrot.slane %v3581_v60, 4  ;;  %v3463_v60 = vrot.slane %v3461_v15, 4  ;;  %v3658_v59 = vrot.slane %v3656_v6, 5 }
 0x263   : > { %3214 = vst.msk [vmem:[#allocation4 + $0x8] sm:$0xf] %vm3211_vm5, %v3120_v2  ;;  %v2982_v42 = vpop.permute.xlu2 %2981  ;;  %v3454_v2 = vrot.slane %v3453_v31, 4  ;;  %v3458_v8 = vrot.slane %v3456_v57, 5  ;;  %v3490_v29 = vrot.slane %v3488_v61, 5 }
 0x264   : > { %3044 = vst.msk [vmem:[#allocation4 + $0x68] sm:$0xf] %vm3017_vm12, %v2974_v11  ;;  %v11019_v11 = vld [vmem:[#allocation2 + $0xac] sm:$0xf] }
 0x265   : > { %3048 = vst.msk [vmem:[#allocation4 + $0x78] sm:$0xf] %vm3017_vm12, %v2982_v42  ;;  %v3487_v42 = vrot.slane %v3485_v62, 4  ;;  %v3590_v37 = vshll.u32 %v11019_v11, 16  ;;  %v3459_v34 = vsel %vm9663_vm13, %v3454_v2, %v3458_v8  ;;  %v3528_v62 = vshll.u32 %v3273_v55, 16 }
 0x266   : > { %v399_v8 = vld [vmem:[#allocation2 + $0xd4] sm:$0x1]  ;;  %v3594_v15 = vshrl.u32 %v11019_v11, 16 }
 0x267   : > { %v3491_v5 = vor.u32 %v3490_v29, %v3487_v42  ;;  %v11036_v14 = vrot.slane %v3590_v37, 5  ;;  %v3500_v42 = vrot.slane %v3498_v51, 4  ;;  %v400_v29 = vsel %vm9605_vm7, 0, %v399_v8 }
 0x268   : > { %3706 = vrot.lane.b32.xlu0 %v3483_v39, %s9535_s13  ;;  %3690 = vrot.lane.b32.xlu1 %v3387_v24, %s9535_s13  ;;  %v3396_v39 = vrot.slane %v3395_v20, 4  ;;  %v3587_v24 = vor.u32 %v3586_v16, %v3583_v30  ;;  %v3653_v20 = vshrl.u32 %v3289_v21, 16  ;;  %401 = vst [vmem:[#allocation2 + $0xd4] sm:$0x1] %v400_v29  ;;  %v3596_v21 = vrot.slane %v3594_v15, 4 }
 0x269   : > { %3680 = vrot.lane.b32.xlu2 %v3329_v9, %s9535_s13  ;;  %v3555_v9 = vsel %vm9663_vm13, %v3550_v33, %v3554_v52  ;;  %v3492_v27 = vrot.slane %v3491_v5, 4  ;;  %v3467_v52 = vor.u32 %v3466_v13, %v3463_v60  ;;  %v3566_v5 = vshll.u32 %v11062_v46, 16 }
 0x26a   : > { %v3126_v0 = vpop.permute.xlu0 %3125  ;;  %v2980_v18 = vpop.permute.xlu1 %2979  ;;  %v3401_v53 = vsel %vm9663_vm13, %v3396_v39, %v10932_v43  ;;  %v3588_v19 = vrot.slane %v3587_v24, 4  ;;  %v11042_v43 = vrot.slane %v3494_v22, 5  ;;  %v3655_v39 = vrot.slane %v3653_v20, 4  ;;  %v11064_v24 = vld [vmem:[#allocation2 + $0xd0] sm:$0xf] }
 0x26b   : > { %3217 = vst.msk [vmem:[#allocation4 + $0x14] sm:$0xf] %vm3211_vm5, %v3126_v0  ;;  %v3118_v40 = vpop.permute.xlu2 %3117  ;;  %v3430_v0 = vrot.slane %v3429_v25, 4  ;;  %v3468_v28 = vrot.slane %v3467_v52, 4  ;;  %v3570_v20 = vshrl.u32 %v11062_v46, 16  ;;  %v3597_v6 = vor.u32 %v3596_v21, %v11036_v14 }
 0x26c   : > { %3047 = vst.msk [vmem:[#allocation4 + $0x74] sm:$0xf] %vm3017_vm12, %v2980_v18  ;;  %v11039_v18 = vrot.slane %v3614_v36, 5  ;;  %v3593_v63 = vsel %vm9663_vm13, %v3588_v19, %v11036_v14  ;;  %v3497_v30 = vsel %vm9663_vm13, %v3492_v27, %v11042_v43  ;;  %v3504_v36 = vshll.u32 %v3270_v38, 16  ;;  %v3283_v46 = vld [vmem:[#allocation2 + $0xb4] sm:$0xf] }
 0x26d   : > { %3213 = vst.msk [vmem:[#allocation4 + $0x4] sm:$0xf] %vm3211_vm5, %v3118_v40  ;;  %v3285_v40 = vld [vmem:[#allocation2 + $0xbc] sm:$0x1]  ;;  %v3435_v33 = vsel %vm9663_vm13, %v3430_v0, %v3434_v45  ;;  %v3659_v22 = vor.u32 %v3658_v59, %v3655_v39  ;;  %v3533_v0 = vshrl.u32 %v3274_v48, 16  ;;  %v3536_v45 = vshll.u32 %v3274_v48, 16 }
 0x26e   : > { %v3621_v61 = vor.u32 %v3620_v47, %v11039_v18  ;;  %v3506_v47 = vrot.slane %v3504_v36, 5  ;;  %v11082_v27 = vrot.slane %v3566_v5, 5  ;;  %v3598_v38 = vrot.slane %v3597_v6, 4  ;;  %v3279_v59 = vld [vmem:[#allocation2 + $0xa4] sm:$0x1] }
 0x26f   : > { %v3535_v13 = vrot.slane %v3533_v0, 4  ;;  %v3572_v29 = vrot.slane %v3570_v20, 4  ;;  %v3576_v36 = vshll.u32 %v3279_v59, 16  ;;  %v3608_v5 = vshll.u32 %v3283_v46, 16  ;;  %v3288_v6 = vld [vmem:[#allocation2 + $0xc8] sm:$0x1] }
 0x270   : > { %3712 = vrot.lane.b32.xlu0 %v3521_v41, %s9535_s13  ;;  %3696 = vrot.lane.b32.xlu1 %v3425_v56, %s9535_s13  ;;  %v3277_v41 = vld [vmem:[#allocation2 + $0x9c] sm:$0xf]  ;;  %v3525_v56 = vor.u32 %v3524_v17, %v10997_v26  ;;  %v3622_v44 = vrot.slane %v3621_v61, 4  ;;  %v3473_v17 = vsel %vm9663_vm13, %v3468_v28, %v10958_v12  ;;  %v3286_v12 = vld [vmem:[#allocation2 + $0xc0] sm:$0xf]  ;;  %v3666_v28 = vshrl.u32 %v11064_v24, 16 }
 0x271   : > { %3686 = vrot.lane.b32.xlu2 %v3363_v7, %s9535_s13  ;;  %v3624_v7 = vshll.u32 %v3285_v40, 16  ;;  %v3557_v16 = vshrl.u32 %v3277_v41, 16  ;;  %v3560_v2 = vshll.u32 %v3277_v41, 16  ;;  %v3538_v41 = vrot.slane %v3536_v45, 5  ;;  %v3291_v45 = vld [vmem:[#allocation2 + $0xd4] sm:$0x1] }
 0x272   : > { %v3132_v35 = vpop.permute.xlu0 %3131  ;;  %v3116_v50 = vpop.permute.xlu1 %3115  ;;  %v3526_v26 = vrot.slane %v3525_v56, 4  ;;  %v3632_v61 = vshll.u32 %v3286_v12, 16  ;;  %v3578_v15 = vrot.slane %v3576_v36, 5  ;;  %vm3772_vm7 = vcmask 257248  }
 0x273   : > { %3220 = vst.msk [vmem:[#allocation4 + $0x20] sm:$0xf] %vm3211_vm5, %v3132_v35  ;;  %v3124_v10 = vpop.permute.xlu2 %3123  ;;  %v3530_v35 = vrot.slane %v3528_v62, 5  ;;  %v3559_v25 = vrot.slane %v3557_v16, 4  ;;  %v3562_v54 = vrot.slane %v3560_v2, 5  ;;  %v3629_v62 = vshrl.u32 %v3286_v12, 16 }
 0x274   : > { %3212 = vst.msk [vmem:[#allocation4] sm:$0xf] %vm3211_vm5, %v3116_v50  ;;  %v3626_v50 = vrot.slane %v3624_v7, 5  ;;  %v3807_v16 = vld [vmem:[#allocation2 + $0x20] sm:$0x1]  ;;  %v3539_v8 = vor.u32 %v3538_v41, %v3535_v13  ;;  %vm6939_vm12 = vcmask 388416  }
 0x275   : > { %3216 = vst.msk [vmem:[#allocation4 + $0x10] sm:$0xf] %vm3211_vm5, %v3124_v10  ;;  %v3531_v23 = vsel %vm9663_vm13, %v3526_v26, %v3530_v35  ;;  %v3563_v19 = vor.u32 %v3562_v54, %v3559_v25  ;;  %v3906_v52 = vrot.slane %v3807_v16, 5  ;;  %v3631_v26 = vrot.slane %v3629_v62, 4 }
 0x276   : > { %v3634_v35 = vrot.slane %v3632_v61, 5  ;;  %v3540_v39 = vrot.slane %v3539_v8, 4  ;;  %v3648_v8 = vshll.u32 %v3288_v6, 16 }
 0x278   : > { %3718 = vrot.lane.b32.xlu0 %v3555_v9, %s9535_s13  ;;  %3702 = vrot.lane.b32.xlu1 %v3459_v34, %s9535_s13  ;;  %v3501_v9 = vor.u32 %v3500_v42, %v11042_v43  ;;  %v3627_v34 = vsel %vm9663_vm13, %v3622_v44, %v3626_v50  ;;  %v3660_v43 = vrot.slane %v3659_v22, 4  ;;  %v3287_v44 = vld [vmem:[#allocation2 + $0xc4] sm:$0xf]  ;;  %v3635_v54 = vor.u32 %v3634_v35, %v3631_v26 }
 0x279   : > { %3692 = vrot.lane.b32.xlu2 %v3401_v53, %s9535_s13  ;;  %v3662_v53 = vshll.u32 %v11064_v24, 16  ;;  %v3545_v48 = vsel %vm9663_vm13, %v3540_v39, %v10999_v4  ;;  %v3610_v4 = vrot.slane %v3608_v5, 5  ;;  %v3642_v13 = vshrl.u32 %v3287_v44, 16 }
 0x27a   : > { %v3138_v1 = vpop.permute.xlu0 %3137  ;;  %v3122_v31 = vpop.permute.xlu1 %3121  ;;  %v3502_v55 = vrot.slane %v3501_v9, 4  ;;  %v3573_v9 = vor.u32 %v3572_v29, %v11082_v27  ;;  %v3636_v22 = vrot.slane %v3635_v54, 4  ;;  %v3650_v29 = vrot.slane %v3648_v8, 5  ;;  %v3819_v8 = vld [vmem:[#allocation2 + $0x50] sm:$0x1] }
 0x27b   : > { %3223 = vst.msk [vmem:[#allocation4 + $0x2c] sm:$0xf] %vm3211_vm5, %v3138_v1  ;;  %v3130_v57 = vpop.permute.xlu2 %3129  ;;  %v11084_v11 = vrot.slane %v3662_v53, 5  ;;  %v3564_v1 = vrot.slane %v3563_v19, 4  ;;  %v3668_v19 = vrot.slane %v3666_v28, 4 }
 0x27c   : > { %3215 = vst.msk [vmem:[#allocation4 + $0xc] sm:$0xf] %vm3211_vm5, %v3122_v31  ;;  %v11087_v31 = vld [vmem:[#allocation2 + $0x1c] sm:$0xf]  ;;  %v3507_v2 = vsel %vm9663_vm13, %v3502_v55, %v3506_v47  ;;  %v3574_v24 = vrot.slane %v3573_v9, 4 }
 0x27d   : > { %3219 = vst.msk [vmem:[#allocation4 + $0x1c] sm:$0xf] %vm3211_vm5, %v3130_v57  ;;  %v3282_v57 = vld [vmem:[#allocation2 + $0xb0] sm:$0x1]  ;;  %v3903_v56 = vrot.slane %v11087_v31, 5  ;;  %v3569_v7 = vsel %vm9663_vm13, %v3564_v1, %v11082_v27  ;;  %v3669_v1 = vor.u32 %v3668_v19, %v11084_v11 }
 0x27e   : > { %v3812_v47 = vld [vmem:[#allocation2 + $0x34] sm:$0xf]  ;;  %v3817_v31 = vld [vmem:[#allocation2 + $0x48] sm:$0xe] }
 0x27f   : > { %v3917_v12 = vrot.slane %v3812_v47, 5 }
 0x280   : > { %3724 = vrot.lane.b32.xlu0 %v3593_v63, %s9535_s13  ;;  %3708 = vrot.lane.b32.xlu1 %v3497_v30, %s9535_s13  ;;  %v3665_v63 = vsel %vm9663_vm13, %v3660_v43, %v11084_v11  ;;  %v3600_v30 = vshll.u32 %v3282_v57, 16  ;;  %v3811_v43 = vld [vmem:[#allocation2 + $0x30] sm:$0xe] }
 0x281   : > { %3698 = vrot.lane.b32.xlu2 %v3435_v33, %s9535_s13  ;;  %v3905_v33 = vrot.slane %v3903_v56, 4  ;;  %v9179_v21 = vrot.slane %v3811_v43, 9  ;;  %v3919_v9 = vrot.slane %v3917_v12, 4 }
 0x282   : > { %v3144_v10 = vpop.permute.xlu0 %3143  ;;  %v3128_v37 = vpop.permute.xlu1 %3127  ;;  %v3602_v14 = vrot.slane %v3600_v30, 5 }
 0x283   : > { %3226 = vst.msk [vmem:[#allocation4 + $0x38] sm:$0xf] %vm3211_vm5, %v3144_v10  ;;  %v3136_v3 = vpop.permute.xlu2 %3135  ;;  %v3907_v25 = vsel %vm10065_vm1, %v3905_v33, %v3906_v52  ;;  %v3918_v57 = vsel %vm10065_vm1, %v9179_v21, %v3917_v12  ;;  %v3808_v33 = vld [vmem:[#allocation2 + $0x24] sm:$0xe]  ;;  %v3809_v52 = vld [vmem:[#allocation2 + $0x28] sm:$0xf] }
 0x284   : > { %3218 = vst.msk [vmem:[#allocation4 + $0x18] sm:$0xf] %vm3211_vm5, %v3128_v37  ;;  %v3638_v37 = vshll.u32 %v3287_v44, 16  ;;  %v9178_v26 = vrot.slane %v3808_v33, 9  ;;  %v3910_v35 = vrot.slane %v3809_v52, 5  ;;  %v3934_v52 = vrot.slane %v3819_v8, 5 }
 0x285   : > { %3222 = vst.msk [vmem:[#allocation4 + $0x28] sm:$0xf] %vm3211_vm5, %v3136_v3  ;;  %v3603_v3 = vsel %vm9663_vm13, %v3598_v38, %v3602_v14  ;;  %v3828_v8 = vld [vmem:[#allocation2 + $0x74] sm:$0x1] }
 0x286   : > { %v3640_v53 = vrot.slane %v3638_v37, 5  ;;  %v3911_v59 = vsel %vm10065_vm1, %v9178_v26, %v3910_v35  ;;  %v3805_v37 = vld [vmem:[#allocation2 + $0x18] sm:$0xe]  ;;  %v3912_v19 = vrot.slane %v3910_v35, 4 }
 0x288   : > { %3730 = vrot.lane.b32.xlu0 %v3627_v34, %s9535_s13  ;;  %3714 = vrot.lane.b32.xlu1 %v3531_v23, %s9535_s13  ;;  %v3605_v34 = vshrl.u32 %v3283_v46, 16  ;;  %v3641_v27 = vsel %vm9663_vm13, %v3636_v22, %v3640_v53 }
 0x289   : > { %3704 = vrot.lane.b32.xlu2 %v3473_v17, %s9535_s13 }
 0x28a   : > { %v3150_v40 = vpop.permute.xlu0 %3149  ;;  %v3134_v60 = vpop.permute.xlu1 %3133  ;;  %v3607_v0 = vrot.slane %v3605_v34, 4  ;;  %v9177_v34 = vrot.slane %v3805_v37, 9 }
 0x28b   : > { %3229 = vst.msk [vmem:[#allocation4 + $0x44] sm:$0xf] %vm3211_vm5, %v3150_v40  ;;  %v3142_v51 = vpop.permute.xlu2 %3141  ;;  %v3672_v40 = vshll.u32 %v3291_v45, 16  ;;  %v9181_v45 = vrot.slane %v3817_v31, 9 }
 0x28c   : > { %3221 = vst.msk [vmem:[#allocation4 + $0x24] sm:$0xf] %vm3211_vm5, %v3134_v60  ;;  %v3579_v60 = vsel %vm9663_vm13, %v3574_v24, %v3578_v15  ;;  %v3611_v41 = vor.u32 %v3610_v4, %v3607_v0  ;;  %v3810_v24 = vld [vmem:[#allocation2 + $0x2c] sm:$0x1] }
 0x28d   : > { %3225 = vst.msk [vmem:[#allocation4 + $0x34] sm:$0xf] %vm3211_vm5, %v3142_v51  ;;  %v3670_v51 = vrot.slane %v3669_v1, 4  ;;  %v3818_v4 = vld [vmem:[#allocation2 + $0x4c] sm:$0xf] }
 0x28e   : > { %v3612_v61 = vrot.slane %v3611_v41, 4 }
 0x290   : > { %3736 = vrot.lane.b32.xlu0 %v3665_v63, %s9535_s13  ;;  %3720 = vrot.lane.b32.xlu1 %v3569_v7, %s9535_s13  ;;  %v3674_v63 = vrot.slane %v3672_v40, 5  ;;  %v3644_v7 = vrot.slane %v3642_v13, 4  ;;  %v3617_v16 = vsel %vm9663_vm13, %v3612_v61, %v11039_v18  ;;  %v3815_v18 = vld [vmem:[#allocation2 + $0x40] sm:$0xf]  ;;  %v3814_v40 = vld [vmem:[#allocation2 + $0x3c] sm:$0xe] }
 0x291   : > { %3710 = vrot.lane.b32.xlu2 %v3507_v2, %s9535_s13  ;;  %v3924_v39 = vrot.slane %v3815_v18, 5  ;;  %v9180_v21 = vrot.slane %v3814_v40, 9 }
 0x292   : > { %v3156_v42 = vpop.permute.xlu0 %3155  ;;  %v3140_v50 = vpop.permute.xlu1 %3139  ;;  %v3675_v30 = vsel %vm9663_vm13, %v3670_v51, %v3674_v63  ;;  %v3645_v2 = vor.u32 %v3644_v7, %v3640_v53  ;;  %v3904_v53 = vsel %vm10065_vm1, %v9177_v34, %v3903_v56  ;;  %v3931_v56 = vrot.slane %v3818_v4, 5  ;;  %v3820_v51 = vld [vmem:[#allocation2 + $0x54] sm:$0xe] }
 0x293   : > { %3232 = vst.msk [vmem:[#allocation4 + $0x50] sm:$0xf] %vm3211_vm5, %v3156_v42  ;;  %v3148_v10 = vpop.permute.xlu2 %3147  ;;  %v3926_v54 = vrot.slane %v3924_v39, 4  ;;  %v3925_v12 = vsel %vm10065_vm1, %v9180_v21, %v3924_v39 }
 0x294   : > { %3224 = vst.msk [vmem:[#allocation4 + $0x30] sm:$0xf] %vm3211_vm5, %v3140_v50  ;;  %v3646_v42 = vrot.slane %v3645_v2, 4  ;;  %v3816_v50 = vld [vmem:[#allocation2 + $0x44] sm:$0x1]  ;;  %v3932_v47 = vsel %vm10065_vm1, %v9181_v45, %v3931_v56  ;;  %v3933_v33 = vrot.slane %v3931_v56, 4 }
 0x295   : > { %3228 = vst.msk [vmem:[#allocation4 + $0x40] sm:$0xf] %vm3211_vm5, %v3148_v10  ;;  %v3927_v10 = vrot.slane %v3816_v50, 5  ;;  %v3823_v45 = vld [vmem:[#allocation2 + $0x60] sm:$0xe] }
 0x296   : > { %v3651_v46 = vsel %vm9663_vm13, %v3646_v42, %v3650_v29  ;;  %v3935_v26 = vsel %vm10065_vm1, %v3933_v33, %v3934_v52  ;;  %v3824_v42 = vld [vmem:[#allocation2 + $0x64] sm:$0xf]  ;;  %v3825_v29 = vld [vmem:[#allocation2 + $0x68] sm:$0x1]  ;;  %v3955_v52 = vrot.slane %v3828_v8, 5 }
 0x297   : > { %v3928_v28 = vsel %vm10065_vm1, %v3926_v54, %v3927_v10  ;;  %v3948_v18 = vrot.slane %v3825_v29, 5 }
 0x298   : > { %4015 = vrot.lane.b32.xlu0 %v3907_v25, %s9536_s14  ;;  %3726 = vrot.lane.b32.xlu1 %v3603_v3, %s9535_s13  ;;  %v3813_v25 = vld [vmem:[#allocation2 + $0x38] sm:$0x1] }
 0x299   : > { %3716 = vrot.lane.b32.xlu2 %v3545_v48, %s9535_s13  ;;  %v3920_v36 = vrot.slane %v3813_v25, 5 }
 0x29a   : > { %v3162_v23 = vpop.permute.xlu0 %3161  ;;  %v3146_v17 = vpop.permute.xlu1 %3145 }
 0x29b   : > { %3235 = vst.msk [vmem:[#allocation4 + $0x5c] sm:$0xf] %vm3211_vm5, %v3162_v23  ;;  %v3154_v55 = vpop.permute.xlu2 %3153  ;;  %v3921_v22 = vsel %vm10065_vm1, %v3919_v9, %v3920_v36 }
 0x29c   : > { %3227 = vst.msk [vmem:[#allocation4 + $0x3c] sm:$0xf] %vm3211_vm5, %v3146_v17  ;;  %v3913_v17 = vrot.slane %v3810_v24, 5 }
 0x29d   : > { %3231 = vst.msk [vmem:[#allocation4 + $0x4c] sm:$0xf] %vm3211_vm5, %v3154_v55 }
 0x29e   : > { %v3914_v55 = vsel %vm10065_vm1, %v3912_v19, %v3913_v17  ;;  %v3829_v19 = vld [vmem:[#allocation2 + $0x78] sm:$0xe]  ;;  %v3830_v17 = vld [vmem:[#allocation2 + $0x7c] sm:$0xf] }
 0x29f   : > { %v9185_v31 = vrot.slane %v3829_v19, 9  ;;  %v3959_v4 = vrot.slane %v3830_v17, 5  ;;  %v3837_v17 = vld [vmem:[#allocation2 + $0x98] sm:$0x1] }
 0x2a0   : > { %3732 = vrot.lane.b32.xlu1 %v3641_v27, %s9535_s13  ;;  %4021 = vrot.lane.b32.xlu0 %v3918_v57, %s9536_s14  ;;  %v3821_v57 = vld [vmem:[#allocation2 + $0x58] sm:$0xf] }
 0x2a1   : > { %3722 = vrot.lane.b32.xlu2 %v3579_v60, %s9535_s13  ;;  %v3938_v63 = vrot.slane %v3821_v57, 5  ;;  %v3960_v56 = vsel %vm10065_vm1, %v9185_v31, %v3959_v4  ;;  %v3831_v57 = vld [vmem:[#allocation2 + $0x80] sm:$0x1]  ;;  %v3976_v31 = vrot.slane %v3837_v17, 5 }
 0x2a2   : > { %v3168_v11 = vpop.permute.xlu0 %3167  ;;  %v3152_v62 = vpop.permute.xlu1 %3151 }
 0x2a3   : > { %3238 = vst.msk [vmem:[#allocation4 + $0x68] sm:$0xf] %vm3211_vm5, %v3168_v11  ;;  %v3160_v20 = vpop.permute.xlu2 %3159  ;;  %v9182_v11 = vrot.slane %v3820_v51, 9  ;;  %v3940_v61 = vrot.slane %v3938_v63, 4  ;;  %v3961_v51 = vrot.slane %v3959_v4, 4 }
 0x2a4   : > { %3230 = vst.msk [vmem:[#allocation4 + $0x48] sm:$0xf] %vm3211_vm5, %v3152_v62  ;;  %v3822_v62 = vld [vmem:[#allocation2 + $0x5c] sm:$0x1]  ;;  %v3844_v4 = vld [vmem:[#allocation2 + $0xb4] sm:$0xe] }
 0x2a5   : > { %3234 = vst.msk [vmem:[#allocation4 + $0x58] sm:$0xf] %vm3211_vm5, %v3160_v20  ;;  %v3941_v7 = vrot.slane %v3822_v62, 5  ;;  %v3939_v20 = vsel %vm10065_vm1, %v9182_v11, %v3938_v63  ;;  %v3962_v11 = vrot.slane %v3831_v57, 5 }
 0x2a7   : > { %v3942_v6 = vsel %vm10065_vm1, %v3940_v61, %v3941_v7  ;;  %v3963_v62 = vsel %vm10065_vm1, %v3961_v51, %v3962_v11  ;;  %v3849_v11 = vld [vmem:[#allocation2 + $0xc8] sm:$0x1] }
 0x2a8   : > { %3738 = vrot.lane.b32.xlu1 %v3675_v30, %s9535_s13  ;;  %4027 = vrot.lane.b32.xlu0 %v3928_v28, %s9536_s14  ;;  %v3826_v28 = vld [vmem:[#allocation2 + $0x6c] sm:$0xe] }
 0x2a9   : > { %3728 = vrot.lane.b32.xlu2 %v3617_v16, %s9535_s13  ;;  %v9184_v9 = vrot.slane %v3826_v28, 9 }
 0x2aa   : > { %v3174_v38 = vpop.permute.xlu0 %3173  ;;  %v3158_v14 = vpop.permute.xlu1 %3157 }
 0x2ab   : > { %3241 = vst.msk [vmem:[#allocation4 + $0x74] sm:$0xf] %vm3211_vm5, %v3174_v38  ;;  %v3166_v44 = vpop.permute.xlu2 %3165 }
 0x2ac   : > { %3233 = vst.msk [vmem:[#allocation4 + $0x54] sm:$0xf] %vm3211_vm5, %v3158_v14 }
 0x2ad   : > { %3237 = vst.msk [vmem:[#allocation4 + $0x64] sm:$0xf] %vm3211_vm5, %v3166_v44  ;;  %v3945_v44 = vrot.slane %v3824_v42, 5 }
 0x2af   : > { %v3947_v50 = vrot.slane %v3945_v44, 4 }
 0x2b0   : > { %4017 = vrot.lane.b32.xlu1 %v3911_v59, %s9536_s14  ;;  %4033 = vrot.lane.b32.xlu0 %v3939_v20, %s9536_s14 }
 0x2b1   : > { %3734 = vrot.lane.b32.xlu2 %v3651_v46, %s9535_s13  ;;  %v3949_v39 = vsel %vm10065_vm1, %v3947_v50, %v3948_v18  ;;  %v3842_v50 = vld [vmem:[#allocation2 + $0xac] sm:$0xf] }
 0x2b2   : > { %v3677_v3 = vpop.permute.xlu0 %3676  ;;  %v3164_v48 = vpop.permute.xlu1 %3163 }
 0x2b3   : > { %3773 = vst.msk [vmem:[#allocation4] sm:$0xf] %vm3772_vm7, %v3677_v3  ;;  %v3172_v5 = vpop.permute.xlu2 %3171  ;;  %v11211_v3 = vld [vmem:[#allocation2 + $0x70] sm:$0xf] }
 0x2b4   : > { %3236 = vst.msk [vmem:[#allocation4 + $0x60] sm:$0xf] %vm3211_vm5, %v3164_v48  ;;  %v3952_v36 = vrot.slane %v11211_v3, 5  ;;  %v4178_v48 = vld [vmem:[%s13019_s1 + $0x10] sm:$0x3] }
 0x2b5   : > { %3240 = vst.msk [vmem:[#allocation4 + $0x70] sm:$0xf] %vm3211_vm5, %v3172_v5  ;;  %v4272_v34 = vunpack.c.l.b16 %v4178_v48  ;;  %v3832_v3 = vld [vmem:[#allocation2 + $0x84] sm:$0xe] }
 0x2b6   : > { %v3953_v5 = vsel %vm10065_vm1, %v9184_v9, %v3952_v36  ;;  %v3954_v33 = vrot.slane %v3952_v36, 4  ;;  %v9186_v48 = vrot.slane %v3832_v3, 9 }
 0x2b8   : > { %4023 = vrot.lane.b32.xlu1 %v3921_v22, %s9536_s14  ;;  %4039 = vrot.lane.b32.xlu0 %v3949_v39, %s9536_s14  ;;  %v4275_v22 = vpack.c.b16 %v4272_v34, %v4272_v34  ;;  %v3956_v29 = vsel %vm10065_vm1, %v3954_v33, %v3955_v52 }
 0x2b9   : > { %4013 = vrot.lane.b32.xlu2 %v3904_v53, %s9536_s14 }
 0x2ba   : > { %v3683_v15 = vpop.permute.xlu0 %3682  ;;  %v3170_v23 = vpop.permute.xlu1 %3169 }
 0x2bb   : > { %3776 = vst.msk [vmem:[#allocation4 + $0xc] sm:$0xf] %vm3772_vm7, %v3683_v15  ;;  %v3178_v0 = vpop.permute.xlu2 %3177  ;;  %v4329_v15 = vsel %vm4327_vm14, %v4275_v22, 0 }
 0x2bc   : > { %3239 = vst.msk [vmem:[#allocation4 + $0x6c] sm:$0xf] %vm3211_vm5, %v3170_v23  ;;  %4336 = vmatpush.bf16.msra.mxu0 %v4329_v15  ;;  %9483 = vmatpush.bf16.msra.mxu3 %v4329_v15 }
 0x2bd   : > { %3243 = vst.msk [vmem:[#allocation4 + $0x7c] sm:$0xf] %vm3211_vm5, %v3178_v0  ;;  %v9462_v0 = vld [vmem:[%s13019_s1 + $0x8] sm:$0xff] }
 0x2c0   : > { %4029 = vrot.lane.b32.xlu1 %v3932_v47, %s9536_s14  ;;  %4337 = vmatpush.bf16.msra.mxu0 %v9462_v0  ;;  %v9461_v47 = vld [vmem:[%s13019_s1] sm:$0xff] }
 0x2c1   : > { %4019 = vrot.lane.b32.xlu2 %v3914_v55, %s9536_s14  ;;  %v9183_v55 = vrot.slane %v3823_v45, 9  ;;  %4045 = vrot.lane.b32.xlu0 %v3960_v56, %s9536_s14  ;;  %v3845_v45 = vld [vmem:[#allocation2 + $0xb8] sm:$0xf]  ;;  %v9190_v56 = vrot.slane %v3844_v4, 9 }
 0x2c2   : > { %v3689_v27 = vpop.permute.xlu0 %3688  ;;  %v3176_v43 = vpop.permute.xlu1 %3175  ;;  %9484 = vmatpush.bf16.msra.mxu3 %v9462_v0 }
 0x2c3   : > { %3779 = vst.msk [vmem:[#allocation4 + $0x18] sm:$0xf] %vm3772_vm7, %v3689_v27  ;;  %v3681_v1 = vpop.permute.xlu2 %3680  ;;  %v3946_v27 = vsel %vm10065_vm1, %v9183_v55, %v3945_v44  ;;  %v3841_v55 = vld [vmem:[#allocation2 + $0xa8] sm:$0xe] }
 0x2c4   : > { %3242 = vst.msk [vmem:[#allocation4 + $0x78] sm:$0xf] %vm3211_vm5, %v3176_v43  ;;  %4338 = vmatpush.bf16.msra.mxu0 %v9461_v47  ;;  %vm8265_vm5 = vcmask 1043456  }
 0x2c5   : > { %3775 = vst.msk [vmem:[#allocation4 + $0x8] sm:$0xf] %vm3772_vm7, %v3681_v1  ;;  %v11236_v1 = vld [vmem:[#allocation2 + $0x88] sm:$0xf] }
 0x2c6   : > { %v3966_v21 = vrot.slane %v11236_v1, 5  ;;  %9485 = vmatpush.bf16.msra.mxu3 %v9461_v47  ;;  %v9189_v1 = vrot.slane %v3841_v55, 9 }
 0x2c8   : > { %4035 = vrot.lane.b32.xlu1 %v3942_v6, %s9536_s14  ;;  %v3838_v6 = vld [vmem:[#allocation2 + $0x9c] sm:$0xe] }
 0x2c9   : > { %4025 = vrot.lane.b32.xlu2 %v3925_v12, %s9536_s14 }
 0x2ca   : > { %v3695_v60 = vpop.permute.xlu0 %3694  ;;  %v3679_v13 = vpop.permute.xlu1 %3678 }
 0x2cb   : > { %3782 = vst.msk [vmem:[#allocation4 + $0x24] sm:$0xf] %vm3772_vm7, %v3695_v60  ;;  %v3687_v41 = vpop.permute.xlu2 %3686  ;;  %v3834_v60 = vld [vmem:[#allocation2 + $0x8c] sm:$0x1] }
 0x2cc   : > { %3774 = vst.msk [vmem:[#allocation4 + $0x4] sm:$0xf] %vm3772_vm7, %v3679_v13  ;;  %v3968_v13 = vrot.slane %v3966_v21, 4 }
 0x2cd   : > { %3778 = vst.msk [vmem:[#allocation4 + $0x14] sm:$0xf] %vm3772_vm7, %v3687_v41  ;;  %v3969_v41 = vrot.slane %v3834_v60, 5 }
 0x2cf   : > { %v3970_v63 = vsel %vm10065_vm1, %v3968_v13, %v3969_v41  ;;  %v3848_v13 = vld [vmem:[#allocation2 + $0xc4] sm:$0xf] }
 0x2d0   : > { %4041 = vrot.lane.b32.xlu1 %v3953_v5, %s9536_s14  ;;  %4051 = vrot.lane.b32.xlu0 %v3970_v63, %s9536_s14  ;;  %v3967_v5 = vsel %vm10065_vm1, %v9186_v48, %v3966_v21  ;;  %v4001_v51 = vrot.slane %v3848_v13, 5  ;;  %v3847_v63 = vld [vmem:[#allocation2 + $0xc0] sm:$0xe] }
 0x2d1   : > { %4031 = vrot.lane.b32.xlu2 %v3935_v26, %s9536_s14  ;;  %v3835_v26 = vld [vmem:[#allocation2 + $0x90] sm:$0xe] }
 0x2d2   : > { %v3701_v30 = vpop.permute.xlu0 %3700  ;;  %v3685_v16 = vpop.permute.xlu1 %3684 }
 0x2d3   : > { %3785 = vst.msk [vmem:[#allocation4 + $0x30] sm:$0xf] %vm3772_vm7, %v3701_v30  ;;  %v3693_v2 = vpop.permute.xlu2 %3692  ;;  %v3839_v30 = vld [vmem:[#allocation2 + $0xa0] sm:$0xf] }
 0x2d4   : > { %3777 = vst.msk [vmem:[#allocation4 + $0x10] sm:$0xf] %vm3772_vm7, %v3685_v16  ;;  %v9188_v16 = vrot.slane %v3838_v6, 9 }
 0x2d5   : > { %3781 = vst.msk [vmem:[#allocation4 + $0x20] sm:$0xf] %vm3772_vm7, %v3693_v2  ;;  %v3980_v2 = vrot.slane %v3839_v30, 5 }
 0x2d7   : > { %v3982_v28 = vrot.slane %v3980_v2, 4 }
 0x2d8   : > { %4047 = vrot.lane.b32.xlu1 %v3963_v62, %s9536_s14  ;;  %v9191_v62 = vrot.slane %v3847_v63, 9 }
 0x2d9   : > { %4037 = vrot.lane.b32.xlu2 %v3946_v27, %s9536_s14  ;;  %v3994_v27 = vrot.slane %v3845_v45, 5  ;;  %v3851_v45 = vld [vmem:[#allocation2 + $0xd0] sm:$0xf] }
 0x2da   : > { %v3707_v35 = vpop.permute.xlu0 %3706  ;;  %v3691_v38 = vpop.permute.xlu1 %3690  ;;  %v4002_v30 = vsel %vm10065_vm1, %v9191_v62, %v4001_v51  ;;  %v4008_v55 = vrot.slane %v3851_v45, 5  ;;  %v11354_v62 = vld [vmem:[%s13020_s2] ss:$0 sm:$0xff] }
 0x2db   : > { %3788 = vst.msk [vmem:[#allocation4 + $0x3c] sm:$0xf] %vm3772_vm7, %v3707_v35  ;;  %v3699_v14 = vpop.permute.xlu2 %3698  ;;  %v3836_v35 = vld [vmem:[#allocation2 + $0x94] sm:$0xf]  ;;  %v3996_v6 = vrot.slane %v3994_v27, 4 }
 0x2dc   : > { %3780 = vst.msk [vmem:[#allocation4 + $0x1c] sm:$0xf] %vm3772_vm7, %v3691_v38  ;;  %v3981_v38 = vsel %vm10065_vm1, %v9188_v16, %v3980_v2  ;;  %v3973_v42 = vrot.slane %v3836_v35, 5 }
 0x2dd   : > { %3784 = vst.msk [vmem:[#allocation4 + $0x2c] sm:$0xf] %vm3772_vm7, %v3699_v14  ;;  %v9187_v14 = vrot.slane %v3835_v26, 9  ;;  %4057 = vrot.lane.b32.xlu0 %v3981_v38, %s9536_s14 }
 0x2de   : > { %v3975_v0 = vrot.slane %v3973_v42, 4 }
 0x2df   : > { %v3974_v44 = vsel %vm10065_vm1, %v9187_v14, %v3973_v42 }
 0x2e0   : > { %4053 = vrot.lane.b32.xlu1 %v3974_v44, %s9536_s14  ;;  %v3977_v47 = vsel %vm10065_vm1, %v3975_v0, %v3976_v31  ;;  %v888_v31 = vld [vmem:[#allocation3 + $0x18] sm:$0x1] }
 0x2e1   : > { %4043 = vrot.lane.b32.xlu2 %v3956_v29, %s9536_s14  ;;  %v889_v4 = vsel %vm11316_vm9, 0, %v888_v31 }
 0x2e2   : > { %v3713_v59 = vpop.permute.xlu0 %3712  ;;  %v3697_v10 = vpop.permute.xlu1 %3696  ;;  %890 = vst [vmem:[#allocation3 + $0x18] sm:$0x1] %v889_v4 }
 0x2e3   : > { %3791 = vst.msk [vmem:[#allocation4 + $0x48] sm:$0xf] %vm3772_vm7, %v3713_v59  ;;  %v3705_v46 = vpop.permute.xlu2 %3704  ;;  %v3987_v59 = vrot.slane %v3842_v50, 5 }
 0x2e4   : > { %3783 = vst.msk [vmem:[#allocation4 + $0x28] sm:$0xf] %vm3772_vm7, %v3697_v10 }
 0x2e5   : > { %3787 = vst.msk [vmem:[#allocation4 + $0x38] sm:$0xf] %vm3772_vm7, %v3705_v46  ;;  %v3843_v46 = vld [vmem:[#allocation2 + $0xb0] sm:$0x1]  ;;  %v3988_v60 = vsel %vm10065_vm1, %v9189_v1, %v3987_v59  ;;  %v3852_v1 = vld [vmem:[#allocation2 + $0xd4] sm:$0x1] }
 0x2e9   : > { %4049 = vrot.lane.b32.xlu2 %v3967_v5, %s9536_s14 }
 0x2ea   : > { %v3719_v25 = vpop.permute.xlu0 %3718  ;;  %v3703_v54 = vpop.permute.xlu1 %3702 }
 0x2eb   : > { %3794 = vst.msk [vmem:[#allocation4 + $0x54] sm:$0xf] %vm3772_vm7, %v3719_v25  ;;  %v3711_v37 = vpop.permute.xlu2 %3710  ;;  %v3989_v25 = vrot.slane %v3987_v59, 4 }
 0x2ec   : > { %3786 = vst.msk [vmem:[#allocation4 + $0x34] sm:$0xf] %vm3772_vm7, %v3703_v54  ;;  %v3990_v54 = vrot.slane %v3843_v46, 5 }
 0x2ed   : > { %3790 = vst.msk [vmem:[#allocation4 + $0x44] sm:$0xf] %vm3772_vm7, %v3711_v37  ;;  %v3840_v37 = vld [vmem:[#allocation2 + $0xa4] sm:$0x1] }
 0x2ee   : > { %v3991_v9 = vsel %vm10065_vm1, %v3989_v25, %v3990_v54  ;;  %v3983_v36 = vrot.slane %v3840_v37, 5  ;;  %v885_v25 = vld [vmem:[#allocation3 + $0xc] sm:$0x1] }
 0x2ef   : > { %4063 = vrot.lane.b32.xlu0 %v3991_v9, %s9536_s14  ;;  %v886_v54 = vsel %vm11316_vm9, 0, %v885_v25 }
 0x2f0   : > { %v3984_v34 = vsel %vm10065_vm1, %v3982_v28, %v3983_v36  ;;  %887 = vst [vmem:[#allocation3 + $0xc] sm:$0x1] %v886_v54 }
 0x2f1   : > { %4059 = vrot.lane.b32.xlu1 %v3984_v34, %s9536_s14  ;;  %4055 = vrot.lane.b32.xlu2 %v3977_v47, %s9536_s14 }
 0x2f2   : > { %v3725_v53 = vpop.permute.xlu0 %3724  ;;  %v3709_v24 = vpop.permute.xlu1 %3708 }
 0x2f3   : > { %3797 = vst.msk [vmem:[#allocation4 + $0x60] sm:$0xf] %vm3772_vm7, %v3725_v53  ;;  %v3717_v23 = vpop.permute.xlu2 %3716 }
 0x2f4   : > { %3789 = vst.msk [vmem:[#allocation4 + $0x40] sm:$0xf] %vm3772_vm7, %v3709_v24 }
 0x2f5   : > { %3793 = vst.msk [vmem:[#allocation4 + $0x50] sm:$0xf] %vm3772_vm7, %v3717_v23 }
 0x2f7   : > { %4069 = vrot.lane.b32.xlu0 %v4002_v30, %s9536_s14 }
 0x2f9   : > { %4061 = vrot.lane.b32.xlu2 %v3988_v60, %s9536_s14 }
 0x2fa   : > { %v3731_v43 = vpop.permute.xlu0 %3730  ;;  %v3715_v40 = vpop.permute.xlu1 %3714 }
 0x2fb   : > { %3800 = vst.msk [vmem:[#allocation4 + $0x6c] sm:$0xf] %vm3772_vm7, %v3731_v43  ;;  %v3723_v12 = vpop.permute.xlu2 %3722  ;;  %v3995_v43 = vsel %vm10065_vm1, %v9190_v56, %v3994_v27 }
 0x2fc   : > { %3792 = vst.msk [vmem:[#allocation4 + $0x4c] sm:$0xf] %vm3772_vm7, %v3715_v40  ;;  %4065 = vrot.lane.b32.xlu1 %v3995_v43, %s9536_s14 }
 0x2fd   : > { %3796 = vst.msk [vmem:[#allocation4 + $0x5c] sm:$0xf] %vm3772_vm7, %v3723_v12 }
 0x302   : > { %v3737_v61 = vpop.permute.xlu0 %3736  ;;  %v3721_v7 = vpop.permute.xlu1 %3720 }
 0x303   : > { %3803 = vst.msk [vmem:[#allocation4 + $0x78] sm:$0xf] %vm3772_vm7, %v3737_v61  ;;  %v3729_v20 = vpop.permute.xlu2 %3728  ;;  %v4003_v61 = vrot.slane %v4001_v51, 4 }
 0x304   : > { %3795 = vst.msk [vmem:[#allocation4 + $0x58] sm:$0xf] %vm3772_vm7, %v3721_v7  ;;  %v4004_v7 = vrot.slane %v3849_v11, 5  ;;  %v943_v11 = vld [vmem:[#allocation3 + $0x20] sm:$0x1] }
 0x305   : > { %3799 = vst.msk [vmem:[#allocation4 + $0x68] sm:$0xf] %vm3772_vm7, %v3729_v20  ;;  %v3846_v20 = vld [vmem:[#allocation2 + $0xbc] sm:$0x1] }
 0x306   : > { %v4005_v16 = vsel %vm10065_vm1, %v4003_v61, %v4004_v7  ;;  %v3997_v2 = vrot.slane %v3846_v20, 5  ;;  %v944_v61 = vsel %vm11332_vm2, 0, %v943_v11 }
 0x307   : > { %4071 = vrot.lane.b32.xlu1 %v4005_v16, %s9536_s14  ;;  %945 = vst [vmem:[#allocation3 + $0x20] sm:$0x1] %v944_v61 }
 0x308   : > { %v3998_v8 = vsel %vm10065_vm1, %v3996_v6, %v3997_v2  ;;  %v937_v6 = vld [vmem:[#allocation3 + $0x8] sm:$0x1] }
 0x309   : > { %4067 = vrot.lane.b32.xlu2 %v3998_v8, %s9536_s14  ;;  %v938_v2 = vsel %vm11332_vm2, 0, %v937_v6 }
 0x30a   : > { %v4016_v18 = vpop.permute.xlu0 %4015  ;;  %v3727_v39 = vpop.permute.xlu1 %3726  ;;  %939 = vst [vmem:[#allocation3 + $0x8] sm:$0x1] %v938_v2 }
 0x30b   : > { %4111 = vst.msk [vmem:[#allocation4 + $0x4] sm:$0xf] %vm4109_vm15, %v4016_v18  ;;  %v3735_v10 = vpop.permute.xlu2 %3734 }
 0x30c   : > { %3798 = vst.msk [vmem:[#allocation4 + $0x64] sm:$0xf] %vm3772_vm7, %v3727_v39 }
 0x30d   : > { %3802 = vst.msk [vmem:[#allocation4 + $0x74] sm:$0xf] %vm3772_vm7, %v3735_v10 }
 0x312   : > { %v3733_v22 = vpop.permute.xlu1 %3732  ;;  %v4022_v53 = vpop.permute.xlu0 %4021 }
 0x313   : > { %v4014_v24 = vpop.permute.xlu2 %4013  ;;  %3801 = vst.msk [vmem:[#allocation4 + $0x70] sm:$0xf] %vm3772_vm7, %v3733_v22 }
 0x314   : > { %4110 = vst.msk [vmem:[#allocation4] sm:$0xf] %vm4109_vm15, %v4014_v24 }
 0x315   : > { %4114 = vst.msk [vmem:[#allocation4 + $0x10] sm:$0xf] %vm4109_vm15, %v4022_v53  ;;  %v940_v53 = vld [vmem:[#allocation3 + $0x14] sm:$0x1] }
 0x316   : > { %v941_v24 = vsel %vm11332_vm2, 0, %v940_v53 }
 0x317   : > { %942 = vst [vmem:[#allocation3 + $0x14] sm:$0x1] %v941_v24 }
 0x31a   : > { %v3739_v15 = vpop.permute.xlu1 %3738  ;;  %v4028_v12 = vpop.permute.xlu0 %4027 }
 0x31b   : > { %3804 = vst.msk [vmem:[#allocation4 + $0x7c] sm:$0xf] %vm3772_vm7, %v3739_v15  ;;  %v9445_v23 = vld [vmem:[#allocation4] sm:$0xff]  ;;  %v4020_v19 = vpop.permute.xlu2 %4019  ;;  %vm7133_vm7 = vcmask 454016  }
 0x31c   : > { %4113 = vst.msk [vmem:[#allocation4 + $0xc] sm:$0xf] %vm4109_vm15, %v4020_v19  ;;  %9265 = vmatmul.msk.bf16.vlgmr.msra.gmra.mxu0 %vm4278_vm6, %v9445_v23  ;;  %v882_v23 = vld [vmem:[#allocation3] sm:$0x1] }
 0x31d   : > { %4117 = vst.msk [vmem:[#allocation4 + $0x1c] sm:$0xf] %vm4109_vm15, %v4028_v12  ;;  %v883_v19 = vsel %vm11316_vm9, 0, %v882_v23  ;;  %v4011_v12 = vrot.slane %v3852_v1, 5  ;;  %v946_v23 = vld [vmem:[#allocation3 + $0x2c] sm:$0x1] }
 0x31e   : > { %884 = vst [vmem:[#allocation3] sm:$0x1] %v883_v19  ;;  %v947_v31 = vsel %vm11332_vm2, 0, %v946_v23  ;;  %v4811_v1 = vld [vmem:[#allocation3 + $0x14] sm:$0x1] }
 0x31f   : > { %948 = vst [vmem:[#allocation3 + $0x2c] sm:$0x1] %v947_v31 }
 0x322   : > { %v4018_v40 = vpop.permute.xlu1 %4017  ;;  %v4034_v35 = vpop.permute.xlu0 %4033 }
 0x323   : > { %4112 = vst.msk [vmem:[#allocation4 + $0x8] sm:$0xf] %vm4109_vm15, %v4018_v40  ;;  %v4026_v21 = vpop.permute.xlu2 %4025 }
 0x324   : > { %4116 = vst.msk [vmem:[#allocation4 + $0x18] sm:$0xf] %vm4109_vm15, %v4026_v21  ;;  %v4010_v21 = vrot.slane %v4008_v55, 4 }
 0x325   : > { %4120 = vst.msk [vmem:[#allocation4 + $0x28] sm:$0xf] %vm4109_vm15, %v4034_v35  ;;  %v4983_v56 = vld [vmem:[#allocation3] sm:$0xf] }
 0x326   : > { %v5032_v47 = vshrl.u32 %v4983_v56, 16  ;;  %v5035_v27 = vshll.u32 %v4983_v56, 16 }
 0x328   : > { %v5034_v60 = vrot.slane %v5032_v47, 4  ;;  %v5037_v13 = vrot.slane %v5035_v27, 5 }
 0x32a   : > { %v9446_v41 = vld [vmem:[#allocation4 + $0x8] sm:$0xff]  ;;  %v4024_v57 = vpop.permute.xlu1 %4023  ;;  %v4040_v29 = vpop.permute.xlu0 %4039  ;;  %v5038_v51 = vor.u32 %v5037_v13, %v5034_v60  ;;  %v894_v13 = vld [vmem:[#allocation3 + $0x30] sm:$0x1] }
 0x32b   : > { %4115 = vst.msk [vmem:[#allocation4 + $0x14] sm:$0xf] %vm4109_vm15, %v4024_v57  ;;  %v4032_v33 = vpop.permute.xlu2 %4031  ;;  %v9448_v14 = vld [vmem:[#allocation4 + $0x18] sm:$0xff]  ;;  %v4012_v57 = vsel %vm10065_vm1, %v4010_v21, %v4011_v12  ;;  %v895_v11 = vsel %vm11316_vm9, 0, %v894_v13 }
 0x32c   : > { %9266 = vmatmul.msk.bf16.gmra.mxu0 %vm4278_vm6, %v9446_v41  ;;  %4119 = vst.msk [vmem:[#allocation4 + $0x24] sm:$0xf] %vm4109_vm15, %v4032_v33  ;;  %v4984_v41 = vld [vmem:[#allocation3 + $0x4] sm:$0xf]  ;;  %4075 = vrot.lane.b32.xlu0 %v4012_v57, %s9536_s14  ;;  %v5039_v7 = vrot.slane %v5038_v51, 4 }
 0x32d   : > { %4123 = vst.msk [vmem:[#allocation4 + $0x34] sm:$0xf] %vm4109_vm15, %v4040_v29  ;;  %v5041_v63 = vshll.u32 %v4984_v41, 16  ;;  %v3850_v33 = vld [vmem:[#allocation2 + $0xcc] sm:$0xe] }
 0x32e   : > { %v9192_v35 = vrot.slane %v3850_v33, 9  ;;  %v891_v29 = vld [vmem:[#allocation3 + $0x24] sm:$0x1]  ;;  %896 = vst [vmem:[#allocation3 + $0x30] sm:$0x1] %v895_v11 }
 0x32f   : > { %v5043_v20 = vrot.slane %v5041_v63, 5 }
 0x331   : > { %v5044_v16 = vsel %vm9663_vm13, %v5039_v7, %v5043_v20 }
 0x332   : > { %v4030_v52 = vpop.permute.xlu1 %4029  ;;  %v9447_v26 = vld [vmem:[#allocation4 + $0x10] sm:$0xff]  ;;  %5415 = vrot.lane.b32.xlu1 %v5044_v16, %s9530_s8 }
 0x333   : > { %4118 = vst.msk [vmem:[#allocation4 + $0x20] sm:$0xf] %vm4109_vm15, %v4030_v52  ;;  %v4038_v42 = vpop.permute.xlu2 %4037  ;;  %v4046_v59 = vpop.permute.xlu0 %4045 }
 0x334   : > { %4122 = vst.msk [vmem:[#allocation4 + $0x30] sm:$0xf] %vm4109_vm15, %v4038_v42  ;;  %v4009_v42 = vsel %vm10065_vm1, %v9192_v35, %v4008_v55 }
 0x335   : > { %4126 = vst.msk [vmem:[#allocation4 + $0x40] sm:$0xf] %vm4109_vm15, %v4046_v59  ;;  %4073 = vrot.lane.b32.xlu2 %v4009_v42, %s9536_s14  ;;  %v4985_v59 = vld [vmem:[#allocation3 + $0x8] sm:$0x1]  ;;  %v949_v42 = vld [vmem:[#allocation3 + $0x38] sm:$0x1] }
 0x33a   : > { %v4036_v38 = vpop.permute.xlu1 %4035  ;;  %v9449_v44 = vld [vmem:[#allocation4 + $0x20] sm:$0xff] }
 0x33b   : > { %4121 = vst.msk [vmem:[#allocation4 + $0x2c] sm:$0xf] %vm4109_vm15, %v4036_v38  ;;  %v4044_v18 = vpop.permute.xlu2 %4043  ;;  %v9451_v3 = vld [vmem:[#allocation4 + $0x30] sm:$0xff] }
 0x33c   : > { %9267 = vmatmul.msk.bf16.gmra.mxu0 %vm4278_vm6, %v9447_v26  ;;  %4125 = vst.msk [vmem:[#allocation4 + $0x3c] sm:$0xf] %vm4109_vm15, %v4044_v18  ;;  %v892_v18 = vsel %vm11316_vm9, 0, %v891_v29 }
 0x33d   : > { %893 = vst [vmem:[#allocation3 + $0x24] sm:$0x1] %v892_v18 }
 0x342   : > { %v4042_v50 = vpop.permute.xlu1 %4041  ;;  %v9450_v39 = vld [vmem:[#allocation4 + $0x28] sm:$0xff]  ;;  %v4052_v37 = vpop.permute.xlu0 %4051 }
 0x343   : > { %4124 = vst.msk [vmem:[#allocation4 + $0x38] sm:$0xf] %vm4109_vm15, %v4042_v50  ;;  %v4050_v10 = vpop.permute.xlu2 %4049 }
 0x344   : > { %4128 = vst.msk [vmem:[#allocation4 + $0x48] sm:$0xf] %vm4109_vm15, %v4050_v10 }
 0x345   : > { %4129 = vst.msk [vmem:[#allocation4 + $0x4c] sm:$0xf] %vm4109_vm15, %v4052_v37  ;;  %v5051_v37 = vshll.u32 %v4985_v59, 16 }
 0x347   : > { %v5053_v53 = vrot.slane %v5051_v37, 5 }
 0x34a   : > { %v4048_v28 = vpop.permute.xlu1 %4047  ;;  %v9452_v17 = vld [vmem:[#allocation4 + $0x38] sm:$0xff] }
 0x34b   : > { %4127 = vst.msk [vmem:[#allocation4 + $0x44] sm:$0xf] %vm4109_vm15, %v4048_v28  ;;  %v4056_v9 = vpop.permute.xlu2 %4055 }
 0x34c   : > { %9268 = vmatmul.msk.bf16.gmra.mxu0 %vm4278_vm6, %v9448_v14  ;;  %4131 = vst.msk [vmem:[#allocation4 + $0x54] sm:$0xf] %vm4109_vm15, %v4056_v9  ;;  %v5045_v14 = vshrl.u32 %v4984_v41, 16  ;;  %v9454_v27 = vld [vmem:[#allocation4 + $0x48] sm:$0xff] }
 0x34e   : > { %v5047_v50 = vrot.slane %v5045_v14, 4 }
 0x34f   : > { %v4058_v36 = vpop.permute.xlu0 %4057 }
 0x350   : > { %4132 = vst.msk [vmem:[#allocation4 + $0x58] sm:$0xf] %vm4109_vm15, %v4058_v36  ;;  %v5048_v10 = vor.u32 %v5047_v50, %v5043_v20  ;;  %v950_v50 = vsel %vm11332_vm2, 0, %v949_v42 }
 0x351   : > { %951 = vst [vmem:[#allocation3 + $0x38] sm:$0x1] %v950_v50 }
 0x352   : > { %v4054_v48 = vpop.permute.xlu1 %4053  ;;  %v9453_v30 = vld [vmem:[#allocation4 + $0x40] sm:$0xff] }
 0x353   : > { %4130 = vst.msk [vmem:[#allocation4 + $0x50] sm:$0xf] %vm4109_vm15, %v4054_v48  ;;  %v4062_v34 = vpop.permute.xlu2 %4061  ;;  %v5049_v48 = vrot.slane %v5048_v10, 4 }
 0x354   : > { %4134 = vst.msk [vmem:[#allocation4 + $0x60] sm:$0xf] %vm4109_vm15, %v4062_v34 }
 0x355   : > { %v5054_v19 = vsel %vm9663_vm13, %v5049_v48, %v5053_v53 }
 0x356   : > { %5417 = vrot.lane.b32.xlu2 %v5054_v19, %s9530_s8 }
 0x35c   : > { %9269 = vmatmul.msk.bf16.gmra.mxu0 %vm4278_vm6, %v9449_v44 }
 0x361   : > { %v4064_v5 = vpop.permute.xlu0 %4063 }
 0x362   : > { %4135 = vst.msk [vmem:[#allocation4 + $0x64] sm:$0xf] %vm4109_vm15, %v4064_v5  ;;  %v4807_v5 = vld [vmem:[#allocation3 + $0xc] sm:$0xf] }
 0x363   : > { %v4060_v15 = vpop.permute.xlu1 %4059  ;;  %v4068_v43 = vpop.permute.xlu2 %4067 }
 0x364   : > { %4133 = vst.msk [vmem:[#allocation4 + $0x5c] sm:$0xf] %vm4109_vm15, %v4060_v15 }
 0x365   : > { %4137 = vst.msk [vmem:[#allocation4 + $0x6c] sm:$0xf] %vm4109_vm15, %v4068_v43 }
 0x369   : > { %v9457_v0 = vld [vmem:[#allocation4 + $0x60] sm:$0xff]  ;;  %v4070_v54 = vpop.permute.xlu0 %4069 }
 0x36a   : > { %9277 = vmatmul.msk.bf16.vlgmr.msra.gmra.mxu3 %vm4278_vm6, %v9457_v0  ;;  %4138 = vst.msk [vmem:[#allocation4 + $0x70] sm:$0xf] %vm4109_vm15, %v4070_v54 }
 0x36c   : > { %9270 = vmatmul.msk.bf16.gmra.mxu0 %vm4278_vm6, %v9450_v39 }
 0x36e   : > { %v4066_v40 = vpop.permute.xlu1 %4065 }
 0x36f   : > { %4136 = vst.msk [vmem:[#allocation4 + $0x68] sm:$0xf] %vm4109_vm15, %v4066_v40 }
 0x376   : > { %v9458_v26 = vld [vmem:[#allocation4 + $0x68] sm:$0xff] }
 0x379   : > { %v4072_v36 = vpop.permute.xlu1 %4071 }
 0x37a   : > { %9278 = vmatmul.msk.bf16.gmra.mxu3 %vm4278_vm6, %v9458_v26  ;;  %4139 = vst.msk [vmem:[#allocation4 + $0x74] sm:$0xf] %vm4109_vm15, %v4072_v36  ;;  %v4814_v26 = vld [vmem:[#allocation3 + $0x18] sm:$0xf] }
 0x37c   : > { %9271 = vmatmul.msk.bf16.gmra.mxu0 %vm4278_vm6, %v9451_v3 }
 0x381   : > { %v9459_v43 = vld [vmem:[#allocation4 + $0x70] sm:$0xff] }
 0x38a   : > { %9279 = vmatmul.msk.bf16.gmra.mxu3 %vm4278_vm6, %v9459_v43 }
 0x38c   : > { %9272 = vmatmul.msk.bf16.gmra.mxu0 %vm4278_vm6, %v9452_v17 }
 0x399   : > { %v4340_v8 = vpop.f32.mrf.mxu0 }
 0x39a   : > { %v4341_v52 = vadd.f32 %v11354_v62, %v4340_v8 }
 0x39c   : > { %v4420_v38 = vmax.f32 %v4341_v52, 0.0  ;;  %9273 = vmatmul.msk.bf16.gmra.mxu0 %vm4278_vm6, %v9453_v30 }
 0x39e   : > { %v4452_v44 = vpack.c.bf16 %v4420_v38, %v4420_v38 }
 0x3a0   : > { %v4485_v39 = vshrl.u32 %v4452_v44, 16  ;;  %v4488_v3 = vshll.u32 %v4452_v44, 16 }
 0x3a1   : > { %v4342_v25 = vpop.f32.mrf.mxu0 }
 0x3a2   : > { %v4487_v28 = vrot.slane %v4485_v39, 7  ;;  %v4343_v9 = vadd.f32 %v11354_v62, %v4342_v25 }
 0x3a4   : > { %v4490_v24 = vor.u32 %v4488_v3, %v4487_v28  ;;  %v4421_v15 = vmax.f32 %v4343_v9, 0.0  ;;  %v4491_v40 = vrot.slane %v4487_v28, 4 }
 0x3a6   : > { %v4808_v17 = vsel %vm11375_vm8, %v4490_v24, %v4807_v5  ;;  %v4453_v0 = vpack.c.bf16 %v4421_v15, %v4421_v15  ;;  %v9455_v24 = vld [vmem:[#allocation4 + $0x50] sm:$0xff]  ;;  %v4818_v15 = vld [vmem:[#allocation3 + $0x20] sm:$0x1] }
 0x3a7   : > { %4809 = vst [vmem:[#allocation3 + $0xc] sm:$0xf] %v4808_v17 }
 0x3a8   : > { %v4493_v4 = vshrl.u32 %v4453_v0, 16  ;;  %v4496_v55 = vshll.u32 %v4453_v0, 16 }
 0x3a9   : > { %v4345_v45 = vpop.f32.mrf.mxu0 }
 0x3aa   : > { %v4495_v56 = vrot.slane %v4493_v4, 7  ;;  %v4346_v47 = vadd.f32 %v11354_v62, %v4345_v45 }
 0x3ac   : > { %v4498_v21 = vor.u32 %v4496_v55, %v4495_v56  ;;  %v4500_v12 = vrot.slane %v4495_v56, 4  ;;  %v4422_v60 = vmax.f32 %v4346_v47, 0.0  ;;  %9274 = vmatmul.msk.bf16.gmra.mxu0 %vm4278_vm6, %v9454_v27  ;;  %v897_v55 = vld [vmem:[#allocation3 + $0x3c] sm:$0x1] }
 0x3ae   : > { %v4499_v41 = vsel %vm9643_vm11, %v4491_v40, %v4498_v21  ;;  %v4812_v57 = vsel %vm11316_vm9, %v4500_v12, %v4811_v1  ;;  %v4454_v51 = vpack.c.bf16 %v4422_v60, %v4422_v60  ;;  %v4986_v63 = vld [vmem:[#allocation3 + $0xc] sm:$0xf]  ;;  %v898_v40 = vsel %vm11316_vm9, 0, %v897_v55 }
 0x3af   : > { %4810 = vst.msk [vmem:[#allocation3 + $0x10] sm:$0xf] %vm871_vm4, %v4499_v41  ;;  %v5056_v61 = vshrl.u32 %v4986_v63, 16  ;;  %v5059_v7 = vshll.u32 %v4986_v63, 16  ;;  %v4921_v20 = vld [vmem:[#allocation3 + $0xc] sm:$0xf] }
 0x3b0   : > { %4813 = vst [vmem:[#allocation3 + $0x14] sm:$0x1] %v4812_v57  ;;  %v4502_v6 = vshrl.u32 %v4454_v51, 16  ;;  %v4505_v33 = vshll.u32 %v4454_v51, 16 }
 0x3b1   : > { %v4347_v30 = vpop.f32.mrf.mxu0  ;;  %v5058_v16 = vrot.slane %v5056_v61, 4  ;;  %v5061_v2 = vrot.slane %v5059_v7, 5  ;;  %4953 = vst.msk [vmem:[#allocation5 + $0x8] sm:$0xf] %vm871_vm4, %v4921_v20  ;;  %v4821_v20 = vld [vmem:[#allocation3 + $0x24] sm:$0xf] }
 0x3b2   : > { %v4504_v8 = vrot.slane %v4502_v6, 7  ;;  %v4348_v52 = vadd.f32 %v11354_v62, %v4347_v30  ;;  %899 = vst [vmem:[#allocation3 + $0x3c] sm:$0x1] %v898_v40 }
 0x3b3   : > { %v5062_v14 = vor.u32 %v5061_v2, %v5058_v16  ;;  %v952_v2 = vld [vmem:[#allocation3 + $0x44] sm:$0x1] }
 0x3b4   : > { %v4507_v35 = vor.u32 %v4505_v33, %v4504_v8  ;;  %v4423_v38 = vmax.f32 %v4348_v52, 0.0  ;;  %v4508_v17 = vrot.slane %v4504_v8, 4 }
 0x3b5   : > { %v5063_v28 = vrot.slane %v5062_v14, 4 }
 0x3b6   : > { %v4815_v29 = vsel %vm11375_vm8, %v4507_v35, %v4814_v26  ;;  %v4455_v44 = vpack.c.bf16 %v4423_v38, %v4423_v38  ;;  %v4987_v18 = vld [vmem:[#allocation3 + $0x10] sm:$0xf]  ;;  %v953_v26 = vsel %vm11332_vm2, 0, %v952_v2 }
 0x3b7   : > { %v4922_v39 = vld [vmem:[#allocation3 + $0x10] sm:$0xf]  ;;  %4816 = vst [vmem:[#allocation3 + $0x18] sm:$0xf] %v4815_v29  ;;  %v5065_v59 = vshll.u32 %v4987_v18, 16  ;;  %v5069_v10 = vshrl.u32 %v4987_v18, 16 }
 0x3b8   : > { %v4988_v25 = vld [vmem:[#allocation3 + $0x14] sm:$0x1]  ;;  %v4510_v54 = vshrl.u32 %v4455_v44, 16  ;;  %v4513_v5 = vshll.u32 %v4455_v44, 16  ;;  %4954 = vst.msk [vmem:[#allocation5 + $0xc] sm:$0xf] %vm871_vm4, %v4922_v39 }
 0x3b9   : > { %v4350_v37 = vpop.f32.mrf.mxu0  ;;  %v5067_v3 = vrot.slane %v5065_v59, 5  ;;  %v5071_v9 = vrot.slane %v5069_v10, 4  ;;  %v5075_v36 = vshll.u32 %v4988_v25, 16  ;;  %954 = vst [vmem:[#allocation3 + $0x44] sm:$0x1] %v953_v26 }
 0x3ba   : > { %v4512_v48 = vrot.slane %v4510_v54, 7  ;;  %v4351_v53 = vadd.f32 %v11354_v62, %v4350_v37  ;;  %v9456_v37 = vld [vmem:[#allocation4 + $0x58] sm:$0xff] }
 0x3bb   : > { %v5068_v23 = vsel %vm9663_vm13, %v5063_v28, %v5067_v3  ;;  %v5072_v19 = vor.u32 %v5071_v9, %v5067_v3  ;;  %v5077_v56 = vrot.slane %v5075_v36, 5  ;;  %v4825_v28 = vld [vmem:[#allocation3 + $0x2c] sm:$0x1] }
 0x3bc   : > { %v4515_v0 = vor.u32 %v4513_v5, %v4512_v48  ;;  %v4517_v31 = vrot.slane %v4512_v48, 4  ;;  %v4424_v4 = vmax.f32 %v4351_v53, 0.0  ;;  %5419 = vrot.lane.b32.xlu0 %v5068_v23, %s9530_s8  ;;  %9275 = vmatmul.msk.bf16.gmra.mxu0 %vm4278_vm6, %v9455_v24  ;;  %v900_v23 = vld [vmem:[#allocation3 + $0x48] sm:$0x1] }
 0x3bd   : > { %v5073_v45 = vrot.slane %v5072_v19, 4 }
 0x3be   : > { %v4516_v47 = vsel %vm9643_vm11, %v4508_v17, %v4515_v0  ;;  %v4819_v27 = vsel %vm11316_vm9, %v4517_v31, %v4818_v15  ;;  %v4456_v43 = vpack.c.bf16 %v4424_v4, %v4424_v4  ;;  %v4989_v1 = vld [vmem:[#allocation3 + $0x18] sm:$0xf]  ;;  %v901_v4 = vsel %vm11316_vm9, 0, %v900_v23 }
 0x3bf   : > { %4817 = vst.msk [vmem:[#allocation3 + $0x1c] sm:$0xf] %vm871_vm4, %v4516_v47  ;;  %v5078_v21 = vsel %vm9663_vm13, %v5073_v45, %v5077_v56  ;;  %v5080_v12 = vshrl.u32 %v4989_v1, 16  ;;  %v5083_v60 = vshll.u32 %v4989_v1, 16  ;;  %v4923_v13 = vld [vmem:[#allocation3 + $0x18] sm:$0xf] }
 0x3c0   : > { %4820 = vst [vmem:[#allocation3 + $0x20] sm:$0x1] %v4819_v27  ;;  %v4519_v41 = vshrl.u32 %v4456_v43, 16  ;;  %5421 = vrot.lane.b32.xlu1 %v5078_v21, %s9530_s8  ;;  %v4522_v61 = vshll.u32 %v4456_v43, 16 }
 0x3c1   : > { %v4352_v57 = vpop.f32.mrf.mxu0  ;;  %v5082_v51 = vrot.slane %v5080_v12, 4  ;;  %v5085_v63 = vrot.slane %v5083_v60, 5  ;;  %4955 = vst.msk [vmem:[#allocation5 + $0x10] sm:$0xf] %vm871_vm4, %v4923_v13  ;;  %v4828_v13 = vld [vmem:[#allocation3 + $0x30] sm:$0xf] }
 0x3c2   : > { %v4521_v11 = vrot.slane %v4519_v41, 7  ;;  %v4353_v7 = vadd.f32 %v11354_v62, %v4352_v57  ;;  %902 = vst [vmem:[#allocation3 + $0x48] sm:$0x1] %v901_v4 }
 0x3c3   : > { %v5086_v16 = vor.u32 %v5085_v63, %v5082_v51  ;;  %v955_v63 = vld [vmem:[#allocation3 + $0x50] sm:$0x1] }
 0x3c4   : > { %v4524_v6 = vor.u32 %v4522_v61, %v4521_v11  ;;  %v4425_v30 = vmax.f32 %v4353_v7, 0.0  ;;  %v4525_v36 = vrot.slane %v4521_v11, 4 }
 0x3c5   : > { %v5087_v18 = vrot.slane %v5086_v16, 4 }
 0x3c6   : > { %v4822_v8 = vsel %vm11375_vm8, %v4524_v6, %v4821_v20  ;;  %v4457_v33 = vpack.c.bf16 %v4425_v30, %v4425_v30  ;;  %v4990_v52 = vld [vmem:[#allocation3 + $0x1c] sm:$0xf]  ;;  %v956_v20 = vsel %vm11332_vm2, 0, %v955_v63 }
 0x3c7   : > { %v4924_v35 = vld [vmem:[#allocation3 + $0x1c] sm:$0xf]  ;;  %4823 = vst [vmem:[#allocation3 + $0x24] sm:$0xf] %v4822_v8  ;;  %v5089_v38 = vshll.u32 %v4990_v52, 16  ;;  %v5093_v14 = vshrl.u32 %v4990_v52, 16 }
 0x3c8   : > { %v4991_v42 = vld [vmem:[#allocation3 + $0x20] sm:$0x1]  ;;  %v4527_v29 = vshrl.u32 %v4457_v33, 16  ;;  %v4530_v25 = vshll.u32 %v4457_v33, 16  ;;  %4956 = vst.msk [vmem:[#allocation5 + $0x14] sm:$0xf] %vm871_vm4, %v4924_v35 }
 0x3c9   : > { %v4355_v44 = vpop.f32.mrf.mxu0  ;;  %v5091_v50 = vrot.slane %v5089_v38, 5  ;;  %v5095_v39 = vrot.slane %v5093_v14, 4  ;;  %v5099_v59 = vshll.u32 %v4991_v42, 16  ;;  %957 = vst [vmem:[#allocation3 + $0x50] sm:$0x1] %v956_v20 }
 0x3ca   : > { %v4529_v10 = vrot.slane %v4527_v29, 7  ;;  %v4356_v54 = vadd.f32 %v11354_v62, %v4355_v44  ;;  %v4832_v44 = vld [vmem:[#allocation3 + $0x38] sm:$0x1] }
 0x3cb   : > { %v5092_v3 = vsel %vm9663_vm13, %v5087_v18, %v5091_v50  ;;  %v5096_v9 = vor.u32 %v5095_v39, %v5091_v50  ;;  %v5101_v15 = vrot.slane %v5099_v59, 5 }
 0x3cc   : > { %v4532_v48 = vor.u32 %v4530_v25, %v4529_v10  ;;  %v4534_v5 = vrot.slane %v4529_v10, 4  ;;  %v4426_v53 = vmax.f32 %v4356_v54, 0.0  ;;  %9276 = vmatmul.msk.bf16.gmra.mxu0 %vm4278_vm6, %v9456_v37  ;;  %5423 = vrot.lane.b32.xlu2 %v5092_v3, %s9530_s8 }
 0x3cd   : > { %v5097_v24 = vrot.slane %v5096_v9, 4 }
 0x3ce   : > { %v4533_v19 = vsel %vm9643_vm11, %v4525_v36, %v4532_v48  ;;  %v4826_v17 = vsel %vm11316_vm9, %v4534_v5, %v4825_v28  ;;  %v4458_v0 = vpack.c.bf16 %v4426_v53, %v4426_v53  ;;  %v4992_v31 = vld [vmem:[#allocation3 + $0x24] sm:$0xf]  ;;  %v903_v28 = vld [vmem:[#allocation3 + $0x54] sm:$0x1] }
 0x3cf   : > { %4824 = vst.msk [vmem:[#allocation3 + $0x28] sm:$0xf] %vm871_vm4, %v4533_v19  ;;  %v5102_v45 = vsel %vm9663_vm13, %v5097_v24, %v5101_v15  ;;  %v5104_v56 = vshrl.u32 %v4992_v31, 16  ;;  %v5107_v55 = vshll.u32 %v4992_v31, 16  ;;  %v4925_v47 = vld [vmem:[#allocation3 + $0x24] sm:$0xf] }
 0x3d0   : > { %4827 = vst [vmem:[#allocation3 + $0x2c] sm:$0x1] %v4826_v17  ;;  %v4536_v27 = vshrl.u32 %v4458_v0, 16  ;;  %5425 = vrot.lane.b32.xlu0 %v5102_v45, %s9530_s8  ;;  %v4539_v12 = vshll.u32 %v4458_v0, 16  ;;  %v904_v5 = vsel %vm11316_vm9, 0, %v903_v28 }
 0x3d1   : > { %v4357_v43 = vpop.f32.mrf.mxu0  ;;  %v5106_v1 = vrot.slane %v5104_v56, 4  ;;  %v5109_v40 = vrot.slane %v5107_v55, 5  ;;  %4957 = vst.msk [vmem:[#allocation5 + $0x18] sm:$0xf] %vm871_vm4, %v4925_v47  ;;  %v4835_v55 = vld [vmem:[#allocation3 + $0x3c] sm:$0xf] }
 0x3d2   : > { %v4538_v21 = vrot.slane %v4536_v27, 7  ;;  %v4358_v60 = vadd.f32 %v11354_v62, %v4357_v43  ;;  %905 = vst [vmem:[#allocation3 + $0x54] sm:$0x1] %v904_v5 }
 0x3d3   : > { %v5110_v51 = vor.u32 %v5109_v40, %v5106_v1  ;;  %v958_v1 = vld [vmem:[#allocation3 + $0x5c] sm:$0x1] }
 0x3d4   : > { %v4541_v41 = vor.u32 %v4539_v12, %v4538_v21  ;;  %v4427_v57 = vmax.f32 %v4358_v60, 0.0  ;;  %v4542_v39 = vrot.slane %v4538_v21, 4  ;;  %v959_v60 = vsel %vm11332_vm2, 0, %v958_v1 }
 0x3d5   : > { %v5111_v52 = vrot.slane %v5110_v51, 4  ;;  %960 = vst [vmem:[#allocation3 + $0x5c] sm:$0x1] %v959_v60 }
 0x3d6   : > { %v4829_v11 = vsel %vm11375_vm8, %v4541_v41, %v4828_v13  ;;  %v4459_v61 = vpack.c.bf16 %v4427_v57, %v4427_v57  ;;  %v4993_v7 = vld [vmem:[#allocation3 + $0x28] sm:$0xf] }
 0x3d7   : > { %v4926_v6 = vld [vmem:[#allocation3 + $0x28] sm:$0xf]  ;;  %4830 = vst [vmem:[#allocation3 + $0x30] sm:$0xf] %v4829_v11  ;;  %v5113_v30 = vshll.u32 %v4993_v7, 16  ;;  %v5117_v16 = vshrl.u32 %v4993_v7, 16 }
 0x3d8   : > { %v4994_v2 = vld [vmem:[#allocation3 + $0x2c] sm:$0x1]  ;;  %v4544_v8 = vshrl.u32 %v4459_v61, 16  ;;  %v4547_v42 = vshll.u32 %v4459_v61, 16  ;;  %4958 = vst.msk [vmem:[#allocation5 + $0x1c] sm:$0xf] %vm871_vm4, %v4926_v6 }
 0x3d9   : > { %v4360_v33 = vpop.f32.mrf.mxu0  ;;  %v5115_v26 = vrot.slane %v5113_v30, 5  ;;  %v5119_v35 = vrot.slane %v5117_v16, 4  ;;  %v5123_v38 = vshll.u32 %v4994_v2, 16 }
 0x3da   : > { %v4546_v14 = vrot.slane %v4544_v8, 7  ;;  %v4361_v29 = vadd.f32 %v11354_v62, %v4360_v33  ;;  %v4839_v8 = vld [vmem:[#allocation3 + $0x44] sm:$0x1] }
 0x3db   : > { %v5116_v18 = vsel %vm9663_vm13, %v5111_v52, %v5115_v26  ;;  %v5120_v50 = vor.u32 %v5119_v35, %v5115_v26  ;;  %v5125_v37 = vrot.slane %v5123_v38, 5 }
 0x3dc   : > { %v4549_v59 = vor.u32 %v4547_v42, %v4546_v14  ;;  %v4551_v10 = vrot.slane %v4546_v14, 4  ;;  %v4428_v25 = vmax.f32 %v4361_v29, 0.0  ;;  %5427 = vrot.lane.b32.xlu1 %v5116_v18, %s9530_s8 }
 0x3dd   : > { %v5121_v54 = vrot.slane %v5120_v50, 4 }
 0x3de   : > { %v4550_v3 = vsel %vm9643_vm11, %v4542_v39, %v4549_v59  ;;  %v4833_v9 = vsel %vm11316_vm9, %v4551_v10, %v4832_v44  ;;  %v4460_v36 = vpack.c.bf16 %v4428_v25, %v4428_v25  ;;  %v4995_v48 = vld [vmem:[#allocation3 + $0x30] sm:$0xf]  ;;  %v906_v44 = vld [vmem:[#allocation3 + $0x60] sm:$0x1] }
 0x3df   : > { %4831 = vst.msk [vmem:[#allocation3 + $0x34] sm:$0xf] %vm871_vm4, %v4550_v3  ;;  %v5126_v53 = vsel %vm9663_vm13, %v5121_v54, %v5125_v37  ;;  %v5128_v24 = vshrl.u32 %v4995_v48, 16  ;;  %v5131_v15 = vshll.u32 %v4995_v48, 16  ;;  %v4927_v23 = vld [vmem:[#allocation3 + $0x30] sm:$0xf] }
 0x3e0   : > { %4834 = vst [vmem:[#allocation3 + $0x38] sm:$0x1] %v4833_v9  ;;  %v4553_v19 = vshrl.u32 %v4460_v36, 16  ;;  %5429 = vrot.lane.b32.xlu2 %v5126_v53, %s9530_s8  ;;  %v4556_v45 = vshll.u32 %v4460_v36, 16  ;;  %v907_v10 = vsel %vm11316_vm9, 0, %v906_v44 }
 0x3e1   : > { %v4362_v17 = vpop.f32.mrf.mxu0  ;;  %v5130_v0 = vrot.slane %v5128_v24, 4  ;;  %v5133_v31 = vrot.slane %v5131_v15, 5  ;;  %4959 = vst.msk [vmem:[#allocation5 + $0x20] sm:$0xf] %vm871_vm4, %v4927_v23  ;;  %v4842_v15 = vld [vmem:[#allocation3 + $0x48] sm:$0xf] }
 0x3e2   : > { %v4555_v4 = vrot.slane %v4553_v19, 7  ;;  %v4363_v56 = vadd.f32 %v11354_v62, %v4362_v17  ;;  %908 = vst [vmem:[#allocation3 + $0x60] sm:$0x1] %v907_v10 }
 0x3e3   : > { %v5134_v43 = vor.u32 %v5133_v31, %v5130_v0  ;;  %v961_v0 = vld [vmem:[#allocation3 + $0x68] sm:$0x1] }
 0x3e4   : > { %v4558_v47 = vor.u32 %v4556_v45, %v4555_v4  ;;  %v4429_v27 = vmax.f32 %v4363_v56, 0.0  ;;  %v4559_v26 = vrot.slane %v4555_v4, 4  ;;  %v962_v56 = vsel %vm11332_vm2, 0, %v961_v0 }
 0x3e5   : > { %v5135_v61 = vrot.slane %v5134_v43, 4  ;;  %963 = vst [vmem:[#allocation3 + $0x68] sm:$0x1] %v962_v56 }
 0x3e6   : > { %v4836_v40 = vsel %vm11375_vm8, %v4558_v47, %v4835_v55  ;;  %v4461_v21 = vpack.c.bf16 %v4429_v27, %v4429_v27  ;;  %v4996_v12 = vld [vmem:[#allocation3 + $0x34] sm:$0xf] }
 0x3e7   : > { %v4928_v13 = vld [vmem:[#allocation3 + $0x34] sm:$0xf]  ;;  %4837 = vst [vmem:[#allocation3 + $0x3c] sm:$0xf] %v4836_v40  ;;  %v5137_v41 = vshll.u32 %v4996_v12, 16  ;;  %v5141_v57 = vshrl.u32 %v4996_v12, 16 }
 0x3e8   : > { %v4997_v51 = vld [vmem:[#allocation3 + $0x38] sm:$0x1]  ;;  %v4561_v63 = vshrl.u32 %v4461_v21, 16  ;;  %v4564_v16 = vshll.u32 %v4461_v21, 16  ;;  %4960 = vst.msk [vmem:[#allocation5 + $0x24] sm:$0xf] %vm871_vm4, %v4928_v13 }
 0x3e9   : > { %v4365_v11 = vpop.f32.mrf.mxu0  ;;  %v5139_v7 = vrot.slane %v5137_v41, 5  ;;  %v5143_v20 = vrot.slane %v5141_v57, 4  ;;  %v5147_v6 = vshll.u32 %v4997_v51, 16  ;;  %v4074_v41 = vpop.permute.xlu2 %4073 }
 0x3ea   : > { %v4563_v30 = vrot.slane %v4561_v63, 7  ;;  %v4366_v2 = vadd.f32 %v11354_v62, %v4365_v11  ;;  %4140 = vst.msk [vmem:[#allocation4 + $0x78] sm:$0xf] %vm4109_vm15, %v4074_v41  ;;  %v4846_v11 = vld [vmem:[#allocation3 + $0x50] sm:$0x1]  ;;  %v4076_v41 = vpop.permute.xlu0 %4075 }
 0x3eb   : > { %v5140_v33 = vsel %vm9663_vm13, %v5135_v61, %v5139_v7  ;;  %v5144_v52 = vor.u32 %v5143_v20, %v5139_v7  ;;  %v5149_v29 = vrot.slane %v5147_v6, 5  ;;  %4141 = vst.msk [vmem:[#allocation4 + $0x7c] sm:$0xf] %vm4109_vm15, %v4076_v41  ;;  %v967_v41 = vld [vmem:[#allocation3 + $0x80] sm:$0x1]  ;;  %vm8031_vm15 = vcmask 585216  }
 0x3ec   : > { %v4566_v35 = vor.u32 %v4564_v16, %v4563_v30  ;;  %v4568_v38 = vrot.slane %v4563_v30, 4  ;;  %v4430_v14 = vmax.f32 %v4366_v2, 0.0  ;;  %5431 = vrot.lane.b32.xlu0 %v5140_v33, %s9530_s8  ;;  %v909_v33 = vld [vmem:[#allocation3 + $0x6c] sm:$0x1] }
 0x3ed   : > { %v5145_v42 = vrot.slane %v5144_v52, 4 }
 0x3ee   : > { %v4567_v18 = vsel %vm9643_vm11, %v4559_v26, %v4566_v35  ;;  %v4840_v50 = vsel %vm11316_vm9, %v4568_v38, %v4839_v8  ;;  %v4462_v39 = vpack.c.bf16 %v4430_v14, %v4430_v14  ;;  %v4998_v59 = vld [vmem:[#allocation3 + $0x3c] sm:$0xf]  ;;  %v910_v14 = vsel %vm11316_vm9, 0, %v909_v33 }
 0x3ef   : > { %4838 = vst.msk [vmem:[#allocation3 + $0x40] sm:$0xf] %vm871_vm4, %v4567_v18  ;;  %v5150_v25 = vsel %vm9663_vm13, %v5145_v42, %v5149_v29  ;;  %v5152_v54 = vshrl.u32 %v4998_v59, 16  ;;  %v5155_v37 = vshll.u32 %v4998_v59, 16  ;;  %v4929_v28 = vld [vmem:[#allocation3 + $0x3c] sm:$0xf] }
 0x3f0   : > { %4841 = vst [vmem:[#allocation3 + $0x44] sm:$0x1] %v4840_v50  ;;  %v4570_v3 = vshrl.u32 %v4462_v39, 16  ;;  %5433 = vrot.lane.b32.xlu1 %v5150_v25, %s9530_s8  ;;  %v4573_v53 = vshll.u32 %v4462_v39, 16 }
 0x3f1   : > { %v4367_v9 = vpop.f32.mrf.mxu0  ;;  %v5154_v36 = vrot.slane %v5152_v54, 4  ;;  %v5157_v48 = vrot.slane %v5155_v37, 5  ;;  %4961 = vst.msk [vmem:[#allocation5 + $0x28] sm:$0xf] %vm871_vm4, %v4929_v28  ;;  %v4849_v28 = vld [vmem:[#allocation3 + $0x54] sm:$0xf] }
 0x3f2   : > { %v4572_v5 = vrot.slane %v4570_v3, 7  ;;  %v4368_v24 = vadd.f32 %v11354_v62, %v4367_v9  ;;  %911 = vst [vmem:[#allocation3 + $0x6c] sm:$0x1] %v910_v14 }
 0x3f3   : > { %v5158_v17 = vor.u32 %v5157_v48, %v5154_v36  ;;  %v964_v48 = vld [vmem:[#allocation3 + $0x74] sm:$0x1] }
 0x3f4   : > { %v4575_v23 = vor.u32 %v4573_v53, %v4572_v5  ;;  %v4431_v19 = vmax.f32 %v4368_v24, 0.0  ;;  %v4576_v20 = vrot.slane %v4572_v5, 4 }
 0x3f5   : > { %v5159_v21 = vrot.slane %v5158_v17, 4 }
 0x3f6   : > { %v4843_v31 = vsel %vm11375_vm8, %v4575_v23, %v4842_v15  ;;  %v4463_v4 = vpack.c.bf16 %v4431_v19, %v4431_v19  ;;  %v4999_v45 = vld [vmem:[#allocation3 + $0x40] sm:$0xf]  ;;  %v965_v15 = vsel %vm11332_vm2, 0, %v964_v48 }
 0x3f7   : > { %4844 = vst [vmem:[#allocation3 + $0x48] sm:$0xf] %v4843_v31  ;;  %v5161_v55 = vshll.u32 %v4999_v45, 16  ;;  %v5165_v47 = vshrl.u32 %v4999_v45, 16  ;;  %v5000_v27 = vld [vmem:[#allocation3 + $0x44] sm:$0x1] }
 0x3f8   : > { %v4578_v43 = vshrl.u32 %v4463_v4, 16  ;;  %v4930_v1 = vld [vmem:[#allocation3 + $0x40] sm:$0xf]  ;;  %v5171_v13 = vshll.u32 %v5000_v27, 16  ;;  %v4581_v51 = vshll.u32 %v4463_v4, 16 }
 0x3f9   : > { %v4370_v40 = vpop.f32.mrf.mxu0  ;;  %v5163_v12 = vrot.slane %v5161_v55, 5  ;;  %v5167_v60 = vrot.slane %v5165_v47, 4  ;;  %4962 = vst.msk [vmem:[#allocation5 + $0x2c] sm:$0xf] %vm871_vm4, %v4930_v1  ;;  %v4920_v27 = vld [vmem:[#allocation3 + $0x4] sm:$0xf] }
 0x3fa   : > { %v4580_v57 = vrot.slane %v4578_v43, 7  ;;  %v4371_v63 = vadd.f32 %v11354_v62, %v4370_v40  ;;  %v5173_v8 = vrot.slane %v5171_v13, 5  ;;  %966 = vst [vmem:[#allocation3 + $0x74] sm:$0x1] %v965_v15 }
 0x3fb   : > { %v5164_v61 = vsel %vm9663_vm13, %v5159_v21, %v5163_v12  ;;  %v5168_v7 = vor.u32 %v5167_v60, %v5163_v12  ;;  %4952 = vst.msk [vmem:[#allocation5 + $0x4] sm:$0xf] %vm871_vm4, %v4920_v27  ;;  %v5418_v21 = vpop.permute.xlu2 %5417  ;;  %v4853_v12 = vld [vmem:[#allocation3 + $0x5c] sm:$0x1] }
 0x3fc   : > { %v4583_v6 = vor.u32 %v4581_v51, %v4580_v57  ;;  %v4585_v30 = vrot.slane %v4580_v57, 4  ;;  %v4432_v16 = vmax.f32 %v4371_v63, 0.0  ;;  %5435 = vrot.lane.b32.xlu2 %v5164_v61, %s9530_s8  ;;  %5513 = vst.msk [vmem:[#allocation5 + $0x4] sm:$0xf] %vm5511_vm3, %v5418_v21 }
 0x3fd   : > { %v5169_v2 = vrot.slane %v5168_v7, 4 }
 0x3fe   : > { %v4584_v52 = vsel %vm9643_vm11, %v4576_v20, %v4583_v6  ;;  %v4847_v26 = vsel %vm11316_vm9, %v4585_v30, %v4846_v11  ;;  %v4464_v35 = vpack.c.bf16 %v4432_v16, %v4432_v16  ;;  %v5001_v38 = vld [vmem:[#allocation3 + $0x48] sm:$0xf] }
 0x3ff   : > { %4845 = vst.msk [vmem:[#allocation3 + $0x4c] sm:$0xf] %vm871_vm4, %v4584_v52  ;;  %v5174_v42 = vsel %vm9663_vm13, %v5169_v2, %v5173_v8  ;;  %v5176_v29 = vshrl.u32 %v5001_v38, 16  ;;  %v5179_v44 = vshll.u32 %v5001_v38, 16  ;;  %v4931_v18 = vld [vmem:[#allocation3 + $0x48] sm:$0xf]  ;;  %v4400_v38 = vpop.f32.mrf.mxu3 }
 0x400   : > { %4848 = vst [vmem:[#allocation3 + $0x50] sm:$0x1] %v4847_v26  ;;  %v4587_v50 = vshrl.u32 %v4464_v35, 16  ;;  %5437 = vrot.lane.b32.xlu0 %v5174_v42, %s9530_s8  ;;  %v4590_v54 = vshll.u32 %v4464_v35, 16  ;;  %v912_v26 = vld [vmem:[#allocation3 + $0x78] sm:$0x1] }
 0x401   : > { %v4372_v39 = vpop.f32.mrf.mxu0  ;;  %v5178_v59 = vrot.slane %v5176_v29, 4  ;;  %v5181_v10 = vrot.slane %v5179_v44, 5  ;;  %4963 = vst.msk [vmem:[#allocation5 + $0x30] sm:$0xf] %vm871_vm4, %v4931_v18  ;;  %v913_v44 = vsel %vm11316_vm9, 0, %v912_v26 }
 0x402   : > { %v4589_v25 = vrot.slane %v4587_v50, 7  ;;  %v4373_v37 = vadd.f32 %v11354_v62, %v4372_v39  ;;  %914 = vst [vmem:[#allocation3 + $0x78] sm:$0x1] %v913_v44 }
 0x403   : > { %v5182_v36 = vor.u32 %v5181_v10, %v5178_v59  ;;  %v4856_v59 = vld [vmem:[#allocation3 + $0x60] sm:$0xf] }
 0x404   : > { %v4592_v3 = vor.u32 %v4590_v54, %v4589_v25  ;;  %v4433_v9 = vmax.f32 %v4373_v37, 0.0  ;;  %v4593_v57 = vrot.slane %v4589_v25, 4 }
 0x405   : > { %v5183_v31 = vrot.slane %v5182_v36, 4 }
 0x406   : > { %v4850_v5 = vsel %vm11375_vm8, %v4592_v3, %v4849_v28  ;;  %v4465_v53 = vpack.c.bf16 %v4433_v9, %v4433_v9  ;;  %v5002_v24 = vld [vmem:[#allocation3 + $0x4c] sm:$0xf] }
 0x407   : > { %4851 = vst [vmem:[#allocation3 + $0x54] sm:$0xf] %v4850_v5  ;;  %v5185_v23 = vshll.u32 %v5002_v24, 16  ;;  %v5189_v19 = vshrl.u32 %v5002_v24, 16  ;;  %v5003_v17 = vld [vmem:[#allocation3 + $0x50] sm:$0x1] }
 0x408   : > { %v4595_v0 = vshrl.u32 %v4465_v53, 16  ;;  %v5195_v4 = vshll.u32 %v5003_v17, 16  ;;  %v4932_v45 = vld [vmem:[#allocation3 + $0x4c] sm:$0xf]  ;;  %v4598_v1 = vshll.u32 %v4465_v53, 16  ;;  %v4401_v53 = vadd.f32 %v11354_v62, %v4400_v38 }
 0x409   : > { %v4375_v56 = vpop.f32.mrf.mxu0  ;;  %v5187_v55 = vrot.slane %v5185_v23, 5  ;;  %v5191_v47 = vrot.slane %v5189_v19, 4  ;;  %4964 = vst.msk [vmem:[#allocation5 + $0x34] sm:$0xf] %vm871_vm4, %v4932_v45  ;;  %v4919_v23 = vld [vmem:[#allocation3] sm:$0xf]  ;;  %v4402_v19 = vpop.f32.mrf.mxu3 }
 0x40a   : > { %v4597_v43 = vrot.slane %v4595_v0, 7  ;;  %v4376_v40 = vadd.f32 %v11354_v62, %v4375_v56  ;;  %v5197_v7 = vrot.slane %v5195_v4, 5  ;;  %v4860_v0 = vld [vmem:[#allocation3 + $0x68] sm:$0x1]  ;;  %4951 = vst.msk [vmem:[#allocation5] sm:$0xf] %vm871_vm4, %v4919_v23 }
 0x40b   : > { %v5188_v60 = vsel %vm9663_vm13, %v5183_v31, %v5187_v55  ;;  %v5192_v13 = vor.u32 %v5191_v47, %v5187_v55  ;;  %v5416_v55 = vpop.permute.xlu1 %5415  ;;  %v4403_v47 = vadd.f32 %v11354_v62, %v4402_v19 }
 0x40c   : > { %v4600_v51 = vor.u32 %v4598_v1, %v4597_v43  ;;  %v4602_v63 = vrot.slane %v4597_v43, 4  ;;  %v4434_v11 = vmax.f32 %v4376_v40, 0.0  ;;  %5439 = vrot.lane.b32.xlu1 %v5188_v60, %s9530_s8  ;;  %5512 = vst.msk [vmem:[#allocation5] sm:$0xf] %vm5511_vm3, %v5416_v55  ;;  %v921_v40 = vld [vmem:[#allocation3 + $0x9c] sm:$0x1] }
 0x40d   : > { %v5193_v61 = vrot.slane %v5192_v13, 4  ;;  %v922_v60 = vsel %vm11316_vm9, 0, %v921_v40  ;;  %v4444_v13 = vmax.f32 %v4401_v53, 0.0 }
 0x40e   : > { %v4601_v20 = vsel %vm9643_vm11, %v4593_v57, %v4600_v51  ;;  %v4854_v6 = vsel %vm11316_vm9, %v4602_v63, %v4853_v12  ;;  %v4466_v30 = vpack.c.bf16 %v4434_v11, %v4434_v11  ;;  %v5004_v16 = vld [vmem:[#allocation3 + $0x54] sm:$0xf]  ;;  %923 = vst [vmem:[#allocation3 + $0x9c] sm:$0x1] %v922_v60 }
 0x40f   : > { %v4933_v2 = vld [vmem:[#allocation3 + $0x54] sm:$0xf]  ;;  %4852 = vst.msk [vmem:[#allocation3 + $0x58] sm:$0xf] %vm871_vm4, %v4601_v20  ;;  %v5198_v8 = vsel %vm9663_vm13, %v5193_v61, %v5197_v7  ;;  %v5200_v33 = vshrl.u32 %v5004_v16, 16  ;;  %v5203_v52 = vshll.u32 %v5004_v16, 16  ;;  %v4476_v7 = vpack.c.bf16 %v4444_v13, %v4444_v13 }
 0x410   : > { %4855 = vst [vmem:[#allocation3 + $0x5c] sm:$0x1] %v4854_v6  ;;  %v4604_v35 = vshrl.u32 %v4466_v30, 16  ;;  %5441 = vrot.lane.b32.xlu2 %v5198_v8, %s9530_s8  ;;  %v4607_v50 = vshll.u32 %v4466_v30, 16  ;;  %v4445_v20 = vmax.f32 %v4403_v47, 0.0 }
 0x411   : > { %v4377_v14 = vpop.f32.mrf.mxu0  ;;  %v5202_v42 = vrot.slane %v5200_v33, 4  ;;  %v5205_v29 = vrot.slane %v5203_v52, 5  ;;  %4965 = vst.msk [vmem:[#allocation5 + $0x38] sm:$0xf] %vm871_vm4, %v4933_v2  ;;  %v4689_v26 = vshrl.u32 %v4476_v7, 16  ;;  %v4692_v38 = vshll.u32 %v4476_v7, 16 }
 0x412   : > { %v4606_v18 = vrot.slane %v4604_v35, 7  ;;  %v4378_v39 = vadd.f32 %v11354_v62, %v4377_v14  ;;  %v4477_v14 = vpack.c.bf16 %v4445_v20, %v4445_v20 }
 0x413   : > { %v5206_v54 = vor.u32 %v5205_v29, %v5202_v42  ;;  %v4405_v42 = vpop.f32.mrf.mxu3 }
 0x414   : > { %v4609_v10 = vor.u32 %v4607_v50, %v4606_v18  ;;  %v4435_v25 = vmax.f32 %v4378_v39, 0.0  ;;  %v4610_v37 = vrot.slane %v4606_v18, 4  ;;  %v4863_v18 = vld [vmem:[#allocation3 + $0x6c] sm:$0xf] }
 0x415   : > { %v5207_v15 = vrot.slane %v5206_v54, 4  ;;  %v4891_v53 = vld [vmem:[#allocation3 + $0x9c] sm:$0xf] }
 0x416   : > { %v4857_v28 = vsel %vm11375_vm8, %v4609_v10, %v4856_v59  ;;  %v4467_v3 = vpack.c.bf16 %v4435_v25, %v4435_v25  ;;  %v5005_v9 = vld [vmem:[#allocation3 + $0x58] sm:$0xf]  ;;  %v4691_v10 = vrot.slane %v4689_v26, 7  ;;  %v976_v25 = vld [vmem:[#allocation3 + $0xa4] sm:$0x1] }
 0x417   : > { %4858 = vst [vmem:[#allocation3 + $0x60] sm:$0xf] %v4857_v28  ;;  %v5209_v36 = vshll.u32 %v5005_v9, 16  ;;  %v5213_v48 = vshrl.u32 %v5005_v9, 16  ;;  %v5006_v5 = vld [vmem:[#allocation3 + $0x5c] sm:$0x1] }
 0x418   : > { %v4612_v24 = vshrl.u32 %v4467_v3, 16  ;;  %v4934_v17 = vld [vmem:[#allocation3 + $0x58] sm:$0xf]  ;;  %v5219_v56 = vshll.u32 %v5006_v5, 16  ;;  %v4615_v43 = vshll.u32 %v4467_v3, 16  ;;  %v977_v3 = vsel %vm11332_vm2, 0, %v976_v25 }
 0x419   : > { %v4380_v31 = vpop.f32.mrf.mxu0  ;;  %v5211_v4 = vrot.slane %v5209_v36, 5  ;;  %v5215_v45 = vrot.slane %v5213_v48, 4  ;;  %4966 = vst.msk [vmem:[#allocation5 + $0x3c] sm:$0xf] %vm871_vm4, %v4934_v17  ;;  %v4697_v9 = vshrl.u32 %v4477_v14, 16  ;;  %v4694_v5 = vor.u32 %v4692_v38, %v4691_v10 }
 0x41a   : > { %v4614_v27 = vrot.slane %v4612_v24, 7  ;;  %v4381_v1 = vadd.f32 %v11354_v62, %v4380_v31  ;;  %v968_v62 = vsel %vm11332_vm2, 0, %v967_v41  ;;  %v5221_v61 = vrot.slane %v5219_v56, 5  ;;  %v915_v36 = vld [vmem:[#allocation3 + $0x84] sm:$0x1] }
 0x41b   : > { %v5212_v21 = vsel %vm9663_vm13, %v5207_v15, %v5211_v4  ;;  %v5216_v12 = vor.u32 %v5215_v45, %v5211_v4  ;;  %969 = vst [vmem:[#allocation3 + $0x80] sm:$0x1] %v968_v62  ;;  %v4700_v24 = vshll.u32 %v4477_v14, 16  ;;  %v4695_v19 = vrot.slane %v4691_v10, 4 }
 0x41c   : > { %v4617_v57 = vor.u32 %v4615_v43, %v4614_v27  ;;  %v4619_v51 = vrot.slane %v4614_v27, 4  ;;  %v4436_v63 = vmax.f32 %v4381_v1, 0.0  ;;  %5443 = vrot.lane.b32.xlu0 %v5212_v21, %s9530_s8  ;;  %978 = vst [vmem:[#allocation3 + $0xa4] sm:$0x1] %v977_v3  ;;  %v4699_v17 = vrot.slane %v4697_v9, 7 }
 0x41d   : > { %v5217_v11 = vrot.slane %v5216_v12, 4  ;;  %v4892_v4 = vsel %vm11375_vm8, %v4694_v5, %v4891_v53  ;;  %v916_v45 = vsel %vm11316_vm9, 0, %v915_v36  ;;  %v979_v5 = vld [vmem:[#allocation3 + $0xb0] sm:$0x1] }
 0x41e   : > { %v4618_v6 = vsel %vm9643_vm11, %v4610_v37, %v4617_v57  ;;  %v4861_v30 = vsel %vm11316_vm9, %v4619_v51, %v4860_v0  ;;  %v4468_v16 = vpack.c.bf16 %v4436_v63, %v4436_v63  ;;  %v5007_v2 = vld [vmem:[#allocation3 + $0x60] sm:$0xf]  ;;  %v11559_v37 = vld [vmem:[%s13020_s2] ss:$0 sm:$0xff]  ;;  %4893 = vst [vmem:[#allocation3 + $0x9c] sm:$0xf] %v4892_v4  ;;  %v4702_v43 = vor.u32 %v4700_v24, %v4699_v17  ;;  %v4407_v51 = vpop.f32.mrf.mxu3 }
 0x41f   : > { %4859 = vst.msk [vmem:[#allocation3 + $0x64] sm:$0xf] %vm871_vm4, %v4618_v6  ;;  %v5222_v8 = vsel %vm9663_vm13, %v5217_v11, %v5221_v61  ;;  %v5224_v33 = vshrl.u32 %v5007_v2, 16  ;;  %v5227_v52 = vshll.u32 %v5007_v2, 16  ;;  %v4935_v29 = vld [vmem:[#allocation3 + $0x60] sm:$0xf]  ;;  %v4406_v57 = vadd.f32 %v11559_v37, %v4405_v42 }
 0x420   : > { %4862 = vst [vmem:[#allocation3 + $0x68] sm:$0x1] %v4861_v30  ;;  %v4621_v35 = vshrl.u32 %v4468_v16, 16  ;;  %5445 = vrot.lane.b32.xlu1 %v5222_v8, %s9530_s8  ;;  %v4624_v44 = vshll.u32 %v4468_v16, 16  ;;  %v4704_v1 = vrot.slane %v4699_v17, 4  ;;  %v4703_v41 = vsel %vm9643_vm11, %v4695_v19, %v4702_v43 }
 0x421   : > { %v4382_v50 = vpop.f32.mrf.mxu0  ;;  %v5226_v39 = vrot.slane %v5224_v33, 4  ;;  %v5229_v59 = vrot.slane %v5227_v52, 5  ;;  %4967 = vst.msk [vmem:[#allocation5 + $0x40] sm:$0xf] %vm871_vm4, %v4935_v29  ;;  %v924_v61 = vld [vmem:[#allocation3 + $0xa8] sm:$0x1]  ;;  %v4408_v7 = vadd.f32 %v11559_v37, %v4407_v51 }
 0x422   : > { %v11554_v54 = vrot.slane %v4621_v35, 7  ;;  %v4383_v28 = vadd.f32 %v11559_v37, %v4382_v50  ;;  %4894 = vst.msk [vmem:[#allocation3 + $0xa0] sm:$0xf] %vm871_vm4, %v4703_v41  ;;  %v4867_v2 = vld [vmem:[#allocation3 + $0x74] sm:$0x1]  ;;  %v925_v26 = vsel %vm11316_vm9, 0, %v924_v61 }
 0x423   : > { %v5230_v48 = vor.u32 %v5229_v59, %v5226_v39  ;;  %v4895_v16 = vld [vmem:[#allocation3 + $0xa4] sm:$0x1]  ;;  %917 = vst [vmem:[#allocation3 + $0x84] sm:$0x1] %v916_v45  ;;  %v970_v35 = vld [vmem:[#allocation3 + $0x8c] sm:$0x1] }
 0x424   : > { %v4626_v15 = vor.u32 %v4624_v44, %v11554_v54  ;;  %v4437_v23 = vmax.f32 %v4383_v28, 0.0  ;;  %v4627_v0 = vrot.slane %v11554_v54, 4  ;;  %v4896_v52 = vsel %vm11316_vm9, %v4704_v1, %v4895_v16  ;;  %926 = vst [vmem:[#allocation3 + $0xa8] sm:$0x1] %v925_v26  ;;  %v918_v1 = vld [vmem:[#allocation3 + $0x90] sm:$0x1] }
 0x425   : > { %v5231_v31 = vrot.slane %v5230_v48, 4  ;;  %4897 = vst [vmem:[#allocation3 + $0xa4] sm:$0x1] %v4896_v52  ;;  %v4446_v29 = vmax.f32 %v4406_v57, 0.0  ;;  %v971_v50 = vsel %vm11332_vm2, 0, %v970_v35  ;;  %v4447_v39 = vmax.f32 %v4408_v7, 0.0 }
 0x426   : > { %v4864_v56 = vsel %vm11375_vm8, %v4626_v15, %v4863_v18  ;;  %v4469_v55 = vpack.c.bf16 %v4437_v23, %v4437_v23  ;;  %v5424_v47 = vpop.permute.xlu2 %5423  ;;  %v5008_v27 = vld [vmem:[#allocation3 + $0x64] sm:$0xf]  ;;  %972 = vst [vmem:[#allocation3 + $0x8c] sm:$0x1] %v971_v50  ;;  %v4410_v19 = vpop.f32.mrf.mxu3  ;;  %v980_v43 = vsel %vm11332_vm2, 0, %v979_v5 }
 0x427   : > { %4865 = vst [vmem:[#allocation3 + $0x6c] sm:$0xf] %v4864_v56  ;;  %v5233_v40 = vshll.u32 %v5008_v27, 16  ;;  %v5237_v21 = vshrl.u32 %v5008_v27, 16  ;;  %v5009_v12 = vld [vmem:[#allocation3 + $0x68] sm:$0x1]  ;;  %v4478_v3 = vpack.c.bf16 %v4446_v29, %v4446_v29  ;;  %v4479_v53 = vpack.c.bf16 %v4447_v39, %v4447_v39 }
 0x428   : > { %v4629_v60 = vshrl.u32 %v4469_v55, 16  ;;  %5516 = vst.msk [vmem:[#allocation5 + $0x10] sm:$0xf] %vm5511_vm3, %v5424_v47  ;;  %v5243_v13 = vshll.u32 %v5009_v12, 16  ;;  %v4632_v6 = vshll.u32 %v4469_v55, 16  ;;  %v4411_v52 = vadd.f32 %v11559_v37, %v4410_v19 }
 0x429   : > { %v4385_v63 = vpop.f32.mrf.mxu0  ;;  %v5235_v62 = vrot.slane %v5233_v40, 5  ;;  %v5239_v11 = vrot.slane %v5237_v21, 4  ;;  %v4706_v15 = vshrl.u32 %v4478_v3, 16  ;;  %v4709_v23 = vshll.u32 %v4478_v3, 16  ;;  %981 = vst [vmem:[#allocation3 + $0xb0] sm:$0x1] %v980_v43 }
 0x42a   : > { %v4631_v20 = vrot.slane %v4629_v60, 7  ;;  %v4386_v30 = vadd.f32 %v11559_v37, %v4385_v63  ;;  %v5245_v18 = vrot.slane %v5243_v13, 5  ;;  %v4714_v21 = vshrl.u32 %v4479_v53, 16  ;;  %v927_v39 = vld [vmem:[#allocation3 + $0xb4] sm:$0x1] }
 0x42b   : > { %v5236_v8 = vsel %vm9663_vm13, %v5231_v31, %v5235_v62  ;;  %v5240_v33 = vor.u32 %v5239_v11, %v5235_v62  ;;  %v4708_v27 = vrot.slane %v4706_v15, 7  ;;  %v4717_v12 = vshll.u32 %v4479_v53, 16  ;;  %v4898_v51 = vld [vmem:[#allocation3 + $0xa8] sm:$0xf] }
 0x42c   : > { %v4634_v38 = vor.u32 %v4632_v6, %v4631_v20  ;;  %v4636_v14 = vrot.slane %v4631_v20, 4  ;;  %v4438_v42 = vmax.f32 %v4386_v30, 0.0  ;;  %5447 = vrot.lane.b32.xlu2 %v5236_v8, %s9530_s8  ;;  %v919_v60 = vsel %vm11316_vm9, 0, %v918_v1 }
 0x42d   : > { %v5241_v44 = vrot.slane %v5240_v33, 4  ;;  %v4711_v57 = vor.u32 %v4709_v23, %v4708_v27  ;;  %v4712_v62 = vrot.slane %v4708_v27, 4  ;;  %v4716_v11 = vrot.slane %v4714_v21, 7  ;;  %920 = vst [vmem:[#allocation3 + $0x90] sm:$0x1] %v919_v60 }
 0x42e   : > { %v4635_v59 = vsel %vm9643_vm11, %v4627_v0, %v4634_v38  ;;  %v4868_v10 = vsel %vm11316_vm9, %v4636_v14, %v4867_v2  ;;  %v4470_v25 = vpack.c.bf16 %v4438_v42, %v4438_v42  ;;  %v5420_v54 = vpop.permute.xlu0 %5419  ;;  %v5010_v28 = vld [vmem:[#allocation3 + $0x6c] sm:$0xf]  ;;  %v4870_v0 = vld [vmem:[#allocation3 + $0x78] sm:$0xf]  ;;  %v4412_v42 = vpop.f32.mrf.mxu3  ;;  %v928_v3 = vsel %vm11316_vm9, 0, %v927_v39 }
 0x42f   : > { %4866 = vst.msk [vmem:[#allocation3 + $0x70] sm:$0xf] %vm871_vm4, %v4635_v59  ;;  %v5246_v9 = vsel %vm9663_vm13, %v5241_v44, %v5245_v18  ;;  %v5248_v36 = vshrl.u32 %v5010_v28, 16  ;;  %v5251_v48 = vshll.u32 %v5010_v28, 16  ;;  %v4899_v30 = vsel %vm11375_vm8, %v4711_v57, %v4898_v51 }
 0x430   : > { %4869 = vst [vmem:[#allocation3 + $0x74] sm:$0x1] %v4868_v10  ;;  %v4638_v24 = vshrl.u32 %v4470_v25, 16  ;;  %5449 = vrot.lane.b32.xlu0 %v5246_v9, %s9530_s8  ;;  %v4641_v17 = vshll.u32 %v4470_v25, 16  ;;  %v4719_v33 = vor.u32 %v4717_v12, %v4716_v11  ;;  %v4721_v14 = vrot.slane %v4716_v11, 4 }
 0x431   : > { %5514 = vst.msk [vmem:[#allocation5 + $0x8] sm:$0xf] %vm5511_vm3, %v5420_v54  ;;  %v4387_v31 = vpop.f32.mrf.mxu0  ;;  %v5250_v4 = vrot.slane %v5248_v36, 4  ;;  %v5253_v45 = vrot.slane %v5251_v48, 5  ;;  %v4448_v59 = vmax.f32 %v4411_v52, 0.0 }
 0x432   : > { %v11598_v56 = vrot.slane %v4638_v24, 7  ;;  %v4388_v55 = vadd.f32 %v11559_v37, %v4387_v31  ;;  %v5422_v47 = vpop.permute.xlu1 %5421  ;;  %4900 = vst [vmem:[#allocation3 + $0xa8] sm:$0xf] %v4899_v30  ;;  %v4720_v50 = vsel %vm9643_vm11, %v4712_v62, %v4719_v33  ;;  %v4874_v9 = vld [vmem:[#allocation3 + $0x80] sm:$0x1]  ;;  %v4413_v24 = vadd.f32 %v11559_v37, %v4412_v42 }
 0x433   : > { %5515 = vst.msk [vmem:[#allocation5 + $0xc] sm:$0xf] %vm5511_vm3, %v5422_v47  ;;  %v5254_v40 = vor.u32 %v5253_v45, %v5250_v4  ;;  %v4902_v5 = vld [vmem:[#allocation3 + $0xb0] sm:$0x1]  ;;  %v4480_v53 = vpack.c.bf16 %v4448_v59, %v4448_v59  ;;  %v973_v4 = vld [vmem:[#allocation3 + $0x98] sm:$0x1] }
 0x434   : > { %v4643_v13 = vor.u32 %v4641_v17, %v11598_v56  ;;  %v4439_v41 = vmax.f32 %v4388_v55, 0.0  ;;  %v4644_v63 = vrot.slane %v11598_v56, 4  ;;  %4901 = vst.msk [vmem:[#allocation3 + $0xac] sm:$0xf] %vm871_vm4, %v4720_v50  ;;  %v4903_v17 = vsel %vm11316_vm9, %v4721_v14, %v4902_v5 }
 0x435   : > { %v5255_v6 = vrot.slane %v5254_v40, 4  ;;  %929 = vst [vmem:[#allocation3 + $0xb4] sm:$0x1] %v928_v3  ;;  %v4723_v31 = vshrl.u32 %v4480_v53, 16  ;;  %v4726_v27 = vshll.u32 %v4480_v53, 16  ;;  %v974_v60 = vsel %vm11332_vm2, 0, %v973_v4 }
 0x436   : > { %v4871_v61 = vsel %vm11375_vm8, %v4643_v13, %v4870_v0  ;;  %v4471_v7 = vpack.c.bf16 %v4439_v41, %v4439_v41  ;;  %v5011_v20 = vld [vmem:[#allocation3 + $0x70] sm:$0xf]  ;;  %4904 = vst [vmem:[#allocation3 + $0xb0] sm:$0x1] %v4903_v17  ;;  %v4449_v13 = vmax.f32 %v4413_v24, 0.0 }
 0x437   : > { %4872 = vst [vmem:[#allocation3 + $0x78] sm:$0xf] %v4871_v61  ;;  %v5257_v16 = vshll.u32 %v5011_v20, 16  ;;  %v5261_v2 = vshrl.u32 %v5011_v20, 16  ;;  %v5012_v8 = vld [vmem:[#allocation3 + $0x74] sm:$0x1] }
 0x438   : > { %v4646_v26 = vshrl.u32 %v4471_v7, 16  ;;  %v4649_v35 = vshll.u32 %v4471_v7, 16  ;;  %v5267_v38 = vshll.u32 %v5012_v8, 16  ;;  %v11633_v21 = vrot.slane %v4723_v31, 7  ;;  %975 = vst [vmem:[#allocation3 + $0x98] sm:$0x1] %v974_v60 }
 0x439   : > { %v4390_v29 = vpop.f32.mrf.mxu0  ;;  %v5259_v44 = vrot.slane %v5257_v16, 5  ;;  %v5263_v18 = vrot.slane %v5261_v2, 4  ;;  %v4877_v61 = vld [vmem:[#allocation3 + $0x84] sm:$0xf]  ;;  %v4481_v30 = vpack.c.bf16 %v4449_v13, %v4449_v13 }
 0x43a   : > { %v4648_v10 = vrot.slane %v4646_v26, 7  ;;  %v4391_v25 = vadd.f32 %v11559_v37, %v4390_v29  ;;  %v5430_v54 = vpop.permute.xlu2 %5429  ;;  %v5269_v28 = vrot.slane %v5267_v38, 5  ;;  %v4936_v38 = vld [vmem:[#allocation3 + $0x64] sm:$0xf] }
 0x43b   : > { %5519 = vst.msk [vmem:[#allocation5 + $0x1c] sm:$0xf] %vm5511_vm3, %v5430_v54  ;;  %v5260_v36 = vsel %vm9663_vm13, %v5255_v6, %v5259_v44  ;;  %v5264_v48 = vor.u32 %v5263_v18, %v5259_v44  ;;  %v982_v6 = vld [vmem:[#allocation3 + $0xbc] sm:$0x1]  ;;  %v4734_v44 = vshll.u32 %v4481_v30, 16 }
 0x43c   : > { %v4651_v15 = vor.u32 %v4649_v35, %v4648_v10  ;;  %v4653_v23 = vrot.slane %v4648_v10, 4  ;;  %v4440_v19 = vmax.f32 %v4391_v25, 0.0  ;;  %5451 = vrot.lane.b32.xlu1 %v5260_v36, %s9530_s8  ;;  %v4905_v16 = vld [vmem:[#allocation3 + $0xb4] sm:$0xf]  ;;  %v983_v2 = vsel %vm11332_vm2, 0, %v982_v6 }
 0x43d   : > { %v5265_v0 = vrot.slane %v5264_v48, 4  ;;  %984 = vst [vmem:[#allocation3 + $0xbc] sm:$0x1] %v983_v2  ;;  %v4731_v35 = vshrl.u32 %v4481_v30, 16  ;;  %v4938_v18 = vld [vmem:[#allocation3 + $0x70] sm:$0xf] }
 0x43e   : > { %v4652_v45 = vsel %vm9643_vm11, %v4644_v63, %v4651_v15  ;;  %v4875_v56 = vsel %vm11316_vm9, %v4653_v23, %v4874_v9  ;;  %v4472_v55 = vpack.c.bf16 %v4440_v19, %v4440_v19  ;;  %v5013_v47 = vld [vmem:[#allocation3 + $0x78] sm:$0xf]  ;;  %v4728_v63 = vor.u32 %v4726_v27, %v11633_v21  ;;  %4970 = vst.msk [vmem:[#allocation5 + $0x4c] sm:$0xf] %vm871_vm4, %v4938_v18  ;;  %v4881_v19 = vld [vmem:[#allocation3 + $0x8c] sm:$0x1] }
 0x43f   : > { %4873 = vst.msk [vmem:[#allocation3 + $0x7c] sm:$0xf] %vm871_vm4, %v4652_v45  ;;  %v5270_v43 = vsel %vm9663_vm13, %v5265_v0, %v5269_v28  ;;  %v5272_v1 = vshrl.u32 %v5013_v47, 16  ;;  %v5275_v40 = vshll.u32 %v5013_v47, 16  ;;  %v4729_v25 = vrot.slane %v11633_v21, 4 }
 0x440   : > { %4876 = vst [vmem:[#allocation3 + $0x80] sm:$0x1] %v4875_v56  ;;  %v4655_v12 = vshrl.u32 %v4472_v55, 16  ;;  %5453 = vrot.lane.b32.xlu2 %v5270_v43, %s9530_s8  ;;  %v4658_v11 = vshll.u32 %v4472_v55, 16  ;;  %v4906_v52 = vsel %vm11375_vm8, %v4728_v63, %v4905_v16  ;;  %v4733_v54 = vrot.slane %v4731_v35, 7 }
 0x441   : > { %v4392_v41 = vpop.f32.mrf.mxu0  ;;  %v5274_v57 = vrot.slane %v5272_v1, 4  ;;  %v5277_v51 = vrot.slane %v5275_v40, 5  ;;  %4907 = vst [vmem:[#allocation3 + $0xb4] sm:$0xf] %v4906_v52  ;;  %v4937_v30 = vld [vmem:[#allocation3 + $0x6c] sm:$0xf] }
 0x442   : > { %v4657_v62 = vrot.slane %v4655_v12, 7  ;;  %v4393_v7 = vadd.f32 %v11559_v37, %v4392_v41  ;;  %v5426_v20 = vpop.permute.xlu0 %5425  ;;  %v4736_v15 = vor.u32 %v4734_v44, %v4733_v54  ;;  %4968 = vst.msk [vmem:[#allocation5 + $0x44] sm:$0xf] %vm871_vm4, %v4936_v38  ;;  %v4738_v31 = vrot.slane %v4733_v54, 4  ;;  %v4884_v16 = vld [vmem:[#allocation3 + $0x90] sm:$0xf] }
 0x443   : > { %5517 = vst.msk [vmem:[#allocation5 + $0x14] sm:$0xf] %vm5511_vm3, %v5426_v20  ;;  %v5278_v26 = vor.u32 %v5277_v51, %v5274_v57  ;;  %v5022_v2 = vld [vmem:[#allocation3 + $0x9c] sm:$0xf] }
 0x444   : > { %v4660_v8 = vor.u32 %v4658_v11, %v4657_v62  ;;  %v4441_v33 = vmax.f32 %v4393_v7, 0.0  ;;  %v4661_v23 = vrot.slane %v4657_v62, 4  ;;  %v4909_v4 = vld [vmem:[#allocation3 + $0xbc] sm:$0x1]  ;;  %v4737_v47 = vsel %vm9643_vm11, %v4729_v25, %v4736_v15  ;;  %4969 = vst.msk [vmem:[#allocation5 + $0x48] sm:$0xf] %vm871_vm4, %v4937_v30 }
 0x445   : > { %v5279_v3 = vrot.slane %v5278_v26, 4  ;;  %4908 = vst.msk [vmem:[#allocation3 + $0xb8] sm:$0xf] %vm871_vm4, %v4737_v47  ;;  %v4910_v1 = vsel %vm11316_vm9, %v4738_v31, %v4909_v4 }
 0x446   : > { %v4878_v14 = vsel %vm11375_vm8, %v4660_v8, %v4877_v61  ;;  %v4473_v42 = vpack.c.bf16 %v4441_v33, %v4441_v33  ;;  %v5014_v29 = vld [vmem:[#allocation3 + $0x7c] sm:$0xf]  ;;  %4911 = vst [vmem:[#allocation3 + $0xbc] sm:$0x1] %v4910_v1 }
 0x447   : > { %4879 = vst [vmem:[#allocation3 + $0x84] sm:$0xf] %v4878_v14  ;;  %v5281_v50 = vshll.u32 %v5014_v29, 16  ;;  %v5285_v39 = vshrl.u32 %v5014_v29, 16  ;;  %v5015_v59 = vld [vmem:[#allocation3 + $0x80] sm:$0x1] }
 0x448   : > { %v4663_v10 = vshrl.u32 %v4473_v42, 16  ;;  %v5291_v48 = vshll.u32 %v5015_v59, 16  ;;  %v4666_v53 = vshll.u32 %v4473_v42, 16  ;;  %v5344_v42 = vshrl.u32 %v5022_v2, 16  ;;  %v5900_v32 = vld [vmem:[#allocation3 + $0x7c] sm:$0xf] }
 0x449   : > { %v4395_v28 = vpop.f32.mrf.mxu0  ;;  %v5283_v9 = vrot.slane %v5281_v50, 5  ;;  %v5287_v36 = vrot.slane %v5285_v39, 4  ;;  %v5347_v29 = vshll.u32 %v5022_v2, 16 }
 0x44a   : > { %v4665_v5 = vrot.slane %v4663_v10, 7  ;;  %v4396_v24 = vadd.f32 %v11559_v37, %v4395_v28  ;;  %v5293_v43 = vrot.slane %v5291_v48, 5  ;;  %v5346_v48 = vrot.slane %v5344_v42, 4 }
 0x44b   : > { %v5284_v17 = vsel %vm9663_vm13, %v5279_v3, %v5283_v9  ;;  %v5288_v0 = vor.u32 %v5287_v36, %v5283_v9  ;;  %v4888_v3 = vld [vmem:[#allocation3 + $0x98] sm:$0x1] }
 0x44c   : > { %v4668_v45 = vor.u32 %v4666_v53, %v4665_v5  ;;  %v4670_v56 = vrot.slane %v4665_v5, 4  ;;  %v4442_v55 = vmax.f32 %v4396_v24, 0.0  ;;  %5455 = vrot.lane.b32.xlu0 %v5284_v17, %s9530_s8  ;;  %v5349_v5 = vrot.slane %v5347_v29, 5  ;;  %v5026_v53 = vld [vmem:[#allocation3 + $0xac] sm:$0xf] }
 0x44d   : > { %v5289_v27 = vrot.slane %v5288_v0, 4  ;;  %v5381_v47 = vshrl.u32 %v5026_v53, 16 }
 0x44e   : > { %v4669_v40 = vsel %vm9643_vm11, %v4661_v23, %v4668_v45  ;;  %v4882_v21 = vsel %vm11316_vm9, %v4670_v56, %v4881_v19  ;;  %v4474_v12 = vpack.c.bf16 %v4442_v55, %v4442_v55  ;;  %v5428_v60 = vpop.permute.xlu1 %5427  ;;  %v5016_v13 = vld [vmem:[#allocation3 + $0x84] sm:$0xf]  ;;  %v5023_v45 = vld [vmem:[#allocation3 + $0xa0] sm:$0xf]  ;;  %v5377_v55 = vshll.u32 %v5026_v53, 16 }
 0x44f   : > { %4880 = vst.msk [vmem:[#allocation3 + $0x88] sm:$0xf] %vm871_vm4, %v4669_v40  ;;  %v5294_v41 = vsel %vm9663_vm13, %v5289_v27, %v5293_v43  ;;  %v5296_v57 = vshrl.u32 %v5016_v13, 16  ;;  %v5299_v51 = vshll.u32 %v5016_v13, 16  ;;  %v5350_v43 = vor.u32 %v5349_v5, %v5346_v48 }
 0x450   : > { %4883 = vst [vmem:[#allocation3 + $0x8c] sm:$0x1] %v4882_v21  ;;  %v4672_v63 = vshrl.u32 %v4474_v12, 16  ;;  %5457 = vrot.lane.b32.xlu1 %v5294_v41, %s9530_s8  ;;  %v4675_v20 = vshll.u32 %v4474_v12, 16  ;;  %v9460_v21 = vld [vmem:[#allocation4 + $0x78] sm:$0xff] }
 0x451   : > { %5518 = vst.msk [vmem:[#allocation5 + $0x18] sm:$0xf] %vm5511_vm3, %v5428_v60  ;;  %v4397_v62 = vpop.f32.mrf.mxu0  ;;  %v5298_v11 = vrot.slane %v5296_v57, 4  ;;  %v5301_v61 = vrot.slane %v5299_v51, 5  ;;  %v5027_v12 = vld [vmem:[#allocation3 + $0xb0] sm:$0x1]  ;;  %9280 = vmatmul.msk.bf16.gmra.mxu3 %vm4278_vm6, %v9460_v21 }
 0x452   : > { %v4674_v7 = vrot.slane %v4672_v63, 7  ;;  %v4398_v6 = vadd.f32 %v11559_v37, %v4397_v62  ;;  %v5353_v60 = vshll.u32 %v5023_v45, 16  ;;  %v5357_v51 = vshrl.u32 %v5023_v45, 16 }
 0x453   : > { %v5302_v52 = vor.u32 %v5301_v61, %v5298_v11  ;;  %v11686_v63 = vrot.slane %v5377_v55, 5  ;;  %v5383_v62 = vrot.slane %v5381_v47, 4  ;;  %v4939_v11 = vld [vmem:[#allocation3 + $0x78] sm:$0xf]  ;;  %v5351_v61 = vrot.slane %v5350_v43, 4 }
 0x454   : > { %v4677_v8 = vor.u32 %v4675_v20, %v4674_v7  ;;  %v4443_v33 = vmax.f32 %v4398_v6, 0.0  ;;  %v4678_v24 = vrot.slane %v4674_v7, 4  ;;  %v5025_v7 = vld [vmem:[#allocation3 + $0xa8] sm:$0xf]  ;;  %v5387_v20 = vshll.u32 %v5027_v12, 16 }
 0x455   : > { %v5303_v39 = vrot.slane %v5302_v52, 4  ;;  %4971 = vst.msk [vmem:[#allocation5 + $0x50] sm:$0xf] %vm871_vm4, %v4939_v11  ;;  %v5355_v6 = vrot.slane %v5353_v60, 5  ;;  %v5368_v52 = vshrl.u32 %v5025_v7, 16  ;;  %vm8216_vm6 = vcmask 588800  }
 0x456   : > { %v4885_v26 = vsel %vm11375_vm8, %v4677_v8, %v4884_v16  ;;  %v4475_v35 = vpack.c.bf16 %v4443_v33, %v4443_v33  ;;  %v5436_v38 = vpop.permute.xlu2 %5435  ;;  %v5017_v14 = vld [vmem:[#allocation3 + $0x88] sm:$0xf]  ;;  %v5024_v16 = vld [vmem:[#allocation3 + $0xa4] sm:$0x1]  ;;  %v5384_v8 = vor.u32 %v5383_v62, %v11686_v63  ;;  %v5359_v33 = vrot.slane %v5357_v51, 4 }
 0x457   : > { %4886 = vst [vmem:[#allocation3 + $0x90] sm:$0xf] %v4885_v26  ;;  %v5305_v44 = vshll.u32 %v5017_v14, 16  ;;  %v5309_v18 = vshrl.u32 %v5017_v14, 16  ;;  %v5018_v37 = vld [vmem:[#allocation3 + $0x8c] sm:$0x1] }
 0x458   : > { %v4680_v50 = vshrl.u32 %v4475_v35, 16  ;;  %5522 = vst.msk [vmem:[#allocation5 + $0x28] sm:$0xf] %vm5511_vm3, %v5436_v38  ;;  %v5315_v25 = vshll.u32 %v5018_v37, 16  ;;  %v4683_v28 = vshll.u32 %v4475_v35, 16  ;;  %v5371_v26 = vshll.u32 %v5025_v7, 16 }
 0x459   : > { %v5307_v59 = vrot.slane %v5305_v44, 5  ;;  %v5311_v10 = vrot.slane %v5309_v18, 4  ;;  %v5356_v35 = vsel %vm9663_vm13, %v5351_v61, %v5355_v6  ;;  %v5389_v29 = vrot.slane %v5387_v20, 5  ;;  %v5028_v18 = vld [vmem:[#allocation3 + $0xb4] sm:$0xf] }
 0x45a   : > { %v4682_v54 = vrot.slane %v4680_v50, 7  ;;  %v5317_v17 = vrot.slane %v5315_v25, 5  ;;  %v5363_v44 = vshll.u32 %v5024_v16, 16  ;;  %v5385_v25 = vrot.slane %v5384_v8, 4  ;;  %v5030_v7 = vld [vmem:[#allocation3 + $0xbc] sm:$0x1] }
 0x45b   : > { %v5308_v9 = vsel %vm9663_vm13, %v5303_v39, %v5307_v59  ;;  %v5312_v36 = vor.u32 %v5311_v10, %v5307_v59  ;;  %v5392_v5 = vshrl.u32 %v5028_v18, 16  ;;  %v5395_v53 = vshll.u32 %v5028_v18, 16 }
 0x45c   : > { %v4685_v15 = vor.u32 %v4683_v28, %v4682_v54  ;;  %v4687_v23 = vrot.slane %v4682_v54, 4  ;;  %5459 = vrot.lane.b32.xlu2 %v5308_v9, %s9530_s8  ;;  %v5360_v54 = vor.u32 %v5359_v33, %v5355_v6  ;;  %v5370_v28 = vrot.slane %v5368_v52, 4  ;;  %v5029_v9 = vld [vmem:[#allocation3 + $0xb8] sm:$0xf]  ;;  %v5549_v33 = vld [vmem:[#allocation3 + $0x14] sm:$0x1] }
 0x45d   : > { %v5313_v19 = vrot.slane %v5312_v36, 4  ;;  %v5394_v47 = vrot.slane %v5392_v5, 4  ;;  %v5405_v43 = vshrl.u32 %v5029_v9, 16  ;;  %v5411_v8 = vshll.u32 %v5030_v7, 16  ;;  %v5546_v52 = vld [vmem:[#allocation3 + $0x8] sm:$0x1] }
 0x45e   : > { %v4686_v0 = vsel %vm9643_vm11, %v4678_v24, %v4685_v15  ;;  %v4889_v31 = vsel %vm11316_vm9, %v4687_v23, %v4888_v3  ;;  %v5432_v4 = vpop.permute.xlu0 %5431  ;;  %v5019_v56 = vld [vmem:[#allocation3 + $0x90] sm:$0xf]  ;;  %v5373_v3 = vrot.slane %v5371_v26, 5  ;;  %v4940_v24 = vld [vmem:[#allocation3 + $0x7c] sm:$0xf] }
 0x45f   : > { %4887 = vst.msk [vmem:[#allocation3 + $0x94] sm:$0xf] %vm871_vm4, %v4686_v0  ;;  %v5318_v27 = vsel %vm9663_vm13, %v5313_v19, %v5317_v17  ;;  %v5320_v1 = vshrl.u32 %v5019_v56, 16  ;;  %v5323_v40 = vshll.u32 %v5019_v56, 16  ;;  %v5365_v19 = vrot.slane %v5363_v44, 5 }
 0x460   : > { %4890 = vst [vmem:[#allocation3 + $0x98] sm:$0x1] %v4889_v31  ;;  %5461 = vrot.lane.b32.xlu0 %v5318_v27, %s9530_s8  ;;  %v5390_v17 = vsel %vm9663_vm13, %v5385_v25, %v5389_v29  ;;  %v5361_v0 = vrot.slane %v5360_v54, 4  ;;  %v5544_v31 = vld [vmem:[#allocation3] sm:$0xe]  ;;  %v5374_v45 = vor.u32 %v5373_v3, %v5370_v28  ;;  %v5401_v56 = vshll.u32 %v5029_v9, 16 }
 0x461   : > { %5520 = vst.msk [vmem:[#allocation5 + $0x20] sm:$0xf] %vm5511_vm3, %v5432_v4  ;;  %v5322_v13 = vrot.slane %v5320_v1, 4  ;;  %v5325_v41 = vrot.slane %v5323_v40, 5  ;;  %v5545_v4 = vld [vmem:[#allocation3 + $0x4] sm:$0xf] }
 0x462   : > { %v5434_v57 = vpop.permute.xlu1 %5433  ;;  %4972 = vst.msk [vmem:[#allocation5 + $0x54] sm:$0xf] %vm871_vm4, %v4940_v24  ;;  %v5397_v27 = vrot.slane %v5395_v53, 5  ;;  %v4945_v1 = vld [vmem:[#allocation3 + $0x9c] sm:$0xf]  ;;  %v9281_v40 = vrot.slane %v5544_v31, 9  ;;  %v5366_v60 = vsel %vm9663_vm13, %v5361_v0, %v5365_v19 }
 0x463   : > { %5521 = vst.msk [vmem:[#allocation5 + $0x24] sm:$0xf] %vm5511_vm3, %v5434_v57  ;;  %v5326_v30 = vor.u32 %v5325_v41, %v5322_v13  ;;  %v5642_v21 = vrot.slane %v5545_v4, 5  ;;  %v5548_v13 = vld [vmem:[#allocation3 + $0x10] sm:$0xf]  ;;  %v5375_v51 = vrot.slane %v5374_v45, 4 }
 0x464   : > { %4977 = vst.msk [vmem:[#allocation5 + $0x68] sm:$0xf] %vm871_vm4, %v4945_v1  ;;  %v4941_v41 = vld [vmem:[#allocation3 + $0x84] sm:$0xf]  ;;  %v4946_v57 = vld [vmem:[#allocation3 + $0xa0] sm:$0xf]  ;;  %v5398_v62 = vor.u32 %v5397_v27, %v5394_v47 }
 0x465   : > { %v5327_v37 = vrot.slane %v5326_v30, 4  ;;  %v5403_v11 = vrot.slane %v5401_v56, 5  ;;  %v5407_v61 = vrot.slane %v5405_v43, 4  ;;  %4973 = vst.msk [vmem:[#allocation5 + $0x58] sm:$0xf] %vm871_vm4, %v4941_v41  ;;  %v5643_v20 = vsel %vm10065_vm1, %v9281_v40, %v5642_v21 }
 0x466   : > { %v5020_v2 = vld [vmem:[#allocation3 + $0x94] sm:$0xf]  ;;  %4978 = vst.msk [vmem:[#allocation5 + $0x6c] sm:$0xf] %vm871_vm4, %v4946_v57  ;;  %v5649_v6 = vrot.slane %v5548_v13, 5  ;;  %v5380_v30 = vsel %vm9663_vm13, %v5375_v51, %v11686_v63  ;;  %v5399_v16 = vrot.slane %v5398_v62, 4 }
 0x467   : > { %v5329_v38 = vshll.u32 %v5020_v2, 16  ;;  %v5333_v14 = vshrl.u32 %v5020_v2, 16  ;;  %v5021_v42 = vld [vmem:[#allocation3 + $0x98] sm:$0x1]  ;;  %v5408_v2 = vor.u32 %v5407_v61, %v5403_v11  ;;  %v4942_v26 = vld [vmem:[#allocation3 + $0x88] sm:$0xf] }
 0x468   : > { %5467 = vrot.lane.b32.xlu0 %v5356_v35, %s9530_s8  ;;  %v5339_v59 = vshll.u32 %v5021_v42, 16  ;;  %v5404_v35 = vsel %vm9663_vm13, %v5399_v16, %v5403_v11  ;;  %v5413_v42 = vrot.slane %v5411_v8, 5  ;;  %4974 = vst.msk [vmem:[#allocation5 + $0x5c] sm:$0xf] %vm871_vm4, %v4942_v26  ;;  %v5652_v63 = vrot.slane %v5549_v33, 5 }
 0x469   : > { %v5331_v50 = vrot.slane %v5329_v38, 5  ;;  %v5335_v39 = vrot.slane %v5333_v14, 4  ;;  %v5651_v38 = vrot.slane %v5649_v6, 4  ;;  %v5409_v14 = vrot.slane %v5408_v2, 4  ;;  %v4948_v25 = vld [vmem:[#allocation3 + $0xac] sm:$0xf] }
 0x46a   : > { %v5442_v10 = vpop.permute.xlu2 %5441  ;;  %v5341_v23 = vrot.slane %v5339_v59, 5  ;;  %v5644_v29 = vrot.slane %v5642_v21, 4  ;;  %v5645_v44 = vrot.slane %v5546_v52, 5  ;;  %v4947_v59 = vld [vmem:[#allocation3 + $0xa8] sm:$0xf] }
 0x46b   : > { %5525 = vst.msk [vmem:[#allocation5 + $0x34] sm:$0xf] %vm5511_vm3, %v5442_v10  ;;  %v5332_v36 = vsel %vm9663_vm13, %v5327_v37, %v5331_v50  ;;  %v5336_v48 = vor.u32 %v5335_v39, %v5331_v50  ;;  %v5653_v37 = vsel %vm10065_vm1, %v5651_v38, %v5652_v63  ;;  %v5414_v50 = vsel %vm9663_vm13, %v5409_v14, %v5413_v42  ;;  %v5554_v39 = vld [vmem:[#allocation3 + $0x28] sm:$0xf]  ;;  %v5553_v54 = vld [vmem:[#allocation3 + $0x24] sm:$0xe] }
 0x46c   : > { %5463 = vrot.lane.b32.xlu1 %v5332_v36, %s9530_s8  ;;  %v5646_v10 = vsel %vm10065_vm1, %v5644_v29, %v5645_v44  ;;  %4979 = vst.msk [vmem:[#allocation5 + $0x70] sm:$0xf] %vm871_vm4, %v4947_v59  ;;  %v5547_v28 = vld [vmem:[#allocation3 + $0xc] sm:$0xe]  ;;  %v4943_v3 = vld [vmem:[#allocation3 + $0x90] sm:$0xf] }
 0x46d   : > { %v5337_v15 = vrot.slane %v5336_v48, 4  ;;  %v5663_v9 = vrot.slane %v5554_v39, 5  ;;  %4975 = vst.msk [vmem:[#allocation5 + $0x60] sm:$0xf] %vm871_vm4, %v4943_v3  ;;  %v5551_v36 = vld [vmem:[#allocation3 + $0x1c] sm:$0xf] }
 0x46e   : > { %v5557_v48 = vld [vmem:[#allocation3 + $0x34] sm:$0xf]  ;;  %4980 = vst.msk [vmem:[#allocation5 + $0x74] sm:$0xf] %vm871_vm4, %v4948_v25  ;;  %v9284_v5 = vrot.slane %v5553_v54, 9  ;;  %v9282_v53 = vrot.slane %v5547_v28, 9 }
 0x46f   : > { %v5342_v55 = vsel %vm9663_vm13, %v5337_v15, %v5341_v23  ;;  %v5550_v15 = vld [vmem:[#allocation3 + $0x18] sm:$0xe]  ;;  %v5670_v0 = vrot.slane %v5557_v48, 5  ;;  %v5558_v4 = vld [vmem:[#allocation3 + $0x38] sm:$0x1]  ;;  %v5665_v13 = vrot.slane %v5663_v9, 4 }
 0x470   : > { %5473 = vrot.lane.b32.xlu0 %v5390_v17, %s9530_s8  ;;  %5465 = vrot.lane.b32.xlu2 %v5342_v55, %s9530_s8  ;;  %v5664_v23 = vsel %vm10065_vm1, %v9284_v5, %v5663_v9  ;;  %v5650_v19 = vsel %vm10065_vm1, %v9282_v53, %v5649_v6  ;;  %v5656_v17 = vrot.slane %v5551_v36, 5  ;;  %v9283_v31 = vrot.slane %v5550_v15, 9  ;;  %v5552_v45 = vld [vmem:[#allocation3 + $0x20] sm:$0x1]  ;;  %v4944_v56 = vld [vmem:[#allocation3 + $0x94] sm:$0xf] }
 0x471   : > { %v5672_v47 = vrot.slane %v5670_v0, 4  ;;  %4976 = vst.msk [vmem:[#allocation5 + $0x64] sm:$0xf] %vm871_vm4, %v4944_v56  ;;  %v5673_v43 = vrot.slane %v5558_v4, 5  ;;  %v5659_v1 = vrot.slane %v5552_v45, 5 }
 0x472   : > { %v5438_v12 = vpop.permute.xlu0 %5437  ;;  %v5657_v55 = vsel %vm10065_vm1, %v9283_v31, %v5656_v17  ;;  %v5658_v27 = vrot.slane %v5656_v17, 4  ;;  %v5555_v21 = vld [vmem:[#allocation3 + $0x2c] sm:$0x1]  ;;  %v4950_v57 = vld [vmem:[#allocation3 + $0xb8] sm:$0xf] }
 0x473   : > { %5523 = vst.msk [vmem:[#allocation5 + $0x2c] sm:$0xf] %vm5511_vm3, %v5438_v12  ;;  %v5674_v12 = vsel %vm10065_vm1, %v5672_v47, %v5673_v43  ;;  %v5563_v41 = vld [vmem:[#allocation3 + $0x4c] sm:$0xf]  ;;  %v5666_v51 = vrot.slane %v5555_v21, 5 }
 0x474   : > { %5469 = vrot.lane.b32.xlu1 %v5366_v60, %s9530_s8  ;;  %v5660_v60 = vsel %vm10065_vm1, %v5658_v27, %v5659_v1  ;;  %4982 = vst.msk [vmem:[#allocation5 + $0x7c] sm:$0xf] %vm871_vm4, %v4950_v57  ;;  %v5562_v11 = vld [vmem:[#allocation3 + $0x48] sm:$0xe]  ;;  %v5556_v61 = vld [vmem:[#allocation3 + $0x30] sm:$0xe] }
 0x475   : > { %v5667_v7 = vsel %vm10065_vm1, %v5665_v13, %v5666_v51  ;;  %v5560_v6 = vld [vmem:[#allocation3 + $0x40] sm:$0xf]  ;;  %v9287_v16 = vrot.slane %v5562_v11, 9  ;;  %v9285_v2 = vrot.slane %v5556_v61, 9  ;;  %v5559_v8 = vld [vmem:[#allocation3 + $0x3c] sm:$0xe] }
 0x476   : > { %v5677_v26 = vrot.slane %v5560_v6, 5  ;;  %v9286_v38 = vrot.slane %v5559_v8, 9  ;;  %v5567_v42 = vld [vmem:[#allocation3 + $0x5c] sm:$0x1]  ;;  %v5561_v63 = vld [vmem:[#allocation3 + $0x44] sm:$0x1] }
 0x477   : > { %v5671_v52 = vsel %vm10065_vm1, %v9285_v2, %v5670_v0  ;;  %v5564_v39 = vld [vmem:[#allocation3 + $0x50] sm:$0x1]  ;;  %v5571_v9 = vld [vmem:[#allocation3 + $0x6c] sm:$0xe]  ;;  %v5565_v36 = vld [vmem:[#allocation3 + $0x54] sm:$0xe] }
 0x478   : > { %5752 = vrot.lane.b32.xlu0 %v5643_v20, %s9532_s10  ;;  %5471 = vrot.lane.b32.xlu2 %v5380_v30, %s9530_s8  ;;  %v5684_v20 = vrot.slane %v5563_v41, 5  ;;  %v5566_v30 = vld [vmem:[#allocation3 + $0x58] sm:$0xf]  ;;  %v5678_v29 = vsel %vm10065_vm1, %v9286_v38, %v5677_v26  ;;  %v5572_v54 = vld [vmem:[#allocation3 + $0x70] sm:$0xf]  ;;  %v5687_v28 = vrot.slane %v5564_v39, 5 }
 0x479   : > { %v5705_v5 = vrot.slane %v5572_v54, 5  ;;  %v5569_v53 = vld [vmem:[#allocation3 + $0x64] sm:$0xf]  ;;  %v9290_v15 = vrot.slane %v5571_v9, 9  ;;  %v5576_v56 = vld [vmem:[#allocation3 + $0x80] sm:$0x1] }
 0x47a   : > { %v5685_v33 = vsel %vm10065_vm1, %v9287_v16, %v5684_v20  ;;  %v5686_v25 = vrot.slane %v5684_v20, 4  ;;  %v5698_v31 = vrot.slane %v5569_v53, 5  ;;  %v5715_v1 = vrot.slane %v5576_v56, 5  ;;  %v5581_v57 = vld [vmem:[#allocation3 + $0x94] sm:$0xf] }
 0x47b   : > { %v5706_v17 = vsel %vm10065_vm1, %v9290_v15, %v5705_v5  ;;  %v5707_v41 = vrot.slane %v5705_v5, 4  ;;  %v5574_v11 = vld [vmem:[#allocation3 + $0x78] sm:$0xe]  ;;  %v5578_v20 = vld [vmem:[#allocation3 + $0x88] sm:$0xf] }
 0x47c   : > { %5475 = vrot.lane.b32.xlu1 %v5404_v35, %s9530_s8  ;;  %v5691_v35 = vrot.slane %v5566_v30, 5  ;;  %v5688_v48 = vsel %vm10065_vm1, %v5686_v25, %v5687_v28  ;;  %v5700_v43 = vrot.slane %v5698_v31, 4  ;;  %v5584_v6 = vld [vmem:[#allocation3 + $0xa0] sm:$0xf]  ;;  %v9291_v16 = vrot.slane %v5574_v11, 9 }
 0x47d   : > { %v5577_v8 = vld [vmem:[#allocation3 + $0x84] sm:$0xe]  ;;  %v5585_v38 = vld [vmem:[#allocation3 + $0xa4] sm:$0x1]  ;;  %v5582_v39 = vld [vmem:[#allocation3 + $0x98] sm:$0x1] }
 0x47e   : > { %v5440_v18 = vpop.permute.xlu1 %5439  ;;  %v5693_v44 = vrot.slane %v5691_v35, 4  ;;  %v5589_v54 = vld [vmem:[#allocation3 + $0xb4] sm:$0xe]  ;;  %v5590_v28 = vld [vmem:[#allocation3 + $0xb8] sm:$0xf]  ;;  %v5729_v9 = vrot.slane %v5582_v39, 5 }
 0x47f   : > { %5524 = vst.msk [vmem:[#allocation5 + $0x30] sm:$0xf] %vm5511_vm3, %v5440_v18  ;;  %v5679_v18 = vrot.slane %v5677_v26, 4  ;;  %v5719_v26 = vrot.slane %v5578_v20, 5  ;;  %v9296_v5 = vrot.slane %v5589_v54, 9  ;;  %v5747_v53 = vrot.slane %v5590_v28, 5 }
 0x480   : > { %5758 = vrot.lane.b32.xlu0 %v5653_v37, %s9532_s10  ;;  %5477 = vrot.lane.b32.xlu2 %v5414_v50, %s9530_s8  ;;  %v5694_v37 = vrot.slane %v5567_v42, 5  ;;  %v5680_v50 = vrot.slane %v5561_v63, 5  ;;  %v5579_v42 = vld [vmem:[#allocation3 + $0x8c] sm:$0x1]  ;;  %v5586_v15 = vld [vmem:[#allocation3 + $0xa8] sm:$0xe] }
 0x481   : > { %v5888_v20 = vld [vmem:[#allocation3 + $0x34] sm:$0xf]  ;;  %v5889_v39 = vld [vmem:[#allocation3 + $0x3c] sm:$0xf]  ;;  %s9539_s8 = smov 56  }
 0x482   : > { %v5695_v59 = vsel %vm10065_vm1, %v5693_v44, %v5694_v37  ;;  %v5736_v44 = vrot.slane %v5585_v38, 5  ;;  %v5722_v37 = vrot.slane %v5579_v42, 5  ;;  %v5887_v42 = vld [vmem:[#allocation3 + $0x30] sm:$0xf] }
 0x484   : > { %5754 = vrot.lane.b32.xlu1 %v5646_v10, %s9532_s10  ;;  %v5681_v10 = vsel %vm10065_vm1, %v5679_v18, %v5680_v50  ;;  %v5721_v18 = vrot.slane %v5719_v26, 4 }
 0x486   : > { %v5448_v24 = vpop.permute.xlu2 %5447 }
 0x487   : > { %5528 = vst.msk [vmem:[#allocation5 + $0x40] sm:$0xf] %vm5511_vm3, %v5448_v24  ;;  %v5575_v24 = vld [vmem:[#allocation3 + $0x7c] sm:$0xf] }
 0x488   : > { %5764 = vrot.lane.b32.xlu0 %v5664_v23, %s9532_s10  ;;  %5756 = vrot.lane.b32.xlu2 %v5650_v19, %s9532_s10  ;;  %v9288_v23 = vrot.slane %v5565_v36, 9  ;;  %v5568_v19 = vld [vmem:[#allocation3 + $0x60] sm:$0xe]  ;;  %v5712_v4 = vrot.slane %v5575_v24, 5 }
 0x489   : > { %v9289_v45 = vrot.slane %v5568_v19, 9  ;;  %v5748_v19 = vsel %vm10065_vm1, %v9296_v5, %v5747_v53 }
 0x48a   : > { %v5692_v0 = vsel %vm10065_vm1, %v9288_v23, %v5691_v35  ;;  %v5714_v27 = vrot.slane %v5712_v4, 4  ;;  %v5733_v35 = vrot.slane %v5584_v6, 5  ;;  %v5587_v23 = vld [vmem:[#allocation3 + $0xac] sm:$0xf]  ;;  %v5884_v6 = vld [vmem:[#allocation3 + $0x1c] sm:$0xf] }
 0x48b   : > { %v5699_v47 = vsel %vm10065_vm1, %v9289_v45, %v5698_v31  ;;  %v5740_v31 = vrot.slane %v5587_v23, 5  ;;  %v4949_v45 = vld [vmem:[#allocation3 + $0xb4] sm:$0xf] }
 0x48c   : > { %5760 = vrot.lane.b32.xlu1 %v5657_v55, %s9532_s10  ;;  %v5570_v55 = vld [vmem:[#allocation3 + $0x68] sm:$0x1]  ;;  %4981 = vst.msk [vmem:[#allocation5 + $0x78] sm:$0xf] %vm871_vm4, %v4949_v45 }
 0x48e   : > { %v5444_v40 = vpop.permute.xlu0 %5443 }
 0x48f   : > { %5526 = vst.msk [vmem:[#allocation5 + $0x38] sm:$0xf] %vm5511_vm3, %v5444_v40  ;;  %v5701_v40 = vrot.slane %v5570_v55, 5 }
 0x490   : > { %5770 = vrot.lane.b32.xlu0 %v5674_v12, %s9532_s10  ;;  %5762 = vrot.lane.b32.xlu2 %v5660_v60, %s9532_s10  ;;  %v5573_v12 = vld [vmem:[#allocation3 + $0x74] sm:$0x1]  ;;  %v5716_v60 = vsel %vm10065_vm1, %v5714_v27, %v5715_v1  ;;  %v5882_v1 = vld [vmem:[#allocation3 + $0x10] sm:$0xf] }
 0x491   : > { %v5702_v13 = vsel %vm10065_vm1, %v5700_v43, %v5701_v40  ;;  %v5708_v51 = vrot.slane %v5573_v12, 5  ;;  %v5591_v43 = vld [vmem:[#allocation3 + $0xbc] sm:$0x1] }
 0x492   : > { %v5446_v62 = vpop.permute.xlu1 %5445  ;;  %v5750_v12 = vrot.slane %v5591_v43, 5 }
 0x493   : > { %5527 = vst.msk [vmem:[#allocation5 + $0x3c] sm:$0xf] %vm5511_vm3, %v5446_v62  ;;  %v5580_v62 = vld [vmem:[#allocation3 + $0x90] sm:$0xe]  ;;  %v5709_v61 = vsel %vm10065_vm1, %v5707_v41, %v5708_v51  ;;  %v5881_v51 = vld [vmem:[#allocation3 + $0xc] sm:$0xf] }
 0x494   : > { %5766 = vrot.lane.b32.xlu1 %v5667_v7, %s9532_s10  ;;  %v5726_v7 = vrot.slane %v5581_v57, 5  ;;  %v9293_v30 = vrot.slane %v5580_v62, 9  ;;  %v5885_v57 = vld [vmem:[#allocation3 + $0x24] sm:$0xf] }
 0x496   : > { %v5728_v25 = vrot.slane %v5726_v7, 4 }
 0x498   : > { %5776 = vrot.lane.b32.xlu0 %v5685_v33, %s9532_s10  ;;  %5768 = vrot.lane.b32.xlu2 %v5671_v52, %s9532_s10  ;;  %v5727_v33 = vsel %vm10065_vm1, %v9293_v30, %v5726_v7  ;;  %v5713_v52 = vsel %vm10065_vm1, %v9291_v16, %v5712_v4  ;;  %v5588_v4 = vld [vmem:[#allocation3 + $0xb0] sm:$0x1]  ;;  %v930_v30 = vld [vmem:[#allocation3 + $0xc0] sm:$0x1] }
 0x499   : > { %v5743_v27 = vrot.slane %v5588_v4, 5  ;;  %v931_v16 = vsel %vm11316_vm9, 0, %v930_v30  ;;  %v5901_v30 = vld [vmem:[#allocation3 + $0x84] sm:$0xf] }
 0x49a   : > { %v5454_v14 = vpop.permute.xlu2 %5453  ;;  %932 = vst [vmem:[#allocation3 + $0xc0] sm:$0x1] %v931_v16 }
 0x49b   : > { %5531 = vst.msk [vmem:[#allocation5 + $0x4c] sm:$0xf] %vm5511_vm3, %v5454_v14  ;;  %v9292_v14 = vrot.slane %v5577_v8, 9 }
 0x49c   : > { %5772 = vrot.lane.b32.xlu1 %v5678_v29, %s9532_s10  ;;  %v5735_v29 = vrot.slane %v5733_v35, 4 }
 0x49d   : > { %v5720_v63 = vsel %vm10065_vm1, %v9292_v14, %v5719_v26  ;;  %v9517_v26 = vld [vmem:[%s13020_s2] ss:$0 sm:$0xff] }
 0x49e   : > { %v5891_v14 = vld [vmem:[#allocation3 + $0x48] sm:$0xf] }
 0x4a0   : > { %5782 = vrot.lane.b32.xlu0 %v5695_v59, %s9532_s10  ;;  %5774 = vrot.lane.b32.xlu2 %v5681_v10, %s9532_s10  ;;  %v5737_v59 = vsel %vm10065_vm1, %v5735_v29, %v5736_v44  ;;  %v5723_v10 = vsel %vm10065_vm1, %v5721_v18, %v5722_v37  ;;  %v985_v29 = vld [vmem:[#allocation3 + $0xc8] sm:$0x1] }
 0x4a1   : > { %v986_v18 = vsel %vm11332_vm2, 0, %v985_v29 }
 0x4a2   : > { %v5450_v3 = vpop.permute.xlu0 %5449  ;;  %987 = vst [vmem:[#allocation3 + $0xc8] sm:$0x1] %v986_v18 }
 0x4a3   : > { %5529 = vst.msk [vmem:[#allocation5 + $0x44] sm:$0xf] %vm5511_vm3, %v5450_v3  ;;  %v5583_v3 = vld [vmem:[#allocation3 + $0x9c] sm:$0xe] }
 0x4a4   : > { %5778 = vrot.lane.b32.xlu1 %v5688_v48, %s9532_s10  ;;  %v5730_v48 = vsel %vm10065_vm1, %v5728_v25, %v5729_v9  ;;  %v9294_v24 = vrot.slane %v5583_v3, 9  ;;  %v5890_v9 = vld [vmem:[#allocation3 + $0x40] sm:$0xf] }
 0x4a8   : > { %5788 = vrot.lane.b32.xlu0 %v5706_v17, %s9532_s10  ;;  %5780 = vrot.lane.b32.xlu2 %v5692_v0, %s9532_s10  ;;  %v5734_v17 = vsel %vm10065_vm1, %v9294_v24, %v5733_v35  ;;  %v9295_v0 = vrot.slane %v5586_v15, 9 }
 0x4a9   : > { %v4916_v43 = vld [vmem:[#allocation3 + $0xc8] sm:$0x1] }
 0x4aa   : > { %v5741_v55 = vsel %vm10065_vm1, %v9295_v0, %v5740_v31 }
 0x4ac   : > { %5784 = vrot.lane.b32.xlu1 %v5699_v47, %s9532_s10  ;;  %v5742_v47 = vrot.slane %v5740_v31, 4 }
 0x4ae   : > { %v5452_v21 = vpop.permute.xlu1 %5451  ;;  %v5744_v40 = vsel %vm10065_vm1, %v5742_v47, %v5743_v27  ;;  %v5893_v47 = vld [vmem:[#allocation3 + $0x54] sm:$0xf] }
 0x4af   : > { %5530 = vst.msk [vmem:[#allocation5 + $0x48] sm:$0xf] %vm5511_vm3, %v5452_v21  ;;  %v5749_v21 = vrot.slane %v5747_v53, 4 }
 0x4b0   : > { %5794 = vrot.lane.b32.xlu0 %v5716_v60, %s9532_s10  ;;  %5786 = vrot.lane.b32.xlu2 %v5702_v13, %s9532_s10 }
 0x4b1   : > { %v5751_v41 = vsel %vm10065_vm1, %v5749_v21, %v5750_v12 }
 0x4b4   : > { %5790 = vrot.lane.b32.xlu1 %v5709_v61, %s9532_s10  ;;  %v5883_v61 = vld [vmem:[#allocation3 + $0x18] sm:$0xf] }
 0x4b6   : > { %v5460_v2 = vpop.permute.xlu2 %5459 }
 0x4b7   : > { %5534 = vst.msk [vmem:[#allocation5 + $0x58] sm:$0xf] %vm5511_vm3, %v5460_v2 }
 0x4b8   : > { %5800 = vrot.lane.b32.xlu0 %v5727_v33, %s9532_s10  ;;  %5792 = vrot.lane.b32.xlu2 %v5713_v52, %s9532_s10  ;;  %v5886_v33 = vld [vmem:[#allocation3 + $0x28] sm:$0xf] }
 0x4bc   : > { %5796 = vrot.lane.b32.xlu1 %v5720_v63, %s9532_s10 }
 0x4be   : > { %v5456_v50 = vpop.permute.xlu0 %5455 }
 0x4bf   : > { %5532 = vst.msk [vmem:[#allocation5 + $0x50] sm:$0xf] %vm5511_vm3, %v5456_v50 }
 0x4c0   : > { %5806 = vrot.lane.b32.xlu0 %v5737_v59, %s9532_s10  ;;  %5798 = vrot.lane.b32.xlu2 %v5723_v10, %s9532_s10 }
 0x4c2   : > { %v5458_v36 = vpop.permute.xlu1 %5457 }
 0x4c3   : > { %5533 = vst.msk [vmem:[#allocation5 + $0x54] sm:$0xf] %vm5511_vm3, %v5458_v36  ;;  %v4912_v36 = vld [vmem:[#allocation3 + $0xc0] sm:$0xf] }
 0x4c4   : > { %5802 = vrot.lane.b32.xlu1 %v5730_v48, %s9532_s10  ;;  %v5894_v48 = vld [vmem:[#allocation3 + $0x58] sm:$0xf] }
 0x4c8   : > { %5812 = vrot.lane.b32.xlu0 %v5748_v19, %s9532_s10  ;;  %5804 = vrot.lane.b32.xlu2 %v5734_v17, %s9532_s10  ;;  %v5892_v17 = vld [vmem:[#allocation3 + $0x4c] sm:$0xf] }
 0x4ca   : > { %v5466_v56 = vpop.permute.xlu2 %5465 }
 0x4cb   : > { %5537 = vst.msk [vmem:[#allocation5 + $0x64] sm:$0xf] %vm5511_vm3, %v5466_v56 }
 0x4cc   : > { %5808 = vrot.lane.b32.xlu1 %v5741_v55, %s9532_s10  ;;  %v5897_v55 = vld [vmem:[#allocation3 + $0x6c] sm:$0xf] }
 0x4d0   : > { %5947 = vrot.lane.b32.xlu0 %v5882_v1, %s9534_s12  ;;  %5810 = vrot.lane.b32.xlu2 %v5744_v40, %s9532_s10 }
 0x4d2   : > { %v5462_v60 = vpop.permute.xlu0 %5461  ;;  %v5472_v13 = vpop.permute.xlu2 %5471 }
 0x4d3   : > { %5535 = vst.msk [vmem:[#allocation5 + $0x5c] sm:$0xf] %vm5511_vm3, %v5462_v60  ;;  %v5895_v60 = vld [vmem:[#allocation3 + $0x60] sm:$0xf] }
 0x4d4   : > { %5540 = vst.msk [vmem:[#allocation5 + $0x70] sm:$0xf] %vm5511_vm3, %v5472_v13  ;;  %5814 = vrot.lane.b32.xlu1 %v5751_v41, %s9532_s10  ;;  %v4415_v52 = vpop.f32.mrf.mxu3  ;;  %v5896_v41 = vld [vmem:[#allocation3 + $0x64] sm:$0xf] }
 0x4d5   : > { %v4416_v35 = vadd.f32 %v9517_v26, %v4415_v52 }
 0x4d7   : > { %v4450_v63 = vmax.f32 %v4416_v35, 0.0  ;;  %v6077_v35 = vld [vmem:[#allocation3 + $0x18] sm:$0xf] }
 0x4d8   : > { %5953 = vrot.lane.b32.xlu0 %v5885_v57, %s9534_s12  ;;  %5945 = vrot.lane.b32.xlu2 %v5881_v51, %s9534_s12  ;;  %v6150_v29 = vshll.u32 %v6077_v35, 16 }
 0x4d9   : > { %v4482_v44 = vpack.c.bf16 %v4450_v63, %v4450_v63  ;;  %v6147_v63 = vshrl.u32 %v6077_v35, 16 }
 0x4da   : > { %v5468_v62 = vpop.permute.xlu0 %5467  ;;  %v5478_v11 = vpop.permute.xlu2 %5477 }
 0x4db   : > { %5538 = vst.msk [vmem:[#allocation5 + $0x68] sm:$0xf] %vm5511_vm3, %v5468_v62  ;;  %v4740_v59 = vshrl.u32 %v4482_v44, 16  ;;  %v4743_v10 = vshll.u32 %v4482_v44, 16  ;;  %v5898_v62 = vld [vmem:[#allocation3 + $0x70] sm:$0xf] }
 0x4dc   : > { %5543 = vst.msk [vmem:[#allocation5 + $0x7c] sm:$0xf] %vm5511_vm3, %v5478_v11  ;;  %5949 = vrot.lane.b32.xlu1 %v5883_v61, %s9534_s12  ;;  %v4417_v25 = vpop.f32.mrf.mxu3  ;;  %v5903_v61 = vld [vmem:[#allocation3 + $0x90] sm:$0xf] }
 0x4dd   : > { %v4742_v54 = vrot.slane %v4740_v59, 7  ;;  %v4418_v28 = vadd.f32 %v9517_v26, %v4417_v25  ;;  %v5904_v26 = vld [vmem:[#allocation3 + $0x94] sm:$0xf]  ;;  %v5907_v59 = vld [vmem:[#allocation3 + $0xa8] sm:$0xf]  ;;  %v6149_v25 = vrot.slane %v6147_v63, 4 }
 0x4de   : > { %v5464_v7 = vpop.permute.xlu1 %5463 }
 0x4df   : > { %5536 = vst.msk [vmem:[#allocation5 + $0x60] sm:$0xf] %vm5511_vm3, %v5464_v7  ;;  %v4745_v5 = vor.u32 %v4743_v10, %v4742_v54  ;;  %v4451_v53 = vmax.f32 %v4418_v28, 0.0  ;;  %v4746_v4 = vrot.slane %v4742_v54, 4  ;;  %v5899_v7 = vld [vmem:[#allocation3 + $0x78] sm:$0xf] }
 0x4e0   : > { %5959 = vrot.lane.b32.xlu0 %v5888_v20, %s9534_s12  ;;  %5951 = vrot.lane.b32.xlu2 %v5884_v6, %s9534_s12  ;;  %v6081_v10 = vld [vmem:[#allocation3 + $0x28] sm:$0xf]  ;;  %v6152_v28 = vrot.slane %v6150_v29, 5  ;;  %v6083_v29 = vld [vmem:[#allocation3 + $0x30] sm:$0xf] }
 0x4e1   : > { %v4913_v24 = vsel %vm11375_vm8, %v4745_v5, %v4912_v36  ;;  %v4483_v15 = vpack.c.bf16 %v4451_v53, %v4451_v53 }
 0x4e2   : > { %v5474_v2 = vpop.permute.xlu0 %5473  ;;  %v5757_v8 = vpop.permute.xlu2 %5756  ;;  %4914 = vst [vmem:[#allocation3 + $0xc0] sm:$0xf] %v4913_v24  ;;  %v6180_v24 = vshll.u32 %v6081_v10, 16 }
 0x4e3   : > { %5541 = vst.msk [vmem:[#allocation5 + $0x74] sm:$0xf] %vm5511_vm3, %v5474_v2  ;;  %v4748_v0 = vshrl.u32 %v4483_v15, 16  ;;  %v4751_v31 = vshll.u32 %v4483_v15, 16  ;;  %v5906_v2 = vld [vmem:[#allocation3 + $0xa0] sm:$0xf] }
 0x4e4   : > { %5851 = vst.msk [vmem:[#allocation5 + $0x8] sm:$0xf] %vm5848_vm0, %v5757_v8  ;;  %5955 = vrot.lane.b32.xlu1 %v5886_v33, %s9534_s12  ;;  %v5902_v8 = vld [vmem:[#allocation3 + $0x88] sm:$0xf]  ;;  %v6184_v15 = vshrl.u32 %v6081_v10, 16 }
 0x4e5   : > { %v4750_v45 = vrot.slane %v4748_v0, 7 }
 0x4e6   : > { %v5470_v38 = vpop.permute.xlu1 %5469 }
 0x4e7   : > { %5539 = vst.msk [vmem:[#allocation5 + $0x6c] sm:$0xf] %vm5511_vm3, %v5470_v38  ;;  %v4753_v34 = vor.u32 %v4751_v31, %v4750_v45  ;;  %v4755_v27 = vrot.slane %v4750_v45, 4 }
 0x4e8   : > { %5965 = vrot.lane.b32.xlu0 %v5891_v14, %s9534_s12  ;;  %5957 = vrot.lane.b32.xlu2 %v5887_v42, %s9534_s12  ;;  %v5909_v14 = vld [vmem:[#allocation3 + $0xb4] sm:$0xf]  ;;  %v5905_v42 = vld [vmem:[#allocation3 + $0x9c] sm:$0xf] }
 0x4e9   : > { %v4754_v1 = vsel %vm9643_vm11, %v4746_v4, %v4753_v34  ;;  %v4917_v12 = vsel %vm11316_vm9, %v4755_v27, %v4916_v43  ;;  %v6186_v34 = vrot.slane %v6184_v15, 4  ;;  %v6076_v27 = vld [vmem:[#allocation3 + $0x14] sm:$0x1]  ;;  %vm6602_vm11 = vcmask 322816  }
 0x4ea   : > { %v5753_v37 = vpop.permute.xlu0 %5752  ;;  %v5763_v50 = vpop.permute.xlu2 %5762  ;;  %4915 = vst.msk [vmem:[#allocation3 + $0xc4] sm:$0xf] %vm871_vm4, %v4754_v1  ;;  %v5910_v1 = vld [vmem:[#allocation3 + $0xb8] sm:$0xf]  ;;  %vm6041_vm4 = vcmask 257216  }
 0x4eb   : > { %5849 = vst.msk [vmem:[#allocation5] sm:$0xf] %vm5848_vm0, %v5753_v37  ;;  %v6078_v37 = vld [vmem:[#allocation3 + $0x1c] sm:$0xf] }
 0x4ec   : > { %5854 = vst.msk [vmem:[#allocation5 + $0x14] sm:$0xf] %vm5848_vm0, %v5763_v50  ;;  %5961 = vrot.lane.b32.xlu1 %v5889_v39, %s9534_s12  ;;  %v6074_v50 = vld [vmem:[#allocation3 + $0xc] sm:$0xf]  ;;  %v6075_v39 = vld [vmem:[#allocation3 + $0x10] sm:$0xf] }
 0x4ed   : > { %4918 = vst [vmem:[#allocation3 + $0xc8] sm:$0x1] %v4917_v12  ;;  %v6126_v36 = vshll.u32 %v6074_v50, 16  ;;  %v6132_v5 = vshll.u32 %v6075_v39, 16  ;;  %v6136_v53 = vshrl.u32 %v6075_v39, 16 }
 0x4ee   : > { %v5476_v3 = vpop.permute.xlu1 %5475 }
 0x4ef   : > { %5542 = vst.msk [vmem:[#allocation5 + $0x78] sm:$0xf] %vm5511_vm3, %v5476_v3  ;;  %v6156_v3 = vshll.u32 %v6078_v37, 16  ;;  %v6128_v4 = vrot.slane %v6126_v36, 5  ;;  %v6138_v43 = vrot.slane %v6136_v53, 4 }
 0x4f0   : > { %5971 = vrot.lane.b32.xlu0 %v5894_v48, %s9534_s12  ;;  %5963 = vrot.lane.b32.xlu2 %v5890_v9, %s9534_s12  ;;  %v6123_v9 = vshrl.u32 %v6074_v50, 16 }
 0x4f1   : > { %v5912_v54 = vld [vmem:[#allocation3 + $0xc4] sm:$0xf]  ;;  %v6158_v0 = vrot.slane %v6156_v3, 5 }
 0x4f2   : > { %v5759_v23 = vpop.permute.xlu0 %5758  ;;  %v5769_v19 = vpop.permute.xlu2 %5768  ;;  %v6125_v31 = vrot.slane %v6123_v9, 4 }
 0x4f3   : > { %5852 = vst.msk [vmem:[#allocation5 + $0xc] sm:$0xf] %vm5848_vm0, %v5759_v23  ;;  %v5908_v23 = vld [vmem:[#allocation3 + $0xac] sm:$0xf] }
 0x4f4   : > { %5857 = vst.msk [vmem:[#allocation5 + $0x20] sm:$0xf] %vm5848_vm0, %v5769_v19  ;;  %5967 = vrot.lane.b32.xlu1 %v5892_v17, %s9534_s12  ;;  %v6160_v19 = vshrl.u32 %v6078_v37, 16  ;;  %v6153_v17 = vor.u32 %v6152_v28, %v6149_v25  ;;  %v6084_v37 = vld [vmem:[#allocation3 + $0x34] sm:$0xf]  ;;  %v6198_v28 = vshll.u32 %v6083_v29, 16 }
 0x4f6   : > { %v5755_v56 = vpop.permute.xlu1 %5754  ;;  %v6154_v12 = vrot.slane %v6153_v17, 4 }
 0x4f7   : > { %5850 = vst.msk [vmem:[#allocation5 + $0x4] sm:$0xf] %vm5848_vm0, %v5755_v56 }
 0x4f8   : > { %5977 = vrot.lane.b32.xlu0 %v5897_v55, %s9534_s12  ;;  %5969 = vrot.lane.b32.xlu2 %v5893_v47, %s9534_s12  ;;  %v6134_v55 = vrot.slane %v6132_v5, 5  ;;  %v11909_v47 = vrot.slane %v6180_v24, 5  ;;  %v6208_v5 = vshrl.u32 %v6084_v37, 16 }
 0x4fa   : > { %v5765_v40 = vpop.permute.xlu0 %5764  ;;  %v5775_v21 = vpop.permute.xlu2 %5774 }
 0x4fb   : > { %5855 = vst.msk [vmem:[#allocation5 + $0x18] sm:$0xf] %vm5848_vm0, %v5765_v40  ;;  %v6082_v40 = vld [vmem:[#allocation3 + $0x2c] sm:$0x1] }
 0x4fc   : > { %5860 = vst.msk [vmem:[#allocation5 + $0x2c] sm:$0xf] %vm5848_vm0, %v5775_v21  ;;  %5973 = vrot.lane.b32.xlu1 %v5895_v60, %s9534_s12  ;;  %v6162_v21 = vrot.slane %v6160_v19, 4  ;;  %v6129_v60 = vor.u32 %v6128_v4, %v6125_v31  ;;  %v6200_v4 = vrot.slane %v6198_v28, 5 }
 0x4fe   : > { %v5761_v13 = vpop.permute.xlu1 %5760 }
 0x4ff   : > { %5853 = vst.msk [vmem:[#allocation5 + $0x10] sm:$0xf] %vm5848_vm0, %v5761_v13  ;;  %v6142_v13 = vshll.u32 %v6076_v27, 16 }
 0x500   : > { %5983 = vrot.lane.b32.xlu0 %v5900_v32, %s9534_s12  ;;  %5975 = vrot.lane.b32.xlu2 %v5896_v41, %s9534_s12  ;;  %v6080_v32 = vld [vmem:[#allocation3 + $0x24] sm:$0xf] }
 0x502   : > { %v5771_v57 = vpop.permute.xlu0 %5770  ;;  %v5781_v51 = vpop.permute.xlu2 %5780 }
 0x503   : > { %5858 = vst.msk [vmem:[#allocation5 + $0x24] sm:$0xf] %vm5848_vm0, %v5771_v57  ;;  %v6187_v57 = vor.u32 %v6186_v34, %v11909_v47 }
 0x504   : > { %5863 = vst.msk [vmem:[#allocation5 + $0x38] sm:$0xf] %vm5848_vm0, %v5781_v51  ;;  %5979 = vrot.lane.b32.xlu1 %v5898_v62, %s9534_s12  ;;  %v6190_v51 = vshll.u32 %v6082_v40, 16  ;;  %v6139_v62 = vor.u32 %v6138_v43, %v6134_v55  ;;  %v6085_v43 = vld [vmem:[#allocation3 + $0x38] sm:$0x1] }
 0x506   : > { %v5767_v11 = vpop.permute.xlu1 %5766 }
 0x507   : > { %5856 = vst.msk [vmem:[#allocation5 + $0x1c] sm:$0xf] %vm5848_vm0, %v5767_v11  ;;  %v6086_v11 = vld [vmem:[#allocation3 + $0x3c] sm:$0xf] }
 0x508   : > { %5989 = vrot.lane.b32.xlu0 %v5903_v61, %s9534_s12  ;;  %5981 = vrot.lane.b32.xlu2 %v5899_v7, %s9534_s12  ;;  %v6159_v61 = vsel %vm9663_vm13, %v6154_v12, %v6158_v0  ;;  %v5911_v7 = vld [vmem:[#allocation3 + $0xc0] sm:$0xf] }
 0x50a   : > { %v5777_v20 = vpop.permute.xlu0 %5776  ;;  %v5787_v6 = vpop.permute.xlu2 %5786 }
 0x50b   : > { %5861 = vst.msk [vmem:[#allocation5 + $0x30] sm:$0xf] %vm5848_vm0, %v5777_v20  ;;  %v6079_v20 = vld [vmem:[#allocation3 + $0x20] sm:$0x1] }
 0x50c   : > { %5866 = vst.msk [vmem:[#allocation5 + $0x44] sm:$0xf] %vm5848_vm0, %v5787_v6  ;;  %5985 = vrot.lane.b32.xlu1 %v5901_v30, %s9534_s12  ;;  %v6163_v6 = vor.u32 %v6162_v21, %v6158_v0  ;;  %v6171_v30 = vshrl.u32 %v6080_v32, 16  ;;  %v6166_v63 = vshll.u32 %v6079_v20, 16 }
 0x50e   : > { %v5773_v16 = vpop.permute.xlu1 %5772  ;;  %v6173_v50 = vrot.slane %v6171_v30, 4  ;;  %v6164_v9 = vrot.slane %v6163_v6, 4  ;;  %v6168_v19 = vrot.slane %v6166_v63, 5 }
 0x50f   : > { %5859 = vst.msk [vmem:[#allocation5 + $0x28] sm:$0xf] %vm5848_vm0, %v5773_v16  ;;  %v6174_v16 = vshll.u32 %v6080_v32, 16  ;;  %v6091_v32 = vld [vmem:[#allocation3 + $0x50] sm:$0x1] }
 0x510   : > { %5995 = vrot.lane.b32.xlu0 %v5906_v2, %s9534_s12  ;;  %5987 = vrot.lane.b32.xlu2 %v5902_v8, %s9534_s12  ;;  %v6130_v2 = vrot.slane %v6129_v60, 4  ;;  %v6144_v8 = vrot.slane %v6142_v13, 5  ;;  %v6169_v40 = vsel %vm9663_vm13, %v6164_v9, %v6168_v19  ;;  %v6089_v60 = vld [vmem:[#allocation3 + $0x48] sm:$0xf] }
 0x511   : > { %v6176_v39 = vrot.slane %v6174_v16, 5  ;;  %v6243_v20 = vshrl.u32 %v6089_v60, 16  ;;  %v6246_v6 = vshll.u32 %v6089_v60, 16  ;;  %v6094_v60 = vld [vmem:[#allocation3 + $0x5c] sm:$0x1] }
 0x512   : > { %v5783_v33 = vpop.permute.xlu0 %5782  ;;  %v5793_v52 = vpop.permute.xlu2 %5792 }
 0x513   : > { %5864 = vst.msk [vmem:[#allocation5 + $0x3c] sm:$0xf] %vm5848_vm0, %v5783_v33  ;;  %v6219_v33 = vshrl.u32 %v6086_v11, 16  ;;  %v6177_v17 = vor.u32 %v6176_v39, %v6173_v50 }
 0x514   : > { %5869 = vst.msk [vmem:[#allocation5 + $0x50] sm:$0xf] %vm5848_vm0, %v5793_v52  ;;  %5991 = vrot.lane.b32.xlu1 %v5904_v26, %s9534_s12  ;;  %v6222_v52 = vshll.u32 %v6086_v11, 16 }
 0x515   : > { %v6221_v10 = vrot.slane %v6219_v33, 4  ;;  %v6178_v13 = vrot.slane %v6177_v17, 4 }
 0x516   : > { %v5779_v38 = vpop.permute.xlu1 %5778  ;;  %v6224_v25 = vrot.slane %v6222_v52, 5 }
 0x517   : > { %5862 = vst.msk [vmem:[#allocation5 + $0x34] sm:$0xf] %vm5848_vm0, %v5779_v38  ;;  %v6188_v38 = vrot.slane %v6187_v57, 4  ;;  %v6183_v11 = vsel %vm9663_vm13, %v6178_v13, %v11909_v47 }
 0x518   : > { %6001 = vrot.lane.b32.xlu0 %v5909_v14, %s9534_s12  ;;  %5993 = vrot.lane.b32.xlu2 %v5905_v42, %s9534_s12  ;;  %v6192_v14 = vrot.slane %v6190_v51, 5  ;;  %v6140_v42 = vrot.slane %v6139_v62, 4  ;;  %v6225_v0 = vor.u32 %v6224_v25, %v6221_v10  ;;  %v6214_v51 = vshll.u32 %v6085_v43, 16  ;;  %v6096_v25 = vld [vmem:[#allocation3 + $0x64] sm:$0xf] }
 0x51a   : > { %v5789_v44 = vpop.permute.xlu0 %5788  ;;  %v5799_v18 = vpop.permute.xlu2 %5798  ;;  %v6193_v53 = vsel %vm9663_vm13, %v6188_v38, %v6192_v14  ;;  %v6145_v24 = vsel %vm9663_vm13, %v6140_v42, %v6144_v8  ;;  %v6088_v8 = vld [vmem:[#allocation3 + $0x44] sm:$0x1]  ;;  %v6216_v52 = vrot.slane %v6214_v51, 5  ;;  %v6092_v38 = vld [vmem:[#allocation3 + $0x54] sm:$0xf] }
 0x51b   : > { %5867 = vst.msk [vmem:[#allocation5 + $0x48] sm:$0xf] %vm5848_vm0, %v5789_v44  ;;  %v6135_v44 = vsel %vm9663_vm13, %v6130_v2, %v6134_v55  ;;  %v6262_v2 = vshll.u32 %v6091_v32, 16  ;;  %v6270_v28 = vshll.u32 %v6092_v38, 16 }
 0x51c   : > { %5872 = vst.msk [vmem:[#allocation5 + $0x5c] sm:$0xf] %vm5848_vm0, %v5799_v18  ;;  %5997 = vrot.lane.b32.xlu1 %v5907_v59, %s9534_s12  ;;  %v6087_v18 = vld [vmem:[#allocation3 + $0x40] sm:$0xf]  ;;  %v6090_v59 = vld [vmem:[#allocation3 + $0x4c] sm:$0xf] }
 0x51d   : > { %v6228_v36 = vshll.u32 %v6087_v18, 16  ;;  %v6252_v15 = vshll.u32 %v6090_v59, 16  ;;  %v6232_v34 = vshrl.u32 %v6087_v18, 16  ;;  %v6248_v18 = vrot.slane %v6246_v6, 5 }
 0x51e   : > { %v5785_v48 = vpop.permute.xlu1 %5784 }
 0x51f   : > { %5865 = vst.msk [vmem:[#allocation5 + $0x40] sm:$0xf] %vm5848_vm0, %v5785_v48  ;;  %v6204_v48 = vshll.u32 %v6084_v37, 16  ;;  %v11932_v55 = vrot.slane %v6228_v36, 5  ;;  %v11937_v21 = vrot.slane %v6252_v15, 5  ;;  %v6234_v33 = vrot.slane %v6232_v34, 4 }
 0x520   : > { %6007 = vrot.lane.b32.xlu0 %v5912_v54, %s9534_s12  ;;  %5999 = vrot.lane.b32.xlu2 %v5908_v23, %s9534_s12  ;;  %v6195_v54 = vshrl.u32 %v6083_v29, 16  ;;  %v6256_v23 = vshrl.u32 %v6090_v59, 16  ;;  %v6238_v29 = vshll.u32 %v6088_v8, 16  ;;  %v6093_v37 = vld [vmem:[#allocation3 + $0x58] sm:$0xf]  ;;  %v6264_v59 = vrot.slane %v6262_v2, 5 }
 0x521   : > { %v6206_v27 = vrot.slane %v6204_v48, 5  ;;  %v6235_v10 = vor.u32 %v6234_v33, %v11932_v55  ;;  %v6276_v48 = vshll.u32 %v6093_v37, 16  ;;  %v6300_v15 = vshll.u32 %v6096_v25, 16 }
 0x522   : > { %v5795_v45 = vpop.permute.xlu0 %5794  ;;  %v5805_v56 = vpop.permute.xlu2 %5804  ;;  %v6197_v31 = vrot.slane %v6195_v54, 4  ;;  %v6258_v12 = vrot.slane %v6256_v23, 4  ;;  %v6267_v54 = vshrl.u32 %v6092_v38, 16 }
 0x523   : > { %5870 = vst.msk [vmem:[#allocation5 + $0x54] sm:$0xf] %vm5848_vm0, %v5795_v45  ;;  %v6236_v19 = vrot.slane %v6235_v10, 4  ;;  %v6278_v34 = vrot.slane %v6276_v48, 5 }
 0x524   : > { %5875 = vst.msk [vmem:[#allocation5 + $0x68] sm:$0xf] %vm5848_vm0, %v5805_v56  ;;  %6003 = vrot.lane.b32.xlu1 %v5910_v1, %s9534_s12  ;;  %v6210_v1 = vrot.slane %v6208_v5, 4  ;;  %v6201_v57 = vor.u32 %v6200_v4, %v6197_v31  ;;  %v6259_v16 = vor.u32 %v6258_v12, %v11937_v21  ;;  %v6280_v5 = vshrl.u32 %v6093_v37, 16 }
 0x525   : > { %v6240_v31 = vrot.slane %v6238_v29, 5  ;;  %v6269_v4 = vrot.slane %v6267_v54, 4  ;;  %v6304_v12 = vshrl.u32 %v6096_v25, 16 }
 0x526   : > { %v5791_v41 = vpop.permute.xlu1 %5790  ;;  %v6202_v47 = vrot.slane %v6201_v57, 4  ;;  %v6260_v39 = vrot.slane %v6259_v16, 4  ;;  %v6098_v57 = vld [vmem:[#allocation3 + $0x6c] sm:$0xf]  ;;  %v6104_v16 = vld [vmem:[#allocation3 + $0x84] sm:$0xf] }
 0x527   : > { %5868 = vst.msk [vmem:[#allocation5 + $0x4c] sm:$0xf] %vm5848_vm0, %v5791_v41  ;;  %v6226_v41 = vrot.slane %v6225_v0, 4  ;;  %v6241_v13 = vsel %vm9663_vm13, %v6236_v19, %v6240_v31  ;;  %v6315_v2 = vshrl.u32 %v6098_v57, 16  ;;  %v6318_v8 = vshll.u32 %v6098_v57, 16 }
 0x528   : > { %6510 = vrot.lane.b32.xlu0 %v6159_v61, %s9536_s14  ;;  %6005 = vrot.lane.b32.xlu2 %v5911_v7, %s9534_s12  ;;  %v6211_v61 = vor.u32 %v6210_v1, %v6206_v27  ;;  %v6095_v7 = vld [vmem:[#allocation3 + $0x60] sm:$0xf]  ;;  %v6207_v50 = vsel %vm9663_vm13, %v6202_v47, %v6206_v27  ;;  %v6265_v23 = vsel %vm9663_vm13, %v6260_v39, %v6264_v59  ;;  %v6282_v27 = vrot.slane %v6280_v5, 4 }
 0x529   : > { %v6231_v30 = vsel %vm9663_vm13, %v6226_v41, %v11932_v55  ;;  %v6366_v29 = vshll.u32 %v6104_v16, 16  ;;  %v6317_v39 = vrot.slane %v6315_v2, 4  ;;  %v6320_v59 = vrot.slane %v6318_v8, 5  ;;  %v6109_v2 = vld [vmem:[#allocation3 + $0x98] sm:$0x1] }
 0x52a   : > { %v5801_v26 = vpop.permute.xlu0 %5800  ;;  %v5811_v35 = vpop.permute.xlu2 %5810  ;;  %v6212_v63 = vrot.slane %v6211_v61, 4 }
 0x52b   : > { %5873 = vst.msk [vmem:[#allocation5 + $0x60] sm:$0xf] %vm5848_vm0, %v5801_v26  ;;  %v6291_v26 = vshrl.u32 %v6095_v7, 16  ;;  %v6368_v48 = vrot.slane %v6366_v29, 5 }
 0x52c   : > { %5878 = vst.msk [vmem:[#allocation5 + $0x74] sm:$0xf] %vm5848_vm0, %v5811_v35  ;;  %6506 = vrot.lane.b32.xlu1 %v6135_v44, %s9536_s14  ;;  %v6294_v35 = vshll.u32 %v6095_v7, 16  ;;  %v6245_v44 = vrot.slane %v6243_v20, 4  ;;  %v6283_v7 = vor.u32 %v6282_v27, %v6278_v34  ;;  %v6286_v20 = vshll.u32 %v6094_v60, 16 }
 0x52d   : > { %v6293_v9 = vrot.slane %v6291_v26, 4 }
 0x52e   : > { %v5797_v3 = vpop.permute.xlu1 %5796  ;;  %v6296_v36 = vrot.slane %v6294_v35, 5  ;;  %v6249_v55 = vor.u32 %v6248_v18, %v6245_v44  ;;  %v6097_v35 = vld [vmem:[#allocation3 + $0x68] sm:$0x1] }
 0x52f   : > { %5871 = vst.msk [vmem:[#allocation5 + $0x58] sm:$0xf] %vm5848_vm0, %v5797_v3  ;;  %v6099_v3 = vld [vmem:[#allocation3 + $0x70] sm:$0xf] }
 0x530   : > { %6516 = vrot.lane.b32.xlu0 %v6193_v53, %s9536_s14  ;;  %6508 = vrot.lane.b32.xlu2 %v6145_v24, %s9536_s14  ;;  %v6217_v24 = vsel %vm9663_vm13, %v6212_v63, %v6216_v52  ;;  %v6324_v17 = vshll.u32 %v6099_v3, 16  ;;  %v6328_v0 = vshrl.u32 %v6099_v3, 16  ;;  %v6250_v61 = vrot.slane %v6249_v55, 4  ;;  %v6105_v3 = vld [vmem:[#allocation3 + $0x88] sm:$0xf] }
 0x531   : > { %v6363_v63 = vshrl.u32 %v6104_v16, 16  ;;  %v6372_v31 = vshll.u32 %v6105_v3, 16  ;;  %v6321_v55 = vor.u32 %v6320_v59, %v6317_v39  ;;  %v6106_v39 = vld [vmem:[#allocation3 + $0x8c] sm:$0x1] }
 0x532   : > { %v5807_v45 = vpop.permute.xlu0 %5806  ;;  %v5946_v56 = vpop.permute.xlu2 %5945  ;;  %v11967_v32 = vrot.slane %v6324_v17, 5  ;;  %v6330_v41 = vrot.slane %v6328_v0, 4  ;;  %v6255_v47 = vsel %vm9663_vm13, %v6250_v61, %v11937_v21  ;;  %v6101_v21 = vld [vmem:[#allocation3 + $0x78] sm:$0xf] }
 0x533   : > { %5876 = vst.msk [vmem:[#allocation5 + $0x6c] sm:$0xf] %vm5848_vm0, %v5807_v45  ;;  %v6272_v45 = vrot.slane %v6270_v28, 5  ;;  %v6102_v28 = vld [vmem:[#allocation3 + $0x7c] sm:$0xf]  ;;  %v6339_v5 = vshrl.u32 %v6101_v21, 16 }
 0x534   : > { %6042 = vst.msk [vmem:[#allocation5] sm:$0xf] %vm6041_vm4, %v5946_v56  ;;  %6512 = vrot.lane.b32.xlu1 %v6169_v40, %s9536_s14  ;;  %v6297_v56 = vor.u32 %v6296_v36, %v6293_v9  ;;  %v6302_v40 = vrot.slane %v6300_v15, 5  ;;  %v6331_v52 = vor.u32 %v6330_v41, %v11967_v32  ;;  %v6108_v9 = vld [vmem:[#allocation3 + $0x94] sm:$0xf]  ;;  %v6365_v36 = vrot.slane %v6363_v63, 4 }
 0x535   : > { %v6273_v51 = vor.u32 %v6272_v45, %v6269_v4  ;;  %v6348_v19 = vshll.u32 %v6102_v28, 16  ;;  %v6352_v17 = vshrl.u32 %v6102_v28, 16  ;;  %v6396_v4 = vshll.u32 %v6108_v9, 16  ;;  %v6113_v41 = vld [vmem:[#allocation3 + $0xa8] sm:$0xf] }
 0x536   : > { %v5803_v62 = vpop.permute.xlu1 %5802  ;;  %v6332_v25 = vrot.slane %v6331_v52, 4  ;;  %v6400_v45 = vshrl.u32 %v6108_v9, 16  ;;  %v6341_v27 = vrot.slane %v6339_v5, 4  ;;  %v6374_v57 = vrot.slane %v6372_v31, 5 }
 0x537   : > { %5874 = vst.msk [vmem:[#allocation5 + $0x64] sm:$0xf] %vm5848_vm0, %v5803_v62  ;;  %v6100_v62 = vld [vmem:[#allocation3 + $0x74] sm:$0x1]  ;;  %v6274_v38 = vrot.slane %v6273_v51, 4  ;;  %v6350_v60 = vrot.slane %v6348_v19, 5 }
 0x538   : > { %6522 = vrot.lane.b32.xlu0 %v6231_v30, %s9536_s14  ;;  %6514 = vrot.lane.b32.xlu2 %v6183_v11, %s9536_s14  ;;  %v6298_v11 = vrot.slane %v6297_v56, 4  ;;  %v6306_v30 = vrot.slane %v6304_v12, 4  ;;  %v6334_v26 = vshll.u32 %v6100_v62, 16  ;;  %v6376_v51 = vshrl.u32 %v6105_v3, 16 }
 0x539   : > { %v6279_v10 = vsel %vm9663_vm13, %v6274_v38, %v6278_v34  ;;  %v6369_v34 = vor.u32 %v6368_v48, %v6365_v36  ;;  %v11995_v62 = vrot.slane %v6396_v4, 5  ;;  %v6322_v61 = vrot.slane %v6321_v55, 4  ;;  %v6117_v36 = vld [vmem:[#allocation3 + $0xb8] sm:$0xf] }
 0x53a   : > { %v5813_v14 = vpop.permute.xlu0 %5812  ;;  %v5952_v42 = vpop.permute.xlu2 %5951  ;;  %v6303_v33 = vsel %vm9663_vm13, %v6298_v11, %v6302_v40  ;;  %v6307_v37 = vor.u32 %v6306_v30, %v6302_v40  ;;  %v6336_v54 = vrot.slane %v6334_v26, 5  ;;  %v6402_v11 = vrot.slane %v6400_v45, 4 }
 0x53b   : > { %5879 = vst.msk [vmem:[#allocation5 + $0x78] sm:$0xf] %vm5848_vm0, %v5813_v14  ;;  %v6284_v14 = vrot.slane %v6283_v7, 4  ;;  %v6370_v7 = vrot.slane %v6369_v34, 4  ;;  %v6327_v16 = vsel %vm9663_vm13, %v6322_v61, %v11967_v32  ;;  %v6435_v8 = vshrl.u32 %v6113_v41, 16 }
 0x53c   : > { %6045 = vst.msk [vmem:[#allocation5 + $0xc] sm:$0xf] %vm6041_vm4, %v5952_v42  ;;  %6518 = vrot.lane.b32.xlu1 %v6207_v50, %s9536_s14  ;;  %v6288_v42 = vrot.slane %v6286_v20, 5  ;;  %v6310_v50 = vshll.u32 %v6097_v35, 16  ;;  %v6337_v0 = vsel %vm9663_vm13, %v6332_v25, %v6336_v54  ;;  %v6403_v26 = vor.u32 %v6402_v11, %v11995_v62 }
 0x53d   : > { %v6375_v52 = vsel %vm9663_vm13, %v6370_v7, %v6374_v57  ;;  %v6378_v38 = vrot.slane %v6376_v51, 4  ;;  %v6406_v63 = vshll.u32 %v6109_v2, 16  ;;  %v6437_v59 = vrot.slane %v6435_v8, 4  ;;  %v6116_v2 = vld [vmem:[#allocation3 + $0xb4] sm:$0xf] }
 0x53e   : > { %v5809_v53 = vpop.permute.xlu1 %5808  ;;  %v6289_v15 = vsel %vm9663_vm13, %v6284_v14, %v6288_v42  ;;  %v6312_v56 = vrot.slane %v6310_v50, 5  ;;  %v6110_v14 = vld [vmem:[#allocation3 + $0x9c] sm:$0xf]  ;;  %v6404_v28 = vrot.slane %v6403_v26, 4  ;;  %v6468_v45 = vshll.u32 %v6117_v36, 16 }
 0x53f   : > { %5877 = vst.msk [vmem:[#allocation5 + $0x70] sm:$0xf] %vm5848_vm0, %v5809_v53  ;;  %v6342_v53 = vshll.u32 %v6101_v21, 16  ;;  %v6414_v25 = vshll.u32 %v6110_v14, 16  ;;  %v6379_v9 = vor.u32 %v6378_v38, %v6374_v57  ;;  %v6112_v57 = vld [vmem:[#allocation3 + $0xa4] sm:$0x1] }
 0x540   : > { %6528 = vrot.lane.b32.xlu0 %v6265_v23, %s9536_s14  ;;  %6520 = vrot.lane.b32.xlu2 %v6217_v24, %s9536_s14  ;;  %v6308_v23 = vrot.slane %v6307_v37, 4  ;;  %v12020_v7 = vrot.slane %v6468_v45, 5  ;;  %v6430_v8 = vshll.u32 %v6112_v57, 16 }
 0x542   : > { %v5948_v43 = vpop.permute.xlu0 %5947  ;;  %v5958_v1 = vpop.permute.xlu2 %5957  ;;  %v6313_v12 = vsel %vm9663_vm13, %v6308_v23, %v6312_v56  ;;  %v6472_v56 = vshrl.u32 %v6117_v36, 16 }
 0x543   : > { %6043 = vst.msk [vmem:[#allocation5 + $0x4] sm:$0xf] %vm6041_vm4, %v5948_v43  ;;  %v6344_v43 = vrot.slane %v6342_v53, 5 }
 0x544   : > { %6048 = vst.msk [vmem:[#allocation5 + $0x18] sm:$0xf] %vm6041_vm4, %v5958_v1  ;;  %6524 = vrot.lane.b32.xlu1 %v6241_v13, %s9536_s14  ;;  %v6354_v13 = vrot.slane %v6352_v17, 4 }
 0x545   : > { %v6345_v20 = vor.u32 %v6344_v43, %v6341_v27  ;;  %v6380_v27 = vrot.slane %v6379_v9, 4  ;;  %v6416_v43 = vrot.slane %v6414_v25, 5 }
 0x546   : > { %v5815_v6 = vpop.permute.xlu1 %5814  ;;  %v6355_v35 = vor.u32 %v6354_v13, %v6350_v60 }
 0x547   : > { %5880 = vst.msk [vmem:[#allocation5 + $0x7c] sm:$0xf] %vm5848_vm0, %v5815_v6  ;;  %v6103_v6 = vld [vmem:[#allocation3 + $0x80] sm:$0x1]  ;;  %v6346_v32 = vrot.slane %v6345_v20, 4  ;;  %v6474_v20 = vrot.slane %v6472_v56, 4 }
 0x548   : > { %6534 = vrot.lane.b32.xlu0 %v6303_v33, %s9536_s14  ;;  %6526 = vrot.lane.b32.xlu2 %v6255_v47, %s9536_s14  ;;  %v6438_v33 = vshll.u32 %v6113_v41, 16  ;;  %v6107_v47 = vld [vmem:[#allocation3 + $0x90] sm:$0xf]  ;;  %v6358_v42 = vshll.u32 %v6103_v6, 16  ;;  %v6356_v3 = vrot.slane %v6355_v35, 4 }
 0x549   : > { %v6387_v29 = vshrl.u32 %v6107_v47, 16  ;;  %v6351_v54 = vsel %vm9663_vm13, %v6346_v32, %v6350_v60  ;;  %v6475_v38 = vor.u32 %v6474_v20, %v12020_v7  ;;  %v6459_v32 = vshrl.u32 %v6116_v2, 16 }
 0x54a   : > { %v5954_v44 = vpop.permute.xlu0 %5953  ;;  %v5964_v18 = vpop.permute.xlu2 %5963  ;;  %v6440_v21 = vrot.slane %v6438_v33, 5  ;;  %v6360_v48 = vrot.slane %v6358_v42, 5  ;;  %v6115_v42 = vld [vmem:[#allocation3 + $0xb0] sm:$0x1] }
 0x54b   : > { %6046 = vst.msk [vmem:[#allocation5 + $0x10] sm:$0xf] %vm6041_vm4, %v5954_v44  ;;  %v6390_v44 = vshll.u32 %v6107_v47, 16  ;;  %v6389_v23 = vrot.slane %v6387_v29, 4 }
 0x54c   : > { %6051 = vst.msk [vmem:[#allocation5 + $0x24] sm:$0xf] %vm6041_vm4, %v5964_v18  ;;  %6530 = vrot.lane.b32.xlu1 %v6279_v10, %s9536_s14  ;;  %v6111_v18 = vld [vmem:[#allocation3 + $0xa0] sm:$0xf]  ;;  %v6411_v10 = vshrl.u32 %v6110_v14, 16  ;;  %v6441_v31 = vor.u32 %v6440_v21, %v6437_v59  ;;  %v6361_v34 = vsel %vm9663_vm13, %v6356_v3, %v6360_v48  ;;  %v6454_v21 = vshll.u32 %v6115_v42, 16 }
 0x54d   : > { %v6420_v5 = vshll.u32 %v6111_v18, 16  ;;  %v6424_v53 = vshrl.u32 %v6111_v18, 16  ;;  %v6392_v19 = vrot.slane %v6390_v44, 5  ;;  %v6461_v3 = vrot.slane %v6459_v32, 4 }
 0x54e   : > { %v5950_v24 = vpop.permute.xlu1 %5949  ;;  %v6413_v4 = vrot.slane %v6411_v10, 4  ;;  %v6442_v61 = vrot.slane %v6441_v31, 4 }
 0x54f   : > { %6044 = vst.msk [vmem:[#allocation5 + $0x8] sm:$0xf] %vm6041_vm4, %v5950_v24  ;;  %v6408_v24 = vrot.slane %v6406_v63, 5  ;;  %v6393_v41 = vor.u32 %v6392_v19, %v6389_v23  ;;  %v6462_v63 = vshll.u32 %v6116_v2, 16  ;;  %v6456_v19 = vrot.slane %v6454_v21, 5 }
 0x550   : > { %6540 = vrot.lane.b32.xlu0 %v6337_v0, %s9536_s14  ;;  %6532 = vrot.lane.b32.xlu2 %v6289_v15, %s9536_s14  ;;  %v6382_v15 = vshll.u32 %v6106_v39, 16  ;;  %v6114_v0 = vld [vmem:[#allocation3 + $0xac] sm:$0xf]  ;;  %v6432_v39 = vrot.slane %v6430_v8, 5  ;;  %v6640_v8 = vld [vmem:[#allocation3 + $0x20] sm:$0x1] }
 0x551   : > { %v6409_v55 = vsel %vm9663_vm13, %v6404_v28, %v6408_v24  ;;  %v6444_v60 = vshll.u32 %v6114_v0, 16  ;;  %v6448_v13 = vshrl.u32 %v6114_v0, 16  ;;  %v6394_v47 = vrot.slane %v6393_v41, 4  ;;  %v6638_v21 = vld [vmem:[#allocation3 + $0x18] sm:$0xe] }
 0x552   : > { %v5960_v1 = vpop.permute.xlu0 %5959  ;;  %v5970_v40 = vpop.permute.xlu2 %5969  ;;  %v6464_v9 = vrot.slane %v6462_v63, 5  ;;  %v6637_v63 = vld [vmem:[#allocation3 + $0x14] sm:$0x1] }
 0x553   : > { %6049 = vst.msk [vmem:[#allocation5 + $0x1c] sm:$0xf] %vm6041_vm4, %v5960_v1  ;;  %v6422_v1 = vrot.slane %v6420_v5, 5  ;;  %v6446_v33 = vrot.slane %v6444_v60, 5  ;;  %v6450_v26 = vrot.slane %v6448_v13, 4  ;;  %v6399_v44 = vsel %vm9663_vm13, %v6394_v47, %v11995_v62 }
 0x554   : > { %6054 = vst.msk [vmem:[#allocation5 + $0x30] sm:$0xf] %vm6041_vm4, %v5970_v40  ;;  %6536 = vrot.lane.b32.xlu1 %v6313_v12, %s9536_s14  ;;  %v6426_v40 = vrot.slane %v6424_v53, 4  ;;  %v6384_v12 = vrot.slane %v6382_v15, 5  ;;  %v6120_v5 = vld [vmem:[#allocation3 + $0xc4] sm:$0xf]  ;;  %v6465_v0 = vor.u32 %v6464_v9, %v6461_v3 }
 0x555   : > { %v6447_v29 = vsel %vm9663_vm13, %v6442_v61, %v6446_v33  ;;  %v6451_v59 = vor.u32 %v6450_v26, %v6446_v33  ;;  %v6492_v45 = vshll.u32 %v6120_v5, 16  ;;  %v6496_v56 = vshrl.u32 %v6120_v5, 16  ;;  %v6641_v9 = vld [vmem:[#allocation3 + $0x24] sm:$0xe]  ;;  %v6973_v5 = vld [vmem:[#allocation3 + $0x18] sm:$0xf] }
 0x556   : > { %v5956_v30 = vpop.permute.xlu1 %5955  ;;  %v6385_v6 = vsel %vm9663_vm13, %v6380_v27, %v6384_v12  ;;  %v6466_v12 = vrot.slane %v6465_v0, 4  ;;  %v9298_v3 = vrot.slane %v6638_v21, 9 }
 0x557   : > { %6047 = vst.msk [vmem:[#allocation5 + $0x14] sm:$0xf] %vm6041_vm4, %v5956_v30  ;;  %v6417_v30 = vor.u32 %v6416_v43, %v6413_v4  ;;  %v6452_v23 = vrot.slane %v6451_v59, 4  ;;  %v6494_v13 = vrot.slane %v6492_v45, 5  ;;  %v6498_v41 = vrot.slane %v6496_v56, 4 }
 0x558   : > { %6546 = vrot.lane.b32.xlu0 %v6375_v52, %s9536_s14  ;;  %6538 = vrot.lane.b32.xlu2 %v6327_v16, %s9536_s14  ;;  %v6118_v16 = vld [vmem:[#allocation3 + $0xbc] sm:$0x1]  ;;  %v6427_v52 = vor.u32 %v6426_v40, %v6422_v1  ;;  %v6643_v45 = vld [vmem:[#allocation3 + $0x2c] sm:$0x1] }
 0x559   : > { %v6478_v14 = vshll.u32 %v6118_v16, 16  ;;  %v6418_v18 = vrot.slane %v6417_v30, 4  ;;  %v6457_v43 = vsel %vm9663_vm13, %v6452_v23, %v6456_v19  ;;  %v12050_v40 = vld [vmem:[#allocation3 + $0x1c] sm:$0xf]  ;;  %v6499_v16 = vor.u32 %v6498_v41, %v6494_v13 }
 0x55a   : > { %v5966_v37 = vpop.permute.xlu0 %5965  ;;  %v5976_v50 = vpop.permute.xlu2 %5975  ;;  %v6740_v20 = vrot.slane %v12050_v40, 5  ;;  %v9299_v23 = vrot.slane %v6641_v9, 9 }
 0x55b   : > { %6052 = vst.msk [vmem:[#allocation5 + $0x28] sm:$0xf] %vm6041_vm4, %v5966_v37  ;;  %v6119_v37 = vld [vmem:[#allocation3 + $0xc0] sm:$0xf]  ;;  %v6480_v28 = vrot.slane %v6478_v14, 5  ;;  %v6423_v62 = vsel %vm9663_vm13, %v6418_v18, %v6422_v1 }
 0x55c   : > { %6057 = vst.msk [vmem:[#allocation5 + $0x3c] sm:$0xf] %vm6041_vm4, %v5976_v50  ;;  %6542 = vrot.lane.b32.xlu1 %v6351_v54, %s9536_s14  ;;  %v6428_v50 = vrot.slane %v6427_v52, 4  ;;  %v6476_v54 = vrot.slane %v6475_v38, 4  ;;  %v6483_v36 = vshrl.u32 %v6119_v37, 16  ;;  %v6486_v48 = vshll.u32 %v6119_v37, 16 }
 0x55d   : > { %v6742_v52 = vrot.slane %v6740_v20, 4  ;;  %v7167_v14 = vld [vmem:[#allocation3 + $0x1c] sm:$0xf] }
 0x55e   : > { %v5962_v17 = vpop.permute.xlu1 %5961  ;;  %v6433_v53 = vsel %vm9663_vm13, %v6428_v50, %v6432_v39  ;;  %v6481_v15 = vsel %vm9663_vm13, %v6476_v54, %v6480_v28  ;;  %v6485_v31 = vrot.slane %v6483_v36, 4  ;;  %v6488_v4 = vrot.slane %v6486_v48, 5  ;;  %v6642_v28 = vld [vmem:[#allocation3 + $0x28] sm:$0xf]  ;;  %v7168_v36 = vld [vmem:[#allocation3 + $0x20] sm:$0x1] }
 0x55f   : > { %6050 = vst.msk [vmem:[#allocation5 + $0x20] sm:$0xf] %vm6041_vm4, %v5962_v17  ;;  %v6636_v17 = vld [vmem:[#allocation3 + $0x10] sm:$0xf]  ;;  %v7224_v18 = vshll.u32 %v7167_v14, 16  ;;  %v7228_v37 = vshrl.u32 %v7167_v14, 16 }
 0x560   : > { %6552 = vrot.lane.b32.xlu0 %v6409_v55, %s9536_s14  ;;  %6544 = vrot.lane.b32.xlu2 %v6361_v34, %s9536_s14  ;;  %v6635_v55 = vld [vmem:[#allocation3 + $0xc] sm:$0xe]  ;;  %v6733_v1 = vrot.slane %v6636_v17, 5  ;;  %v6489_v60 = vor.u32 %v6488_v4, %v6485_v31  ;;  %v6736_v50 = vrot.slane %v6637_v63, 5  ;;  %v7166_v48 = vld [vmem:[#allocation3 + $0x18] sm:$0xf] }
 0x561   : > { %v9297_v57 = vrot.slane %v6635_v55, 9  ;;  %v7230_v54 = vrot.slane %v7228_v37, 4  ;;  %v7234_v19 = vshll.u32 %v7168_v36, 16  ;;  %v7215_v17 = vshrl.u32 %v7166_v48, 16 }
 0x562   : > { %v5972_v51 = vpop.permute.xlu0 %5971  ;;  %v5982_v11 = vpop.permute.xlu2 %5981  ;;  %v6490_v30 = vrot.slane %v6489_v60, 4  ;;  %v7218_v0 = vshll.u32 %v7166_v48, 16  ;;  %v7173_v48 = vld [vmem:[#allocation3 + $0x34] sm:$0xf] }
 0x563   : > { %6055 = vst.msk [vmem:[#allocation5 + $0x34] sm:$0xf] %vm6041_vm4, %v5972_v51  ;;  %v6121_v51 = vld [vmem:[#allocation3 + $0xc8] sm:$0x1]  ;;  %v6734_v61 = vsel %vm10065_vm1, %v9297_v57, %v6733_v1  ;;  %v7217_v40 = vrot.slane %v7215_v17, 4 }
 0x564   : > { %6060 = vst.msk [vmem:[#allocation5 + $0x48] sm:$0xf] %vm6041_vm4, %v5982_v11  ;;  %6548 = vrot.lane.b32.xlu1 %v6385_v6, %s9536_s14  ;;  %v6471_v6 = vsel %vm9663_vm13, %v6466_v12, %v12020_v7  ;;  %v6502_v2 = vshll.u32 %v6121_v51, 16  ;;  %v6495_v26 = vsel %vm9663_vm13, %v6490_v30, %v6494_v13  ;;  %v6743_v7 = vrot.slane %v6640_v8, 5  ;;  %v7727_v30 = vld [vmem:[#allocation3 + $0x18] sm:$0xe] }
 0x565   : > { %v7220_v12 = vrot.slane %v7218_v0, 5  ;;  %v7728_v8 = vld [vmem:[#allocation3 + $0x1c] sm:$0xf]  ;;  %v9313_v14 = vrot.slane %v7727_v30, 9 }
 0x566   : > { %v5968_v35 = vpop.permute.xlu1 %5967  ;;  %v6504_v38 = vrot.slane %v6502_v2, 5  ;;  %v6744_v32 = vsel %vm10065_vm1, %v6742_v52, %v6743_v7  ;;  %v8790_v52 = vld [vmem:[%s13023_s5] sm:$0x3]  ;;  %v6975_v7 = vld [vmem:[#allocation3 + $0x24] sm:$0xf] }
 0x567   : > { %6053 = vst.msk [vmem:[#allocation5 + $0x2c] sm:$0xf] %vm6041_vm4, %v5968_v35  ;;  %v6500_v35 = vrot.slane %v6499_v16, 4 }
 0x568   : > { %6558 = vrot.lane.b32.xlu0 %v6447_v29, %s9536_s14  ;;  %6550 = vrot.lane.b32.xlu2 %v6399_v44, %s9536_s14  ;;  %v6735_v44 = vrot.slane %v6733_v1, 4  ;;  %v6750_v1 = vrot.slane %v6643_v45, 5 }
 0x569   : > { %v6505_v29 = vsel %vm9663_vm13, %v6500_v35, %v6504_v38  ;;  %v12110_v35 = vsel %vm4327_vm14, %v8790_v52, 0  ;;  %vm7694_vm14 = vcmask 519616  }
 0x56a   : > { %v5978_v10 = vpop.permute.xlu0 %5977  ;;  %v5988_v25 = vpop.permute.xlu2 %5987  ;;  %8902 = vmatpush.bf16.msra.mxu2 %v12110_v35 }
 0x56b   : > { %6058 = vst.msk [vmem:[#allocation5 + $0x40] sm:$0xf] %vm6041_vm4, %v5978_v10  ;;  %v6737_v10 = vsel %vm10065_vm1, %v6735_v44, %v6736_v50  ;;  %v7729_v44 = vld [vmem:[#allocation3 + $0x20] sm:$0x1]  ;;  %v8358_v50 = vld [vmem:[#allocation2 + $0xc] sm:$0xf] }
 0x56c   : > { %6063 = vst.msk [vmem:[#allocation5 + $0x54] sm:$0xf] %vm6041_vm4, %v5988_v25  ;;  %6554 = vrot.lane.b32.xlu1 %v6423_v62, %s9536_s14  ;;  %v12079_v25 = vrot.slane %v7224_v18, 5  ;;  %v8407_v21 = vshrl.u32 %v8358_v50, 16  ;;  %v7828_v17 = vrot.slane %v7729_v44, 5 }
 0x56e   : > { %v5974_v24 = vpop.permute.xlu1 %5973 }
 0x56f   : > { %6056 = vst.msk [vmem:[#allocation5 + $0x38] sm:$0xf] %vm6041_vm4, %v5974_v24  ;;  %v6747_v24 = vrot.slane %v6642_v28, 5 }
 0x570   : > { %6564 = vrot.lane.b32.xlu0 %v6481_v15, %s9536_s14  ;;  %6556 = vrot.lane.b32.xlu2 %v6433_v53, %s9536_s14  ;;  %v6741_v53 = vsel %vm10065_vm1, %v9298_v3, %v6740_v20  ;;  %v7231_v15 = vor.u32 %v7230_v54, %v12079_v25 }
 0x571   : > { %v6748_v56 = vsel %vm10065_vm1, %v9299_v23, %v6747_v24 }
 0x572   : > { %v5984_v34 = vpop.permute.xlu0 %5983  ;;  %v5994_v27 = vpop.permute.xlu2 %5993  ;;  %v7232_v55 = vrot.slane %v7231_v15, 4 }
 0x573   : > { %6061 = vst.msk [vmem:[#allocation5 + $0x4c] sm:$0xf] %vm6041_vm4, %v5984_v34  ;;  %v6749_v34 = vrot.slane %v6747_v24, 4 }
 0x574   : > { %6066 = vst.msk [vmem:[#allocation5 + $0x60] sm:$0xf] %vm6041_vm4, %v5994_v27  ;;  %6560 = vrot.lane.b32.xlu1 %v6457_v43, %s9536_s14  ;;  %v7170_v27 = vld [vmem:[#allocation3 + $0x28] sm:$0xf]  ;;  %v7236_v43 = vrot.slane %v7234_v19, 5 }
 0x575   : > { %v7248_v13 = vshll.u32 %v7170_v27, 16  ;;  %v7252_v41 = vshrl.u32 %v7170_v27, 16  ;;  %v6751_v51 = vsel %vm10065_vm1, %v6749_v34, %v6750_v1  ;;  %v7272_v34 = vshll.u32 %v7173_v48, 16 }
 0x576   : > { %v5980_v11 = vpop.permute.xlu1 %5979  ;;  %v7237_v57 = vsel %vm9663_vm13, %v7232_v55, %v7236_v43  ;;  %v7276_v27 = vshrl.u32 %v7173_v48, 16 }
 0x577   : > { %6059 = vst.msk [vmem:[#allocation5 + $0x44] sm:$0xf] %vm6041_vm4, %v5980_v11  ;;  %v7221_v11 = vor.u32 %v7220_v12, %v7217_v40  ;;  %v12101_v16 = vrot.slane %v7248_v13, 5  ;;  %v7254_v2 = vrot.slane %v7252_v41, 4 }
 0x578   : > { %6843 = vrot.lane.b32.xlu0 %v6734_v61, %s9537_s29  ;;  %6562 = vrot.lane.b32.xlu2 %v6471_v6, %s9536_s14  ;;  %v6974_v6 = vld [vmem:[#allocation3 + $0x1c] sm:$0xf] }
 0x57a   : > { %v5990_v33 = vpop.permute.xlu0 %5989  ;;  %v6000_v47 = vpop.permute.xlu2 %5999 }
 0x57b   : > { %6064 = vst.msk [vmem:[#allocation5 + $0x58] sm:$0xf] %vm6041_vm4, %v5990_v33  ;;  %v7171_v33 = vld [vmem:[#allocation3 + $0x2c] sm:$0x1] }
 0x57c   : > { %6069 = vst.msk [vmem:[#allocation5 + $0x6c] sm:$0xf] %vm6041_vm4, %v6000_v47  ;;  %6566 = vrot.lane.b32.xlu1 %v6495_v26, %s9536_s14  ;;  %v7169_v47 = vld [vmem:[#allocation3 + $0x24] sm:$0xf]  ;;  %v7222_v26 = vrot.slane %v7221_v11, 4 }
 0x57d   : > { %v7239_v18 = vshrl.u32 %v7169_v47, 16  ;;  %v7242_v37 = vshll.u32 %v7169_v47, 16  ;;  %v6976_v11 = vld [vmem:[#allocation3 + $0x28] sm:$0xf]  ;;  %v7172_v47 = vld [vmem:[#allocation3 + $0x30] sm:$0xf] }
 0x57e   : > { %v5986_v42 = vpop.permute.xlu1 %5985  ;;  %v7227_v63 = vsel %vm9663_vm13, %v7222_v26, %v12079_v25  ;;  %v7263_v44 = vshrl.u32 %v7172_v47, 16 }
 0x57f   : > { %6062 = vst.msk [vmem:[#allocation5 + $0x50] sm:$0xf] %vm6041_vm4, %v5986_v42  ;;  %v7825_v42 = vrot.slane %v7728_v8, 5  ;;  %v7241_v0 = vrot.slane %v7239_v18, 4  ;;  %v7731_v8 = vld [vmem:[#allocation3 + $0x28] sm:$0xf] }
 0x580   : > { %6849 = vrot.lane.b32.xlu0 %v6744_v32, %s9537_s29  ;;  %6568 = vrot.lane.b32.xlu2 %v6505_v29, %s9536_s14  ;;  %v7255_v32 = vor.u32 %v7254_v2, %v12101_v16  ;;  %v7258_v29 = vshll.u32 %v7171_v33, 16  ;;  %v7174_v33 = vld [vmem:[#allocation3 + $0x38] sm:$0x1]  ;;  %v7266_v18 = vshll.u32 %v7172_v47, 16 }
 0x581   : > { %v7826_v25 = vsel %vm10065_vm1, %v9313_v14, %v7825_v42  ;;  %v7827_v36 = vrot.slane %v7825_v42, 4  ;;  %v7832_v42 = vrot.slane %v7731_v8, 5 }
 0x582   : > { %v5996_v39 = vpop.permute.xlu0 %5995  ;;  %v6006_v59 = vpop.permute.xlu2 %6005  ;;  %v7260_v19 = vrot.slane %v7258_v29, 5  ;;  %v7282_v29 = vshll.u32 %v7174_v33, 16 }
 0x583   : > { %6067 = vst.msk [vmem:[#allocation5 + $0x64] sm:$0xf] %vm6041_vm4, %v5996_v39  ;;  %v8359_v39 = vld [vmem:[#allocation2 + $0x10] sm:$0xf]  ;;  %v7829_v1 = vsel %vm10065_vm1, %v7827_v36, %v7828_v17  ;;  %v7268_v17 = vrot.slane %v7266_v18, 5 }
 0x584   : > { %6072 = vst.msk [vmem:[#allocation5 + $0x78] sm:$0xf] %vm6041_vm4, %v6006_v59  ;;  %6845 = vrot.lane.b32.xlu1 %v6737_v10, %s9537_s29  ;;  %v8360_v59 = vld [vmem:[#allocation2 + $0x14] sm:$0x1]  ;;  %v8410_v10 = vshll.u32 %v8358_v50, 16  ;;  %v8416_v54 = vshll.u32 %v8359_v39, 16 }
 0x585   : > { %v8420_v28 = vshrl.u32 %v8359_v39, 16  ;;  %v8362_v50 = vld [vmem:[#allocation2 + $0x1c] sm:$0xf]  ;;  %v8363_v39 = vld [vmem:[#allocation2 + $0x20] sm:$0x1] }
 0x586   : > { %v5992_v62 = vpop.permute.xlu1 %5991  ;;  %v8412_v24 = vrot.slane %v8410_v10, 5  ;;  %v8418_v15 = vrot.slane %v8416_v54, 5  ;;  %v8440_v54 = vshll.u32 %v8362_v50, 16  ;;  %v8450_v36 = vshll.u32 %v8363_v39, 16 }
 0x587   : > { %6065 = vst.msk [vmem:[#allocation5 + $0x5c] sm:$0xf] %vm6041_vm4, %v5992_v62  ;;  %v7256_v62 = vrot.slane %v7255_v32, 4  ;;  %v8422_v23 = vrot.slane %v8420_v28, 4  ;;  %v8444_v28 = vshrl.u32 %v8362_v50, 16 }
 0x588   : > { %7037 = vrot.lane.b32.xlu0 %v6973_v5, %s9538_s30  ;;  %6847 = vrot.lane.b32.xlu2 %v6741_v53, %s9537_s29  ;;  %v8426_v5 = vshll.u32 %v8360_v59, 16  ;;  %v8409_v53 = vrot.slane %v8407_v21, 4  ;;  %v7732_v59 = vld [vmem:[#allocation3 + $0x2c] sm:$0x1] }
 0x589   : > { %v8423_v45 = vor.u32 %v8422_v23, %v8418_v15  ;;  %v7261_v43 = vsel %vm9663_vm13, %v7256_v62, %v7260_v19  ;;  %v7834_v62 = vrot.slane %v7832_v42, 4  ;;  %v7835_v23 = vrot.slane %v7732_v59, 5 }
 0x58a   : > { %v6002_v31 = vpop.permute.xlu0 %6001  ;;  %v6509_v4 = vpop.permute.xlu2 %6508  ;;  %v7265_v19 = vrot.slane %v7263_v44, 4  ;;  %v7735_v44 = vld [vmem:[#allocation3 + $0x38] sm:$0x1] }
 0x58b   : > { %6070 = vst.msk [vmem:[#allocation5 + $0x70] sm:$0xf] %vm6041_vm4, %v6002_v31  ;;  %v7244_v31 = vrot.slane %v7242_v37, 5  ;;  %v8424_v12 = vrot.slane %v8423_v45, 4  ;;  %v8361_v37 = vld [vmem:[#allocation2 + $0x18] sm:$0xf] }
 0x58c   : > { %6604 = vst.msk [vmem:[#allocation5 + $0x4] sm:$0xf] %vm6602_vm11, %v6509_v4  ;;  %6851 = vrot.lane.b32.xlu1 %v6748_v56, %s9537_s29  ;;  %v8413_v4 = vor.u32 %v8412_v24, %v8409_v53  ;;  %v8428_v56 = vrot.slane %v8426_v5, 5  ;;  %v8431_v21 = vshrl.u32 %v8361_v37, 16  ;;  %v8434_v10 = vshll.u32 %v8361_v37, 16 }
 0x58d   : > { %v8442_v53 = vrot.slane %v8440_v54, 5  ;;  %v8446_v24 = vrot.slane %v8444_v28, 4 }
 0x58e   : > { %v5998_v60 = vpop.permute.xlu1 %5997  ;;  %v8414_v40 = vrot.slane %v8413_v4, 4  ;;  %v8429_v41 = vsel %vm9663_vm13, %v8424_v12, %v8428_v56  ;;  %v8433_v48 = vrot.slane %v8431_v21, 4  ;;  %v8436_v5 = vrot.slane %v8434_v10, 5 }
 0x58f   : > { %6068 = vst.msk [vmem:[#allocation5 + $0x68] sm:$0xf] %vm6041_vm4, %v5998_v60  ;;  %v7245_v60 = vor.u32 %v7244_v31, %v7241_v0  ;;  %v8796_v2 = vunpack.c.l.b16 %v8429_v41  ;;  %v8447_v31 = vor.u32 %v8446_v24, %v8442_v53  ;;  %v8452_v4 = vrot.slane %v8450_v36, 5 }
 0x590   : > { %7600 = vrot.lane.b32.xlu0 %v7237_v57, %s9539_s8  ;;  %6853 = vrot.lane.b32.xlu2 %v6751_v51, %s9537_s29  ;;  %v8419_v13 = vsel %vm9663_vm13, %v8414_v40, %v8418_v15  ;;  %v7284_v15 = vrot.slane %v7282_v29, 5  ;;  %v8437_v0 = vor.u32 %v8436_v5, %v8433_v48  ;;  %v7734_v40 = vld [vmem:[#allocation3 + $0x34] sm:$0xf]  ;;  %v7842_v36 = vrot.slane %v7735_v44, 5  ;;  %v6646_v48 = vld [vmem:[#allocation3 + $0x38] sm:$0x1] }
 0x591   : > { %v8795_v30 = vunpack.c.l.b16 %v8419_v13  ;;  %v7246_v26 = vrot.slane %v7245_v60, 4  ;;  %v8366_v29 = vld [vmem:[#allocation2 + $0x2c] sm:$0x1] }
 0x592   : > { %v6008_v61 = vpop.permute.xlu0 %6007  ;;  %v6515_v20 = vpop.permute.xlu2 %6514 }
 0x593   : > { %6073 = vst.msk [vmem:[#allocation5 + $0x7c] sm:$0xf] %vm6041_vm4, %v6008_v61  ;;  %v7730_v61 = vld [vmem:[#allocation3 + $0x24] sm:$0xe]  ;;  %v8827_v52 = vpack.c.b16 %v8796_v2, %v8795_v30  ;;  %v7733_v30 = vld [vmem:[#allocation3 + $0x30] sm:$0xe] }
 0x594   : > { %6607 = vst.msk [vmem:[#allocation5 + $0x10] sm:$0xf] %vm6602_vm11, %v6515_v20  ;;  %7039 = vrot.lane.b32.xlu1 %v6974_v6, %s9538_s30  ;;  %v12136_v20 = vrot.slane %v7272_v34, 5  ;;  %v7278_v6 = vrot.slane %v7276_v27, 4  ;;  %v9314_v14 = vrot.slane %v7730_v61, 9  ;;  %v8438_v34 = vrot.slane %v8437_v0, 4 }
 0x595   : > { %9425 = vmatmul.msk.bf16.vlgmr.msra.gmra.mxu2 %vm8843_vm10, %v8827_v52  ;;  %v8448_v27 = vrot.slane %v8447_v31, 4  ;;  %v7839_v2 = vrot.slane %v7734_v40, 5  ;;  %v12184_v31 = vld [vmem:[#allocation3 + $0x40] sm:$0xf] }
 0x596   : > { %v6004_v38 = vpop.permute.xlu1 %6003  ;;  %v7279_v32 = vor.u32 %v7278_v6, %v12136_v20  ;;  %v8443_v12 = vsel %vm9663_vm13, %v8438_v34, %v8442_v53  ;;  %v7736_v53 = vld [vmem:[#allocation3 + $0x3c] sm:$0xe]  ;;  %v7846_v40 = vrot.slane %v12184_v31, 5 }
 0x597   : > { %6071 = vst.msk [vmem:[#allocation5 + $0x74] sm:$0xf] %vm6041_vm4, %v6004_v38  ;;  %v8453_v60 = vsel %vm9663_vm13, %v8448_v27, %v8452_v4  ;;  %v7841_v10 = vrot.slane %v7839_v2, 4 }
 0x598   : > { %7041 = vrot.lane.b32.xlu0 %v6975_v7, %s9538_s30  ;;  %7598 = vrot.lane.b32.xlu2 %v7227_v63, %s9539_s8  ;;  %v6977_v7 = vld [vmem:[#allocation3 + $0x30] sm:$0xf]  ;;  %v7251_v63 = vsel %vm9663_vm13, %v7246_v26, %v12101_v16  ;;  %v7833_v16 = vsel %vm10065_vm1, %v9314_v14, %v7832_v42  ;;  %v8798_v61 = vunpack.c.l.b16 %v8453_v60  ;;  %v9315_v26 = vrot.slane %v7733_v30, 9  ;;  %v7175_v14 = vld [vmem:[#allocation3 + $0x3c] sm:$0xf] }
 0x599   : > { %v7287_v54 = vshrl.u32 %v7175_v14, 16  ;;  %v7290_v28 = vshll.u32 %v7175_v14, 16  ;;  %v7843_v0 = vsel %vm10065_vm1, %v7841_v10, %v7842_v36 }
 0x59a   : > { %v6511_v3 = vpop.permute.xlu0 %6510  ;;  %v6521_v9 = vpop.permute.xlu2 %6520  ;;  %v7840_v42 = vsel %vm10065_vm1, %v9315_v26, %v7839_v2  ;;  %v12197_v2 = vld [vmem:[#allocation3 + $0x40] sm:$0xf] }
 0x59b   : > { %6605 = vst.msk [vmem:[#allocation5 + $0x8] sm:$0xf] %vm6602_vm11, %v6511_v3  ;;  %v6761_v14 = vrot.slane %v12197_v2, 5 }
 0x59c   : > { %6610 = vst.msk [vmem:[#allocation5 + $0x1c] sm:$0xf] %vm6602_vm11, %v6521_v9  ;;  %7935 = vrot.lane.b32.xlu1 %v7826_v25, %s9540_s11  ;;  %v7280_v25 = vrot.slane %v7279_v32, 4  ;;  %v8364_v32 = vld [vmem:[#allocation2 + $0x24] sm:$0xf] }
 0x59d   : > { %v8455_v18 = vshrl.u32 %v8364_v32, 16  ;;  %v8458_v37 = vshll.u32 %v8364_v32, 16 }
 0x59e   : > { %v6507_v55 = vpop.permute.xlu1 %6506  ;;  %v7285_v56 = vsel %vm9663_vm13, %v7280_v25, %v7284_v15 }
 0x59f   : > { %6603 = vst.msk [vmem:[#allocation5] sm:$0xf] %vm6602_vm11, %v6507_v55  ;;  %v7836_v55 = vsel %vm10065_vm1, %v7834_v62, %v7835_v23 }
 0x5a0   : > { %7604 = vrot.lane.b32.xlu0 %v7261_v43, %s9539_s8  ;;  %7937 = vrot.lane.b32.xlu2 %v7829_v1, %s9540_s11  ;;  %v6645_v43 = vld [vmem:[#allocation3 + $0x34] sm:$0xf]  ;;  %v7269_v1 = vor.u32 %v7268_v17, %v7265_v19  ;;  %v6980_v17 = vld [vmem:[#allocation3 + $0x40] sm:$0xf] }
 0x5a1   : > { %v6754_v6 = vrot.slane %v6645_v43, 5  ;;  %v6757_v43 = vrot.slane %v6646_v48, 5 }
 0x5a2   : > { %v6517_v57 = vpop.permute.xlu0 %6516  ;;  %v6527_v51 = vpop.permute.xlu2 %6526  ;;  %v7270_v47 = vrot.slane %v7269_v1, 4  ;;  %v9316_v1 = vrot.slane %v7736_v53, 9 }
 0x5a3   : > { %6608 = vst.msk [vmem:[#allocation5 + $0x14] sm:$0xf] %vm6602_vm11, %v6517_v57  ;;  %v6978_v57 = vld [vmem:[#allocation3 + $0x34] sm:$0xf]  ;;  %v6756_v5 = vrot.slane %v6754_v6, 4 }
 0x5a4   : > { %6613 = vst.msk [vmem:[#allocation5 + $0x28] sm:$0xf] %vm6602_vm11, %v6527_v51  ;;  %7043 = vrot.lane.b32.xlu1 %v6976_v11, %s9538_s30  ;;  %v6644_v51 = vld [vmem:[#allocation3 + $0x30] sm:$0xe]  ;;  %v8797_v11 = vunpack.c.l.b16 %v8443_v12 }
 0x5a5   : > { %v9300_v33 = vrot.slane %v6644_v51, 9 }
 0x5a6   : > { %v6513_v38 = vpop.permute.xlu1 %6512  ;;  %v8828_v8 = vpack.c.b16 %v8798_v61, %v8797_v11 }
 0x5a7   : > { %6606 = vst.msk [vmem:[#allocation5 + $0xc] sm:$0xf] %vm6602_vm11, %v6513_v38  ;;  %v6755_v38 = vsel %vm10065_vm1, %v9300_v33, %v6754_v6  ;;  %v6758_v6 = vsel %vm10065_vm1, %v6756_v5, %v6757_v43  ;;  %v7177_v33 = vld [vmem:[#allocation3 + $0x44] sm:$0x1] }
 0x5a8   : > { %7045 = vrot.lane.b32.xlu0 %v6977_v7, %s9538_s30  ;;  %7602 = vrot.lane.b32.xlu2 %v7251_v63, %s9539_s8  ;;  %v7275_v7 = vsel %vm9663_vm13, %v7270_v47, %v12136_v20  ;;  %v8365_v63 = vld [vmem:[#allocation2 + $0x28] sm:$0xf]  ;;  %v7176_v20 = vld [vmem:[#allocation3 + $0x40] sm:$0xf]  ;;  %v7178_v47 = vld [vmem:[#allocation3 + $0x48] sm:$0xf] }
 0x5a9   : > { %9426 = vmatmul.msk.bf16.gmra.mxu2 %vm8843_vm10, %v8828_v8  ;;  %v8464_v50 = vshll.u32 %v8365_v63, 16  ;;  %v8468_v39 = vshrl.u32 %v8365_v63, 16  ;;  %v7296_v4 = vshll.u32 %v7176_v20, 16  ;;  %v6649_v8 = vld [vmem:[#allocation3 + $0x44] sm:$0x1]  ;;  %v7311_v44 = vshrl.u32 %v7178_v47, 16 }
 0x5aa   : > { %v6523_v3 = vpop.permute.xlu0 %6522  ;;  %v6533_v9 = vpop.permute.xlu2 %6532 }
 0x5ab   : > { %6611 = vst.msk [vmem:[#allocation5 + $0x20] sm:$0xf] %vm6602_vm11, %v6523_v3  ;;  %v8474_v3 = vshll.u32 %v8366_v29, 16  ;;  %v8466_v25 = vrot.slane %v8464_v50, 5  ;;  %v8470_v62 = vrot.slane %v8468_v39, 4  ;;  %v7306_v29 = vshll.u32 %v7177_v33, 16 }
 0x5ac   : > { %6616 = vst.msk [vmem:[#allocation5 + $0x34] sm:$0xf] %vm6602_vm11, %v6533_v9  ;;  %7939 = vrot.lane.b32.xlu1 %v7833_v16, %s9540_s11  ;;  %v8457_v9 = vrot.slane %v8455_v18, 4  ;;  %v8460_v16 = vrot.slane %v8458_v37, 5  ;;  %v7314_v18 = vshll.u32 %v7178_v47, 16 }
 0x5ad   : > { %v8471_v15 = vor.u32 %v8470_v62, %v8466_v25  ;;  %v8476_v23 = vrot.slane %v8474_v3, 5  ;;  %v8367_v37 = vld [vmem:[#allocation2 + $0x30] sm:$0xf]  ;;  %v8368_v50 = vld [vmem:[#allocation2 + $0x34] sm:$0xf]  ;;  %v7308_v53 = vrot.slane %v7306_v29, 5 }
 0x5ae   : > { %v6519_v45 = vpop.permute.xlu1 %6518  ;;  %v8461_v24 = vor.u32 %v8460_v16, %v8457_v9  ;;  %v8369_v39 = vld [vmem:[#allocation2 + $0x38] sm:$0x1]  ;;  %v8488_v10 = vshll.u32 %v8368_v50, 16  ;;  %v6763_v9 = vrot.slane %v6761_v14, 4  ;;  %v8370_v29 = vld [vmem:[#allocation2 + $0x3c] sm:$0xf] }
 0x5af   : > { %6609 = vst.msk [vmem:[#allocation5 + $0x18] sm:$0xf] %vm6602_vm11, %v6519_v45  ;;  %v7300_v45 = vshrl.u32 %v7176_v20, 16  ;;  %v8472_v27 = vrot.slane %v8471_v15, 4  ;;  %v8492_v20 = vshrl.u32 %v8368_v50, 16  ;;  %v7313_v15 = vrot.slane %v7311_v44, 4 }
 0x5b0   : > { %7608 = vrot.lane.b32.xlu0 %v7285_v56, %s9539_s8  ;;  %7941 = vrot.lane.b32.xlu2 %v7836_v55, %s9540_s11  ;;  %v7289_v56 = vrot.slane %v7287_v54, 4  ;;  %v7292_v55 = vrot.slane %v7290_v28, 5  ;;  %v8462_v34 = vrot.slane %v8461_v24, 4  ;;  %v8490_v48 = vrot.slane %v8488_v10, 5  ;;  %v7179_v24 = vld [vmem:[#allocation3 + $0x4c] sm:$0xf] }
 0x5b1   : > { %v8477_v60 = vsel %vm9663_vm13, %v8472_v27, %v8476_v23  ;;  %v7302_v51 = vrot.slane %v7300_v45, 4  ;;  %v8494_v5 = vrot.slane %v8492_v20, 4  ;;  %v7316_v23 = vrot.slane %v7314_v18, 5  ;;  %v8371_v44 = vld [vmem:[#allocation2 + $0x40] sm:$0xf] }
 0x5b2   : > { %v6529_v13 = vpop.permute.xlu0 %6528  ;;  %v6539_v41 = vpop.permute.xlu2 %6538  ;;  %v8467_v12 = vsel %vm9663_vm13, %v8462_v34, %v8466_v25  ;;  %v8800_v61 = vunpack.c.l.b16 %v8477_v60  ;;  %v7293_v30 = vor.u32 %v7292_v55, %v7289_v56  ;;  %v8498_v25 = vshll.u32 %v8369_v39, 16  ;;  %v7738_v56 = vld [vmem:[#allocation3 + $0x44] sm:$0x1]  ;;  %v8372_v18 = vld [vmem:[#allocation2 + $0x44] sm:$0x1] }
 0x5b3   : > { %6614 = vst.msk [vmem:[#allocation5 + $0x2c] sm:$0xf] %vm6602_vm11, %v6529_v13  ;;  %v8799_v11 = vunpack.c.l.b16 %v8467_v12  ;;  %v7848_v55 = vrot.slane %v7846_v40, 4  ;;  %v7320_v27 = vshll.u32 %v7179_v24, 16  ;;  %v7849_v12 = vrot.slane %v7738_v56, 5 }
 0x5b4   : > { %6619 = vst.msk [vmem:[#allocation5 + $0x40] sm:$0xf] %vm6602_vm11, %v6539_v41  ;;  %7047 = vrot.lane.b32.xlu1 %v6978_v57, %s9538_s30  ;;  %v7298_v57 = vrot.slane %v7296_v4, 5  ;;  %v7294_v63 = vrot.slane %v7293_v30, 4  ;;  %v7317_v60 = vor.u32 %v7316_v23, %v7313_v15  ;;  %v8503_v50 = vshrl.u32 %v8370_v29, 16 }
 0x5b5   : > { %v7322_v30 = vrot.slane %v7320_v27, 5  ;;  %v8506_v39 = vshll.u32 %v8370_v29, 16  ;;  %v6672_v27 = vld [vmem:[#allocation3 + $0xa0] sm:$0xf]  ;;  %v6997_v29 = vld [vmem:[#allocation3 + $0xa8] sm:$0xf] }
 0x5b6   : > { %v6525_v52 = vpop.permute.xlu1 %6524  ;;  %v7303_v32 = vor.u32 %v7302_v51, %v7298_v57  ;;  %v7299_v3 = vsel %vm9663_vm13, %v7294_v63, %v7298_v57  ;;  %v7324_v57 = vshrl.u32 %v7179_v24, 16  ;;  %v6647_v51 = vld [vmem:[#allocation3 + $0x3c] sm:$0xe]  ;;  %v7318_v47 = vrot.slane %v7317_v60, 4  ;;  %v7741_v63 = vld [vmem:[#allocation3 + $0x50] sm:$0x1] }
 0x5b7   : > { %6612 = vst.msk [vmem:[#allocation5 + $0x24] sm:$0xf] %vm6602_vm11, %v6525_v52  ;;  %v8829_v52 = vpack.c.b16 %v8800_v61, %v8799_v11 }
 0x5b8   : > { %6855 = vrot.lane.b32.xlu0 %v6755_v38, %s9537_s29  ;;  %7606 = vrot.lane.b32.xlu2 %v7275_v7, %s9539_s8  ;;  %v7847_v38 = vsel %vm10065_vm1, %v9316_v1, %v7846_v40  ;;  %v6979_v7 = vld [vmem:[#allocation3 + $0x3c] sm:$0xf]  ;;  %v7304_v16 = vrot.slane %v7303_v32, 4 }
 0x5b9   : > { %9427 = vmatmul.msk.bf16.gmra.mxu2 %vm8843_vm10, %v8829_v52  ;;  %v9301_v52 = vrot.slane %v6647_v51, 9 }
 0x5ba   : > { %v6535_v59 = vpop.permute.xlu0 %6534  ;;  %v6545_v21 = vpop.permute.xlu2 %6544  ;;  %v7309_v34 = vsel %vm9663_vm13, %v7304_v16, %v7308_v53 }
 0x5bb   : > { %6617 = vst.msk [vmem:[#allocation5 + $0x38] sm:$0xf] %vm6602_vm11, %v6535_v59  ;;  %v8479_v59 = vshrl.u32 %v8367_v37, 16  ;;  %v6762_v32 = vsel %vm10065_vm1, %v9301_v52, %v6761_v14  ;;  %v8104_v52 = vld [vmem:[%s13021_s3 + $0x20] sm:$0xf] }
 0x5bc   : > { %6622 = vst.msk [vmem:[#allocation5 + $0x4c] sm:$0xf] %vm6602_vm11, %v6545_v21  ;;  %7943 = vrot.lane.b32.xlu1 %v7840_v42, %s9540_s11  ;;  %v6764_v42 = vrot.slane %v6649_v8, 5  ;;  %v8482_v21 = vshll.u32 %v8367_v37, 16  ;;  %v12233_v8 = vld [vmem:[#allocation3 + $0x4c] sm:$0xf] }
 0x5bd   : > { %v8481_v62 = vrot.slane %v8479_v59, 4  ;;  %v7180_v37 = vld [vmem:[#allocation3 + $0x50] sm:$0x1]  ;;  %v8512_v59 = vshll.u32 %v8371_v44, 16 }
 0x5be   : > { %v6531_v19 = vpop.permute.xlu1 %6530  ;;  %v8484_v36 = vrot.slane %v8482_v21, 5  ;;  %v6765_v45 = vsel %vm10065_vm1, %v6763_v9, %v6764_v42  ;;  %v7323_v42 = vsel %vm9663_vm13, %v7318_v47, %v7322_v30  ;;  %v8516_v21 = vshrl.u32 %v8371_v44, 16 }
 0x5bf   : > { %6615 = vst.msk [vmem:[#allocation5 + $0x30] sm:$0xf] %vm6602_vm11, %v6531_v19  ;;  %v8508_v9 = vrot.slane %v8506_v39, 5  ;;  %v8514_v16 = vrot.slane %v8512_v59, 5 }
 0x5c0   : > { %7051 = vrot.lane.b32.xlu0 %v6980_v17, %s9538_s30  ;;  %7945 = vrot.lane.b32.xlu2 %v7843_v0, %s9540_s11  ;;  %v8485_v19 = vor.u32 %v8484_v36, %v8481_v62  ;;  %v8495_v17 = vor.u32 %v8494_v5, %v8490_v48  ;;  %v8500_v0 = vrot.slane %v8498_v25, 5  ;;  %v8518_v25 = vrot.slane %v8516_v21, 4 }
 0x5c1   : > { %v7856_v62 = vrot.slane %v7741_v63, 5  ;;  %v7330_v36 = vshll.u32 %v7180_v37, 16 }
 0x5c2   : > { %v6541_v13 = vpop.permute.xlu0 %6540  ;;  %v6551_v41 = vpop.permute.xlu2 %6550  ;;  %v8486_v43 = vrot.slane %v8485_v19, 4  ;;  %v8496_v1 = vrot.slane %v8495_v17, 4  ;;  %v8519_v53 = vor.u32 %v8518_v25, %v8514_v16  ;;  %v6982_v19 = vld [vmem:[#allocation3 + $0x4c] sm:$0xf] }
 0x5c3   : > { %6620 = vst.msk [vmem:[#allocation5 + $0x44] sm:$0xf] %vm6602_vm11, %v6541_v13 }
 0x5c4   : > { %6625 = vst.msk [vmem:[#allocation5 + $0x58] sm:$0xf] %vm6602_vm11, %v6551_v41  ;;  %6857 = vrot.lane.b32.xlu1 %v6758_v6, %s9537_s29  ;;  %v8491_v13 = vsel %vm9663_vm13, %v8486_v43, %v8490_v48  ;;  %v8501_v31 = vsel %vm9663_vm13, %v8496_v1, %v8500_v0  ;;  %v7850_v6 = vsel %vm10065_vm1, %v7848_v55, %v7849_v12  ;;  %v7203_v48 = vld [vmem:[#allocation3 + $0xac] sm:$0xf]  ;;  %v7739_v0 = vld [vmem:[#allocation3 + $0x48] sm:$0xe] }
 0x5c5   : > { %v8801_v11 = vunpack.c.l.b16 %v8491_v13  ;;  %v8802_v61 = vunpack.c.l.b16 %v8501_v31  ;;  %v8520_v55 = vrot.slane %v8519_v53, 4  ;;  %v7202_v43 = vld [vmem:[#allocation3 + $0xa8] sm:$0xf] }
 0x5c6   : > { %v6537_v26 = vpop.permute.xlu1 %6536  ;;  %v7506_v37 = vshll.u32 %v7202_v43, 16 }
 0x5c7   : > { %6618 = vst.msk [vmem:[#allocation5 + $0x3c] sm:$0xf] %vm6602_vm11, %v6537_v26  ;;  %v8830_v33 = vpack.c.b16 %v8802_v61, %v8801_v11  ;;  %v6817_v11 = vrot.slane %v6672_v27, 5  ;;  %v12299_v27 = vld [vmem:[#allocation3 + $0x4c] sm:$0xf] }
 0x5c8   : > { %7947 = vrot.lane.b32.xlu0 %v7847_v38, %s9540_s11  ;;  %7049 = vrot.lane.b32.xlu2 %v6979_v7, %s9538_s30  ;;  %v7853_v38 = vrot.slane %v12233_v8, 5  ;;  %v7326_v7 = vrot.slane %v7324_v57, 4 }
 0x5c9   : > { %9428 = vmatmul.msk.bf16.gmra.mxu2 %vm8843_vm10, %v8830_v33  ;;  %v7204_v33 = vld [vmem:[#allocation3 + $0xb0] sm:$0x1]  ;;  %v6819_v39 = vrot.slane %v6817_v11, 4 }
 0x5ca   : > { %v6547_v54 = vpop.permute.xlu0 %6546  ;;  %v6557_v28 = vpop.permute.xlu2 %6556  ;;  %v7855_v2 = vrot.slane %v7853_v38, 4  ;;  %v7327_v14 = vor.u32 %v7326_v7, %v7322_v30  ;;  %v7503_v30 = vshrl.u32 %v7202_v43, 16  ;;  %v6673_v7 = vld [vmem:[#allocation3 + $0xa4] sm:$0x1] }
 0x5cb   : > { %6623 = vst.msk [vmem:[#allocation5 + $0x50] sm:$0xf] %vm6602_vm11, %v6547_v54  ;;  %v6981_v54 = vld [vmem:[#allocation3 + $0x48] sm:$0xf]  ;;  %v6820_v8 = vrot.slane %v6673_v7, 5 }
 0x5cc   : > { %6628 = vst.msk [vmem:[#allocation5 + $0x64] sm:$0xf] %vm6602_vm11, %v6557_v28  ;;  %7610 = vrot.lane.b32.xlu1 %v7299_v3, %s9539_s8  ;;  %v8522_v28 = vshll.u32 %v8372_v18, 16  ;;  %v8505_v3 = vrot.slane %v8503_v50, 4  ;;  %v7857_v23 = vsel %vm10065_vm1, %v7855_v2, %v7856_v62  ;;  %v7328_v17 = vrot.slane %v7327_v14, 4 }
 0x5cd   : > { %v7522_v18 = vshll.u32 %v7204_v33, 16  ;;  %v7505_v59 = vrot.slane %v7503_v30, 4  ;;  %v7763_v33 = vld [vmem:[#allocation3 + $0xa8] sm:$0xe]  ;;  %v7181_v7 = vld [vmem:[#allocation3 + $0x54] sm:$0xf] }
 0x5ce   : > { %v6543_v4 = vpop.permute.xlu1 %6542  ;;  %v8509_v5 = vor.u32 %v8508_v9, %v8505_v3  ;;  %v8524_v24 = vrot.slane %v8522_v28, 5  ;;  %v8375_v28 = vld [vmem:[#allocation2 + $0x50] sm:$0x1] }
 0x5cf   : > { %6621 = vst.msk [vmem:[#allocation5 + $0x48] sm:$0xf] %vm6602_vm11, %v6543_v4  ;;  %v7512_v4 = vshll.u32 %v7203_v48, 16 }
 0x5d0   : > { %6861 = vrot.lane.b32.xlu0 %v6765_v45, %s9537_s29  ;;  %7612 = vrot.lane.b32.xlu2 %v7309_v34, %s9539_s8  ;;  %v7516_v45 = vshrl.u32 %v7203_v48, 16  ;;  %v8510_v56 = vrot.slane %v8509_v5, 4  ;;  %v7332_v34 = vrot.slane %v7330_v36, 5  ;;  %v8525_v12 = vsel %vm9663_vm13, %v8520_v55, %v8524_v24 }
 0x5d1   : > { %v8804_v51 = vunpack.c.l.b16 %v8525_v12  ;;  %v12265_v61 = vrot.slane %v7512_v4, 5  ;;  %v7524_v36 = vrot.slane %v7522_v18, 5  ;;  %v7508_v48 = vrot.slane %v7506_v37, 5 }
 0x5d2   : > { %v6553_v40 = vpop.permute.xlu0 %6552  ;;  %v6563_v41 = vpop.permute.xlu2 %6562  ;;  %v8515_v1 = vsel %vm9663_vm13, %v8510_v56, %v8514_v16  ;;  %v7333_v31 = vsel %vm9663_vm13, %v7328_v17, %v7332_v34  ;;  %v8546_v5 = vshll.u32 %v8375_v28, 16  ;;  %v6821_v55 = vsel %vm10065_vm1, %v6819_v39, %v6820_v8 }
 0x5d3   : > { %6626 = vst.msk [vmem:[#allocation5 + $0x5c] sm:$0xf] %vm6602_vm11, %v6553_v40  ;;  %v9317_v40 = vrot.slane %v7739_v0, 9  ;;  %v8803_v57 = vunpack.c.l.b16 %v8515_v1  ;;  %v7509_v34 = vor.u32 %v7508_v48, %v7505_v59  ;;  %v9325_v18 = vrot.slane %v7763_v33, 9  ;;  %v12350_v33 = vld [vmem:[#allocation3 + $0xac] sm:$0xf] }
 0x5d4   : > { %6631 = vst.msk [vmem:[#allocation5 + $0x70] sm:$0xf] %vm6602_vm11, %v6563_v41  ;;  %7949 = vrot.lane.b32.xlu1 %v7850_v6, %s9540_s11  ;;  %v6671_v41 = vld [vmem:[#allocation3 + $0x9c] sm:$0xe]  ;;  %v7518_v6 = vrot.slane %v7516_v45, 4  ;;  %v8548_v4 = vrot.slane %v8546_v5, 5 }
 0x5d5   : > { %v8831_v47 = vpack.c.b16 %v8804_v51, %v8803_v57  ;;  %v7854_v63 = vsel %vm10065_vm1, %v9317_v40, %v7853_v38  ;;  %v9481_v45 = vld [vmem:[%s13021_s3 + $0x10] sm:$0xff]  ;;  %v6998_v57 = vld [vmem:[#allocation3 + $0xac] sm:$0xf]  ;;  %v6768_v51 = vrot.slane %v12299_v27, 5  ;;  %v7335_v39 = vshrl.u32 %v7181_v7, 16 }
 0x5d6   : > { %v6549_v26 = vpop.permute.xlu1 %6548  ;;  %v7519_v44 = vor.u32 %v7518_v6, %v12265_v61  ;;  %v7338_v8 = vshll.u32 %v7181_v7, 16  ;;  %v6676_v7 = vld [vmem:[#allocation3 + $0xb0] sm:$0x1] }
 0x5d7   : > { %6624 = vst.msk [vmem:[#allocation5 + $0x54] sm:$0xf] %vm6602_vm11, %v6549_v26  ;;  %v9309_v26 = vrot.slane %v6671_v41, 9  ;;  %v9480_v41 = vld [vmem:[%s13021_s3 + $0x8] sm:$0xff] }
 0x5d8   : > { %7614 = vrot.lane.b32.xlu0 %v7323_v42, %s9539_s8  ;;  %6859 = vrot.lane.b32.xlu2 %v6762_v32, %s9537_s29  ;;  %v8206_v42 = vunpack.c.l.b16 %v8104_v52  ;;  %v7520_v62 = vrot.slane %v7519_v44, 4 }
 0x5d9   : > { %9429 = vmatmul.msk.bf16.gmra.mxu2 %vm8843_vm10, %v8831_v47  ;;  %v6818_v38 = vsel %vm10065_vm1, %v9309_v26, %v6817_v11  ;;  %v7510_v11 = vrot.slane %v7509_v34, 4  ;;  %v7764_v47 = vld [vmem:[#allocation3 + $0xac] sm:$0xf] }
 0x5da   : > { %v6559_v10 = vpop.permute.xlu0 %6558  ;;  %v6569_v20 = vpop.permute.xlu2 %6568  ;;  %v8211_v50 = vpack.c.b16 %v8206_v42, %v8206_v42  ;;  %v7525_v56 = vsel %vm9663_vm13, %v7520_v62, %v7524_v36  ;;  %v7182_v42 = vld [vmem:[#allocation3 + $0x58] sm:$0xf]  ;;  %v7909_v37 = vrot.slane %v7764_v47, 5 }
 0x5db   : > { %6629 = vst.msk [vmem:[#allocation5 + $0x68] sm:$0xf] %vm6602_vm11, %v6559_v10  ;;  %v8373_v10 = vld [vmem:[#allocation2 + $0x48] sm:$0xf]  ;;  %v7515_v44 = vsel %vm9663_vm13, %v7510_v11, %v12265_v61  ;;  %v7344_v59 = vshll.u32 %v7182_v42, 16 }
 0x5dc   : > { %6634 = vst.msk [vmem:[#allocation5 + $0x7c] sm:$0xf] %vm6602_vm11, %v6569_v20  ;;  %7053 = vrot.lane.b32.xlu1 %v6981_v54, %s9538_s30  ;;  %v8267_v21 = vsel %vm8265_vm5, %v8211_v50, 0  ;;  %v8374_v20 = vld [vmem:[#allocation2 + $0x4c] sm:$0xf]  ;;  %v9482_v54 = vld [vmem:[%s13021_s3 + $0x18] sm:$0xff] }
 0x5dd   : > { %8272 = vmatpush.bf16.msra.mxu1 %v8267_v21  ;;  %v8527_v3 = vshrl.u32 %v8373_v10, 16  ;;  %v8530_v9 = vshll.u32 %v8373_v10, 16  ;;  %v8536_v16 = vshll.u32 %v8374_v20, 16  ;;  %v8540_v25 = vshrl.u32 %v8374_v20, 16  ;;  %9486 = vmatpush.bf16.msrb.mxu3 %v8267_v21  ;;  %v7765_v50 = vld [vmem:[#allocation3 + $0xb0] sm:$0x1] }
 0x5de   : > { %v6555_v15 = vpop.permute.xlu1 %6554  ;;  %v8376_v21 = vld [vmem:[#allocation2 + $0x54] sm:$0xf]  ;;  %v8377_v10 = vld [vmem:[#allocation2 + $0x58] sm:$0xf]  ;;  %v8378_v61 = vld [vmem:[#allocation2 + $0x5c] sm:$0x1] }
 0x5df   : > { %6627 = vst.msk [vmem:[#allocation5 + $0x60] sm:$0xf] %vm6602_vm11, %v6555_v15  ;;  %v8529_v53 = vrot.slane %v8527_v3, 4  ;;  %v8532_v24 = vrot.slane %v8530_v9, 5  ;;  %v8538_v15 = vrot.slane %v8536_v16, 5  ;;  %v8560_v28 = vshll.u32 %v8377_v10, 16 }
 0x5e0   : > { %7953 = vrot.lane.b32.xlu0 %v7857_v23, %s9540_s11  ;;  %7055 = vrot.lane.b32.xlu2 %v6982_v19, %s9538_s30  ;;  %v8542_v23 = vrot.slane %v8540_v25, 4  ;;  %v8564_v3 = vshrl.u32 %v8377_v10, 16  ;;  %v7910_v9 = vsel %vm10065_vm1, %v9325_v18, %v7909_v37  ;;  %v7911_v16 = vrot.slane %v7909_v37, 4  ;;  %v8379_v10 = vld [vmem:[#allocation2 + $0x60] sm:$0xf] }
 0x5e1   : > { %v8533_v17 = vor.u32 %v8532_v24, %v8529_v53  ;;  %8273 = vmatpush.bf16.msra.mxu1 %v9482_v54  ;;  %9487 = vmatpush.bf16.msrb.mxu3 %v9482_v54  ;;  %v7912_v25 = vrot.slane %v7765_v50, 5  ;;  %v8570_v62 = vshll.u32 %v8378_v61, 16  ;;  %v8562_v5 = vrot.slane %v8560_v28, 5 }
 0x5e2   : > { %v6565_v60 = vpop.permute.xlu0 %6564  ;;  %v6848_v13 = vpop.permute.xlu2 %6847  ;;  %v8543_v0 = vor.u32 %v8542_v23, %v8538_v15  ;;  %v8566_v53 = vrot.slane %v8564_v3, 4  ;;  %v7337_v24 = vrot.slane %v7335_v39, 4  ;;  %v6652_v23 = vld [vmem:[#allocation3 + $0x50] sm:$0x1]  ;;  %v7346_v34 = vrot.slane %v7344_v59, 5 }
 0x5e3   : > { %6632 = vst.msk [vmem:[#allocation5 + $0x74] sm:$0xf] %vm6602_vm11, %v6565_v60  ;;  %v8534_v43 = vrot.slane %v8533_v17, 4  ;;  %v6824_v37 = vrot.slane %v12350_v33, 5  ;;  %v8575_v28 = vshrl.u32 %v8379_v10, 16  ;;  %v8578_v3 = vshll.u32 %v8379_v10, 16 }
 0x5e4   : > { %6942 = vst.msk [vmem:[#allocation5 + $0x8] sm:$0xf] %vm6939_vm12, %v6848_v13  ;;  %7616 = vrot.lane.b32.xlu1 %v7333_v31, %s9539_s8  ;;  %v8544_v1 = vrot.slane %v8543_v0, 4  ;;  %v6650_v13 = vld [vmem:[#allocation3 + $0x48] sm:$0xe]  ;;  %v8567_v0 = vor.u32 %v8566_v53, %v8562_v5 }
 0x5e5   : > { %v8539_v31 = vsel %vm9663_vm13, %v8534_v43, %v8538_v15  ;;  %8274 = vmatpush.bf16.msra.mxu1 %v9481_v45  ;;  %9488 = vmatpush.bf16.msrb.mxu3 %v9481_v45  ;;  %v9302_v52 = vrot.slane %v6650_v13, 9  ;;  %v6984_v45 = vld [vmem:[#allocation3 + $0x58] sm:$0xf]  ;;  %v6999_v33 = vld [vmem:[#allocation3 + $0xb4] sm:$0xf] }
 0x5e6   : > { %v6561_v32 = vpop.permute.xlu1 %6560  ;;  %v8549_v40 = vsel %vm9663_vm13, %v8544_v1, %v8548_v4  ;;  %v8805_v6 = vunpack.c.l.b16 %v8539_v31  ;;  %v8572_v4 = vrot.slane %v8570_v62, 5 }
 0x5e7   : > { %6630 = vst.msk [vmem:[#allocation5 + $0x6c] sm:$0xf] %vm6602_vm11, %v6561_v32  ;;  %v8806_v30 = vunpack.c.l.b16 %v8549_v40  ;;  %v7742_v40 = vld [vmem:[#allocation3 + $0x54] sm:$0xe] }
 0x5e8   : > { %7085 = vrot.lane.b32.xlu0 %v6997_v29, %s9538_s30  ;;  %7951 = vrot.lane.b32.xlu2 %v7854_v63, %s9540_s11  ;;  %v9479_v63 = vld [vmem:[%s13021_s3] sm:$0xff]  ;;  %v6769_v29 = vsel %vm10065_vm1, %v9302_v52, %v6768_v51  ;;  %v7205_v52 = vld [vmem:[#allocation3 + $0xb4] sm:$0xf] }
 0x5e9   : > { %v8832_v26 = vpack.c.b16 %v8806_v30, %v8805_v6  ;;  %8275 = vmatpush.bf16.msra.mxu1 %v9480_v41  ;;  %9489 = vmatpush.bf16.msrb.mxu3 %v9480_v41  ;;  %v7527_v50 = vshrl.u32 %v7205_v52, 16  ;;  %v7530_v39 = vshll.u32 %v7205_v52, 16 }
 0x5ea   : > { %v6844_v2 = vpop.permute.xlu0 %6843  ;;  %v6854_v14 = vpop.permute.xlu2 %6853 }
 0x5eb   : > { %6940 = vst.msk [vmem:[#allocation5] sm:$0xf] %vm6939_vm12, %v6844_v2  ;;  %9430 = vmatmul.msk.bf16.gmra.mxu2 %vm8843_vm10, %v8832_v26  ;;  %v8551_v2 = vshrl.u32 %v8376_v21, 16  ;;  %v9318_v26 = vrot.slane %v7742_v40, 9  ;;  %v7529_v62 = vrot.slane %v7527_v50, 4 }
 0x5ec   : > { %6945 = vst.msk [vmem:[#allocation5 + $0x14] sm:$0xf] %vm6939_vm12, %v6854_v14  ;;  %6891 = vrot.lane.b32.xlu1 %v6818_v38, %s9537_s29  ;;  %v7348_v38 = vshrl.u32 %v7182_v42, 16  ;;  %v8554_v14 = vshll.u32 %v8376_v21, 16  ;;  %v7183_v42 = vld [vmem:[#allocation3 + $0x5c] sm:$0x1] }
 0x5ed   : > { %8276 = vmatpush.bf16.msra.mxu1 %v9479_v63  ;;  %9490 = vmatpush.bf16.msrb.mxu3 %v9479_v63  ;;  %v8553_v36 = vrot.slane %v8551_v2, 4 }
 0x5ee   : > { %v6567_v19 = vpop.permute.xlu1 %6566  ;;  %v8556_v48 = vrot.slane %v8554_v14, 5  ;;  %v7350_v43 = vrot.slane %v7348_v38, 4  ;;  %v7354_v38 = vshll.u32 %v7183_v42, 16  ;;  %v8381_v14 = vld [vmem:[#allocation2 + $0x68] sm:$0x1] }
 0x5ef   : > { %6633 = vst.msk [vmem:[#allocation5 + $0x78] sm:$0xf] %vm6602_vm11, %v6567_v19  ;;  %v7340_v19 = vrot.slane %v7338_v8, 5  ;;  %v6827_v8 = vrot.slane %v6676_v7, 5 }
 0x5f0   : > { %7648 = vrot.lane.b32.xlu0 %v7525_v56, %s9539_s8  ;;  %6893 = vrot.lane.b32.xlu2 %v6821_v55, %s9537_s29  ;;  %v8557_v17 = vor.u32 %v8556_v48, %v8553_v36  ;;  %v6770_v56 = vrot.slane %v6768_v51, 4  ;;  %v12340_v55 = vld [vmem:[#allocation3 + $0x58] sm:$0xf]  ;;  %v7351_v47 = vor.u32 %v7350_v43, %v7346_v34  ;;  %v8594_v36 = vshll.u32 %v8381_v14, 16  ;;  %v6674_v43 = vld [vmem:[#allocation3 + $0xa8] sm:$0xe] }
 0x5f1   : > { %9491 = vmatpush.bf16.msra.mxu3 %v12110_v35  ;;  %v7913_v35 = vsel %vm10065_vm1, %v7911_v16, %v7912_v25  ;;  %v7341_v41 = vor.u32 %v7340_v19, %v7337_v24  ;;  %v7860_v11 = vrot.slane %v12340_v55, 5  ;;  %v6826_v25 = vrot.slane %v6824_v37, 4 }
 0x5f2   : > { %v6850_v12 = vpop.permute.xlu0 %6849  ;;  %v7599_v60 = vpop.permute.xlu2 %7598  ;;  %v8558_v1 = vrot.slane %v8557_v17, 4  ;;  %v7352_v59 = vrot.slane %v7351_v47, 4  ;;  %v8577_v48 = vrot.slane %v8575_v28, 4 }
 0x5f3   : > { %6943 = vst.msk [vmem:[#allocation5 + $0xc] sm:$0xf] %vm6939_vm12, %v6850_v12  ;;  %v8568_v12 = vrot.slane %v8567_v0, 4  ;;  %v7861_v18 = vsel %vm10065_vm1, %v9318_v26, %v7860_v11  ;;  %v7862_v17 = vrot.slane %v7860_v11, 4  ;;  %v7206_v0 = vld [vmem:[#allocation3 + $0xb8] sm:$0xf] }
 0x5f4   : > { %7087 = vrot.lane.b32.xlu1 %v6998_v57, %s9538_s30  ;;  %v8563_v57 = vsel %vm9663_vm13, %v8558_v1, %v8562_v5  ;;  %v8580_v5 = vrot.slane %v8578_v3, 5 }
 0x5f5   : > { %v8573_v27 = vsel %vm9663_vm13, %v8568_v12, %v8572_v4  ;;  %v8807_v6 = vunpack.c.l.b16 %v8563_v57 }
 0x5f6   : > { %v6846_v32 = vpop.permute.xlu1 %6845  ;;  %v8808_v30 = vunpack.c.l.b16 %v8573_v27  ;;  %v8581_v4 = vor.u32 %v8580_v5, %v8577_v48  ;;  %v9310_v27 = vrot.slane %v6674_v43, 9 }
 0x5f7   : > { %6941 = vst.msk [vmem:[#allocation5 + $0x4] sm:$0xf] %vm6939_vm12, %v6846_v32 }
 0x5f8   : > { %6863 = vrot.lane.b32.xlu0 %v6769_v29, %s9537_s29  ;;  %7646 = vrot.lane.b32.xlu2 %v7515_v44, %s9539_s8  ;;  %v8833_v32 = vpack.c.b16 %v8808_v30, %v8807_v6  ;;  %v6983_v29 = vld [vmem:[#allocation3 + $0x54] sm:$0xf]  ;;  %v7342_v44 = vrot.slane %v7341_v41, 4  ;;  %v8582_v12 = vrot.slane %v8581_v4, 4  ;;  %v7540_v30 = vshrl.u32 %v7206_v0, 16 }
 0x5fa   : > { %v7038_v20 = vpop.permute.xlu0 %7037  ;;  %v12325_v54 = vpop.permute.xlu2 %7937  ;;  %v7347_v21 = vsel %vm9663_vm13, %v7342_v44, %v7346_v34  ;;  %v6825_v44 = vsel %vm10065_vm1, %v9310_v27, %v6824_v37  ;;  %v7542_v50 = vrot.slane %v7540_v30, 4  ;;  %v8382_v37 = vld [vmem:[#allocation2 + $0x6c] sm:$0xf]  ;;  %v6654_v27 = vld [vmem:[#allocation3 + $0x58] sm:$0xf] }
 0x5fb   : > { %7134 = vst.msk [vmem:[#allocation5] sm:$0xf] %vm7133_vm7, %v7038_v20  ;;  %9431 = vmatmul.msk.bf16.gmra.mxu2 %vm8843_vm10, %v8833_v32  ;;  %v8380_v20 = vld [vmem:[#allocation2 + $0x64] sm:$0xf]  ;;  %v8602_v14 = vshll.u32 %v8382_v37, 16 }
 0x5fc   : > { %7983 = vrot.lane.b32.xlu1 %v7910_v9, %s9540_s11  ;;  %7695 = vst.msk [vmem:[#allocation5] sm:$0xf] %vm7694_vm14, %v7599_v60  ;;  %v6771_v60 = vrot.slane %v6652_v23, 5  ;;  %v8584_v9 = vshll.u32 %v8380_v20, 16  ;;  %v8588_v16 = vshrl.u32 %v8380_v20, 16 }
 0x5fd   : > { %v7744_v23 = vld [vmem:[#allocation3 + $0x5c] sm:$0x1]  ;;  %v7186_v30 = vld [vmem:[#allocation3 + $0x68] sm:$0x1] }
 0x5fe   : > { %v6852_v15 = vpop.permute.xlu1 %6851  ;;  %v6772_v51 = vsel %vm10065_vm1, %v6770_v56, %v6771_v60  ;;  %v8586_v53 = vrot.slane %v8584_v9, 5  ;;  %v8590_v24 = vrot.slane %v8588_v16, 4  ;;  %v6828_v56 = vsel %vm10065_vm1, %v6826_v25, %v6827_v8  ;;  %v7207_v8 = vld [vmem:[#allocation3 + $0xbc] sm:$0x1] }
 0x5ff   : > { %6944 = vst.msk [vmem:[#allocation5 + $0x10] sm:$0xf] %vm6939_vm12, %v6852_v15  ;;  %v7356_v15 = vrot.slane %v7354_v38, 5  ;;  %v7863_v1 = vrot.slane %v7744_v23, 5  ;;  %v8383_v38 = vld [vmem:[#allocation2 + $0x70] sm:$0xf] }
 0x600   : > { %7059 = vrot.lane.b32.xlu0 %v6984_v45, %s9538_s30  ;;  %7985 = vrot.lane.b32.xlu2 %v7913_v35, %s9540_s11  ;;  %v8591_v45 = vor.u32 %v8590_v24, %v8586_v53  ;;  %v8596_v35 = vrot.slane %v8594_v36, 5  ;;  %v8384_v20 = vld [vmem:[#allocation2 + $0x74] sm:$0x1]  ;;  %v8608_v28 = vshll.u32 %v8383_v38, 16  ;;  %v8612_v3 = vshrl.u32 %v8383_v38, 16 }
 0x601   : > { %v7357_v55 = vsel %vm9663_vm13, %v7352_v59, %v7356_v15  ;;  %v7864_v57 = vsel %vm10065_vm1, %v7862_v17, %v7863_v1  ;;  %v7185_v59 = vld [vmem:[#allocation3 + $0x64] sm:$0xf]  ;;  %v7546_v25 = vshll.u32 %v7207_v8, 16  ;;  %v6653_v1 = vld [vmem:[#allocation3 + $0x54] sm:$0xe] }
 0x602   : > { %v7601_v13 = vpop.permute.xlu0 %7600  ;;  %v7603_v31 = vpop.permute.xlu2 %7602  ;;  %v8592_v60 = vrot.slane %v8591_v45, 4  ;;  %v8610_v36 = vrot.slane %v8608_v28, 5  ;;  %v8614_v48 = vrot.slane %v8612_v3, 4  ;;  %v7368_v5 = vshll.u32 %v7185_v59, 16 }
 0x603   : > { %v7372_v24 = vshrl.u32 %v7185_v59, 16  ;;  %v7548_v45 = vrot.slane %v7546_v25, 5  ;;  %v8385_v59 = vld [vmem:[#allocation2 + $0x78] sm:$0xf] }
 0x604   : > { %6865 = vrot.lane.b32.xlu1 %v6772_v51, %s9537_s29  ;;  %v8587_v51 = vsel %vm9663_vm13, %v8582_v12, %v8586_v53  ;;  %v8597_v11 = vsel %vm9663_vm13, %v8592_v60, %v8596_v35  ;;  %v8615_v23 = vor.u32 %v8614_v48, %v8610_v36  ;;  %v7766_v35 = vld [vmem:[#allocation3 + $0xb4] sm:$0xe]  ;;  %v12414_v12 = vrot.slane %v7368_v5, 5 }
 0x605   : > { %v8809_v47 = vunpack.c.l.b16 %v8587_v51  ;;  %v8810_v52 = vunpack.c.l.b16 %v8597_v11  ;;  %v7374_v60 = vrot.slane %v7372_v24, 4  ;;  %v7184_v51 = vld [vmem:[#allocation3 + $0x60] sm:$0xf]  ;;  %v8626_v38 = vshll.u32 %v8385_v59, 16 }
 0x606   : > { %v7040_v63 = vpop.permute.xlu1 %7039  ;;  %v7362_v8 = vshll.u32 %v7184_v51, 16 }
 0x607   : > { %7135 = vst.msk [vmem:[#allocation5 + $0x4] sm:$0xf] %vm7133_vm7, %v7040_v63  ;;  %v8834_v42 = vpack.c.b16 %v8810_v52, %v8809_v47  ;;  %v8628_v25 = vrot.slane %v8626_v38, 5 }
 0x608   : > { %7696 = vst.msk [vmem:[#allocation5 + $0x4] sm:$0xf] %vm7694_vm14, %v7601_v13  ;;  %7955 = vrot.lane.b32.xlu0 %v7861_v18, %s9540_s11  ;;  %7057 = vrot.lane.b32.xlu2 %v6983_v29, %s9538_s30  ;;  %v7536_v13 = vshll.u32 %v7206_v0, 16  ;;  %v7768_v18 = vld [vmem:[#allocation3 + $0xbc] sm:$0x1]  ;;  %v7364_v5 = vrot.slane %v7362_v8, 5 }
 0x609   : > { %8033 = vst.msk [vmem:[#allocation5 + $0x4] sm:$0xf] %vm8031_vm15, %v12325_v54  ;;  %v7532_v54 = vrot.slane %v7530_v39, 5  ;;  %v7919_v9 = vrot.slane %v7768_v18, 5  ;;  %v7000_v0 = vld [vmem:[#allocation3 + $0xb8] sm:$0xf]  ;;  %v7375_v18 = vor.u32 %v7374_v60, %v12414_v12 }
 0x60a   : > { %v7042_v61 = vpop.permute.xlu0 %7041  ;;  %v12364_v2 = vpop.permute.xlu2 %7941  ;;  %v7538_v7 = vrot.slane %v7536_v13, 5  ;;  %v6986_v60 = vld [vmem:[#allocation3 + $0x64] sm:$0xf]  ;;  %v8389_v8 = vld [vmem:[#allocation2 + $0x88] sm:$0xf] }
 0x60b   : > { %7136 = vst.msk [vmem:[#allocation5 + $0x8] sm:$0xf] %vm7133_vm7, %v7042_v61  ;;  %v7533_v34 = vor.u32 %v7532_v54, %v7529_v62  ;;  %9432 = vmatmul.msk.bf16.gmra.mxu2 %vm8843_vm10, %v8834_v42  ;;  %v8599_v61 = vshrl.u32 %v8382_v37, 16  ;;  %v8618_v62 = vshll.u32 %v8384_v20, 16  ;;  %v8604_v54 = vrot.slane %v8602_v14, 5 }
 0x60c   : > { %7697 = vst.msk [vmem:[#allocation5 + $0x8] sm:$0xf] %vm7694_vm14, %v7603_v31  ;;  %7618 = vrot.lane.b32.xlu1 %v7347_v21, %s9539_s8  ;;  %v12378_v31 = vld [vmem:[#allocation3 + $0xb8] sm:$0xf]  ;;  %v7543_v16 = vor.u32 %v7542_v50, %v7538_v7  ;;  %v9303_v42 = vrot.slane %v6653_v1, 9  ;;  %v7378_v50 = vshll.u32 %v7186_v30, 16 }
 0x60d   : > { %v7534_v6 = vrot.slane %v7533_v34, 4  ;;  %v7916_v26 = vrot.slane %v12378_v31, 5  ;;  %v8623_v37 = vshrl.u32 %v8385_v59, 16 }
 0x60e   : > { %v7936_v19 = vpop.permute.xlu1 %7935  ;;  %v7544_v4 = vrot.slane %v7543_v16, 4 }
 0x60f   : > { %8032 = vst.msk [vmem:[#allocation5] sm:$0xf] %vm8031_vm15, %v7936_v19  ;;  %v7539_v29 = vsel %vm9663_vm13, %v7534_v6, %v7538_v7  ;;  %v7918_v39 = vrot.slane %v7916_v26, 4  ;;  %v8620_v19 = vrot.slane %v8618_v62, 5  ;;  %v8625_v16 = vrot.slane %v8623_v37, 4 }
 0x610   : > { %6897 = vrot.lane.b32.xlu0 %v6828_v56, %s9537_s29  ;;  %7620 = vrot.lane.b32.xlu2 %v7357_v55, %s9539_s8  ;;  %v8616_v55 = vrot.slane %v8615_v23, 4 }
 0x611   : > { %v7920_v17 = vsel %vm10065_vm1, %v7918_v39, %v7919_v9  ;;  %v6655_v39 = vld [vmem:[#allocation3 + $0x5c] sm:$0x1]  ;;  %v7376_v9 = vrot.slane %v7375_v18, 4 }
 0x612   : > { %v7605_v40 = vpop.permute.xlu0 %7604  ;;  %v7607_v41 = vpop.permute.xlu2 %7606  ;;  %v6778_v62 = vrot.slane %v6655_v39, 5  ;;  %v8388_v39 = vld [vmem:[#allocation2 + $0x84] sm:$0xf] }
 0x614   : > { %7957 = vrot.lane.b32.xlu1 %v7864_v57, %s9540_s11  ;;  %v9326_v57 = vrot.slane %v7766_v35, 9 }
 0x616   : > { %v7044_v32 = vpop.permute.xlu1 %7043  ;;  %v9463_v63 = vld [vmem:[#allocation5] sm:$0xff] }
 0x617   : > { %7137 = vst.msk [vmem:[#allocation5 + $0xc] sm:$0xf] %vm7133_vm7, %v7044_v32  ;;  %9409 = vmatmul.msk.bf16.vlgmr.msra.gmra.mxu1 %vm8216_vm6, %v9463_v63  ;;  %v6775_v32 = vrot.slane %v6654_v27, 5  ;;  %v7359_v63 = vshrl.u32 %v7184_v51, 16  ;;  %v7746_v51 = vld [vmem:[#allocation3 + $0x64] sm:$0xf] }
 0x618   : > { %7698 = vst.msk [vmem:[#allocation5 + $0xc] sm:$0xf] %vm7694_vm14, %v7605_v40  ;;  %7650 = vrot.lane.b32.xlu0 %v7539_v29, %s9539_s8  ;;  %6895 = vrot.lane.b32.xlu2 %v6825_v44, %s9537_s29  ;;  %v8621_v40 = vsel %vm9663_vm13, %v8616_v55, %v8620_v19  ;;  %v6985_v29 = vld [vmem:[#allocation3 + $0x60] sm:$0xf]  ;;  %v7917_v44 = vsel %vm10065_vm1, %v9326_v57, %v7916_v26  ;;  %v12436_v31 = vpop.f32.mrf.mxu2  ;;  %v8387_v26 = vld [vmem:[#allocation2 + $0x80] sm:$0x1] }
 0x619   : > { %8035 = vst.msk [vmem:[#allocation5 + $0xc] sm:$0xf] %vm8031_vm15, %v12364_v2  ;;  %v8601_v2 = vrot.slane %v8599_v61, 4  ;;  %v8812_v6 = vunpack.c.l.b16 %v8621_v40  ;;  %v6776_v61 = vsel %vm10065_vm1, %v9303_v42, %v6775_v32  ;;  %v8642_v3 = vshll.u32 %v8387_v26, 16 }
 0x61a   : > { %v7046_v21 = vpop.permute.xlu0 %7045  ;;  %v12404_v10 = vpop.permute.xlu2 %7945  ;;  %v7361_v48 = vrot.slane %v7359_v63, 4  ;;  %v8650_v26 = vshll.u32 %v8388_v39, 16 }
 0x61b   : > { %7138 = vst.msk [vmem:[#allocation5 + $0x10] sm:$0xf] %vm7133_vm7, %v7046_v21  ;;  %v8605_v15 = vor.u32 %v8604_v54, %v8601_v2  ;;  %v8644_v23 = vrot.slane %v8642_v3, 5 }
 0x61c   : > { %7699 = vst.msk [vmem:[#allocation5 + $0x10] sm:$0xf] %vm7694_vm14, %v7607_v41  ;;  %7089 = vrot.lane.b32.xlu1 %v6999_v33, %s9538_s30  ;;  %v7549_v41 = vsel %vm9663_vm13, %v7544_v4, %v7548_v45  ;;  %v8386_v33 = vld [vmem:[#allocation2 + $0x7c] sm:$0xf]  ;;  %v6677_v4 = vld [vmem:[#allocation3 + $0xb4] sm:$0xe] }
 0x61d   : > { %v8606_v56 = vrot.slane %v8605_v15, 4  ;;  %v8632_v14 = vshll.u32 %v8386_v33, 16  ;;  %v8636_v28 = vshrl.u32 %v8386_v33, 16  ;;  %v12452_v45 = vld [vmem:[#allocation3 + $0xb8] sm:$0xf]  ;;  %v9311_v57 = vrot.slane %v6677_v4, 9 }
 0x61e   : > { %v7940_v53 = vpop.permute.xlu1 %7939  ;;  %v6831_v27 = vrot.slane %v12452_v45, 5  ;;  %v8647_v33 = vshrl.u32 %v8388_v39, 16  ;;  %v7769_v45 = vld [vmem:[#allocation3 + $0xc0] sm:$0xe] }
 0x61f   : > { %8034 = vst.msk [vmem:[#allocation5 + $0x8] sm:$0xf] %vm8031_vm15, %v7940_v53  ;;  %v8611_v13 = vsel %vm9663_vm13, %v8606_v56, %v8610_v36  ;;  %v8634_v2 = vrot.slane %v8632_v14, 5  ;;  %v8638_v54 = vrot.slane %v8636_v28, 4  ;;  %v7380_v36 = vrot.slane %v7378_v50, 5 }
 0x620   : > { %7989 = vrot.lane.b32.xlu0 %v7920_v17, %s9540_s11  ;;  %7091 = vrot.lane.b32.xlu2 %v7000_v0, %s9538_s30  ;;  %v8811_v11 = vunpack.c.l.b16 %v8611_v13  ;;  %v8629_v53 = vor.u32 %v8628_v25, %v8625_v16  ;;  %v7365_v56 = vor.u32 %v7364_v5, %v7361_v48  ;;  %v12454_v55 = vpop.f32.mrf.mxu2  ;;  %v7745_v13 = vld [vmem:[#allocation3 + $0x60] sm:$0xe]  ;;  %v6832_v63 = vsel %vm10065_vm1, %v9311_v57, %v6831_v27 }
 0x621   : > { %v8639_v15 = vor.u32 %v8638_v54, %v8634_v2  ;;  %v7381_v19 = vsel %vm9663_vm13, %v7376_v9, %v7380_v36  ;;  %v9319_v42 = vrot.slane %v7745_v13, 9  ;;  %v8660_v14 = vshrl.u32 %v8389_v8, 16 }
 0x622   : > { %v7609_v34 = vpop.permute.xlu0 %7608  ;;  %v7050_v43 = vpop.permute.xlu2 %7049  ;;  %v8835_v47 = vpack.c.b16 %v8812_v6, %v8811_v11  ;;  %v8630_v0 = vrot.slane %v8629_v53, 4  ;;  %v7208_v6 = vld [vmem:[#allocation3 + $0xc0] sm:$0xf]  ;;  %v7366_v30 = vrot.slane %v7365_v56, 4  ;;  %v8649_v16 = vrot.slane %v8647_v33, 4 }
 0x623   : > { %v8640_v35 = vrot.slane %v8639_v15, 4  ;;  %v7551_v18 = vshrl.u32 %v7208_v6, 16  ;;  %v7554_v50 = vshll.u32 %v7208_v6, 16  ;;  %v6833_v4 = vrot.slane %v6831_v27, 4  ;;  %v12487_v56 = vld [vmem:[#allocation3 + $0xc4] sm:$0xf] }
 0x624   : > { %7652 = vrot.lane.b32.xlu1 %v7549_v41, %s9539_s8  ;;  %9433 = vmatmul.msk.bf16.gmra.mxu2 %vm8843_vm10, %v8835_v47 }
 0x625   : > { %v8645_v40 = vsel %vm9663_vm13, %v8640_v35, %v8644_v23  ;;  %v7553_v36 = vrot.slane %v7551_v18, 4  ;;  %v7556_v48 = vrot.slane %v7554_v50, 5 }
 0x626   : > { %v7048_v52 = vpop.permute.xlu1 %7047  ;;  %v9464_v7 = vld [vmem:[#allocation5 + $0x8] sm:$0xff]  ;;  %v8814_v11 = vunpack.c.l.b16 %v8645_v40 }
 0x627   : > { %7139 = vst.msk [vmem:[#allocation5 + $0x14] sm:$0xf] %vm7133_vm7, %v7048_v52  ;;  %9410 = vmatmul.msk.bf16.gmra.mxu1 %vm8216_vm6, %v9464_v7 }
 0x628   : > { %7700 = vst.msk [vmem:[#allocation5 + $0x14] sm:$0xf] %vm7694_vm14, %v7609_v34  ;;  %7061 = vrot.lane.b32.xlu0 %v6985_v29, %s9538_s30  ;;  %7987 = vrot.lane.b32.xlu2 %v7917_v44, %s9540_s11  ;;  %v8635_v34 = vsel %vm9663_vm13, %v8630_v0, %v8634_v2  ;;  %v7371_v29 = vsel %vm9663_vm13, %v7366_v30, %v12414_v12  ;;  %v7747_v44 = vld [vmem:[#allocation3 + $0x68] sm:$0x1]  ;;  %v8390_v12 = vld [vmem:[#allocation2 + $0x8c] sm:$0x1] }
 0x629   : > { %8037 = vst.msk [vmem:[#allocation5 + $0x14] sm:$0xf] %vm8031_vm15, %v12404_v10  ;;  %v6777_v10 = vrot.slane %v6775_v32, 4  ;;  %v8813_v41 = vunpack.c.l.b16 %v8635_v34  ;;  %v7867_v32 = vrot.slane %v7746_v51, 5  ;;  %v8666_v28 = vshll.u32 %v8390_v12, 16 }
 0x62a   : > { %v6856_v21 = vpop.permute.xlu0 %6855  ;;  %v12438_v20 = vpop.permute.xlu2 %7612  ;;  %v7870_v25 = vrot.slane %v7747_v44, 5  ;;  %v8662_v2 = vrot.slane %v8660_v14, 4  ;;  %v9327_v30 = vrot.slane %v7769_v45, 9 }
 0x62b   : > { %6946 = vst.msk [vmem:[#allocation5 + $0x18] sm:$0xf] %vm6939_vm12, %v6856_v21  ;;  %v6779_v17 = vsel %vm10065_vm1, %v6777_v10, %v6778_v62  ;;  %v8836_v47 = vpack.c.b16 %v8814_v11, %v8813_v41  ;;  %v6679_v21 = vld [vmem:[#allocation3 + $0xbc] sm:$0x1]  ;;  %v7868_v3 = vsel %vm10065_vm1, %v9319_v42, %v7867_v32  ;;  %v7869_v9 = vrot.slane %v7867_v32, 4 }
 0x62c   : > { %7140 = vst.msk [vmem:[#allocation5 + $0x18] sm:$0xf] %vm7133_vm7, %v7050_v43  ;;  %6867 = vrot.lane.b32.xlu1 %v6776_v61, %s9537_s29  ;;  %v12476_v59 = vpop.f32.mrf.mxu2  ;;  %v8656_v61 = vshll.u32 %v8389_v8, 16  ;;  %v7209_v10 = vld [vmem:[#allocation3 + $0xc4] sm:$0xf]  ;;  %v6834_v54 = vrot.slane %v6679_v21, 5 }
 0x62d   : > { %v7560_v15 = vshll.u32 %v7209_v10, 16  ;;  %v7564_v23 = vshrl.u32 %v7209_v10, 16  ;;  %v7871_v0 = vsel %vm10065_vm1, %v7869_v9, %v7870_v25  ;;  %v7210_v42 = vld [vmem:[#allocation3 + $0xc8] sm:$0x1]  ;;  %v7001_v8 = vld [vmem:[#allocation3 + $0xc0] sm:$0xf] }
 0x62e   : > { %v7944_v24 = vpop.permute.xlu1 %7943  ;;  %v8658_v62 = vrot.slane %v8656_v61, 5  ;;  %v6835_v6 = vsel %vm10065_vm1, %v6833_v4, %v6834_v54  ;;  %v7570_v12 = vshll.u32 %v7210_v42, 16  ;;  %v12516_v61 = vld [vmem:[#allocation3 + $0x70] sm:$0xf]  ;;  %v8392_v9 = vld [vmem:[#allocation2 + $0x94] sm:$0xf] }
 0x62f   : > { %8036 = vst.msk [vmem:[#allocation5 + $0x10] sm:$0xf] %vm8031_vm15, %v7944_v24  ;;  %v7002_v24 = vld [vmem:[#allocation3 + $0xc4] sm:$0xf]  ;;  %v7562_v57 = vrot.slane %v7560_v15, 5  ;;  %v7566_v27 = vrot.slane %v7564_v23, 4 }
 0x630   : > { %7624 = vrot.lane.b32.xlu0 %v7381_v19, %s9539_s8  ;;  %6869 = vrot.lane.b32.xlu2 %v6779_v17, %s9537_s29  ;;  %v8663_v19 = vor.u32 %v8662_v2, %v8658_v62  ;;  %v8668_v17 = vrot.slane %v8666_v28, 5  ;;  %v933_v28 = vld [vmem:[#allocation3 + $0xcc] sm:$0x1] }
 0x631   : > { %v7567_v50 = vor.u32 %v7566_v27, %v7562_v57  ;;  %v934_v25 = vsel %vm11316_vm9, 0, %v933_v28  ;;  %vm9048_vm9 = vcmask 64512  }
 0x632   : > { %v7052_v43 = vpop.permute.xlu0 %7051  ;;  %v6860_v1 = vpop.permute.xlu2 %6859  ;;  %v8664_v34 = vrot.slane %v8663_v19, 4  ;;  %935 = vst [vmem:[#allocation3 + $0xcc] sm:$0x1] %v934_v25 }
 0x633   : > { %6948 = vst.msk [vmem:[#allocation5 + $0x20] sm:$0xf] %vm6939_vm12, %v6860_v1  ;;  %v12489_v1 = vld [vmem:[#allocation3 + $0x64] sm:$0xf] }
 0x634   : > { %7063 = vrot.lane.b32.xlu1 %v6986_v60, %s9538_s30  ;;  %9434 = vmatmul.msk.bf16.gmra.mxu2 %vm8843_vm10, %v8836_v47  ;;  %v12491_v60 = vpop.f32.mrf.mxu2  ;;  %v8669_v51 = vsel %vm9663_vm13, %v8664_v34, %v8668_v17  ;;  %v7923_v47 = vrot.slane %v12487_v56, 5  ;;  %v7392_v34 = vshll.u32 %v12516_v61, 16 }
 0x636   : > { %v6858_v52 = vpop.permute.xlu1 %6857  ;;  %v9465_v7 = vld [vmem:[#allocation5 + $0x10] sm:$0xff]  ;;  %v7924_v39 = vsel %vm10065_vm1, %v9327_v30, %v7923_v47  ;;  %v7925_v56 = vrot.slane %v7923_v47, 4 }
 0x637   : > { %6947 = vst.msk [vmem:[#allocation5 + $0x1c] sm:$0xf] %vm6939_vm12, %v6858_v52  ;;  %9411 = vmatmul.msk.bf16.gmra.mxu1 %vm8216_vm6, %v9465_v7  ;;  %v8816_v52 = vunpack.c.l.b16 %v8669_v51  ;;  %v6782_v7 = vrot.slane %v12489_v1, 5  ;;  %v988_v51 = vld [vmem:[#allocation3 + $0xd4] sm:$0x1] }
 0x638   : > { %7141 = vst.msk [vmem:[#allocation5 + $0x1c] sm:$0xf] %vm7133_vm7, %v7052_v43  ;;  %6899 = vrot.lane.b32.xlu0 %v6832_v63, %s9537_s29  ;;  %7622 = vrot.lane.b32.xlu2 %v7371_v29, %s9539_s8  ;;  %v7557_v43 = vor.u32 %v7556_v48, %v7553_v36  ;;  %v6658_v63 = vld [vmem:[#allocation3 + $0x68] sm:$0x1]  ;;  %v7187_v29 = vld [vmem:[#allocation3 + $0x6c] sm:$0xf] }
 0x639   : > { %7702 = vst.msk [vmem:[#allocation5 + $0x1c] sm:$0xf] %vm7694_vm14, %v12438_v20  ;;  %v8652_v20 = vrot.slane %v8650_v26, 5  ;;  %v6784_v33 = vrot.slane %v6782_v7, 4  ;;  %v6785_v26 = vrot.slane %v6658_v63, 5  ;;  %v7572_v36 = vrot.slane %v7570_v12, 5 }
 0x63a   : > { %v7948_v37 = vpop.permute.xlu0 %7947  ;;  %v7056_v38 = vpop.permute.xlu2 %7055  ;;  %v7558_v32 = vrot.slane %v7557_v43, 4  ;;  %v8680_v48 = vshll.u32 %v8392_v9, 16  ;;  %v7396_v63 = vshrl.u32 %v12516_v61, 16  ;;  %v6987_v1 = vld [vmem:[#allocation3 + $0x6c] sm:$0xf] }
 0x63b   : > { %v8653_v5 = vor.u32 %v8652_v20, %v8649_v16  ;;  %v7568_v20 = vrot.slane %v7567_v50, 4  ;;  %v6786_v45 = vsel %vm10065_vm1, %v6784_v33, %v6785_v26 }
 0x63c   : > { %7959 = vrot.lane.b32.xlu1 %v7868_v3, %s9540_s11  ;;  %v7563_v21 = vsel %vm9663_vm13, %v7558_v32, %v7562_v57  ;;  %v12518_v14 = vpop.f32.mrf.mxu2  ;;  %v8391_v3 = vld [vmem:[#allocation2 + $0x90] sm:$0xf] }
 0x63d   : > { %v8654_v35 = vrot.slane %v8653_v5, 4  ;;  %v8671_v2 = vshrl.u32 %v8391_v3, 16  ;;  %v8674_v54 = vshll.u32 %v8391_v3, 16  ;;  %v8684_v5 = vshrl.u32 %v8392_v9, 16  ;;  %v7750_v3 = vld [vmem:[#allocation3 + $0x74] sm:$0x1] }
 0x63e   : > { %v7611_v53 = vpop.permute.xlu1 %7610  ;;  %v7189_v9 = vld [vmem:[#allocation3 + $0x74] sm:$0x1] }
 0x63f   : > { %7701 = vst.msk [vmem:[#allocation5 + $0x18] sm:$0xf] %vm7694_vm14, %v7611_v53  ;;  %v8659_v13 = vsel %vm9663_vm13, %v8654_v35, %v8658_v62  ;;  %v8393_v62 = vld [vmem:[#allocation2 + $0x98] sm:$0x1]  ;;  %v8673_v15 = vrot.slane %v8671_v2, 4  ;;  %v8676_v23 = vrot.slane %v8674_v54, 5 }
 0x640   : > { %8038 = vst.msk [vmem:[#allocation5 + $0x18] sm:$0xf] %vm8031_vm15, %v7948_v37  ;;  %7095 = vrot.lane.b32.xlu0 %v7002_v24, %s9538_s30  ;;  %7961 = vrot.lane.b32.xlu2 %v7871_v0, %s9540_s11  ;;  %v8815_v11 = vunpack.c.l.b16 %v8659_v13  ;;  %v7383_v37 = vshrl.u32 %v7187_v29, 16  ;;  %v8690_v53 = vshll.u32 %v8393_v62, 16  ;;  %v7771_v24 = vld [vmem:[#allocation3 + $0xc8] sm:$0x1]  ;;  %v7573_v13 = vsel %vm9663_vm13, %v7568_v20, %v7572_v36 }
 0x641   : > { %v8682_v0 = vrot.slane %v8680_v48, 5  ;;  %v8686_v46 = vrot.slane %v8684_v5, 4  ;;  %v8677_v43 = vor.u32 %v8676_v23, %v8673_v15  ;;  %v8394_v20 = vld [vmem:[#allocation2 + $0x9c] sm:$0xf]  ;;  %v7877_v2 = vrot.slane %v7750_v3, 5 }
 0x642   : > { %v6862_v40 = vpop.permute.xlu0 %6861  ;;  %v12495_v41 = vpop.permute.xlu2 %7951  ;;  %v8837_v44 = vpack.c.b16 %v8816_v52, %v8815_v11  ;;  %v7385_v19 = vrot.slane %v7383_v37, 4  ;;  %v8692_v27 = vrot.slane %v8690_v53, 5  ;;  %v8395_v36 = vld [vmem:[#allocation2 + $0xa0] sm:$0xf]  ;;  %v8396_v48 = vld [vmem:[#allocation2 + $0xa4] sm:$0x1] }
 0x643   : > { %6949 = vst.msk [vmem:[#allocation5 + $0x24] sm:$0xf] %vm6939_vm12, %v6862_v40  ;;  %v7926_v40 = vrot.slane %v7771_v24, 5  ;;  %v8687_v57 = vor.u32 %v8686_v46, %v8682_v0  ;;  %v8678_v11 = vrot.slane %v8677_v43, 4  ;;  %v8695_v5 = vshrl.u32 %v8394_v20, 16 }
 0x644   : > { %7143 = vst.msk [vmem:[#allocation5 + $0x24] sm:$0xf] %vm7133_vm7, %v7056_v38  ;;  %6901 = vrot.lane.b32.xlu1 %v6835_v6, %s9537_s29  ;;  %9435 = vmatmul.msk.bf16.gmra.mxu2 %vm8843_vm10, %v8837_v44  ;;  %v7386_v38 = vshll.u32 %v7187_v29, 16  ;;  %v989_v6 = vsel %vm11332_vm2, 0, %v988_v51  ;;  %v12538_v47 = vpop.f32.mrf.mxu2  ;;  %v6656_v29 = vld [vmem:[#allocation3 + $0x60] sm:$0xe] }
 0x645   : > { %v8688_v52 = vrot.slane %v8687_v57, 4  ;;  %v8683_v44 = vsel %vm9663_vm13, %v8678_v11, %v8682_v0  ;;  %990 = vst [vmem:[#allocation3 + $0xd4] sm:$0x1] %v989_v6  ;;  %v7927_v22 = vsel %vm10065_vm1, %v7925_v56, %v7926_v40  ;;  %v9304_v33 = vrot.slane %v6656_v29, 9  ;;  %v6988_v43 = vld [vmem:[#allocation3 + $0x70] sm:$0xf] }
 0x646   : > { %v7950_v18 = vpop.permute.xlu1 %7949  ;;  %v7388_v17 = vrot.slane %v7386_v38, 5  ;;  %v7398_v38 = vrot.slane %v7396_v63, 4  ;;  %v8698_v53 = vshll.u32 %v8394_v20, 16  ;;  %v8704_v24 = vshll.u32 %v8395_v36, 16  ;;  %v7748_v6 = vld [vmem:[#allocation3 + $0x6c] sm:$0xe] }
 0x647   : > { %8039 = vst.msk [vmem:[#allocation5 + $0x1c] sm:$0xf] %vm8031_vm15, %v7950_v18  ;;  %v12547_v18 = vld [vmem:[#allocation3 + $0x70] sm:$0xf]  ;;  %v8693_v50 = vsel %vm9663_vm13, %v8688_v52, %v8692_v27  ;;  %v6783_v28 = vsel %vm10065_vm1, %v9304_v33, %v6782_v7  ;;  %v8708_v15 = vshrl.u32 %v8395_v36, 16  ;;  %v7402_v23 = vshll.u32 %v7189_v9, 16 }
 0x648   : > { %7991 = vrot.lane.b32.xlu0 %v7924_v39, %s9540_s11  ;;  %7093 = vrot.lane.b32.xlu2 %v7001_v8, %s9538_s30  ;;  %v7389_v30 = vor.u32 %v7388_v17, %v7385_v19  ;;  %v8817_v39 = vunpack.c.l.b16 %v8683_v44  ;;  %v8818_v8 = vunpack.c.l.b16 %v8693_v50  ;;  %v7874_v37 = vrot.slane %v12547_v18, 5  ;;  %v7211_v50 = vld [vmem:[#allocation3 + $0xcc] sm:$0xf]  ;;  %v6680_v33 = vld [vmem:[#allocation3 + $0xc0] sm:$0xe] }
 0x649   : > { %v8714_v0 = vshll.u32 %v8396_v48, 16  ;;  %v8697_v46 = vrot.slane %v8695_v5, 4  ;;  %v7404_v11 = vrot.slane %v7402_v23, 5  ;;  %v7575_v9 = vshrl.u32 %v7211_v50, 16 }
 0x64a   : > { %v7615_v10 = vpop.permute.xlu0 %7614  ;;  %v6894_v16 = vpop.permute.xlu2 %6893  ;;  %v7390_v12 = vrot.slane %v7389_v30, 4  ;;  %v7876_v7 = vrot.slane %v7874_v37, 4 }
 0x64b   : > { %6965 = vst.msk [vmem:[#allocation5 + $0x64] sm:$0xf] %vm6939_vm12, %v6894_v16  ;;  %v7212_v16 = vld [vmem:[#allocation3 + $0xd0] sm:$0xf]  ;;  %v8716_v51 = vrot.slane %v8714_v0, 5  ;;  %v7577_v5 = vrot.slane %v7575_v9, 4 }
 0x64c   : > { %7654 = vrot.lane.b32.xlu1 %v7563_v21, %s9539_s8  ;;  %v8838_v21 = vpack.c.b16 %v8818_v8, %v8817_v39  ;;  %v7584_v19 = vshll.u32 %v7212_v16, 16  ;;  %v7588_v17 = vshrl.u32 %v7212_v16, 16  ;;  %v7578_v16 = vshll.u32 %v7211_v50, 16 }
 0x64e   : > { %v7054_v4 = vpop.permute.xlu1 %7053  ;;  %v9466_v35 = vld [vmem:[#allocation5 + $0x18] sm:$0xff]  ;;  %v12580_v30 = vrot.slane %v7584_v19, 5  ;;  %v7590_v52 = vrot.slane %v7588_v17, 4 }
 0x64f   : > { %7142 = vst.msk [vmem:[#allocation5 + $0x20] sm:$0xf] %vm7133_vm7, %v7054_v4  ;;  %9412 = vmatmul.msk.bf16.gmra.mxu1 %vm8216_vm6, %v9466_v35  ;;  %v8700_v4 = vrot.slane %v8698_v53, 5  ;;  %v8710_v35 = vrot.slane %v8708_v15, 4  ;;  %v7580_v53 = vrot.slane %v7578_v16, 5 }
 0x650   : > { %7703 = vst.msk [vmem:[#allocation5 + $0x20] sm:$0xf] %vm7694_vm14, %v7615_v10  ;;  %6873 = vrot.lane.b32.xlu0 %v6786_v45, %s9537_s29  ;;  %7656 = vrot.lane.b32.xlu2 %v7573_v13, %s9539_s8  ;;  %v12564_v10 = vpop.f32.mrf.mxu2  ;;  %v8706_v45 = vrot.slane %v8704_v24, 5 }
 0x651   : > { %8040 = vst.msk [vmem:[#allocation5 + $0x20] sm:$0xf] %vm8031_vm15, %v12495_v41  ;;  %v7394_v41 = vrot.slane %v7392_v34, 5  ;;  %v7878_v34 = vsel %vm10065_vm1, %v7876_v7, %v7877_v2  ;;  %v8701_v57 = vor.u32 %v8700_v4, %v8697_v46  ;;  %v9312_v7 = vrot.slane %v6680_v33, 9  ;;  %v6660_v4 = vld [vmem:[#allocation3 + $0x70] sm:$0xf] }
 0x652   : > { %v7954_v42 = vpop.permute.xlu0 %7953  ;;  %v12540_v32 = vpop.permute.xlu2 %7646  ;;  %v8711_v27 = vor.u32 %v8710_v35, %v8706_v45  ;;  %v7581_v17 = vor.u32 %v7580_v53, %v7577_v5  ;;  %v7191_v33 = vld [vmem:[#allocation3 + $0x7c] sm:$0xf] }
 0x653   : > { %v7395_v61 = vsel %vm9663_vm13, %v7390_v12, %v7394_v41  ;;  %v7399_v54 = vor.u32 %v7398_v38, %v7394_v41  ;;  %v8702_v63 = vrot.slane %v8701_v57, 4  ;;  %v7213_v41 = vld [vmem:[#allocation3 + $0xd4] sm:$0x1]  ;;  %v9320_v12 = vrot.slane %v7748_v6, 9  ;;  %v7773_v57 = vld [vmem:[#allocation3 + $0xd0] sm:$0xf] }
 0x654   : > { %7993 = vrot.lane.b32.xlu1 %v7927_v22, %s9540_s11  ;;  %9436 = vmatmul.msk.bf16.gmra.mxu2 %vm8843_vm10, %v8838_v21  ;;  %v8712_v29 = vrot.slane %v8711_v27, 4  ;;  %v7594_v3 = vshll.u32 %v7213_v41, 16  ;;  %v7582_v35 = vrot.slane %v7581_v17, 4  ;;  %v6789_v27 = vrot.slane %v6660_v4, 5 }
 0x655   : > { %v7400_v40 = vrot.slane %v7399_v54, 4  ;;  %v8707_v8 = vsel %vm9663_vm13, %v8702_v63, %v8706_v45  ;;  %v6682_v54 = vld [vmem:[#allocation3 + $0xc8] sm:$0x1]  ;;  %v7004_v45 = vld [vmem:[#allocation3 + $0xd0] sm:$0xf]  ;;  %v7416_v16 = vshll.u32 %v7191_v33, 16 }
 0x656   : > { %v7617_v26 = vpop.permute.xlu1 %7616  ;;  %v8819_v38 = vunpack.c.l.b16 %v8707_v8  ;;  %v7596_v48 = vrot.slane %v7594_v3, 5  ;;  %v6841_v19 = vrot.slane %v6682_v54, 5  ;;  %v6661_v3 = vld [vmem:[#allocation3 + $0x74] sm:$0x1]  ;;  %v6791_v9 = vrot.slane %v6789_v27, 4 }
 0x657   : > { %7704 = vst.msk [vmem:[#allocation5 + $0x24] sm:$0xf] %vm7694_vm14, %v7617_v26  ;;  %v7405_v39 = vsel %vm9663_vm13, %v7400_v40, %v7404_v11  ;;  %v6681_v26 = vld [vmem:[#allocation3 + $0xc4] sm:$0xf]  ;;  %v7772_v40 = vld [vmem:[#allocation3 + $0xcc] sm:$0xe]  ;;  %v7587_v11 = vsel %vm9663_vm13, %v7582_v35, %v12580_v30 }
 0x658   : > { %8041 = vst.msk [vmem:[#allocation5 + $0x24] sm:$0xf] %vm8031_vm15, %v7954_v42  ;;  %7626 = vrot.lane.b32.xlu0 %v7395_v61, %s9539_s8  ;;  %6871 = vrot.lane.b32.xlu2 %v6783_v28, %s9537_s29  ;;  %v12582_v42 = vpop.f32.mrf.mxu2  ;;  %v7003_v61 = vld [vmem:[#allocation3 + $0xcc] sm:$0xf]  ;;  %v7591_v28 = vor.u32 %v7590_v52, %v12580_v30  ;;  %v6838_v2 = vrot.slane %v6681_v26, 5  ;;  %v9328_v6 = vrot.slane %v7772_v40, 9 }
 0x659   : > { %v7930_v52 = vrot.slane %v7773_v57, 5 }
 0x65a   : > { %v7086_v25 = vpop.permute.xlu0 %7085  ;;  %v12566_v62 = vpop.permute.xlu2 %7985  ;;  %v7592_v36 = vrot.slane %v7591_v28, 4  ;;  %v6839_v15 = vsel %vm10065_vm1, %v9312_v7, %v6838_v2  ;;  %v6840_v23 = vrot.slane %v6838_v2, 4  ;;  %v6990_v28 = vld [vmem:[#allocation3 + $0x7c] sm:$0xf] }
 0x65b   : > { %v7931_v30 = vsel %vm10065_vm1, %v9328_v6, %v7930_v52  ;;  %v7932_v41 = vrot.slane %v7930_v52, 4 }
 0x65c   : > { %7065 = vrot.lane.b32.xlu1 %v6987_v1, %s9538_s30  ;;  %v7875_v1 = vsel %vm10065_vm1, %v9320_v12, %v7874_v37  ;;  %v6842_v46 = vsel %vm10065_vm1, %v6840_v23, %v6841_v19  ;;  %v12650_v23 = vld [vmem:[#allocation3 + $0x7c] sm:$0xf] }
 0x65d   : > { %v6796_v35 = vrot.slane %v12650_v23, 5 }
 0x65e   : > { %v6892_v56 = vpop.permute.xlu1 %6891 }
 0x65f   : > { %6964 = vst.msk [vmem:[#allocation5 + $0x60] sm:$0xf] %vm6939_vm12, %v6892_v56  ;;  %v9467_v13 = vld [vmem:[#allocation5 + $0x20] sm:$0xff]  ;;  %v6798_v52 = vrot.slane %v6796_v35, 4 }
 0x660   : > { %7158 = vst.msk [vmem:[#allocation5 + $0x60] sm:$0xf] %vm7133_vm7, %v7086_v25  ;;  %7965 = vrot.lane.b32.xlu0 %v7878_v34, %s9540_s11  ;;  %7067 = vrot.lane.b32.xlu2 %v6988_v43, %s9538_s30  ;;  %v12603_v18 = vpop.f32.mrf.mxu2 }
 0x661   : > { %7719 = vst.msk [vmem:[#allocation5 + $0x60] sm:$0xf] %vm7694_vm14, %v12540_v32  ;;  %9413 = vmatmul.msk.bf16.gmra.mxu1 %vm8216_vm6, %v9467_v13  ;;  %v8717_v32 = vsel %vm9663_vm13, %v8712_v29, %v8716_v51  ;;  %v6659_v13 = vld [vmem:[#allocation3 + $0x6c] sm:$0xe] }
 0x662   : > { %v7649_v44 = vpop.permute.xlu0 %7648  ;;  %v7058_v22 = vpop.permute.xlu2 %7057  ;;  %v8820_v21 = vunpack.c.l.b16 %v8717_v32  ;;  %v9305_v51 = vrot.slane %v6659_v13, 9  ;;  %v7190_v32 = vld [vmem:[#allocation3 + $0x78] sm:$0xf] }
 0x664   : > { %7628 = vrot.lane.b32.xlu1 %v7405_v39, %s9539_s8  ;;  %v8839_v25 = vpack.c.b16 %v8820_v21, %v8819_v38  ;;  %v7407_v38 = vshrl.u32 %v7190_v32, 16  ;;  %v7410_v21 = vshll.u32 %v7190_v32, 16  ;;  %v7753_v32 = vld [vmem:[#allocation3 + $0x80] sm:$0x1] }
 0x666   : > { %v7088_v20 = vpop.permute.xlu1 %7087  ;;  %9437 = vmatmul.msk.bf16.gmra.mxu2 %vm8843_vm10, %v8839_v25  ;;  %v7752_v25 = vld [vmem:[#allocation3 + $0x7c] sm:$0xf]  ;;  %v7409_v7 = vrot.slane %v7407_v38, 4  ;;  %v7412_v2 = vrot.slane %v7410_v21, 5 }
 0x667   : > { %7159 = vst.msk [vmem:[#allocation5 + $0x64] sm:$0xf] %vm7133_vm7, %v7088_v20  ;;  %v7420_v20 = vshrl.u32 %v7191_v33, 16  ;;  %v7881_v53 = vrot.slane %v7752_v25, 5 }
 0x668   : > { %7720 = vst.msk [vmem:[#allocation5 + $0x64] sm:$0xf] %vm7694_vm14, %v7649_v44  ;;  %7097 = vrot.lane.b32.xlu0 %v7003_v61, %s9538_s30  ;;  %7963 = vrot.lane.b32.xlu2 %v7875_v1, %s9540_s11  ;;  %v12617_v56 = vpop.f32.mrf.mxu2  ;;  %v7774_v44 = vld [vmem:[#allocation3 + $0xd4] sm:$0x1]  ;;  %v6792_v1 = vrot.slane %v6661_v3, 5 }
 0x669   : > { %8057 = vst.msk [vmem:[#allocation5 + $0x64] sm:$0xf] %vm8031_vm15, %v12566_v62  ;;  %v7597_v62 = vsel %vm9663_vm13, %v7592_v36, %v7596_v48  ;;  %v7933_v50 = vrot.slane %v7774_v44, 5  ;;  %v7751_v48 = vld [vmem:[#allocation3 + $0x78] sm:$0xe]  ;;  %v7883_v38 = vrot.slane %v7881_v53, 4 }
 0x66a   : > { %v6864_v37 = vpop.permute.xlu0 %6863  ;;  %v7621_v24 = vpop.permute.xlu2 %7620  ;;  %v6793_v5 = vsel %vm10065_vm1, %v6791_v9, %v6792_v1  ;;  %v9321_v19 = vrot.slane %v7751_v48, 9  ;;  %v7194_v44 = vld [vmem:[#allocation3 + $0x88] sm:$0xf] }
 0x66b   : > { %6950 = vst.msk [vmem:[#allocation5 + $0x28] sm:$0xf] %vm6939_vm12, %v6864_v37  ;;  %v7934_v26 = vsel %vm10065_vm1, %v7932_v41, %v7933_v50  ;;  %v7418_v37 = vrot.slane %v7416_v16, 5  ;;  %v7440_v21 = vshll.u32 %v7194_v44, 16  ;;  %v12684_v1 = vld [vmem:[%s13022_s4] ss:$0 sm:$0xff] }
 0x66c   : > { %7144 = vst.msk [vmem:[#allocation5 + $0x28] sm:$0xf] %vm7133_vm7, %v7058_v22  ;;  %6903 = vrot.lane.b32.xlu1 %v6839_v15, %s9537_s29  ;;  %v6790_v22 = vsel %vm10065_vm1, %v9305_v51, %v6789_v27  ;;  %v7882_v4 = vsel %vm10065_vm1, %v9321_v19, %v7881_v53 }
 0x66e   : > { %v7984_v0 = vpop.permute.xlu1 %7983 }
 0x66f   : > { %8056 = vst.msk [vmem:[#allocation5 + $0x60] sm:$0xf] %vm8031_vm15, %v7984_v0  ;;  %v7192_v0 = vld [vmem:[#allocation3 + $0x80] sm:$0x1] }
 0x670   : > { %7660 = vrot.lane.b32.xlu0 %v7597_v62, %s9539_s8  ;;  %6905 = vrot.lane.b32.xlu2 %v6842_v46, %s9537_s29  ;;  %v12634_v12 = vpop.f32.mrf.mxu2  ;;  %v7413_v62 = vor.u32 %v7412_v2, %v7409_v7  ;;  %v7193_v46 = vld [vmem:[#allocation3 + $0x84] sm:$0xf]  ;;  %v7426_v13 = vshll.u32 %v7192_v0, 16  ;;  %v7442_v7 = vrot.slane %v7440_v21, 5  ;;  %v7444_v2 = vshrl.u32 %v7194_v44, 16 }
 0x671   : > { %v7431_v40 = vshrl.u32 %v7193_v46, 16  ;;  %v7434_v57 = vshll.u32 %v7193_v46, 16  ;;  %v7756_v46 = vld [vmem:[#allocation3 + $0x8c] sm:$0x1] }
 0x672   : > { %v7060_v34 = vpop.permute.xlu0 %7059  ;;  %v6896_v43 = vpop.permute.xlu2 %6895  ;;  %v7446_v0 = vrot.slane %v7444_v2, 4  ;;  %v6665_v2 = vld [vmem:[#allocation3 + $0x84] sm:$0xe] }
 0x673   : > { %6966 = vst.msk [vmem:[#allocation5 + $0x68] sm:$0xf] %vm6939_vm12, %v6896_v43  ;;  %v7414_v43 = vrot.slane %v7413_v62, 4  ;;  %v7433_v41 = vrot.slane %v7431_v40, 4  ;;  %v7436_v50 = vrot.slane %v7434_v57, 5 }
 0x674   : > { %7099 = vrot.lane.b32.xlu1 %v7004_v45, %s9538_s30  ;;  %v6989_v45 = vld [vmem:[#allocation3 + $0x78] sm:$0xf]  ;;  %v7447_v40 = vor.u32 %v7446_v0, %v7442_v7  ;;  %v9307_v0 = vrot.slane %v6665_v2, 9 }
 0x675   : > { %v7419_v6 = vsel %vm9663_vm13, %v7414_v43, %v7418_v37  ;;  %v7437_v3 = vor.u32 %v7436_v50, %v7433_v41 }
 0x676   : > { %v6866_v63 = vpop.permute.xlu1 %6865  ;;  %v9475_v29 = vld [vmem:[#allocation5 + $0x60] sm:$0xff]  ;;  %v7448_v50 = vrot.slane %v7447_v40, 4 }
 0x677   : > { %6951 = vst.msk [vmem:[#allocation5 + $0x2c] sm:$0xf] %vm6939_vm12, %v6866_v63  ;;  %9421 = vmatmul.msk.bf16.vlgmr.msrb.gmra.mxu3 %vm8216_vm6, %v9475_v29 }
 0x678   : > { %7145 = vst.msk [vmem:[#allocation5 + $0x2c] sm:$0xf] %vm7133_vm7, %v7060_v34  ;;  %6875 = vrot.lane.b32.xlu0 %v6790_v22, %s9537_s29  ;;  %7658 = vrot.lane.b32.xlu2 %v7587_v11, %s9539_s8  ;;  %v12646_v15 = vpop.f32.mrf.mxu2  ;;  %v6664_v11 = vld [vmem:[#allocation3 + $0x80] sm:$0x1] }
 0x679   : > { %7706 = vst.msk [vmem:[#allocation5 + $0x2c] sm:$0xf] %vm7694_vm14, %v7621_v24  ;;  %v7422_v24 = vrot.slane %v7420_v20, 4  ;;  %v6799_v22 = vrot.slane %v6664_v11, 5  ;;  %v6662_v20 = vld [vmem:[#allocation3 + $0x78] sm:$0xe] }
 0x67a   : > { %v7956_v39 = vpop.permute.xlu0 %7955  ;;  %v7092_v8 = vpop.permute.xlu2 %7091  ;;  %v9306_v53 = vrot.slane %v6662_v20, 9 }
 0x67b   : > { %v7423_v34 = vor.u32 %v7422_v24, %v7418_v37  ;;  %v6800_v33 = vsel %vm10065_vm1, %v6798_v52, %v6799_v22  ;;  %v6992_v22 = vld [vmem:[#allocation3 + $0x88] sm:$0xf] }
 0x67c   : > { %7995 = vrot.lane.b32.xlu1 %v7931_v30, %s9540_s11  ;;  %v7428_v30 = vrot.slane %v7426_v13, 5  ;;  %v6991_v13 = vld [vmem:[#allocation3 + $0x84] sm:$0xf] }
 0x67d   : > { %v7424_v63 = vrot.slane %v7423_v34, 4  ;;  %v7195_v34 = vld [vmem:[#allocation3 + $0x8c] sm:$0x1] }
 0x67e   : > { %v7619_v61 = vpop.permute.xlu1 %7618 }
 0x67f   : > { %7705 = vst.msk [vmem:[#allocation5 + $0x28] sm:$0xf] %vm7694_vm14, %v7619_v61  ;;  %v12675_v61 = vld [vmem:[%s13024_s6] ss:$0 sm:$0xff] }
 0x680   : > { %8042 = vst.msk [vmem:[#allocation5 + $0x28] sm:$0xf] %vm8031_vm15, %v7956_v39  ;;  %7071 = vrot.lane.b32.xlu0 %v6990_v28, %s9538_s30  ;;  %7997 = vrot.lane.b32.xlu2 %v7934_v26, %s9540_s11  ;;  %v12661_v29 = vpop.f32.mrf.mxu2  ;;  %v7429_v26 = vsel %vm9663_vm13, %v7424_v63, %v7428_v30  ;;  %v7884_v28 = vrot.slane %v7753_v32, 5  ;;  %v8905_v48 = vadd.f32 %v12675_v61, %v12436_v31 }
 0x681   : > { %v8907_v11 = vadd.f32 %v12675_v61, %v12454_v55 }
 0x682   : > { %v6898_v54 = vpop.permute.xlu0 %6897  ;;  %v7988_v36 = vpop.permute.xlu2 %7987  ;;  %v7885_v25 = vsel %vm10065_vm1, %v7883_v38, %v7884_v28  ;;  %v7754_v38 = vld [vmem:[#allocation3 + $0x84] sm:$0xe] }
 0x683   : > { %6967 = vst.msk [vmem:[#allocation5 + $0x6c] sm:$0xf] %vm6939_vm12, %v6898_v54  ;;  %v12686_v54 = vld [vmem:[#allocation3 + $0x88] sm:$0xf] }
 0x684   : > { %7161 = vst.msk [vmem:[#allocation5 + $0x6c] sm:$0xf] %vm7133_vm7, %v7092_v8  ;;  %6877 = vrot.lane.b32.xlu1 %v6793_v5, %s9537_s29  ;;  %v7438_v5 = vrot.slane %v7437_v3, 4  ;;  %v7888_v23 = vrot.slane %v12686_v54, 5 }
 0x686   : > { %v7958_v17 = vpop.permute.xlu1 %7957  ;;  %v7443_v62 = vsel %vm9663_vm13, %v7438_v5, %v7442_v7  ;;  %v9322_v7 = vrot.slane %v7754_v38, 9 }
 0x687   : > { %8043 = vst.msk [vmem:[#allocation5 + $0x2c] sm:$0xf] %vm8031_vm15, %v7958_v17  ;;  %v6797_v17 = vsel %vm10065_vm1, %v9306_v53, %v6796_v35  ;;  %v7890_v35 = vrot.slane %v7888_v23, 4 }
 0x688   : > { %7967 = vrot.lane.b32.xlu0 %v7882_v4, %s9540_s11  ;;  %7069 = vrot.lane.b32.xlu2 %v6989_v45, %s9538_s30 }
 0x68a   : > { %v7651_v27 = vpop.permute.xlu0 %7650  ;;  %v6870_v51 = vpop.permute.xlu2 %6869 }
 0x68b   : > { %6953 = vst.msk [vmem:[#allocation5 + $0x34] sm:$0xf] %vm6939_vm12, %v6870_v51  ;;  %v7197_v51 = vld [vmem:[#allocation3 + $0x94] sm:$0xf] }
 0x68c   : > { %7630 = vrot.lane.b32.xlu1 %v7419_v6, %s9539_s8  ;;  %v7450_v6 = vshll.u32 %v7195_v34, 16 }
 0x68e   : > { %v7090_v39 = vpop.permute.xlu1 %7089  ;;  %v9468_v8 = vld [vmem:[#allocation5 + $0x28] sm:$0xff]  ;;  %v7452_v32 = vrot.slane %v7450_v6, 5 }
 0x68f   : > { %7160 = vst.msk [vmem:[#allocation5 + $0x68] sm:$0xf] %vm7133_vm7, %v7090_v39  ;;  %9414 = vmatmul.msk.bf16.gmra.mxu1 %vm8216_vm6, %v9468_v8  ;;  %v7464_v39 = vshll.u32 %v7197_v51, 16  ;;  %v7468_v8 = vshrl.u32 %v7197_v51, 16 }
 0x690   : > { %7721 = vst.msk [vmem:[#allocation5 + $0x68] sm:$0xf] %vm7694_vm14, %v7651_v27  ;;  %6881 = vrot.lane.b32.xlu0 %v6800_v33, %s9537_s29  ;;  %7632 = vrot.lane.b32.xlu2 %v7429_v26, %s9539_s8  ;;  %v7891_v27 = vrot.slane %v7756_v46, 5  ;;  %v7453_v28 = vsel %vm9663_vm13, %v7448_v50, %v7452_v32 }
 0x691   : > { %8058 = vst.msk [vmem:[#allocation5 + $0x68] sm:$0xf] %vm8031_vm15, %v7988_v36  ;;  %v12688_v36 = vpop.f32.mrf.mxu2  ;;  %v12729_v3 = vrot.slane %v7464_v39, 5 }
 0x692   : > { %v7990_v9 = vpop.permute.xlu0 %7989  ;;  %v7623_v16 = vpop.permute.xlu2 %7622  ;;  %v7892_v44 = vsel %vm10065_vm1, %v7890_v35, %v7891_v27 }
 0x694   : > { %7969 = vrot.lane.b32.xlu1 %v7885_v25, %s9540_s11  ;;  %v8278_v24 = vpop.f32.mrf.mxu1  ;;  %v6666_v25 = vld [vmem:[#allocation3 + $0x88] sm:$0xf] }
 0x695   : > { %v8279_v19 = vadd.f32 %v12684_v1, %v8278_v24 }
 0x696   : > { %v7653_v37 = vpop.permute.xlu1 %7652 }
 0x697   : > { %7722 = vst.msk [vmem:[#allocation5 + $0x6c] sm:$0xf] %vm7694_vm14, %v7653_v37  ;;  %v8984_v31 = vadd.f32 %v8905_v48, %v8279_v19  ;;  %v7198_v48 = vld [vmem:[#allocation3 + $0x98] sm:$0x1]  ;;  %v7196_v37 = vld [vmem:[#allocation3 + $0x90] sm:$0xf] }
 0x698   : > { %8059 = vst.msk [vmem:[#allocation5 + $0x6c] sm:$0xf] %vm8031_vm15, %v7990_v9  ;;  %7634 = vrot.lane.b32.xlu0 %v7443_v62, %s9539_s8  ;;  %6879 = vrot.lane.b32.xlu2 %v6797_v17, %s9537_s29  ;;  %v7470_v9 = vrot.slane %v7468_v8, 4  ;;  %v6993_v19 = vld [vmem:[#allocation3 + $0x90] sm:$0xf]  ;;  %v7889_v62 = vsel %vm10065_vm1, %v9322_v7, %v7888_v23  ;;  %v6803_v17 = vrot.slane %v6666_v25, 5  ;;  %v8915_v25 = vadd.f32 %v12675_v61, %v12518_v14 }
 0x699   : > { %v9016_v43 = vmax.f32 %v8984_v31, 0.0  ;;  %v12711_v57 = vpop.f32.mrf.mxu2  ;;  %v7474_v31 = vshll.u32 %v7198_v48, 16  ;;  %v7455_v54 = vshrl.u32 %v7196_v37, 16  ;;  %v7458_v35 = vshll.u32 %v7196_v37, 16 }
 0x69a   : > { %v7062_v4 = vpop.permute.xlu0 %7061  ;;  %v7962_v45 = vpop.permute.xlu2 %7961  ;;  %v6805_v27 = vrot.slane %v6803_v17, 4 }
 0x69b   : > { %9049 = vst.msk [vmem:[%s12707_s25] sm:$0xff] %vm9048_vm9, %v9016_v43  ;;  %v7476_v6 = vrot.slane %v7474_v31, 5 }
 0x69c   : > { %7073 = vrot.lane.b32.xlu1 %v6991_v13, %s9538_s30  ;;  %v8280_v63 = vpop.f32.mrf.mxu1  ;;  %v6804_v13 = vsel %vm10065_vm1, %v9307_v0, %v6803_v17  ;;  %v7759_v0 = vld [vmem:[#allocation3 + $0x98] sm:$0x1] }
 0x69d   : > { %v8281_v30 = vadd.f32 %v12684_v1, %v8280_v63  ;;  %v7460_v63 = vrot.slane %v7458_v35, 5 }
 0x69e   : > { %v6868_v52 = vpop.permute.xlu1 %6867 }
 0x69f   : > { %6952 = vst.msk [vmem:[#allocation5 + $0x30] sm:$0xf] %vm6939_vm12, %v6868_v52  ;;  %v9476_v41 = vld [vmem:[#allocation5 + $0x68] sm:$0xff]  ;;  %v8985_v55 = vadd.f32 %v8907_v11, %v8281_v30  ;;  %v8912_v11 = vadd.f32 %v12675_v61, %v12491_v60  ;;  %v7457_v52 = vrot.slane %v7455_v54, 4  ;;  %v6669_v60 = vld [vmem:[#allocation3 + $0x94] sm:$0xf] }
 0x6a0   : > { %7146 = vst.msk [vmem:[#allocation5 + $0x30] sm:$0xf] %vm7133_vm7, %v7062_v4  ;;  %7973 = vrot.lane.b32.xlu0 %v7892_v44, %s9540_s11  ;;  %7075 = vrot.lane.b32.xlu2 %v6992_v22, %s9538_s30  ;;  %v6667_v4 = vld [vmem:[#allocation3 + $0x8c] sm:$0x1] }
 0x6a1   : > { %7707 = vst.msk [vmem:[#allocation5 + $0x30] sm:$0xf] %vm7694_vm14, %v7623_v16  ;;  %9422 = vmatmul.msk.bf16.gmra.mxu3 %vm8216_vm6, %v9476_v41  ;;  %v9017_v21 = vmax.f32 %v8985_v55, 0.0  ;;  %v12731_v20 = vpop.f32.mrf.mxu2  ;;  %v8910_v16 = vadd.f32 %v12675_v61, %v12476_v59  ;;  %v7471_v59 = vor.u32 %v7470_v9, %v12729_v3  ;;  %v7461_v8 = vor.u32 %v7460_v63, %v7457_v52 }
 0x6a2   : > { %v7625_v33 = vpop.permute.xlu0 %7624  ;;  %v7094_v26 = vpop.permute.xlu2 %7093 }
 0x6a3   : > { %9050 = vst.msk [vmem:[%s12707_s25 + $0x8] sm:$0xff] %vm9048_vm9, %v9017_v21  ;;  %v7472_v40 = vrot.slane %v7471_v59, 4  ;;  %v6810_v21 = vrot.slane %v6669_v60, 5  ;;  %v7462_v7 = vrot.slane %v7461_v8, 4 }
 0x6a4   : > { %7636 = vrot.lane.b32.xlu1 %v7453_v28, %s9539_s8  ;;  %v8283_v53 = vpop.f32.mrf.mxu1  ;;  %v7758_v28 = vld [vmem:[#allocation3 + $0x94] sm:$0xf] }
 0x6a5   : > { %v8284_v24 = vadd.f32 %v12684_v1, %v8283_v53  ;;  %v7477_v41 = vsel %vm9663_vm13, %v7472_v40, %v7476_v6  ;;  %v7757_v53 = vld [vmem:[#allocation3 + $0x90] sm:$0xe]  ;;  %v7895_v37 = vrot.slane %v7758_v28, 5  ;;  %v7467_v14 = vsel %vm9663_vm13, %v7462_v7, %v12729_v3 }
 0x6a6   : > { %v7064_v5 = vpop.permute.xlu1 %7063  ;;  %v9323_v59 = vrot.slane %v7757_v53, 9  ;;  %v8917_v40 = vadd.f32 %v12675_v61, %v12538_v47  ;;  %v6812_v63 = vrot.slane %v6810_v21, 4  ;;  %v6995_v53 = vld [vmem:[#allocation3 + $0x9c] sm:$0xf] }
 0x6a7   : > { %7147 = vst.msk [vmem:[#allocation5 + $0x34] sm:$0xf] %vm7133_vm7, %v7064_v5  ;;  %v8986_v46 = vadd.f32 %v8910_v16, %v8284_v24 }
 0x6a8   : > { %7708 = vst.msk [vmem:[#allocation5 + $0x34] sm:$0xf] %vm7694_vm14, %v7625_v33  ;;  %7077 = vrot.lane.b32.xlu0 %v6993_v19, %s9538_s30  ;;  %7971 = vrot.lane.b32.xlu2 %v7889_v62, %s9540_s11  ;;  %v6994_v33 = vld [vmem:[#allocation3 + $0x94] sm:$0xf]  ;;  %v7199_v62 = vld [vmem:[#allocation3 + $0x9c] sm:$0xf]  ;;  %v7896_v3 = vsel %vm10065_vm1, %v9323_v59, %v7895_v37 }
 0x6a9   : > { %8045 = vst.msk [vmem:[#allocation5 + $0x34] sm:$0xf] %vm8031_vm15, %v7962_v45  ;;  %v9018_v43 = vmax.f32 %v8986_v46, 0.0  ;;  %v12752_v51 = vpop.f32.mrf.mxu2  ;;  %v6806_v45 = vrot.slane %v6667_v4, 5  ;;  %v7897_v4 = vrot.slane %v7895_v37, 4 }
 0x6aa   : > { %v6900_v34 = vpop.permute.xlu0 %6899  ;;  %v7657_v23 = vpop.permute.xlu2 %7656 }
 0x6ab   : > { %6968 = vst.msk [vmem:[#allocation5 + $0x70] sm:$0xf] %vm6939_vm12, %v6900_v34  ;;  %v6807_v50 = vsel %vm10065_vm1, %v6805_v27, %v6806_v45  ;;  %v7200_v34 = vld [vmem:[#allocation3 + $0xa0] sm:$0xf]  ;;  %v6670_v45 = vld [vmem:[#allocation3 + $0x98] sm:$0x1] }
 0x6ac   : > { %7162 = vst.msk [vmem:[#allocation5 + $0x70] sm:$0xf] %vm7133_vm7, %v7094_v26  ;;  %6883 = vrot.lane.b32.xlu1 %v6804_v13, %s9537_s29  ;;  %v8285_v22 = vpop.f32.mrf.mxu1  ;;  %v6668_v26 = vld [vmem:[#allocation3 + $0x90] sm:$0xe]  ;;  %v7482_v13 = vshll.u32 %v7199_v62, 16  ;;  %v7492_v47 = vshrl.u32 %v7200_v34, 16 }
 0x6ad   : > { %9051 = vst.msk [vmem:[%s12707_s25 + $0x10] sm:$0xff] %vm9048_vm9, %v9018_v43  ;;  %v8286_v30 = vadd.f32 %v12684_v1, %v8285_v22  ;;  %v9308_v16 = vrot.slane %v6668_v26, 9  ;;  %v7479_v43 = vshrl.u32 %v7199_v62, 16  ;;  %v6996_v27 = vld [vmem:[#allocation3 + $0xa0] sm:$0xf] }
 0x6ae   : > { %v7960_v44 = vpop.permute.xlu1 %7959  ;;  %v7761_v22 = vld [vmem:[#allocation3 + $0xa0] sm:$0xf]  ;;  %v7484_v60 = vrot.slane %v7482_v13, 5 }
 0x6af   : > { %8044 = vst.msk [vmem:[#allocation5 + $0x30] sm:$0xf] %vm8031_vm15, %v7960_v44  ;;  %v8987_v39 = vadd.f32 %v8912_v11, %v8286_v30  ;;  %v6811_v19 = vsel %vm10065_vm1, %v9308_v16, %v6810_v21  ;;  %v7760_v44 = vld [vmem:[#allocation3 + $0x9c] sm:$0xe]  ;;  %v7488_v30 = vshll.u32 %v7200_v34, 16  ;;  %v7494_v16 = vrot.slane %v7492_v47, 4 }
 0x6b0   : > { %7640 = vrot.lane.b32.xlu0 %v7477_v41, %s9539_s8  ;;  %6885 = vrot.lane.b32.xlu2 %v6807_v50, %s9537_s29  ;;  %v7481_v50 = vrot.slane %v7479_v43, 4  ;;  %v9324_v26 = vrot.slane %v7760_v44, 9  ;;  %v8925_v47 = vadd.f32 %v12675_v61, %v12603_v18 }
 0x6b1   : > { %v9019_v38 = vmax.f32 %v8987_v39, 0.0  ;;  %v12769_v9 = vpop.f32.mrf.mxu2  ;;  %v6813_v39 = vrot.slane %v6670_v45, 5 }
 0x6b2   : > { %v7096_v55 = vpop.permute.xlu0 %7095  ;;  %v6872_v32 = vpop.permute.xlu2 %6871  ;;  %v7485_v28 = vor.u32 %v7484_v60, %v7481_v50 }
 0x6b3   : > { %6954 = vst.msk [vmem:[#allocation5 + $0x38] sm:$0xf] %vm6939_vm12, %v6872_v32 }
 0x6b4   : > { %7079 = vrot.lane.b32.xlu1 %v6994_v33, %s9538_s30  ;;  %9052 = vst.msk [vmem:[%s12707_s25 + $0x18] sm:$0xff] %vm9048_vm9, %v9019_v38  ;;  %v8288_v48 = vpop.f32.mrf.mxu1  ;;  %v6814_v33 = vsel %vm10065_vm1, %v6812_v63, %v6813_v39  ;;  %v7902_v38 = vrot.slane %v7761_v22, 5  ;;  %v7486_v37 = vrot.slane %v7485_v28, 4 }
 0x6b5   : > { %v8289_v24 = vadd.f32 %v12684_v1, %v8288_v48 }
 0x6b6   : > { %v6902_v2 = vpop.permute.xlu1 %6901  ;;  %v9469_v5 = vld [vmem:[#allocation5 + $0x30] sm:$0xff] }
 0x6b7   : > { %6969 = vst.msk [vmem:[#allocation5 + $0x74] sm:$0xf] %vm6939_vm12, %v6902_v2  ;;  %v8988_v17 = vadd.f32 %v8915_v25, %v8289_v24  ;;  %9415 = vmatmul.msk.bf16.gmra.mxu1 %vm8216_vm6, %v9469_v5  ;;  %v7490_v25 = vrot.slane %v7488_v30, 5  ;;  %v7201_v2 = vld [vmem:[#allocation3 + $0xa4] sm:$0x1]  ;;  %v7903_v5 = vsel %vm10065_vm1, %v9324_v26, %v7902_v38 }
 0x6b8   : > { %7163 = vst.msk [vmem:[#allocation5 + $0x74] sm:$0xf] %vm7133_vm7, %v7096_v55  ;;  %6887 = vrot.lane.b32.xlu0 %v6811_v19, %s9537_s29  ;;  %7638 = vrot.lane.b32.xlu2 %v7467_v14, %s9539_s8  ;;  %v7498_v19 = vshll.u32 %v7201_v2, 16 }
 0x6b9   : > { %7724 = vst.msk [vmem:[#allocation5 + $0x74] sm:$0xf] %vm7694_vm14, %v7657_v23  ;;  %v9020_v54 = vmax.f32 %v8988_v17, 0.0  ;;  %v12790_v35 = vpop.f32.mrf.mxu2  ;;  %v7898_v23 = vrot.slane %v7759_v0, 5  ;;  %v7495_v24 = vor.u32 %v7494_v16, %v7490_v25  ;;  %v7491_v17 = vsel %vm9663_vm13, %v7486_v37, %v7490_v25 }
 0x6ba   : > { %v7992_v31 = vpop.permute.xlu0 %7991  ;;  %v7068_v46 = vpop.permute.xlu2 %7067  ;;  %v7500_v0 = vrot.slane %v7498_v19, 5 }
 0x6bb   : > { %9053 = vst.msk [vmem:[%s12707_s25 + $0x20] sm:$0xff] %vm9048_vm9, %v9020_v54  ;;  %v7899_v52 = vsel %vm10065_vm1, %v7897_v4, %v7898_v23  ;;  %v7496_v59 = vrot.slane %v7495_v24, 4  ;;  %v7904_v23 = vrot.slane %v7902_v38, 4  ;;  %v8398_v24 = vld [vmem:[#allocation2 + $0xac] sm:$0xf] }
 0x6bc   : > { %7975 = vrot.lane.b32.xlu1 %v7896_v3, %s9540_s11  ;;  %v8290_v6 = vpop.f32.mrf.mxu1 }
 0x6bd   : > { %v8291_v41 = vadd.f32 %v12684_v1, %v8290_v6  ;;  %v7501_v13 = vsel %vm9663_vm13, %v7496_v59, %v7500_v0  ;;  %v8732_v59 = vshrl.u32 %v8398_v24, 16 }
 0x6be   : > { %v7655_v11 = vpop.permute.xlu1 %7654 }
 0x6bf   : > { %7723 = vst.msk [vmem:[#allocation5 + $0x70] sm:$0xf] %vm7694_vm14, %v7655_v11  ;;  %v8989_v8 = vadd.f32 %v8917_v40, %v8291_v41 }
 0x6c0   : > { %8060 = vst.msk [vmem:[#allocation5 + $0x70] sm:$0xf] %vm8031_vm15, %v7992_v31  ;;  %7083 = vrot.lane.b32.xlu0 %v6996_v27, %s9538_s30  ;;  %7977 = vrot.lane.b32.xlu2 %v7899_v52, %s9540_s11  ;;  %v7762_v31 = vld [vmem:[#allocation3 + $0xa4] sm:$0x1]  ;;  %v8922_v52 = vadd.f32 %v12675_v61, %v12582_v42 }
 0x6c1   : > { %v9021_v21 = vmax.f32 %v8989_v8, 0.0  ;;  %v12807_v7 = vpop.f32.mrf.mxu2  ;;  %v7905_v40 = vrot.slane %v7762_v31, 5 }
 0x6c2   : > { %v6874_v55 = vpop.permute.xlu0 %6873  ;;  %v7964_v32 = vpop.permute.xlu2 %7963 }
 0x6c3   : > { %6955 = vst.msk [vmem:[#allocation5 + $0x3c] sm:$0xf] %vm6939_vm12, %v6874_v55  ;;  %v7906_v6 = vsel %vm10065_vm1, %v7904_v23, %v7905_v40 }
 0x6c4   : > { %7149 = vst.msk [vmem:[#allocation5 + $0x3c] sm:$0xf] %vm7133_vm7, %v7068_v46  ;;  %6889 = vrot.lane.b32.xlu1 %v6814_v33, %s9537_s29  ;;  %v8920_v46 = vadd.f32 %v12675_v61, %v12564_v10 }
 0x6c5   : > { %9054 = vst.msk [vmem:[%s12707_s25 + $0x28] sm:$0xff] %vm9048_vm9, %v9021_v21  ;;  %v8927_v21 = vadd.f32 %v12675_v61, %v12617_v56  ;;  %v8397_v56 = vld [vmem:[#allocation2 + $0xa8] sm:$0xf] }
 0x6c6   : > { %v7994_v48 = vpop.permute.xlu1 %7993  ;;  %v8719_v19 = vshrl.u32 %v8397_v56, 16 }
 0x6c7   : > { %8061 = vst.msk [vmem:[#allocation5 + $0x74] sm:$0xf] %vm8031_vm15, %v7994_v48 }
 0x6c8   : > { %7979 = vrot.lane.b32.xlu0 %v7903_v5, %s9540_s11  ;;  %7081 = vrot.lane.b32.xlu2 %v6995_v53, %s9538_s30  ;;  %v8721_v0 = vrot.slane %v8719_v19, 4 }
 0x6c9   : > { %v12824_v4 = vpop.f32.mrf.mxu2 }
 0x6ca   : > { %v7627_v14 = vpop.permute.xlu0 %7626  ;;  %v6906_v62 = vpop.permute.xlu2 %6905 }
 0x6cb   : > { %6971 = vst.msk [vmem:[#allocation5 + $0x7c] sm:$0xf] %vm6939_vm12, %v6906_v62  ;;  %v8728_v62 = vshll.u32 %v8398_v24, 16  ;;  %v8402_v24 = vld [vmem:[#allocation2 + $0xbc] sm:$0x1] }
 0x6cc   : > { %7642 = vrot.lane.b32.xlu1 %v7491_v17, %s9539_s8  ;;  %v8293_v3 = vpop.f32.mrf.mxu1 }
 0x6cd   : > { %v8294_v43 = vadd.f32 %v12684_v1, %v8293_v3 }
 0x6ce   : > { %v7066_v54 = vpop.permute.xlu1 %7065  ;;  %v9477_v34 = vld [vmem:[#allocation5 + $0x70] sm:$0xff] }
 0x6cf   : > { %7148 = vst.msk [vmem:[#allocation5 + $0x38] sm:$0xf] %vm7133_vm7, %v7066_v54  ;;  %9423 = vmatmul.msk.bf16.gmra.mxu3 %vm8216_vm6, %v9477_v34  ;;  %v8990_v10 = vadd.f32 %v8920_v46, %v8294_v43  ;;  %v8730_v46 = vrot.slane %v8728_v62, 5  ;;  %v8734_v54 = vrot.slane %v8732_v59, 4  ;;  %v8399_v43 = vld [vmem:[#allocation2 + $0xb0] sm:$0x1] }
 0x6d0   : > { %7709 = vst.msk [vmem:[#allocation5 + $0x38] sm:$0xf] %vm7694_vm14, %v7627_v14  ;;  %7644 = vrot.lane.b32.xlu2 %v7501_v13, %s9539_s8  ;;  %v8722_v14 = vshll.u32 %v8397_v56, 16  ;;  %v8738_v40 = vshll.u32 %v8399_v43, 16 }
 0x6d1   : > { %8046 = vst.msk [vmem:[#allocation5 + $0x38] sm:$0xf] %vm8031_vm15, %v7964_v32  ;;  %v9022_v11 = vmax.f32 %v8990_v10, 0.0  ;;  %v12843_v30 = vpop.f32.mrf.mxu2  ;;  %v8735_v23 = vor.u32 %v8734_v54, %v8730_v46 }
 0x6d2   : > { %v7966_v27 = vpop.permute.xlu0 %7965  ;;  %v7659_v45 = vpop.permute.xlu2 %7658  ;;  %v8724_v31 = vrot.slane %v8722_v14, 5 }
 0x6d3   : > { %9055 = vst.msk [vmem:[%s12707_s25 + $0x30] sm:$0xff] %vm9048_vm9, %v9022_v11 }
 0x6d4   : > { %7981 = vrot.lane.b32.xlu1 %v7906_v6, %s9540_s11  ;;  %v8295_v44 = vpop.f32.mrf.mxu1  ;;  %v8725_v13 = vor.u32 %v8724_v31, %v8721_v0  ;;  %v8736_v6 = vrot.slane %v8735_v23, 4  ;;  %v8762_v31 = vshll.u32 %v8402_v24, 16  ;;  %v8403_v23 = vld [vmem:[#allocation2 + $0xc0] sm:$0xf] }
 0x6d5   : > { %v8296_v22 = vadd.f32 %v12684_v1, %v8295_v44 }
 0x6d6   : > { %v7629_v63 = vpop.permute.xlu1 %7628  ;;  %v8726_v11 = vrot.slane %v8725_v13, 4  ;;  %v8764_v13 = vrot.slane %v8762_v31, 5 }
 0x6d7   : > { %7710 = vst.msk [vmem:[#allocation5 + $0x3c] sm:$0xf] %vm7694_vm14, %v7629_v63  ;;  %v8991_v58 = vadd.f32 %v8922_v52, %v8296_v22  ;;  %v8740_v52 = vrot.slane %v8738_v40, 5 }
 0x6d8   : > { %8047 = vst.msk [vmem:[#allocation5 + $0x3c] sm:$0xf] %vm8031_vm15, %v7966_v27 }
 0x6d9   : > { %v9023_v60 = vmax.f32 %v8991_v58, 0.0  ;;  %v12855_v33 = vpop.f32.mrf.mxu2 }
 0x6da   : > { %v7098_v41 = vpop.permute.xlu0 %7097  ;;  %v7998_v50 = vpop.permute.xlu2 %7997 }
 0x6db   : > { %9056 = vst.msk [vmem:[%s12707_s25 + $0x38] sm:$0xff] %vm9048_vm9, %v9023_v60  ;;  %v8741_v60 = vsel %vm9663_vm13, %v8736_v6, %v8740_v52  ;;  %v8767_v6 = vshrl.u32 %v8403_v23, 16 }
 0x6de   : > { %v6904_v42 = vpop.permute.xlu1 %6903  ;;  %v8298_v39 = vpop.f32.mrf.mxu1 }
 0x6df   : > { %6970 = vst.msk [vmem:[#allocation5 + $0x78] sm:$0xf] %vm6939_vm12, %v6904_v42  ;;  %v8299_v8 = vadd.f32 %v12684_v1, %v8298_v39  ;;  %v9470_v55 = vld [vmem:[#allocation5 + $0x38] sm:$0xff]  ;;  %v8401_v42 = vld [vmem:[#allocation2 + $0xb8] sm:$0xf] }
 0x6e0   : > { %7164 = vst.msk [vmem:[#allocation5 + $0x78] sm:$0xf] %vm7133_vm7, %v7098_v41  ;;  %9416 = vmatmul.msk.bf16.gmra.mxu1 %vm8216_vm6, %v9470_v55 }
 0x6e1   : > { %7725 = vst.msk [vmem:[#allocation5 + $0x78] sm:$0xf] %vm7694_vm14, %v7659_v45  ;;  %v8992_v32 = vadd.f32 %v8925_v47, %v8299_v8  ;;  %v12867_v37 = vpop.f32.mrf.mxu2  ;;  %v8400_v47 = vld [vmem:[#allocation2 + $0xb4] sm:$0xf] }
 0x6e2   : > { %v7661_v18 = vpop.permute.xlu0 %7660  ;;  %v7070_v26 = vpop.permute.xlu2 %7069  ;;  %v8743_v8 = vshrl.u32 %v8400_v47, 16  ;;  %v8746_v55 = vshll.u32 %v8400_v47, 16 }
 0x6e3   : > { %v9024_v38 = vmax.f32 %v8992_v32, 0.0  ;;  %v8752_v32 = vshll.u32 %v8401_v42, 16 }
 0x6e5   : > { %9057 = vst.msk [vmem:[%s12707_s25 + $0x40] sm:$0xff] %vm9048_vm9, %v9024_v38 }
 0x6e6   : > { %v7100_v28 = vpop.permute.xlu1 %7099  ;;  %v8300_v25 = vpop.f32.mrf.mxu1 }
 0x6e7   : > { %7165 = vst.msk [vmem:[#allocation5 + $0x7c] sm:$0xf] %vm7133_vm7, %v7100_v28  ;;  %v8301_v16 = vadd.f32 %v12684_v1, %v8300_v25  ;;  %v8822_v28 = vunpack.c.l.b16 %v8741_v60  ;;  %v8745_v25 = vrot.slane %v8743_v8, 4 }
 0x6e8   : > { %7726 = vst.msk [vmem:[#allocation5 + $0x7c] sm:$0xf] %vm7694_vm14, %v7661_v18  ;;  %v8756_v18 = vshrl.u32 %v8401_v42, 16  ;;  %v8769_v42 = vrot.slane %v8767_v6, 4 }
 0x6e9   : > { %8063 = vst.msk [vmem:[#allocation5 + $0x7c] sm:$0xf] %vm8031_vm15, %v7998_v50  ;;  %v8993_v2 = vadd.f32 %v8927_v21, %v8301_v16  ;;  %v8964_v45 = vpop.f32.mrf.mxu2  ;;  %v8731_v50 = vsel %vm9663_vm13, %v8726_v11, %v8730_v46  ;;  %v8748_v16 = vrot.slane %v8746_v55, 5 }
 0x6ea   : > { %v6876_v48 = vpop.permute.xlu0 %6875  ;;  %v7633_v5 = vpop.permute.xlu2 %7632  ;;  %v8965_v22 = vadd.f32 %v12675_v61, %v8964_v45  ;;  %v8821_v21 = vunpack.c.l.b16 %v8731_v50  ;;  %v8930_v45 = vadd.f32 %v12675_v61, %v12634_v12 }
 0x6eb   : > { %v9025_v53 = vmax.f32 %v8993_v2, 0.0  ;;  %6956 = vst.msk [vmem:[#allocation5 + $0x40] sm:$0xf] %vm6939_vm12, %v6876_v48  ;;  %v8754_v48 = vrot.slane %v8752_v32, 5 }
 0x6ec   : > { %7150 = vst.msk [vmem:[#allocation5 + $0x40] sm:$0xf] %vm7133_vm7, %v7070_v26  ;;  %v8840_v62 = vpack.c.b16 %v8822_v28, %v8821_v21  ;;  %v8932_v28 = vadd.f32 %v12675_v61, %v12646_v15 }
 0x6ed   : > { %9058 = vst.msk [vmem:[%s12707_s25 + $0x48] sm:$0xff] %vm9048_vm9, %v9025_v53 }
 0x6ee   : > { %v7996_v17 = vpop.permute.xlu1 %7995 }
 0x6ef   : > { %8062 = vst.msk [vmem:[#allocation5 + $0x78] sm:$0xf] %vm8031_vm15, %v7996_v17  ;;  %v8749_v17 = vor.u32 %v8748_v16, %v8745_v25 }
 0x6f1   : > { %v8966_v38 = vpop.f32.mrf.mxu2 }
 0x6f2   : > { %v7072_v3 = vpop.permute.xlu0 %7071  ;;  %v6880_v34 = vpop.permute.xlu2 %6879  ;;  %v8967_v19 = vadd.f32 %v12675_v61, %v8966_v38 }
 0x6f3   : > { %6958 = vst.msk [vmem:[#allocation5 + $0x48] sm:$0xf] %vm6939_vm12, %v6880_v34 }
 0x6f6   : > { %v6878_v10 = vpop.permute.xlu1 %6877  ;;  %v9478_v27 = vld [vmem:[#allocation5 + $0x78] sm:$0xff] }
 0x6f7   : > { %6957 = vst.msk [vmem:[#allocation5 + $0x44] sm:$0xf] %vm6939_vm12, %v6878_v10  ;;  %9424 = vmatmul.msk.bf16.gmra.mxu3 %vm8216_vm6, %v9478_v27  ;;  %v8404_v27 = vld [vmem:[#allocation2 + $0xc4] sm:$0xf] }
 0x6f8   : > { %7151 = vst.msk [vmem:[#allocation5 + $0x44] sm:$0xf] %vm7133_vm7, %v7072_v3  ;;  %v8750_v3 = vrot.slane %v8749_v17, 4 }
 0x6f9   : > { %7712 = vst.msk [vmem:[#allocation5 + $0x44] sm:$0xf] %vm7694_vm14, %v7633_v5  ;;  %v8758_v5 = vrot.slane %v8756_v18, 4 }
 0x6fa   : > { %v7968_v63 = vpop.permute.xlu0 %7967  ;;  %v7076_v44 = vpop.permute.xlu2 %7075  ;;  %v8755_v11 = vsel %vm9663_vm13, %v8750_v3, %v8754_v48 }
 0x6fb   : > { %v8338_v58 = vpop.f32.mrf.mxu3  ;;  %v8759_v0 = vor.u32 %v8758_v5, %v8754_v48  ;;  %v8823_v12 = vunpack.c.l.b16 %v8755_v11 }
 0x6fc   : > { %v8339_v41 = vadd.f32 %v12684_v1, %v8338_v58 }
 0x6fd   : > { %v8760_v43 = vrot.slane %v8759_v0, 4 }
 0x6fe   : > { %v7631_v39 = vpop.permute.xlu1 %7630  ;;  %v9008_v26 = vadd.f32 %v8965_v22, %v8339_v41  ;;  %v8780_v22 = vshrl.u32 %v8404_v27, 16 }
 0x6ff   : > { %7711 = vst.msk [vmem:[#allocation5 + $0x40] sm:$0xf] %vm7694_vm14, %v7631_v39  ;;  %v8765_v52 = vsel %vm9663_vm13, %v8760_v43, %v8764_v13 }
 0x700   : > { %8048 = vst.msk [vmem:[#allocation5 + $0x40] sm:$0xf] %vm8031_vm15, %v7968_v63  ;;  %v9040_v2 = vmax.f32 %v9008_v26, 0.0  ;;  %v8770_v63 = vshll.u32 %v8403_v23, 16  ;;  %v8824_v47 = vunpack.c.l.b16 %v8765_v52  ;;  %v8782_v32 = vrot.slane %v8780_v22, 4 }
 0x701   : > { %v8405_v26 = vld [vmem:[#allocation2 + $0xc8] sm:$0x1] }
 0x702   : > { %v6882_v53 = vpop.permute.xlu0 %6881  ;;  %v7972_v56 = vpop.permute.xlu2 %7971  ;;  %9073 = vst.msk [vmem:[%s12707_s25 + $0xc0] sm:$0xff] %vm9048_vm9, %v9040_v2  ;;  %v8772_v8 = vrot.slane %v8770_v63, 5  ;;  %v8841_v21 = vpack.c.b16 %v8824_v47, %v8823_v12  ;;  %v8786_v2 = vshll.u32 %v8405_v26, 16 }
 0x703   : > { %6959 = vst.msk [vmem:[#allocation5 + $0x4c] sm:$0xf] %vm6939_vm12, %v6882_v53  ;;  %v8340_v14 = vpop.f32.mrf.mxu3 }
 0x704   : > { %7153 = vst.msk [vmem:[#allocation5 + $0x4c] sm:$0xf] %vm7133_vm7, %v7076_v44  ;;  %v8341_v59 = vadd.f32 %v12684_v1, %v8340_v14  ;;  %v8776_v44 = vshll.u32 %v8404_v27, 16  ;;  %v8773_v25 = vor.u32 %v8772_v8, %v8769_v42  ;;  %v8788_v14 = vrot.slane %v8786_v2, 5 }
 0x705   : > { %v8935_v27 = vadd.f32 %v12675_v61, %v12661_v29  ;;  %v8937_v29 = vadd.f32 %v12675_v61, %v12688_v36 }
 0x706   : > { %v7970_v46 = vpop.permute.xlu1 %7969  ;;  %v9009_v54 = vadd.f32 %v8967_v19, %v8341_v59  ;;  %v8778_v55 = vrot.slane %v8776_v44, 5  ;;  %v8774_v19 = vrot.slane %v8773_v25, 4 }
 0x707   : > { %8049 = vst.msk [vmem:[#allocation5 + $0x44] sm:$0xf] %vm8031_vm15, %v7970_v46  ;;  %9438 = vmatmul.msk.bf16.vlgmr.msra.gmra.mxu3 %vm8843_vm10, %v8840_v62 }
 0x708   : > { %v9041_v34 = vmax.f32 %v9009_v54, 0.0  ;;  %v8783_v16 = vor.u32 %v8782_v32, %v8778_v55  ;;  %v8779_v59 = vsel %vm9663_vm13, %v8774_v19, %v8778_v55  ;;  %v8940_v55 = vadd.f32 %v12675_v61, %v12711_v57 }
 0x709   : > { %v8825_v54 = vunpack.c.l.b16 %v8779_v59  ;;  %v8945_v19 = vadd.f32 %v12675_v61, %v12752_v51 }
 0x70a   : > { %v7635_v40 = vpop.permute.xlu0 %7634  ;;  %v6886_v10 = vpop.permute.xlu2 %6885  ;;  %9074 = vst.msk [vmem:[%s12707_s25 + $0xc8] sm:$0xff] %vm9048_vm9, %v9041_v34  ;;  %v8784_v15 = vrot.slane %v8783_v16, 4 }
 0x70b   : > { %6961 = vst.msk [vmem:[#allocation5 + $0x54] sm:$0xf] %vm6939_vm12, %v6886_v10 }
 0x70c   : > { %v8303_v41 = vpop.f32.mrf.mxu1  ;;  %v8789_v0 = vsel %vm9663_vm13, %v8784_v15, %v8788_v14 }
 0x70d   : > { %v8304_v60 = vadd.f32 %v12684_v1, %v8303_v41  ;;  %v8826_v3 = vunpack.c.l.b16 %v8789_v0 }
 0x70e   : > { %v7074_v58 = vpop.permute.xlu1 %7073  ;;  %v9471_v50 = vld [vmem:[#allocation5 + $0x40] sm:$0xff] }
 0x70f   : > { %7152 = vst.msk [vmem:[#allocation5 + $0x48] sm:$0xf] %vm7133_vm7, %v7074_v58  ;;  %9417 = vmatmul.msk.bf16.gmra.mxu1 %vm8216_vm6, %v9471_v50  ;;  %v8994_v39 = vadd.f32 %v8930_v45, %v8304_v60  ;;  %v8842_v13 = vpack.c.b16 %v8826_v3, %v8825_v54 }
 0x710   : > { %7713 = vst.msk [vmem:[#allocation5 + $0x48] sm:$0xf] %vm7694_vm14, %v7635_v40 }
 0x711   : > { %8050 = vst.msk [vmem:[#allocation5 + $0x48] sm:$0xf] %vm8031_vm15, %v7972_v56  ;;  %v9026_v38 = vmax.f32 %v8994_v39, 0.0 }
 0x712   : > { %v7974_v18 = vpop.permute.xlu0 %7973  ;;  %v7639_v53 = vpop.permute.xlu2 %7638 }
 0x713   : > { %9059 = vst.msk [vmem:[%s12707_s25 + $0x50] sm:$0xff] %vm9048_vm9, %v9026_v38 }
 0x714   : > { %v8305_v5 = vpop.f32.mrf.mxu1 }
 0x715   : > { %v8306_v56 = vadd.f32 %v12684_v1, %v8305_v5 }
 0x716   : > { %v7637_v48 = vpop.permute.xlu1 %7636 }
 0x717   : > { %7714 = vst.msk [vmem:[#allocation5 + $0x4c] sm:$0xf] %vm7694_vm14, %v7637_v48  ;;  %9439 = vmatmul.msk.bf16.gmra.mxu3 %vm8843_vm10, %v8841_v21  ;;  %v8995_v24 = vadd.f32 %v8932_v28, %v8306_v56  ;;  %v8942_v28 = vadd.f32 %v12675_v61, %v12731_v20 }
 0x718   : > { %8051 = vst.msk [vmem:[#allocation5 + $0x4c] sm:$0xf] %vm8031_vm15, %v7974_v18 }
 0x719   : > { %v9027_v17 = vmax.f32 %v8995_v24, 0.0 }
 0x71a   : > { %v7078_v62 = vpop.permute.xlu0 %7077  ;;  %v7978_v34 = vpop.permute.xlu2 %7977 }
 0x71b   : > { %9060 = vst.msk [vmem:[%s12707_s25 + $0x58] sm:$0xff] %vm9048_vm9, %v9027_v17 }
 0x71e   : > { %v6884_v31 = vpop.permute.xlu1 %6883 }
 0x71f   : > { %6960 = vst.msk [vmem:[#allocation5 + $0x50] sm:$0xf] %vm6939_vm12, %v6884_v31  ;;  %v9472_v46 = vld [vmem:[#allocation5 + $0x48] sm:$0xff] }
 0x720   : > { %7154 = vst.msk [vmem:[#allocation5 + $0x50] sm:$0xf] %vm7133_vm7, %v7078_v62  ;;  %9418 = vmatmul.msk.bf16.gmra.mxu1 %vm8216_vm6, %v9472_v46 }
 0x721   : > { %7715 = vst.msk [vmem:[#allocation5 + $0x50] sm:$0xf] %vm7694_vm14, %v7639_v53 }
 0x722   : > { %v7641_v43 = vpop.permute.xlu0 %7640  ;;  %v7082_v40 = vpop.permute.xlu2 %7081 }
 0x724   : > { %v8343_v8 = vpop.f32.mrf.mxu3 }
 0x725   : > { %v8344_v20 = vadd.f32 %v12684_v1, %v8343_v8 }
 0x726   : > { %v7080_v23 = vpop.permute.xlu1 %7079 }
 0x727   : > { %7155 = vst.msk [vmem:[#allocation5 + $0x54] sm:$0xf] %vm7133_vm7, %v7080_v23  ;;  %9440 = vmatmul.msk.bf16.gmra.mxu3 %vm8843_vm10, %v8842_v13 }
 0x728   : > { %7716 = vst.msk [vmem:[#allocation5 + $0x54] sm:$0xf] %vm7694_vm14, %v7641_v43 }
 0x729   : > { %8053 = vst.msk [vmem:[#allocation5 + $0x54] sm:$0xf] %vm8031_vm15, %v7978_v34  ;;  %v8947_v34 = vadd.f32 %v12675_v61, %v12769_v9  ;;  %v8950_v9 = vadd.f32 %v12675_v61, %v12790_v35 }
 0x72a   : > { %v6888_v49 = vpop.permute.xlu0 %6887  ;;  %v7645_v44 = vpop.permute.xlu2 %7644 }
 0x72b   : > { %6962 = vst.msk [vmem:[#allocation5 + $0x58] sm:$0xf] %vm6939_vm12, %v6888_v49 }
 0x72c   : > { %7156 = vst.msk [vmem:[#allocation5 + $0x58] sm:$0xf] %vm7133_vm7, %v7082_v40  ;;  %v8345_v26 = vpop.f32.mrf.mxu3 }
 0x72d   : > { %v8346_v54 = vadd.f32 %v12684_v1, %v8345_v26 }
 0x72e   : > { %v7976_v10 = vpop.permute.xlu1 %7975 }
 0x72f   : > { %8052 = vst.msk [vmem:[#allocation5 + $0x50] sm:$0xf] %vm8031_vm15, %v7976_v10 }
 0x732   : > { %v7084_v45 = vpop.permute.xlu0 %7083 }
 0x734   : > { %v8308_v6 = vpop.f32.mrf.mxu1 }
 0x735   : > { %v8309_v63 = vadd.f32 %v12684_v1, %v8308_v6 }
 0x736   : > { %v6890_v11 = vpop.permute.xlu1 %6889  ;;  %v9473_v52 = vld [vmem:[#allocation5 + $0x50] sm:$0xff] }
 0x737   : > { %6963 = vst.msk [vmem:[#allocation5 + $0x5c] sm:$0xf] %vm6939_vm12, %v6890_v11  ;;  %9419 = vmatmul.msk.bf16.gmra.mxu1 %vm8216_vm6, %v9473_v52  ;;  %v8996_v22 = vadd.f32 %v8935_v27, %v8309_v63 }
 0x738   : > { %7157 = vst.msk [vmem:[#allocation5 + $0x5c] sm:$0xf] %vm7133_vm7, %v7084_v45 }
 0x739   : > { %7718 = vst.msk [vmem:[#allocation5 + $0x5c] sm:$0xf] %vm7694_vm14, %v7645_v44  ;;  %v9028_v58 = vmax.f32 %v8996_v22, 0.0 }
 0x73a   : > { %v7980_v60 = vpop.permute.xlu0 %7979 }
 0x73b   : > { %9061 = vst.msk [vmem:[%s12707_s25 + $0x60] sm:$0xff] %vm9048_vm9, %v9028_v58 }
 0x73c   : > { %v8310_v50 = vpop.f32.mrf.mxu1 }
 0x73d   : > { %v8311_v12 = vadd.f32 %v12684_v1, %v8310_v50 }
 0x73e   : > { %v7643_v41 = vpop.permute.xlu1 %7642 }
 0x73f   : > { %7717 = vst.msk [vmem:[#allocation5 + $0x58] sm:$0xf] %vm7694_vm14, %v7643_v41  ;;  %v8997_v47 = vadd.f32 %v8937_v29, %v8311_v12  ;;  %v9518_v41 = vld [vmem:[%s13024_s6] ss:$0 sm:$0xff] }
 0x740   : > { %8054 = vst.msk [vmem:[#allocation5 + $0x58] sm:$0xf] %vm8031_vm15, %v7980_v60  ;;  %v8952_v60 = vadd.f32 %v9518_v41, %v12807_v7  ;;  %v9519_v12 = vld [vmem:[%s13022_s4] ss:$0 sm:$0xff] }
 0x741   : > { %v9029_v42 = vmax.f32 %v8997_v47, 0.0 }
 0x743   : > { %9062 = vst.msk [vmem:[%s12707_s25 + $0x68] sm:$0xff] %vm9048_vm9, %v9029_v42 }
 0x746   : > { %v7982_v39 = vpop.permute.xlu1 %7981 }
 0x747   : > { %8055 = vst.msk [vmem:[#allocation5 + $0x5c] sm:$0xf] %vm8031_vm15, %v7982_v39 }
 0x74e   : > { %v9474_v36 = vld [vmem:[#allocation5 + $0x58] sm:$0xff] }
 0x74f   : > { %9420 = vmatmul.msk.bf16.gmra.mxu1 %vm8216_vm6, %v9474_v36 }
 0x752   : > { %v8348_v2 = vpop.f32.mrf.mxu3 }
 0x753   : > { %v8349_v27 = vadd.f32 %v12684_v1, %v8348_v2 }
 0x75a   : > { %v8350_v57 = vpop.f32.mrf.mxu3 }
 0x75b   : > { %v8351_v29 = vadd.f32 %v12684_v1, %v8350_v57 }
 0x75d   : > { %v8313_v32 = vpop.f32.mrf.mxu1 }
 0x75e   : > { %v8314_v18 = vadd.f32 %v12684_v1, %v8313_v32 }
 0x760   : > { %v8998_v38 = vadd.f32 %v8940_v55, %v8314_v18 }
 0x762   : > { %v9030_v21 = vmax.f32 %v8998_v38, 0.0 }
 0x764   : > { %9063 = vst.msk [vmem:[%s12707_s25 + $0x70] sm:$0xff] %vm9048_vm9, %v9030_v21 }
 0x765   : > { %v8315_v25 = vpop.f32.mrf.mxu1 }
 0x766   : > { %v8316_v16 = vadd.f32 %v12684_v1, %v8315_v25 }
 0x768   : > { %v8999_v48 = vadd.f32 %v8942_v28, %v8316_v16  ;;  %v8955_v28 = vadd.f32 %v9518_v41, %v12824_v4 }
 0x76a   : > { %v9031_v5 = vmax.f32 %v8999_v48, 0.0 }
 0x76c   : > { %9064 = vst.msk [vmem:[%s12707_s25 + $0x78] sm:$0xff] %vm9048_vm9, %v9031_v5 }
 0x77a   : > { %v8353_v53 = vpop.f32.mrf.mxu3 }
 0x77b   : > { %v8354_v8 = vadd.f32 %v9519_v12, %v8353_v53  ;;  %v8957_v53 = vadd.f32 %v9518_v41, %v12843_v30 }
 0x782   : > { %v8355_v56 = vpop.f32.mrf.mxu3 }
 0x783   : > { %v8356_v26 = vadd.f32 %v9519_v12, %v8355_v56 }
 0x78a   : > { %v8969_v24 = vpop.f32.mrf.mxu3 }
 0x78b   : > { %v8970_v15 = vadd.f32 %v12675_v61, %v8969_v24 }
 0x78c   : > { %v8318_v14 = vpop.f32.mrf.mxu1 }
 0x78d   : > { %v9010_v62 = vadd.f32 %v8970_v15, %v8344_v20  ;;  %v8319_v17 = vadd.f32 %v12684_v1, %v8318_v14  ;;  %v8960_v20 = vadd.f32 %v9518_v41, %v12855_v33 }
 0x78f   : > { %v9042_v59 = vmax.f32 %v9010_v62, 0.0  ;;  %v9000_v0 = vadd.f32 %v8945_v19, %v8319_v17 }
 0x791   : > { %9075 = vst.msk [vmem:[%s12707_s25 + $0xd0] sm:$0xff] %vm9048_vm9, %v9042_v59  ;;  %v9032_v31 = vmax.f32 %v9000_v0, 0.0  ;;  %v8962_v59 = vadd.f32 %v9518_v41, %v12867_v37 }
 0x792   : > { %v8971_v46 = vpop.f32.mrf.mxu3 }
 0x793   : > { %9065 = vst.msk [vmem:[%s12707_s25 + $0x80] sm:$0xff] %vm9048_vm9, %v9032_v31  ;;  %v8972_v51 = vadd.f32 %v12675_v61, %v8971_v46 }
 0x794   : > { %v8320_v3 = vpop.f32.mrf.mxu1 }
 0x795   : > { %v9011_v43 = vadd.f32 %v8972_v51, %v8346_v54  ;;  %v8321_v13 = vadd.f32 %v12684_v1, %v8320_v3 }
 0x797   : > { %v9043_v23 = vmax.f32 %v9011_v43, 0.0  ;;  %v9001_v49 = vadd.f32 %v8947_v34, %v8321_v13 }
 0x799   : > { %9076 = vst.msk [vmem:[%s12707_s25 + $0xd8] sm:$0xff] %vm9048_vm9, %v9043_v23  ;;  %v9033_v40 = vmax.f32 %v9001_v49, 0.0 }
 0x79a   : > { %v8974_v10 = vpop.f32.mrf.mxu3 }
 0x79b   : > { %9066 = vst.msk [vmem:[%s12707_s25 + $0x88] sm:$0xff] %vm9048_vm9, %v9033_v40  ;;  %v8975_v45 = vadd.f32 %v12675_v61, %v8974_v10 }
 0x79d   : > { %v9012_v11 = vadd.f32 %v8975_v45, %v8349_v27  ;;  %v8323_v6 = vpop.f32.mrf.mxu1 }
 0x79e   : > { %v8324_v52 = vadd.f32 %v12684_v1, %v8323_v6 }
 0x79f   : > { %v9044_v63 = vmax.f32 %v9012_v11, 0.0 }
 0x7a0   : > { %v9002_v44 = vadd.f32 %v8950_v9, %v8324_v52 }
 0x7a1   : > { %9077 = vst.msk [vmem:[%s12707_s25 + $0xe0] sm:$0xff] %vm9048_vm9, %v9044_v63 }
 0x7a2   : > { %v9034_v22 = vmax.f32 %v9002_v44, 0.0  ;;  %v8976_v58 = vpop.f32.mrf.mxu3 }
 0x7a3   : > { %v8977_v50 = vadd.f32 %v9518_v41, %v8976_v58 }
 0x7a4   : > { %9067 = vst.msk [vmem:[%s12707_s25 + $0x90] sm:$0xff] %vm9048_vm9, %v9034_v22 }
 0x7a5   : > { %v9013_v61 = vadd.f32 %v8977_v50, %v8351_v29  ;;  %v8325_v35 = vpop.f32.mrf.mxu1 }
 0x7a6   : > { %v8326_v47 = vadd.f32 %v9519_v12, %v8325_v35 }
 0x7a7   : > { %v9045_v42 = vmax.f32 %v9013_v61, 0.0 }
 0x7a8   : > { %v9003_v1 = vadd.f32 %v8952_v60, %v8326_v47 }
 0x7a9   : > { %9078 = vst.msk [vmem:[%s12707_s25 + $0xe8] sm:$0xff] %vm9048_vm9, %v9045_v42 }
 0x7aa   : > { %v9035_v39 = vmax.f32 %v9003_v1, 0.0  ;;  %v8979_v36 = vpop.f32.mrf.mxu3 }
 0x7ab   : > { %v8980_v55 = vadd.f32 %v9518_v41, %v8979_v36 }
 0x7ac   : > { %9068 = vst.msk [vmem:[%s12707_s25 + $0x98] sm:$0xff] %vm9048_vm9, %v9035_v39 }
 0x7ad   : > { %v9014_v32 = vadd.f32 %v8980_v55, %v8354_v8 }
 0x7af   : > { %v9046_v18 = vmax.f32 %v9014_v32, 0.0 }
 0x7b1   : > { %9079 = vst.msk [vmem:[%s12707_s25 + $0xf0] sm:$0xff] %vm9048_vm9, %v9046_v18 }
 0x7b2   : > { %v8981_v7 = vpop.f32.mrf.mxu3 }
 0x7b3   : > { %v8982_v38 = vadd.f32 %v9518_v41, %v8981_v7 }
 0x7b4   : > { %v8328_v21 = vpop.f32.mrf.mxu1 }
 0x7b5   : > { %v9015_v25 = vadd.f32 %v8982_v38, %v8356_v26  ;;  %v8329_v16 = vadd.f32 %v9519_v12, %v8328_v21 }
 0x7b7   : > { %v9047_v2 = vmax.f32 %v9015_v25, 0.0  ;;  %v9004_v48 = vadd.f32 %v8955_v28, %v8329_v16 }
 0x7b9   : > { %9080 = vst.msk [vmem:[%s12707_s25 + $0xf8] sm:$0xff] %vm9048_vm9, %v9047_v2  ;;  %v9036_v5 = vmax.f32 %v9004_v48, 0.0 }
 0x7bb   : > { %9069 = vst.msk [vmem:[%s12707_s25 + $0xa0] sm:$0xff] %vm9048_vm9, %v9036_v5 }
 0x7bc   : > { %v8330_v57 = vpop.f32.mrf.mxu1 }
 0x7bd   : > { %v8331_v56 = vadd.f32 %v9519_v12, %v8330_v57 }
 0x7bf   : > { %v9005_v24 = vadd.f32 %v8957_v53, %v8331_v56 }
 0x7c1   : > { %v9037_v19 = vmax.f32 %v9005_v24, 0.0 }
 0x7c3   : > { %9070 = vst.msk [vmem:[%s12707_s25 + $0xa8] sm:$0xff] %vm9048_vm9, %v9037_v19 }
 0x7cc   : > { %v8333_v4 = vpop.f32.mrf.mxu1 }
 0x7cd   : > { %v8334_v15 = vadd.f32 %v9519_v12, %v8333_v4 }
 0x7cf   : > { %v9006_v14 = vadd.f32 %v8960_v20, %v8334_v15 }
 0x7d1   : > { %v9038_v62 = vmax.f32 %v9006_v14, 0.0 }
 0x7d3   : > { %9071 = vst.msk [vmem:[%s12707_s25 + $0xb0] sm:$0xff] %vm9048_vm9, %v9038_v62 }
 0x7d4   : > { %v8335_v17 = vpop.f32.mrf.mxu1 }
 0x7d5   : > { %v8336_v0 = vadd.f32 %v9519_v12, %v8335_v17 }
 0x7d7   : > { %v9007_v31 = vadd.f32 %v8962_v59, %v8336_v0 }
 0x7d9   : > { %v9039_v30 = vmax.f32 %v9007_v31, 0.0 }
 0x7db   : > { %9072 = vst.msk [vmem:[%s12707_s25 + $0xb8] sm:$0xff] %vm9048_vm9, %v9039_v30 }
 0x7dc PF: > { %s17_s24 = sadd.s32 1, %s9526_s24  }
 0x7dd   : > { %p14_p4 = scmp.ge.s32.totalorder %s17_s24, 4  }
 0x7df   :  { %16 = sbr.rel (!%p14_p4) target bundleno = 1 (0x1), region = 84 }

</bundles_post_ra>
